<compile_context>
chip_gen: v5e
topology: v5e:2x2
jax: 0.10.0
libtpu: 0.0.40
codegen_flags: <defaults>
</compile_context>

<pallas_src>
import functools

import jax
import jax.numpy as jnp
from jax.experimental import pallas as pl
from jax.experimental.pallas import tpu as pltpu

BN_EPS = 1e-5


# --------------------------------------------------------------------------
# tile-size helpers
# --------------------------------------------------------------------------

def _pick_tile(total, target):
    """Largest divisor of `total` that is <= target (>=1)."""
    t = min(total, max(1, target))
    while total % t:
        t -= 1
    return t


def _conv_tile_h(h, w, budget=2048):
    """Row tile for the 3x3-conv kernels: ~`budget` activation pixels per block
    (~0.5-1 MiB of bf16), capped at 32 rows, so double-buffered inputs + weights
    + halo scratch + the f32 accumulator stay inside every chip's default scoped
    VMEM limit (16 MiB v5e / 32 MiB v6e,v7x) without raising vmem_limit_bytes."""
    return _pick_tile(h, max(8, min(32, budget // max(w, 1))))


# --------------------------------------------------------------------------
# bilinear interpolation matrices (align_corners=False, matches F.upsample)
# --------------------------------------------------------------------------

def _resize_matrix(out_size, in_size):
    scale = in_size / out_size
    coords = (jnp.arange(out_size, dtype=jnp.float32) + 0.5) * scale - 0.5
    coords = jnp.maximum(coords, 0.0)
    lo = jnp.minimum(jnp.floor(coords), in_size - 1).astype(jnp.int32)
    hi = jnp.minimum(lo + 1, in_size - 1)
    frac = coords - lo.astype(jnp.float32)
    oh_lo = jax.nn.one_hot(lo, in_size, dtype=jnp.float32)
    oh_hi = jax.nn.one_hot(hi, in_size, dtype=jnp.float32)
    return oh_lo * (1.0 - frac)[:, None] + oh_hi * frac[:, None]


# --------------------------------------------------------------------------
# K1: upsample(x) + conv1(low)+bn1+relu + concat + conv2(3x3)+bn2+relu
# --------------------------------------------------------------------------

def _make_conv2_kernel(th, h4, wd, cx, clow, c8, cout):
    wdp = wd + 2

    def kernel(xw_ref, low_ref, rhp_ref, w1_ref, t1_ref, w2a_ref, w2b_ref,
               t2_ref, o_ref):
        r = pl.program_id(1)
        row0 = r * th

        # ---- x4 branch: padded rows [row0, row0+th+2) of the upsampled x.
        # RHp has zero first/last rows and xw already carries zero-padded W
        # columns, so conv2's zero border on x4 falls out of the matmul.
        rhp_rows = rhp_ref[pl.ds(row0, th + 2), :]            # (th+2, H16) bf16
        x4 = jnp.dot(rhp_rows, xw_ref[0],
                     preferred_element_type=jnp.float32)       # (th+2, (W4+2)*256)
        x4 = x4.reshape(th + 2, wdp, cx).astype(jnp.bfloat16)

        # ---- low-level branch: conv1 (1x1, 16->8) + bn1 + relu on the same
        # halo window (a 1x1 conv is pointwise, so this is exact).
        low_rows = low_ref[0, pl.ds(row0, th + 2), :, :]       # (th+2, W4+2, 16)
        l8 = jnp.dot(low_rows.reshape((th + 2) * wdp, clow), w1_ref[...],
                     preferred_element_type=jnp.float32)
        l8 = jnp.maximum(l8 + t1_ref[...], 0.0).reshape(th + 2, wdp, c8)
        # torch zero-pads *after* bn1+relu -> zero the 1-px border exactly
        prow = jax.lax.broadcasted_iota(jnp.int32, (th + 2, wdp, 1), 0) + row0
        pcol = jax.lax.broadcasted_iota(jnp.int32, (th + 2, wdp, 1), 1)
        inside = (prow >= 1) & (prow <= h4) & (pcol >= 1) & (pcol <= wd)
        l8 = (l8 * inside.astype(l8.dtype)).astype(jnp.bfloat16)

        # ---- 9 conv2 taps over [x4 | low8]; the concat is folded into split
        # weights.  Accumulate in an SSA f32 value (no per-tap scratch RMW).
        acc = None
        for dx in range(3):
            xa = x4[:, dx:dx + wd, :].reshape((th + 2) * wd, cx)
            xb = l8[:, dx:dx + wd, :].reshape((th + 2) * wd, c8)
            for dy in range(3):
                lo, hi = dy * wd, (dy + th) * wd
                d = jnp.dot(xa[lo:hi], w2a_ref[3 * dy + dx],
                            preferred_element_type=jnp.float32)
                d = d + jnp.dot(xb[lo:hi], w2b_ref[3 * dy + dx],
                                preferred_element_type=jnp.float32)
                acc = d if acc is None else acc + d

        y = jnp.maximum(acc + t2_ref[...], 0.0)                # bn2 shift + relu
        o_ref[0] = y.reshape(th, wd, cout).astype(o_ref.dtype)

    return kernel


def conv2_fused(xw2, lowp, rhp, w1, t1, w2a, w2b, t2, *, h4, wd):
    n, h16, _ = xw2.shape
    cx, cout = w2a.shape[1], w2a.shape[2]
    c8 = w2b.shape[1]
    clow = lowp.shape[-1]
    wdp = wd + 2
    th = _conv_tile_h(h4, wd, budget=1024)
    kern = _make_conv2_kernel(th, h4, wd, cx, clow, c8, cout)
    return pl.pallas_call(
        kern,
        grid=(n, h4 // th),
        in_specs=[
            pl.BlockSpec((1, h16, wdp * cx), lambda i, r: (i, 0, 0)),
            pl.BlockSpec((1, h4 + 2, wdp, clow), lambda i, r: (i, 0, 0, 0)),
            pl.BlockSpec((h4 + 2, h16), lambda i, r: (0, 0)),
            pl.BlockSpec((clow, c8), lambda i, r: (0, 0)),
            pl.BlockSpec((1, c8), lambda i, r: (0, 0)),
            pl.BlockSpec((9, cx, cout), lambda i, r: (0, 0, 0)),
            pl.BlockSpec((9, c8, cout), lambda i, r: (0, 0, 0)),
            pl.BlockSpec((1, cout), lambda i, r: (0, 0)),
        ],
        out_specs=pl.BlockSpec((1, th, wd, cout), lambda i, r: (i, r, 0, 0)),
        out_shape=jax.ShapeDtypeStruct((n, h4, wd, cout), jnp.bfloat16),
        compiler_params=pltpu.CompilerParams(
            dimension_semantics=("parallel", "parallel")),
    )(xw2, lowp, rhp, w1, t1, w2a, w2b, t2)


# --------------------------------------------------------------------------
# K2: conv3(3x3)+bn3+relu fused with conv4(1x1 + bias)
# --------------------------------------------------------------------------

def _make_conv3_kernel(th, wd, cin, cls):
    def kernel(main_ref, top_ref, bot_ref, w3_ref, t3_ref, w4_ref, b4_ref,
               o_ref, buf_ref):
        r = pl.program_id(1)
        last = pl.num_programs(1) - 1
        zrow = jnp.zeros((wd, cin), buf_ref.dtype)

        # Assemble the halo'd, zero-padded tile in VMEM.  Halo rows arrive as
        # ordinary (pipelined) 1-row blocks; out-of-image rows are zeroed here.
        buf_ref[:, 0, :] = jnp.zeros((th + 2, cin), buf_ref.dtype)
        buf_ref[:, wd + 1, :] = jnp.zeros((th + 2, cin), buf_ref.dtype)
        buf_ref[1:th + 1, 1:wd + 1, :] = main_ref[0]

        @pl.when(r > 0)
        def _():
            buf_ref[0, 1:wd + 1, :] = top_ref[0, 0]

        @pl.when(r == 0)
        def _():
            buf_ref[0, 1:wd + 1, :] = zrow

        @pl.when(r < last)
        def _():
            buf_ref[th + 1, 1:wd + 1, :] = bot_ref[0, 0]

        @pl.when(r == last)
        def _():
            buf_ref[th + 1, 1:wd + 1, :] = zrow

        x = buf_ref[...]
        acc = None
        for dx in range(3):
            xs = x[:, dx:dx + wd, :].reshape((th + 2) * wd, cin)
            for dy in range(3):
                d = jnp.dot(xs[dy * wd:(dy + th) * wd], w3_ref[3 * dy + dx],
                            preferred_element_type=jnp.float32)
                acc = d if acc is None else acc + d

        y3 = jnp.maximum(acc + t3_ref[...], 0.0)               # (th*wd, 256) f32
        logits = jnp.dot(y3.astype(jnp.bfloat16), w4_ref[...],
                         preferred_element_type=jnp.float32) + b4_ref[...]
        o_ref[0] = logits.reshape(th, wd, cls).astype(o_ref.dtype)

    return kernel


def conv3_conv4(y2, w3, t3, w4, b4):
    n, h4, wd, cin = y2.shape
    cls = w4.shape[-1]
    th = _conv_tile_h(h4, wd, budget=2048)
    kern = _make_conv3_kernel(th, wd, cin, cls)
    return pl.pallas_call(
        kern,
        grid=(n, h4 // th),
        in_specs=[
            pl.BlockSpec((1, th, wd, cin), lambda i, r: (i, r, 0, 0)),
            pl.BlockSpec((1, 1, wd, cin),
                         lambda i, r: (i, jnp.maximum(r * th - 1, 0), 0, 0)),
            pl.BlockSpec((1, 1, wd, cin),
                         lambda i, r: (i, jnp.minimum(r * th + th, h4 - 1), 0, 0)),
            pl.BlockSpec((9, cin, cin), lambda i, r: (0, 0, 0)),
            pl.BlockSpec((1, cin), lambda i, r: (0, 0)),
            pl.BlockSpec((cin, cls), lambda i, r: (0, 0)),
            pl.BlockSpec((1, cls), lambda i, r: (0, 0)),
        ],
        out_specs=pl.BlockSpec((1, th, wd, cls), lambda i, r: (i, r, 0, 0)),
        out_shape=jax.ShapeDtypeStruct((n, h4, wd, cls), jnp.float32),
        scratch_shapes=[pltpu.VMEM((th + 2, wd + 2, cin), y2.dtype)],
        compiler_params=pltpu.CompilerParams(
            dimension_semantics=("parallel", "parallel")),
    )(y2, y2, y2, w3, t3, w4, b4)


# --------------------------------------------------------------------------
# K3: final bilinear upsample (fused H then W), NCHW in -> NCHW out
# --------------------------------------------------------------------------

def _make_upsample_kernel(cls):
    def kernel(x_ref, rh_ref, rwt_ref, o_ref):
        rh = rh_ref[...].astype(jnp.bfloat16)                  # (toh, H4)
        rwt = rwt_ref[...].astype(jnp.bfloat16)                # (W4, W)
        for ch in range(cls):                                  # class_num small & static
            a = jnp.dot(rh, x_ref[0, ch].astype(jnp.bfloat16),
                        preferred_element_type=jnp.float32)
            o_ref[0, ch] = jnp.dot(a.astype(jnp.bfloat16), rwt,
                                   preferred_element_type=jnp.float32
                                   ).astype(o_ref.dtype)
    return kernel


def bilinear_upsample_nchw(x_nchw, out_h, out_w):
    n, c, h, wd = x_nchw.shape
    rh = _resize_matrix(out_h, h)                              # (out_h, h)
    rwt = _resize_matrix(out_w, wd).T                          # (wd, out_w)
    toh = _pick_tile(out_h,
                     max(8, min(256, (1 << 22) // max(4 * out_w * c, 1))))
    kern = _make_upsample_kernel(c)
    return pl.pallas_call(
        kern,
        grid=(n, out_h // toh),
        in_specs=[pl.BlockSpec((1, c, h, wd), lambda i, r: (i, 0, 0, 0)),
                  pl.BlockSpec((toh, h), lambda i, r: (r, 0)),
                  pl.BlockSpec((wd, out_w), lambda i, r: (0, 0))],
        out_specs=pl.BlockSpec((1, c, toh, out_w), lambda i, r: (i, 0, r, 0)),
        out_shape=jax.ShapeDtypeStruct((n, c, out_h, out_w), jnp.float32),
        compiler_params=pltpu.CompilerParams(
            dimension_semantics=("parallel", "parallel")),
    )(x_nchw, rh, rwt)


# --------------------------------------------------------------------------
# parameters (shapes from EfficientDecoder.__init__, b0 -> 16 low-level ch)
# --------------------------------------------------------------------------

def init_params(key, class_num, low_level_channels=16):
    keys = jax.random.split(key, 5)

    def kaiming(k, shape):                     # (kh, kw, cin, cout), fan_in mode
        fan_in = shape[0] * shape[1] * shape[2]
        std = (2.0 / fan_in) ** 0.5
        return std * jax.random.normal(k, shape, jnp.float32)

    w1 = kaiming(keys[0], (1, 1, low_level_channels, 8))[0, 0]     # (16, 8)
    w2 = kaiming(keys[1], (3, 3, 256 + 8, 256))
    w3 = kaiming(keys[2], (3, 3, 256, 256))
    w4 = kaiming(keys[3], (1, 1, 256, class_num))[0, 0]            # (256, C)
    bound = 1.0 / (256.0 ** 0.5)
    b4 = jax.random.uniform(keys[4], (class_num,), jnp.float32, -bound, bound)

    # Inference BN (gamma=1, beta=0, mean=0, var=1): fold the scale into the
    # conv weights (kernels only add the shift), cast matmul operands to bf16.
    s = 1.0 / (1.0 + BN_EPS) ** 0.5
    w1 = (w1 * s).astype(jnp.bfloat16)
    w2 = w2 * s
    w2a = w2[:, :, :256, :].reshape(9, 256, 256).astype(jnp.bfloat16)
    w2b = w2[:, :, 256:, :].reshape(9, 8, 256).astype(jnp.bfloat16)
    w3 = (w3 * s).reshape(9, 256, 256).astype(jnp.bfloat16)
    return dict(
        w1=w1, w2a=w2a, w2b=w2b, w3=w3, w4=w4.astype(jnp.bfloat16),
        t1=jnp.zeros((1, 8), jnp.float32),
        t2=jnp.zeros((1, 256), jnp.float32),
        t3=jnp.zeros((1, 256), jnp.float32),
        b4=b4.reshape(1, class_num),
    )


# --------------------------------------------------------------------------
# forward (EfficientDecoder + EfficientDeepLab's final upsample)
# --------------------------------------------------------------------------

def efficient_deeplab_forward(params, x_nchw, low_nchw, out_hw):
    n, cx, h16, w16 = x_nchw.shape
    _, _, h4, wd4 = low_nchw.shape
    out_h, out_w = out_hw

    # Padded interpolation matrices: zero first/last rows provide conv2's zero
    # border on x4 with no separate HBM pad pass on any 256-channel tensor.
    rwp = jnp.pad(_resize_matrix(wd4, w16), ((1, 1), (0, 0)))      # (W4+2, W16)
    rhp = jnp.pad(_resize_matrix(h4, h16),
                  ((1, 1), (0, 0))).astype(jnp.bfloat16)           # (H4+2, H16)

    # W-direction resize of the tiny stride-16 feature map is precomputed here
    # (|xw| ~ 2x|x|); the large stride-4 H-resize runs inside the conv2 kernel,
    # so the full-size x4 never touches HBM.
    xw = jnp.einsum('ow,nchw->nhoc', rwp, x_nchw)                  # (N,H16,W4+2,256)
    xw = xw.astype(jnp.bfloat16).reshape(n, h16, (wd4 + 2) * cx)

    # low-level features: NHWC + cheap 16-channel zero pad, bf16
    lowp = jnp.transpose(low_nchw, (0, 2, 3, 1))
    lowp = jnp.pad(lowp, ((0, 0), (1, 1), (1, 1), (0, 0))).astype(jnp.bfloat16)

    # conv1+bn1+relu, upsample(x), concat, conv2+bn2+relu (dropout2 = identity)
    y = conv2_fused(xw, lowp, rhp, params["w1"], params["t1"],
                    params["w2a"], params["w2b"], params["t2"], h4=h4, wd=wd4)

    # conv3+bn3+relu fused with conv4 (+bias)            (dropout3 = identity)
    logits = conv3_conv4(y, params["w3"], params["t3"],
                         params["w4"], params["b4"])

    # tiny class_num-channel transpose, then fused full-resolution bilinear
    # upsample writing NCHW directly (lane-dense stores).
    logits_nchw = jnp.transpose(logits, (0, 3, 1, 2))
    return bilinear_upsample_nchw(logits_nchw, out_h, out_w)


# --------------------------------------------------------------------------
# demo
# --------------------------------------------------------------------------

if __name__ == "__main__":
    key = jax.random.PRNGKey(0)
    k_x, k_low, k_p = jax.random.split(key, 3)

    N, CLASS_NUM = 2, 5
    Hi = Wi = 32
    # encoder (ASPP) output: 256 ch at stride 16 ; low-level: 16 ch at stride 4
    x = jax.random.normal(k_x, (N, 256, Hi // 16, Wi // 16), jnp.float32)
    low = jax.random.normal(k_low, (N, 16, Hi // 4, Wi // 4), jnp.float32)
    params = init_params(k_p, CLASS_NUM)

    fwd = jax.jit(functools.partial(efficient_deeplab_forward, out_hw=(Hi, Wi)))
    out = fwd(params, x, low)
    jax.block_until_ready(out)
    assert out.shape == (N, CLASS_NUM, Hi, Wi), out.shape
    assert bool(jnp.isfinite(out).all())
    print("KERNEL_OK")
</pallas_src>

<mosaic_0001>
module attributes {stable_mosaic.version = 11 : i64} {
  func.func @kernel(%arg0: i32, %arg1: i32, %arg2: memref<1x8x8x256xbf16, #tpu.memory_space<vmem>>, %arg3: memref<1x1x8x256xbf16, #tpu.memory_space<vmem>>, %arg4: memref<1x1x8x256xbf16, #tpu.memory_space<vmem>>, %arg5: memref<9x256x256xbf16, #tpu.memory_space<vmem>>, %arg6: memref<1x256xf32, #tpu.memory_space<vmem>>, %arg7: memref<256x5xbf16, #tpu.memory_space<vmem>>, %arg8: memref<1x5xf32, #tpu.memory_space<vmem>>, %arg9: memref<1x8x8x5xf32, #tpu.memory_space<vmem>>, %arg10: memref<10x10x256xbf16, #tpu.memory_space<vmem>>) attributes {dimension_semantics = [#tpu.dimension_semantics<parallel>, #tpu.dimension_semantics<parallel>], iteration_bounds = array<i64: 2, 1>, scalar_prefetch = 0 : i64, scratch_operands = 1 : i64, tpu.core_type = #tpu.core_type<tc>, window_params = [{transform_indices = @transform_0, window_bounds = array<i64: 1, 8, 8, 256>}, {transform_indices = @transform_1, window_bounds = array<i64: 1, 1, 8, 256>}, {transform_indices = @transform_2, window_bounds = array<i64: 1, 1, 8, 256>}, {pipeline_mode = #tpu.pipeline_mode<synchronous>, transform_indices = @transform_3, window_bounds = array<i64: 9, 256, 256>}, {pipeline_mode = #tpu.pipeline_mode<synchronous>, transform_indices = @transform_4, window_bounds = array<i64: 1, 256>}, {pipeline_mode = #tpu.pipeline_mode<synchronous>, transform_indices = @transform_5, window_bounds = array<i64: 256, 5>}, {pipeline_mode = #tpu.pipeline_mode<synchronous>, transform_indices = @transform_6, window_bounds = array<i64: 1, 5>}, {transform_indices = @transform_7, window_bounds = array<i64: 1, 8, 8, 5>}]} {
    %cst = arith.constant 0.000000e+00 : bf16
    %0 = vector.broadcast %cst : bf16 to vector<8x256xbf16>
    %cst_0 = arith.constant 0.000000e+00 : bf16
    %1 = vector.broadcast %cst_0 : bf16 to vector<10x256xbf16>
    %c0 = arith.constant 0 : index
    %c0_1 = arith.constant 0 : index
    %c0_2 = arith.constant 0 : index
    %2 = vector.load %arg10[%c0, %c0_1, %c0_2] : memref<10x10x256xbf16, #tpu.memory_space<vmem>>, vector<10x1x256xbf16>
    %3 = vector.shape_cast %2 : vector<10x1x256xbf16> to vector<10x256xbf16>
    %4 = vector.shape_cast %1 : vector<10x256xbf16> to vector<10x1x256xbf16>
    tpu.vector_store %arg10[%c0, %c0_1, %c0_2], %4 {strides = array<i32>} : memref<10x10x256xbf16, #tpu.memory_space<vmem>>, vector<10x1x256xbf16>,
    %cst_3 = arith.constant 0.000000e+00 : bf16
    %5 = vector.broadcast %cst_3 : bf16 to vector<10x256xbf16>
    %c0_4 = arith.constant 0 : index
    %c9 = arith.constant 9 : index
    %c0_5 = arith.constant 0 : index
    %6 = vector.load %arg10[%c0_4, %c9, %c0_5] : memref<10x10x256xbf16, #tpu.memory_space<vmem>>, vector<10x1x256xbf16>
    %7 = vector.shape_cast %6 : vector<10x1x256xbf16> to vector<10x256xbf16>
    %8 = vector.shape_cast %5 : vector<10x256xbf16> to vector<10x1x256xbf16>
    tpu.vector_store %arg10[%c0_4, %c9, %c0_5], %8 {strides = array<i32>} : memref<10x10x256xbf16, #tpu.memory_space<vmem>>, vector<10x1x256xbf16>,
    %c0_6 = arith.constant 0 : index
    %c0_7 = arith.constant 0 : index
    %c0_8 = arith.constant 0 : index
    %c0_9 = arith.constant 0 : index
    %9 = vector.load %arg2[%c0_6, %c0_7, %c0_8, %c0_9] : memref<1x8x8x256xbf16, #tpu.memory_space<vmem>>, vector<1x8x8x256xbf16>
    %10 = vector.shape_cast %9 : vector<1x8x8x256xbf16> to vector<8x8x256xbf16>
    %c1 = arith.constant 1 : index
    %c1_10 = arith.constant 1 : index
    %c0_11 = arith.constant 0 : index
    %11 = vector.load %arg10[%c1, %c1_10, %c0_11] : memref<10x10x256xbf16, #tpu.memory_space<vmem>>, vector<8x8x256xbf16>
    tpu.vector_store %arg10[%c1, %c1_10, %c0_11], %10 {strides = array<i32>} : memref<10x10x256xbf16, #tpu.memory_space<vmem>>, vector<8x8x256xbf16>,
    %c0_i32 = arith.constant 0 : i32
    %12 = arith.cmpi sgt, %arg1, %c0_i32 : i32
    %13 = arith.extui %12 : i1 to i32
    %c0_i32_12 = arith.constant 0 : i32
    %14 = arith.cmpi ne, %13, %c0_i32_12 : i32
    scf.if %14 {
      %c0_63 = arith.constant 0 : index
      %c0_64 = arith.constant 0 : index
      %c0_65 = arith.constant 0 : index
      %c0_66 = arith.constant 0 : index
      %90 = vector.load %arg3[%c0_63, %c0_64, %c0_65, %c0_66] : memref<1x1x8x256xbf16, #tpu.memory_space<vmem>>, vector<1x1x8x256xbf16>
      %91 = vector.shape_cast %90 : vector<1x1x8x256xbf16> to vector<8x256xbf16>
      %c0_67 = arith.constant 0 : index
      %c1_68 = arith.constant 1 : index
      %c0_69 = arith.constant 0 : index
      %92 = vector.load %arg10[%c0_67, %c1_68, %c0_69] : memref<10x10x256xbf16, #tpu.memory_space<vmem>>, vector<1x8x256xbf16>
      %93 = vector.shape_cast %92 : vector<1x8x256xbf16> to vector<8x256xbf16>
      %94 = vector.shape_cast %91 : vector<8x256xbf16> to vector<1x8x256xbf16>
      tpu.vector_store %arg10[%c0_67, %c1_68, %c0_69], %94 {strides = array<i32>} : memref<10x10x256xbf16, #tpu.memory_space<vmem>>, vector<1x8x256xbf16>,
    } else {
    }
    %c0_i32_13 = arith.constant 0 : i32
    %15 = arith.cmpi eq, %arg1, %c0_i32_13 : i32
    %16 = arith.extui %15 : i1 to i32
    %c0_i32_14 = arith.constant 0 : i32
    %17 = arith.cmpi ne, %16, %c0_i32_14 : i32
    scf.if %17 {
      %c0_63 = arith.constant 0 : index
      %c1_64 = arith.constant 1 : index
      %c0_65 = arith.constant 0 : index
      %90 = vector.load %arg10[%c0_63, %c1_64, %c0_65] : memref<10x10x256xbf16, #tpu.memory_space<vmem>>, vector<1x8x256xbf16>
      %91 = vector.shape_cast %90 : vector<1x8x256xbf16> to vector<8x256xbf16>
      %92 = vector.shape_cast %0 : vector<8x256xbf16> to vector<1x8x256xbf16>
      tpu.vector_store %arg10[%c0_63, %c1_64, %c0_65], %92 {strides = array<i32>} : memref<10x10x256xbf16, #tpu.memory_space<vmem>>, vector<1x8x256xbf16>,
    } else {
    }
    %c0_i32_15 = arith.constant 0 : i32
    %18 = arith.cmpi slt, %arg1, %c0_i32_15 : i32
    %19 = arith.extui %18 : i1 to i32
    %c0_i32_16 = arith.constant 0 : i32
    %20 = arith.cmpi ne, %19, %c0_i32_16 : i32
    scf.if %20 {
      %c0_63 = arith.constant 0 : index
      %c0_64 = arith.constant 0 : index
      %c0_65 = arith.constant 0 : index
      %c0_66 = arith.constant 0 : index
      %90 = vector.load %arg4[%c0_63, %c0_64, %c0_65, %c0_66] : memref<1x1x8x256xbf16, #tpu.memory_space<vmem>>, vector<1x1x8x256xbf16>
      %91 = vector.shape_cast %90 : vector<1x1x8x256xbf16> to vector<8x256xbf16>
      %c9_67 = arith.constant 9 : index
      %c1_68 = arith.constant 1 : index
      %c0_69 = arith.constant 0 : index
      %92 = vector.load %arg10[%c9_67, %c1_68, %c0_69] : memref<10x10x256xbf16, #tpu.memory_space<vmem>>, vector<1x8x256xbf16>
      %93 = vector.shape_cast %92 : vector<1x8x256xbf16> to vector<8x256xbf16>
      %94 = vector.shape_cast %91 : vector<8x256xbf16> to vector<1x8x256xbf16>
      tpu.vector_store %arg10[%c9_67, %c1_68, %c0_69], %94 {strides = array<i32>} : memref<10x10x256xbf16, #tpu.memory_space<vmem>>, vector<1x8x256xbf16>,
    } else {
    }
    %c0_i32_17 = arith.constant 0 : i32
    %21 = arith.cmpi eq, %arg1, %c0_i32_17 : i32
    %22 = arith.extui %21 : i1 to i32
    %c0_i32_18 = arith.constant 0 : i32
    %23 = arith.cmpi ne, %22, %c0_i32_18 : i32
    scf.if %23 {
      %c9_63 = arith.constant 9 : index
      %c1_64 = arith.constant 1 : index
      %c0_65 = arith.constant 0 : index
      %90 = vector.load %arg10[%c9_63, %c1_64, %c0_65] : memref<10x10x256xbf16, #tpu.memory_space<vmem>>, vector<1x8x256xbf16>
      %91 = vector.shape_cast %90 : vector<1x8x256xbf16> to vector<8x256xbf16>
      %92 = vector.shape_cast %0 : vector<8x256xbf16> to vector<1x8x256xbf16>
      tpu.vector_store %arg10[%c9_63, %c1_64, %c0_65], %92 {strides = array<i32>} : memref<10x10x256xbf16, #tpu.memory_space<vmem>>, vector<1x8x256xbf16>,
    } else {
    }
    %c0_19 = arith.constant 0 : index
    %c0_20 = arith.constant 0 : index
    %c0_21 = arith.constant 0 : index
    %24 = vector.load %arg10[%c0_19, %c0_20, %c0_21] : memref<10x10x256xbf16, #tpu.memory_space<vmem>>, vector<10x10x256xbf16>
    %25 = vector.extract_strided_slice %24 {offsets = [0, 0, 0], sizes = [10, 8, 256], strides = [1, 1, 1]} : vector<10x10x256xbf16> to vector<10x8x256xbf16>
    %26 = vector.shape_cast %25 : vector<10x8x256xbf16> to vector<80x256xbf16>
    %27 = vector.extract_strided_slice %26 {offsets = [0, 0], sizes = [64, 256], strides = [1, 1]} : vector<80x256xbf16> to vector<64x256xbf16>
    %c0_22 = arith.constant 0 : index
    %c0_23 = arith.constant 0 : index
    %c0_24 = arith.constant 0 : index
    %28 = vector.load %arg5[%c0_22, %c0_23, %c0_24] : memref<9x256x256xbf16, #tpu.memory_space<vmem>>, vector<1x256x256xbf16>
    %29 = vector.shape_cast %28 : vector<1x256x256xbf16> to vector<256x256xbf16>
    %cst_25 = arith.constant dense<0.000000e+00> : vector<64x256xf32>
    %30 = tpu.matmul %27, %29, %cst_25 {dimension_numbers = #tpu.dot_dimension_numbers<[1], [0], [0], [1], [0, 0, 1, 1], [], []>} : vector<64x256xbf16>, vector<256x256xbf16>, vector<64x256xf32> -> vector<64x256xf32>
    %31 = vector.extract_strided_slice %26 {offsets = [8, 0], sizes = [64, 256], strides = [1, 1]} : vector<80x256xbf16> to vector<64x256xbf16>
    %c3 = arith.constant 3 : index
    %c0_26 = arith.constant 0 : index
    %c0_27 = arith.constant 0 : index
    %32 = vector.load %arg5[%c3, %c0_26, %c0_27] : memref<9x256x256xbf16, #tpu.memory_space<vmem>>, vector<1x256x256xbf16>
    %33 = vector.shape_cast %32 : vector<1x256x256xbf16> to vector<256x256xbf16>
    %cst_28 = arith.constant dense<0.000000e+00> : vector<64x256xf32>
    %34 = tpu.matmul %31, %33, %cst_28 {dimension_numbers = #tpu.dot_dimension_numbers<[1], [0], [0], [1], [0, 0, 1, 1], [], []>} : vector<64x256xbf16>, vector<256x256xbf16>, vector<64x256xf32> -> vector<64x256xf32>
    %35 = arith.addf %30, %34 : vector<64x256xf32>
    %36 = vector.extract_strided_slice %26 {offsets = [16, 0], sizes = [64, 256], strides = [1, 1]} : vector<80x256xbf16> to vector<64x256xbf16>
    %c6 = arith.constant 6 : index
    %c0_29 = arith.constant 0 : index
    %c0_30 = arith.constant 0 : index
    %37 = vector.load %arg5[%c6, %c0_29, %c0_30] : memref<9x256x256xbf16, #tpu.memory_space<vmem>>, vector<1x256x256xbf16>
    %38 = vector.shape_cast %37 : vector<1x256x256xbf16> to vector<256x256xbf16>
    %cst_31 = arith.constant dense<0.000000e+00> : vector<64x256xf32>
    %39 = tpu.matmul %36, %38, %cst_31 {dimension_numbers = #tpu.dot_dimension_numbers<[1], [0], [0], [1], [0, 0, 1, 1], [], []>} : vector<64x256xbf16>, vector<256x256xbf16>, vector<64x256xf32> -> vector<64x256xf32>
    %40 = arith.addf %35, %39 : vector<64x256xf32>
    %41 = vector.extract_strided_slice %24 {offsets = [0, 1, 0], sizes = [10, 8, 256], strides = [1, 1, 1]} : vector<10x10x256xbf16> to vector<10x8x256xbf16>
    %42 = vector.shape_cast %41 : vector<10x8x256xbf16> to vector<80x256xbf16>
    %43 = vector.extract_strided_slice %42 {offsets = [0, 0], sizes = [64, 256], strides = [1, 1]} : vector<80x256xbf16> to vector<64x256xbf16>
    %c1_32 = arith.constant 1 : index
    %c0_33 = arith.constant 0 : index
    %c0_34 = arith.constant 0 : index
    %44 = vector.load %arg5[%c1_32, %c0_33, %c0_34] : memref<9x256x256xbf16, #tpu.memory_space<vmem>>, vector<1x256x256xbf16>
    %45 = vector.shape_cast %44 : vector<1x256x256xbf16> to vector<256x256xbf16>
    %cst_35 = arith.constant dense<0.000000e+00> : vector<64x256xf32>
    %46 = tpu.matmul %43, %45, %cst_35 {dimension_numbers = #tpu.dot_dimension_numbers<[1], [0], [0], [1], [0, 0, 1, 1], [], []>} : vector<64x256xbf16>, vector<256x256xbf16>, vector<64x256xf32> -> vector<64x256xf32>
    %47 = arith.addf %40, %46 : vector<64x256xf32>
    %48 = vector.extract_strided_slice %42 {offsets = [8, 0], sizes = [64, 256], strides = [1, 1]} : vector<80x256xbf16> to vector<64x256xbf16>
    %c4 = arith.constant 4 : index
    %c0_36 = arith.constant 0 : index
    %c0_37 = arith.constant 0 : index
    %49 = vector.load %arg5[%c4, %c0_36, %c0_37] : memref<9x256x256xbf16, #tpu.memory_space<vmem>>, vector<1x256x256xbf16>
    %50 = vector.shape_cast %49 : vector<1x256x256xbf16> to vector<256x256xbf16>
    %cst_38 = arith.constant dense<0.000000e+00> : vector<64x256xf32>
    %51 = tpu.matmul %48, %50, %cst_38 {dimension_numbers = #tpu.dot_dimension_numbers<[1], [0], [0], [1], [0, 0, 1, 1], [], []>} : vector<64x256xbf16>, vector<256x256xbf16>, vector<64x256xf32> -> vector<64x256xf32>
    %52 = arith.addf %47, %51 : vector<64x256xf32>
    %53 = vector.extract_strided_slice %42 {offsets = [16, 0], sizes = [64, 256], strides = [1, 1]} : vector<80x256xbf16> to vector<64x256xbf16>
    %c7 = arith.constant 7 : index
    %c0_39 = arith.constant 0 : index
    %c0_40 = arith.constant 0 : index
    %54 = vector.load %arg5[%c7, %c0_39, %c0_40] : memref<9x256x256xbf16, #tpu.memory_space<vmem>>, vector<1x256x256xbf16>
    %55 = vector.shape_cast %54 : vector<1x256x256xbf16> to vector<256x256xbf16>
    %cst_41 = arith.constant dense<0.000000e+00> : vector<64x256xf32>
    %56 = tpu.matmul %53, %55, %cst_41 {dimension_numbers = #tpu.dot_dimension_numbers<[1], [0], [0], [1], [0, 0, 1, 1], [], []>} : vector<64x256xbf16>, vector<256x256xbf16>, vector<64x256xf32> -> vector<64x256xf32>
    %57 = arith.addf %52, %56 : vector<64x256xf32>
    %58 = vector.extract_strided_slice %24 {offsets = [0, 2, 0], sizes = [10, 8, 256], strides = [1, 1, 1]} : vector<10x10x256xbf16> to vector<10x8x256xbf16>
    %59 = vector.shape_cast %58 : vector<10x8x256xbf16> to vector<80x256xbf16>
    %60 = vector.extract_strided_slice %59 {offsets = [0, 0], sizes = [64, 256], strides = [1, 1]} : vector<80x256xbf16> to vector<64x256xbf16>
    %c2 = arith.constant 2 : index
    %c0_42 = arith.constant 0 : index
    %c0_43 = arith.constant 0 : index
    %61 = vector.load %arg5[%c2, %c0_42, %c0_43] : memref<9x256x256xbf16, #tpu.memory_space<vmem>>, vector<1x256x256xbf16>
    %62 = vector.shape_cast %61 : vector<1x256x256xbf16> to vector<256x256xbf16>
    %cst_44 = arith.constant dense<0.000000e+00> : vector<64x256xf32>
    %63 = tpu.matmul %60, %62, %cst_44 {dimension_numbers = #tpu.dot_dimension_numbers<[1], [0], [0], [1], [0, 0, 1, 1], [], []>} : vector<64x256xbf16>, vector<256x256xbf16>, vector<64x256xf32> -> vector<64x256xf32>
    %64 = arith.addf %57, %63 : vector<64x256xf32>
    %65 = vector.extract_strided_slice %59 {offsets = [8, 0], sizes = [64, 256], strides = [1, 1]} : vector<80x256xbf16> to vector<64x256xbf16>
    %c5 = arith.constant 5 : index
    %c0_45 = arith.constant 0 : index
    %c0_46 = arith.constant 0 : index
    %66 = vector.load %arg5[%c5, %c0_45, %c0_46] : memref<9x256x256xbf16, #tpu.memory_space<vmem>>, vector<1x256x256xbf16>
    %67 = vector.shape_cast %66 : vector<1x256x256xbf16> to vector<256x256xbf16>
    %cst_47 = arith.constant dense<0.000000e+00> : vector<64x256xf32>
    %68 = tpu.matmul %65, %67, %cst_47 {dimension_numbers = #tpu.dot_dimension_numbers<[1], [0], [0], [1], [0, 0, 1, 1], [], []>} : vector<64x256xbf16>, vector<256x256xbf16>, vector<64x256xf32> -> vector<64x256xf32>
    %69 = arith.addf %64, %68 : vector<64x256xf32>
    %70 = vector.extract_strided_slice %59 {offsets = [16, 0], sizes = [64, 256], strides = [1, 1]} : vector<80x256xbf16> to vector<64x256xbf16>
    %c8 = arith.constant 8 : index
    %c0_48 = arith.constant 0 : index
    %c0_49 = arith.constant 0 : index
    %71 = vector.load %arg5[%c8, %c0_48, %c0_49] : memref<9x256x256xbf16, #tpu.memory_space<vmem>>, vector<1x256x256xbf16>
    %72 = vector.shape_cast %71 : vector<1x256x256xbf16> to vector<256x256xbf16>
    %cst_50 = arith.constant dense<0.000000e+00> : vector<64x256xf32>
    %73 = tpu.matmul %70, %72, %cst_50 {dimension_numbers = #tpu.dot_dimension_numbers<[1], [0], [0], [1], [0, 0, 1, 1], [], []>} : vector<64x256xbf16>, vector<256x256xbf16>, vector<64x256xf32> -> vector<64x256xf32>
    %74 = arith.addf %69, %73 : vector<64x256xf32>
    %c0_51 = arith.constant 0 : index
    %c0_52 = arith.constant 0 : index
    %75 = vector.load %arg6[%c0_51, %c0_52] : memref<1x256xf32, #tpu.memory_space<vmem>>, vector<1x256xf32>
    %76 = vector.broadcast %75 : vector<1x256xf32> to vector<64x256xf32>
    %77 = arith.addf %74, %76 : vector<64x256xf32>
    %cst_53 = arith.constant 0.000000e+00 : f32
    %78 = vector.broadcast %cst_53 : f32 to vector<64x256xf32>
    %79 = arith.maximumf %77, %78 : vector<64x256xf32>
    %80 = arith.truncf %79 : vector<64x256xf32> to vector<64x256xbf16>
    %c0_54 = arith.constant 0 : index
    %c0_55 = arith.constant 0 : index
    %81 = vector.load %arg7[%c0_54, %c0_55] : memref<256x5xbf16, #tpu.memory_space<vmem>>, vector<256x5xbf16>
    %cst_56 = arith.constant dense<0.000000e+00> : vector<64x5xf32>
    %82 = tpu.matmul %80, %81, %cst_56 {dimension_numbers = #tpu.dot_dimension_numbers<[1], [0], [0], [1], [0, 0, 1, 1], [], []>} : vector<64x256xbf16>, vector<256x5xbf16>, vector<64x5xf32> -> vector<64x5xf32>
    %c0_57 = arith.constant 0 : index
    %c0_58 = arith.constant 0 : index
    %83 = vector.load %arg8[%c0_57, %c0_58] : memref<1x5xf32, #tpu.memory_space<vmem>>, vector<1x5xf32>
    %84 = vector.broadcast %83 : vector<1x5xf32> to vector<64x5xf32>
    %85 = arith.addf %82, %84 : vector<64x5xf32>
    %86 = vector.shape_cast %85 : vector<64x5xf32> to vector<8x8x5xf32>
    %c0_59 = arith.constant 0 : index
    %c0_60 = arith.constant 0 : index
    %c0_61 = arith.constant 0 : index
    %c0_62 = arith.constant 0 : index
    %87 = vector.load %arg9[%c0_59, %c0_60, %c0_61, %c0_62] : memref<1x8x8x5xf32, #tpu.memory_space<vmem>>, vector<1x8x8x5xf32>
    %88 = vector.shape_cast %87 : vector<1x8x8x5xf32> to vector<8x8x5xf32>
    %89 = vector.shape_cast %86 : vector<8x8x5xf32> to vector<1x8x8x5xf32>
    tpu.vector_store %arg9[%c0_59, %c0_60, %c0_61, %c0_62], %89 {strides = array<i32>} : memref<1x8x8x5xf32, #tpu.memory_space<vmem>>, vector<1x8x8x5xf32>,
    return
  }
  func.func @transform_0(%arg0: i32, %arg1: i32) -> (i32, i32, i32, i32) {
    %c0_i32 = arith.constant 0 : i32
    %c0_i32_0 = arith.constant 0 : i32
    %c0_i32_1 = arith.constant 0 : i32
    return %arg0, %arg1, %c0_i32, %c0_i32_0 : i32, i32, i32, i32
  }
  func.func @transform_1(%arg0: i32, %arg1: i32) -> (i32, i32, i32, i32) {
    %c8_i32 = arith.constant 8 : i32
    %0 = arith.muli %arg1, %c8_i32 : i32
    %c1_i32 = arith.constant 1 : i32
    %1 = arith.subi %0, %c1_i32 : i32
    %c0_i32 = arith.constant 0 : i32
    %2 = arith.maxsi %1, %c0_i32 : i32
    %c0_i32_0 = arith.constant 0 : i32
    %c0_i32_1 = arith.constant 0 : i32
    %c0_i32_2 = arith.constant 0 : i32
    return %arg0, %2, %c0_i32_0, %c0_i32_1 : i32, i32, i32, i32
  }
  func.func @transform_2(%arg0: i32, %arg1: i32) -> (i32, i32, i32, i32) {
    %c8_i32 = arith.constant 8 : i32
    %0 = arith.muli %arg1, %c8_i32 : i32
    %c8_i32_0 = arith.constant 8 : i32
    %1 = arith.addi %0, %c8_i32_0 : i32
    %c7_i32 = arith.constant 7 : i32
    %2 = arith.minsi %1, %c7_i32 : i32
    %c0_i32 = arith.constant 0 : i32
    %c0_i32_1 = arith.constant 0 : i32
    %c0_i32_2 = arith.constant 0 : i32
    return %arg0, %2, %c0_i32, %c0_i32_1 : i32, i32, i32, i32
  }
  func.func @transform_3(%arg0: i32, %arg1: i32) -> (i32, i32, i32) {
    %c0_i32 = arith.constant 0 : i32
    %c0_i32_0 = arith.constant 0 : i32
    %c0_i32_1 = arith.constant 0 : i32
    %c0_i32_2 = arith.constant 0 : i32
    return %c0_i32, %c0_i32_0, %c0_i32_1 : i32, i32, i32
  }
  func.func @transform_4(%arg0: i32, %arg1: i32) -> (i32, i32) {
    %c0_i32 = arith.constant 0 : i32
    %c0_i32_0 = arith.constant 0 : i32
    %c0_i32_1 = arith.constant 0 : i32
    return %c0_i32, %c0_i32_0 : i32, i32
  }
  func.func @transform_5(%arg0: i32, %arg1: i32) -> (i32, i32) {
    %c0_i32 = arith.constant 0 : i32
    %c0_i32_0 = arith.constant 0 : i32
    %c0_i32_1 = arith.constant 0 : i32
    return %c0_i32, %c0_i32_0 : i32, i32
  }
  func.func @transform_6(%arg0: i32, %arg1: i32) -> (i32, i32) {
    %c0_i32 = arith.constant 0 : i32
    %c0_i32_0 = arith.constant 0 : i32
    %c0_i32_1 = arith.constant 0 : i32
    return %c0_i32, %c0_i32_0 : i32, i32
  }
  func.func @transform_7(%arg0: i32, %arg1: i32) -> (i32, i32, i32, i32) {
    %c0_i32 = arith.constant 0 : i32
    %c0_i32_0 = arith.constant 0 : i32
    %c0_i32_1 = arith.constant 0 : i32
    return %arg0, %arg1, %c0_i32, %c0_i32_0 : i32, i32, i32, i32
  }
}

module attributes {stable_mosaic.version = 11 : i64} {
  func.func @kernel(%arg0: i32, %arg1: i32, %arg2: memref<1x2x2560xbf16, #tpu.memory_space<vmem>>, %arg3: memref<1x10x10x16xbf16, #tpu.memory_space<vmem>>, %arg4: memref<10x2xbf16, #tpu.memory_space<vmem>>, %arg5: memref<16x8xbf16, #tpu.memory_space<vmem>>, %arg6: memref<1x8xf32, #tpu.memory_space<vmem>>, %arg7: memref<9x256x256xbf16, #tpu.memory_space<vmem>>, %arg8: memref<9x8x256xbf16, #tpu.memory_space<vmem>>, %arg9: memref<1x256xf32, #tpu.memory_space<vmem>>, %arg10: memref<1x8x8x256xbf16, #tpu.memory_space<vmem>>) attributes {dimension_semantics = [#tpu.dimension_semantics<parallel>, #tpu.dimension_semantics<parallel>], iteration_bounds = array<i64: 2, 1>, scalar_prefetch = 0 : i64, scratch_operands = 0 : i64, tpu.core_type = #tpu.core_type<tc>, window_params = [{transform_indices = @transform_0, window_bounds = array<i64: 1, 2, 2560>}, {transform_indices = @transform_1, window_bounds = array<i64: 1, 10, 10, 16>}, {pipeline_mode = #tpu.pipeline_mode<synchronous>, transform_indices = @transform_2, window_bounds = array<i64: 10, 2>}, {pipeline_mode = #tpu.pipeline_mode<synchronous>, transform_indices = @transform_3, window_bounds = array<i64: 16, 8>}, {pipeline_mode = #tpu.pipeline_mode<synchronous>, transform_indices = @transform_4, window_bounds = array<i64: 1, 8>}, {pipeline_mode = #tpu.pipeline_mode<synchronous>, transform_indices = @transform_5, window_bounds = array<i64: 9, 256, 256>}, {pipeline_mode = #tpu.pipeline_mode<synchronous>, transform_indices = @transform_6, window_bounds = array<i64: 9, 8, 256>}, {pipeline_mode = #tpu.pipeline_mode<synchronous>, transform_indices = @transform_7, window_bounds = array<i64: 1, 256>}, {transform_indices = @transform_8, window_bounds = array<i64: 1, 8, 8, 256>}]} {
    %c8_i32 = arith.constant 8 : i32
    %0 = arith.muli %arg1, %c8_i32 : i32
    %1 = arith.index_cast %0 : i32 to index
    %c0 = arith.constant 0 : index
    %2 = vector.load %arg4[%1, %c0] : memref<10x2xbf16, #tpu.memory_space<vmem>>, vector<10x2xbf16>
    %c0_0 = arith.constant 0 : index
    %c0_1 = arith.constant 0 : index
    %c0_2 = arith.constant 0 : index
    %3 = vector.load %arg2[%c0_0, %c0_1, %c0_2] : memref<1x2x2560xbf16, #tpu.memory_space<vmem>>, vector<1x2x2560xbf16>
    %4 = vector.shape_cast %3 : vector<1x2x2560xbf16> to vector<2x2560xbf16>
    %cst = arith.constant dense<0.000000e+00> : vector<10x2560xf32>
    %5 = tpu.matmul %2, %4, %cst {dimension_numbers = #tpu.dot_dimension_numbers<[1], [0], [0], [1], [0, 0, 1, 1], [], []>} : vector<10x2xbf16>, vector<2x2560xbf16>, vector<10x2560xf32> -> vector<10x2560xf32>
    %6 = vector.shape_cast %5 : vector<10x2560xf32> to vector<10x10x256xf32>
    %7 = arith.truncf %6 : vector<10x10x256xf32> to vector<10x10x256xbf16>
    %c0_3 = arith.constant 0 : index
    %8 = arith.index_cast %0 : i32 to index
    %c0_4 = arith.constant 0 : index
    %c0_5 = arith.constant 0 : index
    %9 = vector.load %arg3[%c0_3, %8, %c0_4, %c0_5] : memref<1x10x10x16xbf16, #tpu.memory_space<vmem>>, vector<1x10x10x16xbf16>
    %10 = vector.shape_cast %9 : vector<1x10x10x16xbf16> to vector<10x10x16xbf16>
    %11 = vector.shape_cast %10 : vector<10x10x16xbf16> to vector<100x16xbf16>
    %c0_6 = arith.constant 0 : index
    %c0_7 = arith.constant 0 : index
    %12 = vector.load %arg5[%c0_6, %c0_7] : memref<16x8xbf16, #tpu.memory_space<vmem>>, vector<16x8xbf16>
    %cst_8 = arith.constant dense<0.000000e+00> : vector<100x8xf32>
    %13 = tpu.matmul %11, %12, %cst_8 {dimension_numbers = #tpu.dot_dimension_numbers<[1], [0], [0], [1], [0, 0, 1, 1], [], []>} : vector<100x16xbf16>, vector<16x8xbf16>, vector<100x8xf32> -> vector<100x8xf32>
    %c0_9 = arith.constant 0 : index
    %c0_10 = arith.constant 0 : index
    %14 = vector.load %arg6[%c0_9, %c0_10] : memref<1x8xf32, #tpu.memory_space<vmem>>, vector<1x8xf32>
    %15 = vector.broadcast %14 : vector<1x8xf32> to vector<100x8xf32>
    %16 = arith.addf %13, %15 : vector<100x8xf32>
    %cst_11 = arith.constant 0.000000e+00 : f32
    %17 = vector.broadcast %cst_11 : f32 to vector<100x8xf32>
    %18 = arith.maximumf %16, %17 : vector<100x8xf32>
    %19 = vector.shape_cast %18 : vector<100x8xf32> to vector<10x10x8xf32>
    %20 = tpu.iota {dimensions = array<i32: 0>} : vector<10x10x1xi32>
    %21 = vector.broadcast %0 : i32 to vector<10x10x1xi32>
    %22 = arith.addi %20, %21 : vector<10x10x1xi32>
    %23 = tpu.iota {dimensions = array<i32: 1>} : vector<10x10x1xi32>
    %c1_i32 = arith.constant 1 : i32
    %24 = vector.broadcast %c1_i32 : i32 to vector<10x10x1xi32>
    %25 = arith.cmpi sge, %22, %24 : vector<10x10x1xi32>
    %c8_i32_12 = arith.constant 8 : i32
    %26 = vector.broadcast %c8_i32_12 : i32 to vector<10x10x1xi32>
    %27 = arith.cmpi sle, %22, %26 : vector<10x10x1xi32>
    %28 = arith.andi %25, %27 : vector<10x10x1xi1>
    %c1_i32_13 = arith.constant 1 : i32
    %29 = vector.broadcast %c1_i32_13 : i32 to vector<10x10x1xi32>
    %30 = arith.cmpi sge, %23, %29 : vector<10x10x1xi32>
    %31 = arith.andi %28, %30 : vector<10x10x1xi1>
    %c8_i32_14 = arith.constant 8 : i32
    %32 = vector.broadcast %c8_i32_14 : i32 to vector<10x10x1xi32>
    %33 = arith.cmpi sle, %23, %32 : vector<10x10x1xi32>
    %34 = arith.andi %31, %33 : vector<10x10x1xi1>
    %35 = arith.extui %34 : vector<10x10x1xi1> to vector<10x10x1xi32>
    %36 = arith.sitofp %35 : vector<10x10x1xi32> to vector<10x10x1xf32>
    %37 = vector.broadcast %36 : vector<10x10x1xf32> to vector<10x10x8xf32>
    %38 = arith.mulf %19, %37 : vector<10x10x8xf32>
    %39 = arith.truncf %38 : vector<10x10x8xf32> to vector<10x10x8xbf16>
    %40 = vector.extract_strided_slice %7 {offsets = [0, 0, 0], sizes = [10, 8, 256], strides = [1, 1, 1]} : vector<10x10x256xbf16> to vector<10x8x256xbf16>
    %41 = vector.shape_cast %40 : vector<10x8x256xbf16> to vector<80x256xbf16>
    %42 = vector.extract_strided_slice %39 {offsets = [0, 0, 0], sizes = [10, 8, 8], strides = [1, 1, 1]} : vector<10x10x8xbf16> to vector<10x8x8xbf16>
    %43 = vector.shape_cast %42 : vector<10x8x8xbf16> to vector<80x8xbf16>
    %44 = vector.extract_strided_slice %41 {offsets = [0, 0], sizes = [64, 256], strides = [1, 1]} : vector<80x256xbf16> to vector<64x256xbf16>
    %c0_15 = arith.constant 0 : index
    %c0_16 = arith.constant 0 : index
    %c0_17 = arith.constant 0 : index
    %45 = vector.load %arg7[%c0_15, %c0_16, %c0_17] : memref<9x256x256xbf16, #tpu.memory_space<vmem>>, vector<1x256x256xbf16>
    %46 = vector.shape_cast %45 : vector<1x256x256xbf16> to vector<256x256xbf16>
    %cst_18 = arith.constant dense<0.000000e+00> : vector<64x256xf32>
    %47 = tpu.matmul %44, %46, %cst_18 {dimension_numbers = #tpu.dot_dimension_numbers<[1], [0], [0], [1], [0, 0, 1, 1], [], []>} : vector<64x256xbf16>, vector<256x256xbf16>, vector<64x256xf32> -> vector<64x256xf32>
    %48 = vector.extract_strided_slice %43 {offsets = [0, 0], sizes = [64, 8], strides = [1, 1]} : vector<80x8xbf16> to vector<64x8xbf16>
    %c0_19 = arith.constant 0 : index
    %c0_20 = arith.constant 0 : index
    %c0_21 = arith.constant 0 : index
    %49 = vector.load %arg8[%c0_19, %c0_20, %c0_21] : memref<9x8x256xbf16, #tpu.memory_space<vmem>>, vector<1x8x256xbf16>
    %50 = vector.shape_cast %49 : vector<1x8x256xbf16> to vector<8x256xbf16>
    %cst_22 = arith.constant dense<0.000000e+00> : vector<64x256xf32>
    %51 = tpu.matmul %48, %50, %cst_22 {dimension_numbers = #tpu.dot_dimension_numbers<[1], [0], [0], [1], [0, 0, 1, 1], [], []>} : vector<64x8xbf16>, vector<8x256xbf16>, vector<64x256xf32> -> vector<64x256xf32>
    %52 = arith.addf %47, %51 : vector<64x256xf32>
    %53 = vector.extract_strided_slice %41 {offsets = [8, 0], sizes = [64, 256], strides = [1, 1]} : vector<80x256xbf16> to vector<64x256xbf16>
    %c3 = arith.constant 3 : index
    %c0_23 = arith.constant 0 : index
    %c0_24 = arith.constant 0 : index
    %54 = vector.load %arg7[%c3, %c0_23, %c0_24] : memref<9x256x256xbf16, #tpu.memory_space<vmem>>, vector<1x256x256xbf16>
    %55 = vector.shape_cast %54 : vector<1x256x256xbf16> to vector<256x256xbf16>
    %cst_25 = arith.constant dense<0.000000e+00> : vector<64x256xf32>
    %56 = tpu.matmul %53, %55, %cst_25 {dimension_numbers = #tpu.dot_dimension_numbers<[1], [0], [0], [1], [0, 0, 1, 1], [], []>} : vector<64x256xbf16>, vector<256x256xbf16>, vector<64x256xf32> -> vector<64x256xf32>
    %57 = vector.extract_strided_slice %43 {offsets = [8, 0], sizes = [64, 8], strides = [1, 1]} : vector<80x8xbf16> to vector<64x8xbf16>
    %c3_26 = arith.constant 3 : index
    %c0_27 = arith.constant 0 : index
    %c0_28 = arith.constant 0 : index
    %58 = vector.load %arg8[%c3_26, %c0_27, %c0_28] : memref<9x8x256xbf16, #tpu.memory_space<vmem>>, vector<1x8x256xbf16>
    %59 = vector.shape_cast %58 : vector<1x8x256xbf16> to vector<8x256xbf16>
    %cst_29 = arith.constant dense<0.000000e+00> : vector<64x256xf32>
    %60 = tpu.matmul %57, %59, %cst_29 {dimension_numbers = #tpu.dot_dimension_numbers<[1], [0], [0], [1], [0, 0, 1, 1], [], []>} : vector<64x8xbf16>, vector<8x256xbf16>, vector<64x256xf32> -> vector<64x256xf32>
    %61 = arith.addf %56, %60 : vector<64x256xf32>
    %62 = arith.addf %52, %61 : vector<64x256xf32>
    %63 = vector.extract_strided_slice %41 {offsets = [16, 0], sizes = [64, 256], strides = [1, 1]} : vector<80x256xbf16> to vector<64x256xbf16>
    %c6 = arith.constant 6 : index
    %c0_30 = arith.constant 0 : index
    %c0_31 = arith.constant 0 : index
    %64 = vector.load %arg7[%c6, %c0_30, %c0_31] : memref<9x256x256xbf16, #tpu.memory_space<vmem>>, vector<1x256x256xbf16>
    %65 = vector.shape_cast %64 : vector<1x256x256xbf16> to vector<256x256xbf16>
    %cst_32 = arith.constant dense<0.000000e+00> : vector<64x256xf32>
    %66 = tpu.matmul %63, %65, %cst_32 {dimension_numbers = #tpu.dot_dimension_numbers<[1], [0], [0], [1], [0, 0, 1, 1], [], []>} : vector<64x256xbf16>, vector<256x256xbf16>, vector<64x256xf32> -> vector<64x256xf32>
    %67 = vector.extract_strided_slice %43 {offsets = [16, 0], sizes = [64, 8], strides = [1, 1]} : vector<80x8xbf16> to vector<64x8xbf16>
    %c6_33 = arith.constant 6 : index
    %c0_34 = arith.constant 0 : index
    %c0_35 = arith.constant 0 : index
    %68 = vector.load %arg8[%c6_33, %c0_34, %c0_35] : memref<9x8x256xbf16, #tpu.memory_space<vmem>>, vector<1x8x256xbf16>
    %69 = vector.shape_cast %68 : vector<1x8x256xbf16> to vector<8x256xbf16>
    %cst_36 = arith.constant dense<0.000000e+00> : vector<64x256xf32>
    %70 = tpu.matmul %67, %69, %cst_36 {dimension_numbers = #tpu.dot_dimension_numbers<[1], [0], [0], [1], [0, 0, 1, 1], [], []>} : vector<64x8xbf16>, vector<8x256xbf16>, vector<64x256xf32> -> vector<64x256xf32>
    %71 = arith.addf %66, %70 : vector<64x256xf32>
    %72 = arith.addf %62, %71 : vector<64x256xf32>
    %73 = vector.extract_strided_slice %7 {offsets = [0, 1, 0], sizes = [10, 8, 256], strides = [1, 1, 1]} : vector<10x10x256xbf16> to vector<10x8x256xbf16>
    %74 = vector.shape_cast %73 : vector<10x8x256xbf16> to vector<80x256xbf16>
    %75 = vector.extract_strided_slice %39 {offsets = [0, 1, 0], sizes = [10, 8, 8], strides = [1, 1, 1]} : vector<10x10x8xbf16> to vector<10x8x8xbf16>
    %76 = vector.shape_cast %75 : vector<10x8x8xbf16> to vector<80x8xbf16>
    %77 = vector.extract_strided_slice %74 {offsets = [0, 0], sizes = [64, 256], strides = [1, 1]} : vector<80x256xbf16> to vector<64x256xbf16>
    %c1 = arith.constant 1 : index
    %c0_37 = arith.constant 0 : index
    %c0_38 = arith.constant 0 : index
    %78 = vector.load %arg7[%c1, %c0_37, %c0_38] : memref<9x256x256xbf16, #tpu.memory_space<vmem>>, vector<1x256x256xbf16>
    %79 = vector.shape_cast %78 : vector<1x256x256xbf16> to vector<256x256xbf16>
    %cst_39 = arith.constant dense<0.000000e+00> : vector<64x256xf32>
    %80 = tpu.matmul %77, %79, %cst_39 {dimension_numbers = #tpu.dot_dimension_numbers<[1], [0], [0], [1], [0, 0, 1, 1], [], []>} : vector<64x256xbf16>, vector<256x256xbf16>, vector<64x256xf32> -> vector<64x256xf32>
    %81 = vector.extract_strided_slice %76 {offsets = [0, 0], sizes = [64, 8], strides = [1, 1]} : vector<80x8xbf16> to vector<64x8xbf16>
    %c1_40 = arith.constant 1 : index
    %c0_41 = arith.constant 0 : index
    %c0_42 = arith.constant 0 : index
    %82 = vector.load %arg8[%c1_40, %c0_41, %c0_42] : memref<9x8x256xbf16, #tpu.memory_space<vmem>>, vector<1x8x256xbf16>
    %83 = vector.shape_cast %82 : vector<1x8x256xbf16> to vector<8x256xbf16>
    %cst_43 = arith.constant dense<0.000000e+00> : vector<64x256xf32>
    %84 = tpu.matmul %81, %83, %cst_43 {dimension_numbers = #tpu.dot_dimension_numbers<[1], [0], [0], [1], [0, 0, 1, 1], [], []>} : vector<64x8xbf16>, vector<8x256xbf16>, vector<64x256xf32> -> vector<64x256xf32>
    %85 = arith.addf %80, %84 : vector<64x256xf32>
    %86 = arith.addf %72, %85 : vector<64x256xf32>
    %87 = vector.extract_strided_slice %74 {offsets = [8, 0], sizes = [64, 256], strides = [1, 1]} : vector<80x256xbf16> to vector<64x256xbf16>
    %c4 = arith.constant 4 : index
    %c0_44 = arith.constant 0 : index
    %c0_45 = arith.constant 0 : index
    %88 = vector.load %arg7[%c4, %c0_44, %c0_45] : memref<9x256x256xbf16, #tpu.memory_space<vmem>>, vector<1x256x256xbf16>
    %89 = vector.shape_cast %88 : vector<1x256x256xbf16> to vector<256x256xbf16>
    %cst_46 = arith.constant dense<0.000000e+00> : vector<64x256xf32>
    %90 = tpu.matmul %87, %89, %cst_46 {dimension_numbers = #tpu.dot_dimension_numbers<[1], [0], [0], [1], [0, 0, 1, 1], [], []>} : vector<64x256xbf16>, vector<256x256xbf16>, vector<64x256xf32> -> vector<64x256xf32>
    %91 = vector.extract_strided_slice %76 {offsets = [8, 0], sizes = [64, 8], strides = [1, 1]} : vector<80x8xbf16> to vector<64x8xbf16>
    %c4_47 = arith.constant 4 : index
    %c0_48 = arith.constant 0 : index
    %c0_49 = arith.constant 0 : index
    %92 = vector.load %arg8[%c4_47, %c0_48, %c0_49] : memref<9x8x256xbf16, #tpu.memory_space<vmem>>, vector<1x8x256xbf16>
    %93 = vector.shape_cast %92 : vector<1x8x256xbf16> to vector<8x256xbf16>
    %cst_50 = arith.constant dense<0.000000e+00> : vector<64x256xf32>
    %94 = tpu.matmul %91, %93, %cst_50 {dimension_numbers = #tpu.dot_dimension_numbers<[1], [0], [0], [1], [0, 0, 1, 1], [], []>} : vector<64x8xbf16>, vector<8x256xbf16>, vector<64x256xf32> -> vector<64x256xf32>
    %95 = arith.addf %90, %94 : vector<64x256xf32>
    %96 = arith.addf %86, %95 : vector<64x256xf32>
    %97 = vector.extract_strided_slice %74 {offsets = [16, 0], sizes = [64, 256], strides = [1, 1]} : vector<80x256xbf16> to vector<64x256xbf16>
    %c7 = arith.constant 7 : index
    %c0_51 = arith.constant 0 : index
    %c0_52 = arith.constant 0 : index
    %98 = vector.load %arg7[%c7, %c0_51, %c0_52] : memref<9x256x256xbf16, #tpu.memory_space<vmem>>, vector<1x256x256xbf16>
    %99 = vector.shape_cast %98 : vector<1x256x256xbf16> to vector<256x256xbf16>
    %cst_53 = arith.constant dense<0.000000e+00> : vector<64x256xf32>
    %100 = tpu.matmul %97, %99, %cst_53 {dimension_numbers = #tpu.dot_dimension_numbers<[1], [0], [0], [1], [0, 0, 1, 1], [], []>} : vector<64x256xbf16>, vector<256x256xbf16>, vector<64x256xf32> -> vector<64x256xf32>
    %101 = vector.extract_strided_slice %76 {offsets = [16, 0], sizes = [64, 8], strides = [1, 1]} : vector<80x8xbf16> to vector<64x8xbf16>
    %c7_54 = arith.constant 7 : index
    %c0_55 = arith.constant 0 : index
    %c0_56 = arith.constant 0 : index
    %102 = vector.load %arg8[%c7_54, %c0_55, %c0_56] : memref<9x8x256xbf16, #tpu.memory_space<vmem>>, vector<1x8x256xbf16>
    %103 = vector.shape_cast %102 : vector<1x8x256xbf16> to vector<8x256xbf16>
    %cst_57 = arith.constant dense<0.000000e+00> : vector<64x256xf32>
    %104 = tpu.matmul %101, %103, %cst_57 {dimension_numbers = #tpu.dot_dimension_numbers<[1], [0], [0], [1], [0, 0, 1, 1], [], []>} : vector<64x8xbf16>, vector<8x256xbf16>, vector<64x256xf32> -> vector<64x256xf32>
    %105 = arith.addf %100, %104 : vector<64x256xf32>
    %106 = arith.addf %96, %105 : vector<64x256xf32>
    %107 = vector.extract_strided_slice %7 {offsets = [0, 2, 0], sizes = [10, 8, 256], strides = [1, 1, 1]} : vector<10x10x256xbf16> to vector<10x8x256xbf16>
    %108 = vector.shape_cast %107 : vector<10x8x256xbf16> to vector<80x256xbf16>
    %109 = vector.extract_strided_slice %39 {offsets = [0, 2, 0], sizes = [10, 8, 8], strides = [1, 1, 1]} : vector<10x10x8xbf16> to vector<10x8x8xbf16>
    %110 = vector.shape_cast %109 : vector<10x8x8xbf16> to vector<80x8xbf16>
    %111 = vector.extract_strided_slice %108 {offsets = [0, 0], sizes = [64, 256], strides = [1, 1]} : vector<80x256xbf16> to vector<64x256xbf16>
    %c2 = arith.constant 2 : index
    %c0_58 = arith.constant 0 : index
    %c0_59 = arith.constant 0 : index
    %112 = vector.load %arg7[%c2, %c0_58, %c0_59] : memref<9x256x256xbf16, #tpu.memory_space<vmem>>, vector<1x256x256xbf16>
    %113 = vector.shape_cast %112 : vector<1x256x256xbf16> to vector<256x256xbf16>
    %cst_60 = arith.constant dense<0.000000e+00> : vector<64x256xf32>
    %114 = tpu.matmul %111, %113, %cst_60 {dimension_numbers = #tpu.dot_dimension_numbers<[1], [0], [0], [1], [0, 0, 1, 1], [], []>} : vector<64x256xbf16>, vector<256x256xbf16>, vector<64x256xf32> -> vector<64x256xf32>
    %115 = vector.extract_strided_slice %110 {offsets = [0, 0], sizes = [64, 8], strides = [1, 1]} : vector<80x8xbf16> to vector<64x8xbf16>
    %c2_61 = arith.constant 2 : index
    %c0_62 = arith.constant 0 : index
    %c0_63 = arith.constant 0 : index
    %116 = vector.load %arg8[%c2_61, %c0_62, %c0_63] : memref<9x8x256xbf16, #tpu.memory_space<vmem>>, vector<1x8x256xbf16>
    %117 = vector.shape_cast %116 : vector<1x8x256xbf16> to vector<8x256xbf16>
    %cst_64 = arith.constant dense<0.000000e+00> : vector<64x256xf32>
    %118 = tpu.matmul %115, %117, %cst_64 {dimension_numbers = #tpu.dot_dimension_numbers<[1], [0], [0], [1], [0, 0, 1, 1], [], []>} : vector<64x8xbf16>, vector<8x256xbf16>, vector<64x256xf32> -> vector<64x256xf32>
    %119 = arith.addf %114, %118 : vector<64x256xf32>
    %120 = arith.addf %106, %119 : vector<64x256xf32>
    %121 = vector.extract_strided_slice %108 {offsets = [8, 0], sizes = [64, 256], strides = [1, 1]} : vector<80x256xbf16> to vector<64x256xbf16>
    %c5 = arith.constant 5 : index
    %c0_65 = arith.constant 0 : index
    %c0_66 = arith.constant 0 : index
    %122 = vector.load %arg7[%c5, %c0_65, %c0_66] : memref<9x256x256xbf16, #tpu.memory_space<vmem>>, vector<1x256x256xbf16>
    %123 = vector.shape_cast %122 : vector<1x256x256xbf16> to vector<256x256xbf16>
    %cst_67 = arith.constant dense<0.000000e+00> : vector<64x256xf32>
    %124 = tpu.matmul %121, %123, %cst_67 {dimension_numbers = #tpu.dot_dimension_numbers<[1], [0], [0], [1], [0, 0, 1, 1], [], []>} : vector<64x256xbf16>, vector<256x256xbf16>, vector<64x256xf32> -> vector<64x256xf32>
    %125 = vector.extract_strided_slice %110 {offsets = [8, 0], sizes = [64, 8], strides = [1, 1]} : vector<80x8xbf16> to vector<64x8xbf16>
    %c5_68 = arith.constant 5 : index
    %c0_69 = arith.constant 0 : index
    %c0_70 = arith.constant 0 : index
    %126 = vector.load %arg8[%c5_68, %c0_69, %c0_70] : memref<9x8x256xbf16, #tpu.memory_space<vmem>>, vector<1x8x256xbf16>
    %127 = vector.shape_cast %126 : vector<1x8x256xbf16> to vector<8x256xbf16>
    %cst_71 = arith.constant dense<0.000000e+00> : vector<64x256xf32>
    %128 = tpu.matmul %125, %127, %cst_71 {dimension_numbers = #tpu.dot_dimension_numbers<[1], [0], [0], [1], [0, 0, 1, 1], [], []>} : vector<64x8xbf16>, vector<8x256xbf16>, vector<64x256xf32> -> vector<64x256xf32>
    %129 = arith.addf %124, %128 : vector<64x256xf32>
    %130 = arith.addf %120, %129 : vector<64x256xf32>
    %131 = vector.extract_strided_slice %108 {offsets = [16, 0], sizes = [64, 256], strides = [1, 1]} : vector<80x256xbf16> to vector<64x256xbf16>
    %c8 = arith.constant 8 : index
    %c0_72 = arith.constant 0 : index
    %c0_73 = arith.constant 0 : index
    %132 = vector.load %arg7[%c8, %c0_72, %c0_73] : memref<9x256x256xbf16, #tpu.memory_space<vmem>>, vector<1x256x256xbf16>
    %133 = vector.shape_cast %132 : vector<1x256x256xbf16> to vector<256x256xbf16>
    %cst_74 = arith.constant dense<0.000000e+00> : vector<64x256xf32>
    %134 = tpu.matmul %131, %133, %cst_74 {dimension_numbers = #tpu.dot_dimension_numbers<[1], [0], [0], [1], [0, 0, 1, 1], [], []>} : vector<64x256xbf16>, vector<256x256xbf16>, vector<64x256xf32> -> vector<64x256xf32>
    %135 = vector.extract_strided_slice %110 {offsets = [16, 0], sizes = [64, 8], strides = [1, 1]} : vector<80x8xbf16> to vector<64x8xbf16>
    %c8_75 = arith.constant 8 : index
    %c0_76 = arith.constant 0 : index
    %c0_77 = arith.constant 0 : index
    %136 = vector.load %arg8[%c8_75, %c0_76, %c0_77] : memref<9x8x256xbf16, #tpu.memory_space<vmem>>, vector<1x8x256xbf16>
    %137 = vector.shape_cast %136 : vector<1x8x256xbf16> to vector<8x256xbf16>
    %cst_78 = arith.constant dense<0.000000e+00> : vector<64x256xf32>
    %138 = tpu.matmul %135, %137, %cst_78 {dimension_numbers = #tpu.dot_dimension_numbers<[1], [0], [0], [1], [0, 0, 1, 1], [], []>} : vector<64x8xbf16>, vector<8x256xbf16>, vector<64x256xf32> -> vector<64x256xf32>
    %139 = arith.addf %134, %138 : vector<64x256xf32>
    %140 = arith.addf %130, %139 : vector<64x256xf32>
    %c0_79 = arith.constant 0 : index
    %c0_80 = arith.constant 0 : index
    %141 = vector.load %arg9[%c0_79, %c0_80] : memref<1x256xf32, #tpu.memory_space<vmem>>, vector<1x256xf32>
    %142 = vector.broadcast %141 : vector<1x256xf32> to vector<64x256xf32>
    %143 = arith.addf %140, %142 : vector<64x256xf32>
    %cst_81 = arith.constant 0.000000e+00 : f32
    %144 = vector.broadcast %cst_81 : f32 to vector<64x256xf32>
    %145 = arith.maximumf %143, %144 : vector<64x256xf32>
    %146 = vector.shape_cast %145 : vector<64x256xf32> to vector<8x8x256xf32>
    %147 = arith.truncf %146 : vector<8x8x256xf32> to vector<8x8x256xbf16>
    %c0_82 = arith.constant 0 : index
    %c0_83 = arith.constant 0 : index
    %c0_84 = arith.constant 0 : index
    %c0_85 = arith.constant 0 : index
    %148 = vector.load %arg10[%c0_82, %c0_83, %c0_84, %c0_85] : memref<1x8x8x256xbf16, #tpu.memory_space<vmem>>, vector<1x8x8x256xbf16>
    %149 = vector.shape_cast %148 : vector<1x8x8x256xbf16> to vector<8x8x256xbf16>
    %150 = vector.shape_cast %147 : vector<8x8x256xbf16> to vector<1x8x8x256xbf16>
    tpu.vector_store %arg10[%c0_82, %c0_83, %c0_84, %c0_85], %150 {strides = array<i32>} : memref<1x8x8x256xbf16, #tpu.memory_space<vmem>>, vector<1x8x8x256xbf16>,
    return
  }
  func.func @transform_0(%arg0: i32, %arg1: i32) -> (i32, i32, i32) {
    %c0_i32 = arith.constant 0 : i32
    %c0_i32_0 = arith.constant 0 : i32
    %c0_i32_1 = arith.constant 0 : i32
    return %arg0, %c0_i32, %c0_i32_0 : i32, i32, i32
  }
  func.func @transform_1(%arg0: i32, %arg1: i32) -> (i32, i32, i32, i32) {
    %c0_i32 = arith.constant 0 : i32
    %c0_i32_0 = arith.constant 0 : i32
    %c0_i32_1 = arith.constant 0 : i32
    %c0_i32_2 = arith.constant 0 : i32
    return %arg0, %c0_i32, %c0_i32_0, %c0_i32_1 : i32, i32, i32, i32
  }
  func.func @transform_2(%arg0: i32, %arg1: i32) -> (i32, i32) {
    %c0_i32 = arith.constant 0 : i32
    %c0_i32_0 = arith.constant 0 : i32
    %c0_i32_1 = arith.constant 0 : i32
    return %c0_i32, %c0_i32_0 : i32, i32
  }
  func.func @transform_3(%arg0: i32, %arg1: i32) -> (i32, i32) {
    %c0_i32 = arith.constant 0 : i32
    %c0_i32_0 = arith.constant 0 : i32
    %c0_i32_1 = arith.constant 0 : i32
    return %c0_i32, %c0_i32_0 : i32, i32
  }
  func.func @transform_4(%arg0: i32, %arg1: i32) -> (i32, i32) {
    %c0_i32 = arith.constant 0 : i32
    %c0_i32_0 = arith.constant 0 : i32
    %c0_i32_1 = arith.constant 0 : i32
    return %c0_i32, %c0_i32_0 : i32, i32
  }
  func.func @transform_5(%arg0: i32, %arg1: i32) -> (i32, i32, i32) {
    %c0_i32 = arith.constant 0 : i32
    %c0_i32_0 = arith.constant 0 : i32
    %c0_i32_1 = arith.constant 0 : i32
    %c0_i32_2 = arith.constant 0 : i32
    return %c0_i32, %c0_i32_0, %c0_i32_1 : i32, i32, i32
  }
  func.func @transform_6(%arg0: i32, %arg1: i32) -> (i32, i32, i32) {
    %c0_i32 = arith.constant 0 : i32
    %c0_i32_0 = arith.constant 0 : i32
    %c0_i32_1 = arith.constant 0 : i32
    %c0_i32_2 = arith.constant 0 : i32
    return %c0_i32, %c0_i32_0, %c0_i32_1 : i32, i32, i32
  }
  func.func @transform_7(%arg0: i32, %arg1: i32) -> (i32, i32) {
    %c0_i32 = arith.constant 0 : i32
    %c0_i32_0 = arith.constant 0 : i32
    %c0_i32_1 = arith.constant 0 : i32
    return %c0_i32, %c0_i32_0 : i32, i32
  }
  func.func @transform_8(%arg0: i32, %arg1: i32) -> (i32, i32, i32, i32) {
    %c0_i32 = arith.constant 0 : i32
    %c0_i32_0 = arith.constant 0 : i32
    %c0_i32_1 = arith.constant 0 : i32
    return %arg0, %arg1, %c0_i32, %c0_i32_0 : i32, i32, i32, i32
  }
}

module attributes {stable_mosaic.version = 11 : i64} {
  func.func @kernel(%arg0: i32, %arg1: i32, %arg2: memref<1x5x8x8xf32, #tpu.memory_space<vmem>>, %arg3: memref<32x8xf32, #tpu.memory_space<vmem>>, %arg4: memref<8x32xf32, #tpu.memory_space<vmem>>, %arg5: memref<1x5x32x32xf32, #tpu.memory_space<vmem>>) attributes {dimension_semantics = [#tpu.dimension_semantics<parallel>, #tpu.dimension_semantics<parallel>], iteration_bounds = array<i64: 2, 1>, scalar_prefetch = 0 : i64, scratch_operands = 0 : i64, tpu.core_type = #tpu.core_type<tc>, window_params = [{transform_indices = @transform_0, window_bounds = array<i64: 1, 5, 8, 8>}, {transform_indices = @transform_1, window_bounds = array<i64: 32, 8>}, {pipeline_mode = #tpu.pipeline_mode<synchronous>, transform_indices = @transform_2, window_bounds = array<i64: 8, 32>}, {transform_indices = @transform_3, window_bounds = array<i64: 1, 5, 32, 32>}]} {
    %c0 = arith.constant 0 : index
    %c0_0 = arith.constant 0 : index
    %0 = vector.load %arg3[%c0, %c0_0] : memref<32x8xf32, #tpu.memory_space<vmem>>, vector<32x8xf32>
    %1 = arith.truncf %0 : vector<32x8xf32> to vector<32x8xbf16>
    %c0_1 = arith.constant 0 : index
    %c0_2 = arith.constant 0 : index
    %2 = vector.load %arg4[%c0_1, %c0_2] : memref<8x32xf32, #tpu.memory_space<vmem>>, vector<8x32xf32>
    %3 = arith.truncf %2 : vector<8x32xf32> to vector<8x32xbf16>
    %c0_3 = arith.constant 0 : index
    %c0_4 = arith.constant 0 : index
    %c0_5 = arith.constant 0 : index
    %c0_6 = arith.constant 0 : index
    %4 = vector.load %arg2[%c0_3, %c0_4, %c0_5, %c0_6] : memref<1x5x8x8xf32, #tpu.memory_space<vmem>>, vector<1x1x8x8xf32>
    %5 = vector.shape_cast %4 : vector<1x1x8x8xf32> to vector<8x8xf32>
    %6 = arith.truncf %5 : vector<8x8xf32> to vector<8x8xbf16>
    %cst = arith.constant dense<0.000000e+00> : vector<32x8xf32>
    %7 = tpu.matmul %1, %6, %cst {dimension_numbers = #tpu.dot_dimension_numbers<[1], [0], [0], [1], [0, 0, 1, 1], [], []>} : vector<32x8xbf16>, vector<8x8xbf16>, vector<32x8xf32> -> vector<32x8xf32>
    %8 = arith.truncf %7 : vector<32x8xf32> to vector<32x8xbf16>
    %cst_7 = arith.constant dense<0.000000e+00> : vector<32x32xf32>
    %9 = tpu.matmul %8, %3, %cst_7 {dimension_numbers = #tpu.dot_dimension_numbers<[1], [0], [0], [1], [0, 0, 1, 1], [], []>} : vector<32x8xbf16>, vector<8x32xbf16>, vector<32x32xf32> -> vector<32x32xf32>
    %c0_8 = arith.constant 0 : index
    %c0_9 = arith.constant 0 : index
    %c0_10 = arith.constant 0 : index
    %c0_11 = arith.constant 0 : index
    %10 = vector.load %arg5[%c0_8, %c0_9, %c0_10, %c0_11] : memref<1x5x32x32xf32, #tpu.memory_space<vmem>>, vector<1x1x32x32xf32>
    %11 = vector.shape_cast %10 : vector<1x1x32x32xf32> to vector<32x32xf32>
    %12 = vector.shape_cast %9 : vector<32x32xf32> to vector<1x1x32x32xf32>
    tpu.vector_store %arg5[%c0_8, %c0_9, %c0_10, %c0_11], %12 {strides = array<i32>} : memref<1x5x32x32xf32, #tpu.memory_space<vmem>>, vector<1x1x32x32xf32>,
    %c0_12 = arith.constant 0 : index
    %c1 = arith.constant 1 : index
    %c0_13 = arith.constant 0 : index
    %c0_14 = arith.constant 0 : index
    %13 = vector.load %arg2[%c0_12, %c1, %c0_13, %c0_14] : memref<1x5x8x8xf32, #tpu.memory_space<vmem>>, vector<1x1x8x8xf32>
    %14 = vector.shape_cast %13 : vector<1x1x8x8xf32> to vector<8x8xf32>
    %15 = arith.truncf %14 : vector<8x8xf32> to vector<8x8xbf16>
    %cst_15 = arith.constant dense<0.000000e+00> : vector<32x8xf32>
    %16 = tpu.matmul %1, %15, %cst_15 {dimension_numbers = #tpu.dot_dimension_numbers<[1], [0], [0], [1], [0, 0, 1, 1], [], []>} : vector<32x8xbf16>, vector<8x8xbf16>, vector<32x8xf32> -> vector<32x8xf32>
    %17 = arith.truncf %16 : vector<32x8xf32> to vector<32x8xbf16>
    %cst_16 = arith.constant dense<0.000000e+00> : vector<32x32xf32>
    %18 = tpu.matmul %17, %3, %cst_16 {dimension_numbers = #tpu.dot_dimension_numbers<[1], [0], [0], [1], [0, 0, 1, 1], [], []>} : vector<32x8xbf16>, vector<8x32xbf16>, vector<32x32xf32> -> vector<32x32xf32>
    %c0_17 = arith.constant 0 : index
    %c1_18 = arith.constant 1 : index
    %c0_19 = arith.constant 0 : index
    %c0_20 = arith.constant 0 : index
    %19 = vector.load %arg5[%c0_17, %c1_18, %c0_19, %c0_20] : memref<1x5x32x32xf32, #tpu.memory_space<vmem>>, vector<1x1x32x32xf32>
    %20 = vector.shape_cast %19 : vector<1x1x32x32xf32> to vector<32x32xf32>
    %21 = vector.shape_cast %18 : vector<32x32xf32> to vector<1x1x32x32xf32>
    tpu.vector_store %arg5[%c0_17, %c1_18, %c0_19, %c0_20], %21 {strides = array<i32>} : memref<1x5x32x32xf32, #tpu.memory_space<vmem>>, vector<1x1x32x32xf32>,
    %c0_21 = arith.constant 0 : index
    %c2 = arith.constant 2 : index
    %c0_22 = arith.constant 0 : index
    %c0_23 = arith.constant 0 : index
    %22 = vector.load %arg2[%c0_21, %c2, %c0_22, %c0_23] : memref<1x5x8x8xf32, #tpu.memory_space<vmem>>, vector<1x1x8x8xf32>
    %23 = vector.shape_cast %22 : vector<1x1x8x8xf32> to vector<8x8xf32>
    %24 = arith.truncf %23 : vector<8x8xf32> to vector<8x8xbf16>
    %cst_24 = arith.constant dense<0.000000e+00> : vector<32x8xf32>
    %25 = tpu.matmul %1, %24, %cst_24 {dimension_numbers = #tpu.dot_dimension_numbers<[1], [0], [0], [1], [0, 0, 1, 1], [], []>} : vector<32x8xbf16>, vector<8x8xbf16>, vector<32x8xf32> -> vector<32x8xf32>
    %26 = arith.truncf %25 : vector<32x8xf32> to vector<32x8xbf16>
    %cst_25 = arith.constant dense<0.000000e+00> : vector<32x32xf32>
    %27 = tpu.matmul %26, %3, %cst_25 {dimension_numbers = #tpu.dot_dimension_numbers<[1], [0], [0], [1], [0, 0, 1, 1], [], []>} : vector<32x8xbf16>, vector<8x32xbf16>, vector<32x32xf32> -> vector<32x32xf32>
    %c0_26 = arith.constant 0 : index
    %c2_27 = arith.constant 2 : index
    %c0_28 = arith.constant 0 : index
    %c0_29 = arith.constant 0 : index
    %28 = vector.load %arg5[%c0_26, %c2_27, %c0_28, %c0_29] : memref<1x5x32x32xf32, #tpu.memory_space<vmem>>, vector<1x1x32x32xf32>
    %29 = vector.shape_cast %28 : vector<1x1x32x32xf32> to vector<32x32xf32>
    %30 = vector.shape_cast %27 : vector<32x32xf32> to vector<1x1x32x32xf32>
    tpu.vector_store %arg5[%c0_26, %c2_27, %c0_28, %c0_29], %30 {strides = array<i32>} : memref<1x5x32x32xf32, #tpu.memory_space<vmem>>, vector<1x1x32x32xf32>,
    %c0_30 = arith.constant 0 : index
    %c3 = arith.constant 3 : index
    %c0_31 = arith.constant 0 : index
    %c0_32 = arith.constant 0 : index
    %31 = vector.load %arg2[%c0_30, %c3, %c0_31, %c0_32] : memref<1x5x8x8xf32, #tpu.memory_space<vmem>>, vector<1x1x8x8xf32>
    %32 = vector.shape_cast %31 : vector<1x1x8x8xf32> to vector<8x8xf32>
    %33 = arith.truncf %32 : vector<8x8xf32> to vector<8x8xbf16>
    %cst_33 = arith.constant dense<0.000000e+00> : vector<32x8xf32>
    %34 = tpu.matmul %1, %33, %cst_33 {dimension_numbers = #tpu.dot_dimension_numbers<[1], [0], [0], [1], [0, 0, 1, 1], [], []>} : vector<32x8xbf16>, vector<8x8xbf16>, vector<32x8xf32> -> vector<32x8xf32>
    %35 = arith.truncf %34 : vector<32x8xf32> to vector<32x8xbf16>
    %cst_34 = arith.constant dense<0.000000e+00> : vector<32x32xf32>
    %36 = tpu.matmul %35, %3, %cst_34 {dimension_numbers = #tpu.dot_dimension_numbers<[1], [0], [0], [1], [0, 0, 1, 1], [], []>} : vector<32x8xbf16>, vector<8x32xbf16>, vector<32x32xf32> -> vector<32x32xf32>
    %c0_35 = arith.constant 0 : index
    %c3_36 = arith.constant 3 : index
    %c0_37 = arith.constant 0 : index
    %c0_38 = arith.constant 0 : index
    %37 = vector.load %arg5[%c0_35, %c3_36, %c0_37, %c0_38] : memref<1x5x32x32xf32, #tpu.memory_space<vmem>>, vector<1x1x32x32xf32>
    %38 = vector.shape_cast %37 : vector<1x1x32x32xf32> to vector<32x32xf32>
    %39 = vector.shape_cast %36 : vector<32x32xf32> to vector<1x1x32x32xf32>
    tpu.vector_store %arg5[%c0_35, %c3_36, %c0_37, %c0_38], %39 {strides = array<i32>} : memref<1x5x32x32xf32, #tpu.memory_space<vmem>>, vector<1x1x32x32xf32>,
    %c0_39 = arith.constant 0 : index
    %c4 = arith.constant 4 : index
    %c0_40 = arith.constant 0 : index
    %c0_41 = arith.constant 0 : index
    %40 = vector.load %arg2[%c0_39, %c4, %c0_40, %c0_41] : memref<1x5x8x8xf32, #tpu.memory_space<vmem>>, vector<1x1x8x8xf32>
    %41 = vector.shape_cast %40 : vector<1x1x8x8xf32> to vector<8x8xf32>
    %42 = arith.truncf %41 : vector<8x8xf32> to vector<8x8xbf16>
    %cst_42 = arith.constant dense<0.000000e+00> : vector<32x8xf32>
    %43 = tpu.matmul %1, %42, %cst_42 {dimension_numbers = #tpu.dot_dimension_numbers<[1], [0], [0], [1], [0, 0, 1, 1], [], []>} : vector<32x8xbf16>, vector<8x8xbf16>, vector<32x8xf32> -> vector<32x8xf32>
    %44 = arith.truncf %43 : vector<32x8xf32> to vector<32x8xbf16>
    %cst_43 = arith.constant dense<0.000000e+00> : vector<32x32xf32>
    %45 = tpu.matmul %44, %3, %cst_43 {dimension_numbers = #tpu.dot_dimension_numbers<[1], [0], [0], [1], [0, 0, 1, 1], [], []>} : vector<32x8xbf16>, vector<8x32xbf16>, vector<32x32xf32> -> vector<32x32xf32>
    %c0_44 = arith.constant 0 : index
    %c4_45 = arith.constant 4 : index
    %c0_46 = arith.constant 0 : index
    %c0_47 = arith.constant 0 : index
    %46 = vector.load %arg5[%c0_44, %c4_45, %c0_46, %c0_47] : memref<1x5x32x32xf32, #tpu.memory_space<vmem>>, vector<1x1x32x32xf32>
    %47 = vector.shape_cast %46 : vector<1x1x32x32xf32> to vector<32x32xf32>
    %48 = vector.shape_cast %45 : vector<32x32xf32> to vector<1x1x32x32xf32>
    tpu.vector_store %arg5[%c0_44, %c4_45, %c0_46, %c0_47], %48 {strides = array<i32>} : memref<1x5x32x32xf32, #tpu.memory_space<vmem>>, vector<1x1x32x32xf32>,
    return
  }
  func.func @transform_0(%arg0: i32, %arg1: i32) -> (i32, i32, i32, i32) {
    %c0_i32 = arith.constant 0 : i32
    %c0_i32_0 = arith.constant 0 : i32
    %c0_i32_1 = arith.constant 0 : i32
    %c0_i32_2 = arith.constant 0 : i32
    return %arg0, %c0_i32, %c0_i32_0, %c0_i32_1 : i32, i32, i32, i32
  }
  func.func @transform_1(%arg0: i32, %arg1: i32) -> (i32, i32) {
    %c0_i32 = arith.constant 0 : i32
    %c0_i32_0 = arith.constant 0 : i32
    return %arg1, %c0_i32 : i32, i32
  }
  func.func @transform_2(%arg0: i32, %arg1: i32) -> (i32, i32) {
    %c0_i32 = arith.constant 0 : i32
    %c0_i32_0 = arith.constant 0 : i32
    %c0_i32_1 = arith.constant 0 : i32
    return %c0_i32, %c0_i32_0 : i32, i32
  }
  func.func @transform_3(%arg0: i32, %arg1: i32) -> (i32, i32, i32, i32) {
    %c0_i32 = arith.constant 0 : i32
    %c0_i32_0 = arith.constant 0 : i32
    %c0_i32_1 = arith.constant 0 : i32
    return %arg0, %c0_i32, %arg1, %c0_i32_0 : i32, i32, i32, i32
  }
}

</mosaic_0001>

<bundles_post_ra>
// kernel: efficient_deeplab_forward.5
= control target key start
LH: loop header
LB: loop body
LE: loop exit
PB: predicated region body
PF: predicated region fallthrough
CT: control target
= control target key end

     0   :  { %8 = vsyncpa [#allocation3], 0  ;;  %s1015_s0 = inlined_call_operand.vmem [shape: f32[2,5,8,8], index: 0, kind: input, shape index: {}]   ;;  %s1016_s1 = inlined_call_operand.vmem [shape: f32[32,8], index: 1, kind: input, shape index: {}]   ;;  %s1017_s2 = inlined_call_operand.vmem [shape: f32[8,32], index: 2, kind: input, shape index: {}]   ;;  %s1018_s3 = inlined_call_operand.hbm [shape: f32[2,5,32,32], index: 3, kind: output, shape index: {}]  }
   0x1   :  { %10 = vsyncpa [#allocation3 + $0x1], 0  ;;  %s830_s12 = smov 0   ;;  %s832_s13 = smov 0  }
   0x2   :  { %s834_s14 = smov 0   ;;  %s836_s15 = smov 0  }
   0x3   :  { %s838_s16 = smov 0   ;;  %s840_s17 = smov 0  }
   0x4 LB: > { %s616_s18 = sadd.s32 4294967295, %s806_s17   ;;  %s617_s19 = sadd.s32 4294967294, %s806_s17   ;;  %s806_s17 = sphi %s840_s17, %s16_s17   ;;  %s802_s16 = sphi %s838_s16, %s1025_s16   ;;  %s798_s15 = sphi %s836_s15, %s1024_s15   ;;  %s794_s14 = sphi %s834_s14, %s1023_s14   ;;  %s790_s13 = sphi %s832_s13, %s1022_s13   ;;  %s786_s12 = sphi %s830_s12, %s1021_s12  }
   0x5   : > { %s28_s20 = sadd.s32 1, %s802_s16  ;;  %s110_s21 = sadd.s32 1, %s794_s14 }
   0x6   : > { %p30_p0 = scmp.ge.s32.totalorder %s28_s20, 2  ;;  %p120_p1 = scmp.ne.s32.totalorder %s794_s14, %s790_s13 }
   0x7   : > { %p121_p2 = scmp.eq.s32.totalorder %s616_s18, 1  ;;  %p126_p3 = scmp.ne.s32.totalorder %s790_s13, %s786_s12 }
   0x8   : > { %s1027_s20 = smov (%p30_p0, %s28_s20), 0  ;;  %p127_p5 = scmp.eq.s32.totalorder %s617_s19, 1 }
   0x9   : > { %p870_p4 = por %p121_p2, %p120_p1  ;;  %s105_s23 = ssub.s32 %s802_s16, %s1027_s20 }
   0xa   : > { %p621_p6 = scmp.ge.s32.totalorder %s806_s17, 1  ;;  %p108_p7 = scmp.eq.s32.totalorder %s105_s23, 0 }
   0xb   : > { %p877_p8 = por %p127_p5, %p126_p3  ;;  %p165_p9 = scmp.lt.s32.totalorder %s806_s17, 3 }
   0xc   : > { %s883_s25 = scalar_select %p108_p7, %s794_s14, %s110_s21  }
   0xd   : > { %p166_p10 = pnand %p621_p6, %p165_p9 }
   0xe   : > { %p194_p11 = scmp.lt.s32.totalorder (!%p166_p10), %s798_s15, 1  ;;  %s191_s21 = sand.u32 (!%p166_p10), 1, %s790_s13  }
   0xf   : > { %169 = sbr.rel (%p166_p10) target bundleno = 382 (0x17e), region = 32  ;;  %s511_s6 = scalar_lea.sflag (!%p166_p10), [#allocation3], %s191_s21 }
  0x10   : > { %s668_s23 = smul.u32 (!%p166_p10), 160, %s191_s21  ;;  %s748_s10 = scalar_lea.hbm (!%p166_p10), %s1018_s3, 320 }
  0x14   : > { %s195_s26 = scalar_select %p194_p11, %s798_s15, 1  ;;  %v207_v0 = vld [vmem:[%s1016_s1] sm:$0xff]  ;;  %v208_v1 = vld [vmem:[%s1016_s1 + $0x8] sm:$0xff]  ;;  %v209_v2 = vld [vmem:[%s1016_s1 + $0x10] sm:$0xff]  ;;  %vm224_vm0 = vcmask 1043456   ;;  %vm217_vm1 = vcmask 64512  }
  0x15   : > { %v210_v3 = vld [vmem:[%s1016_s1 + $0x18] sm:$0xff]  ;;  %v211_v12 = vpack.c.bf16 %v208_v1, %v207_v0  ;;  %v213_v21 = vld [vmem:[%s1017_s2] sm:$0xff]  ;;  %vm277_vm2 = vcmask 261120  }
  0x16   : > { %s669_s27 = smul.u32 40, %s195_s26  ;;  %v212_v16 = vpack.c.bf16 %v210_v3, %v209_v2  ;;  %v214_v22 = vpack.c.bf16 %v213_v21, %v213_v21  ;;  %s934_s26 = scalar_lea.vmem [#allocation2], %s668_s23 }
  0x17   : > { %s525_s4 = sshll.u32 %s934_s26, 4  ;;  %s526_s4 = int_to_ptr.vmem [resolvable:$true] %s525_s4 }
  0x18   : > { %s198_s5 = scalar_lea.vmem %s1015_s0, %s669_s27  ;;  %v256_v23 = vsel %vm224_vm0, %v214_v22, 0  ;;  %s670_s27 = smul.u32 160, %s798_s15 }
  0x19   : > { %v215_v4 = vld [vmem:[%s198_s5] sm:$0xff]  ;;  %v627_v5 = vld [vmem:[%s198_s5 + $0x8] sm:$0xff]  ;;  %v636_v6 = vld [vmem:[%s198_s5 + $0x10] sm:$0xff]  ;;  %265 = vmatpush.bf16.msra.mxu1 %v256_v23  ;;  %667 = vmatpush.bf16.msra.mxu3 %v256_v23 }
  0x1a   : > { %v216_v7 = vpack.c.bf16 %v215_v4, %v215_v4  ;;  %v284_v8 = vpack.c.bf16 %v627_v5, %v627_v5  ;;  %v341_v9 = vpack.c.bf16 %v636_v6, %v636_v6  ;;  %v645_v10 = vld [vmem:[%s198_s5 + $0x18] sm:$0xff]  ;;  %v654_v11 = vld [vmem:[%s198_s5 + $0x20] sm:$0xff]  ;;  %s524_s30 = scalar_lea.hbm %s1018_s3, %s670_s27 }
  0x1b   : > { %v398_v13 = vpack.c.bf16 %v645_v10, %v645_v10  ;;  %v455_v14 = vpack.c.bf16 %v654_v11, %v654_v11  ;;  %s527_s5 = sshll.u32 %s524_s30, 4  ;;  %s528_s5 = int_to_ptr.hbm [resolvable:$true] %s527_s5 }
  0x1c   : > { %v226_v15 = vsel %vm224_vm0, %v216_v7, 0  ;;  %v286_v17 = vsel %vm224_vm0, %v284_v8, 0  ;;  %v343_v18 = vsel %vm224_vm0, %v341_v9, 0  ;;  %s742_s15 = sshra.s32 %s528_s5, 4  ;;  %s743_s15 = int_to_ptr.hbm [resolvable:$true] %s742_s15 }
  0x1d   : > { %235 = vmatpush.bf16.msra.mxu0 %v226_v15  ;;  %666 = vmatpush.bf16.msra.mxu2 %v226_v15  ;;  %v400_v19 = vsel %vm224_vm0, %v398_v13, 0  ;;  %v457_v20 = vsel %vm224_vm0, %v455_v14, 0  ;;  %s744_s7 = scalar_lea.hbm %s743_s15, 160  ;;  %p749_p1 = scmp.lt.s32.totalorder %s743_s15, %s1018_s3 }
  0x1e   : > { %322 = vmatpush.bf16.msrb.mxu3 %v256_v23  ;;  %379 = vmatpush.bf16.msrb.mxu1 %v256_v23  ;;  %p745_p12 = scmp.ne.s32.totalorder %s743_s15, %s744_s7  ;;  %p750_p2 = scmp.lt.s32.totalorder %s748_s10, %s744_s7 }
  0x20   : > { %623 = vmatmul.msk.bf16.vlgmr.msra.gmra.mxu0 %vm217_vm1, %v211_v12  ;;  %624 = vmatmul.msk.bf16.vlgmr.msra.gmra.mxu2 %vm217_vm1, %v212_v16  ;;  %p746_p13 = pnand %p745_p12, %p870_p4  ;;  %p751_p3 = por %p750_p2, %p749_p1 }
  0x21   : > { %295 = vmatpush.bf16.msrb.mxu2 %v286_v17  ;;  %352 = vmatpush.bf16.msrb.mxu0 %v343_v18 }
  0x22   : > { %p747_p0 = pneg %p746_p13 }
  0x24   : > { %p752_p5 = pnand %p751_p3, %p747_p0 }
  0x25   : > { %409 = vmatpush.bf16.msra.mxu2 %v400_v19  ;;  %466 = vmatpush.bf16.msra.mxu0 %v457_v20 }
  0x30   : > { %628 = vmatmul.msk.bf16.vlgmr.msrb.gmra.mxu2 %vm217_vm1, %v211_v12  ;;  %637 = vmatmul.msk.bf16.vlgmr.msrb.gmra.mxu0 %vm217_vm1, %v211_v12 }
  0x40   : > { %629 = vmatmul.msk.bf16.gmra.mxu2 %vm217_vm1, %v212_v16  ;;  %638 = vmatmul.msk.bf16.gmra.mxu0 %vm217_vm1, %v212_v16 }
  0x50   : > { %646 = vmatmul.msk.bf16.vlgmr.msra.gmra.mxu2 %vm217_vm1, %v211_v12  ;;  %655 = vmatmul.msk.bf16.vlgmr.msra.gmra.mxu0 %vm217_vm1, %v211_v12 }
  0x60   : > { %647 = vmatmul.msk.bf16.gmra.mxu2 %vm217_vm1, %v212_v16  ;;  %656 = vmatmul.msk.bf16.gmra.mxu0 %vm217_vm1, %v212_v16 }
  0x9d   : > { %v237_v24 = vpop.f32.mrf.mxu0 }
  0xa3   : > { %v242_v25 = vpop.f32.mrf.mxu2 }
  0xa5   : > { %v239_v26 = vpop.f32.mrf.mxu0 }
  0xa6   : > { %v247_v27 = vpack.c.bf16 %v239_v26, %v237_v24 }
  0xa8   : > { %625 = vmatmul.msk.bf16.vlgmr.msra.gmra.mxu1 %vm217_vm1, %v247_v27 }
  0xa9   : > { %493 = vmatpush.bf16.msra.mxu1 %v256_v23 }
  0xab   : > { %v244_v28 = vpop.f32.mrf.mxu2 }
  0xac   : > { %v248_v29 = vpack.c.bf16 %v244_v28, %v242_v25 }
  0xad   : > { %v354_v30 = vpop.f32.mrf.mxu0 }
  0xae   : > { %626 = vmatmul.msk.bf16.vlgmr.msra.gmra.mxu3 %vm217_vm1, %v248_v29 }
  0xaf   : > { %436 = vmatpush.bf16.msra.mxu3 %v256_v23 }
  0xb3   : > { %v297_v31 = vpop.f32.mrf.mxu2 }
  0xb5   : > { %v356_v32 = vpop.f32.mrf.mxu0 }
  0xb6   : > { %v364_v33 = vpack.c.bf16 %v356_v32, %v354_v30 }
  0xb8   : > { %639 = vmatmul.msk.bf16.vlgmr.msrb.gmra.mxu1 %vm217_vm1, %v364_v33 }
  0xbb   : > { %v299_v34 = vpop.f32.mrf.mxu2 }
  0xbc   : > { %v307_v35 = vpack.c.bf16 %v299_v34, %v297_v31 }
  0xbd   : > { %v359_v36 = vpop.f32.mrf.mxu0 }
  0xbe   : > { %630 = vmatmul.msk.bf16.vlgmr.msrb.gmra.mxu3 %vm217_vm1, %v307_v35 }
  0xc3   : > { %v302_v37 = vpop.f32.mrf.mxu2 }
  0xc5   : > { %v361_v38 = vpop.f32.mrf.mxu0 }
  0xc6   : > { %v365_v39 = vpack.c.bf16 %v361_v38, %v359_v36 }
  0xc8   : > { %640 = vmatmul.msk.bf16.gmra.mxu1 %vm217_vm1, %v365_v39 }
  0xcb   : > { %v304_v40 = vpop.f32.mrf.mxu2 }
  0xcc   : > { %v308_v41 = vpack.c.bf16 %v304_v40, %v302_v37 }
  0xcd   : > { %v468_v42 = vpop.f32.mrf.mxu0 }
  0xce   : > { %631 = vmatmul.msk.bf16.gmra.mxu3 %vm217_vm1, %v308_v41 }
  0xd3   : > { %v411_v43 = vpop.f32.mrf.mxu2 }
  0xd5   : > { %v470_v44 = vpop.f32.mrf.mxu0 }
  0xd6   : > { %v478_v45 = vpack.c.bf16 %v470_v44, %v468_v42 }
  0xd8   : > { %657 = vmatmul.msk.bf16.vlgmr.msra.gmra.mxu1 %vm217_vm1, %v478_v45 }
  0xdb   : > { %v413_v46 = vpop.f32.mrf.mxu2 }
  0xdc   : > { %v421_v47 = vpack.c.bf16 %v413_v46, %v411_v43 }
  0xdd   : > { %v473_v48 = vpop.f32.mrf.mxu0 }
  0xde   : > { %648 = vmatmul.msk.bf16.vlgmr.msra.gmra.mxu3 %vm217_vm1, %v421_v47 }
  0xe3   : > { %v416_v49 = vpop.f32.mrf.mxu2 }
  0xe5   : > { %v475_v50 = vpop.f32.mrf.mxu0 }
  0xe6   : > { %v479_v51 = vpack.c.bf16 %v475_v50, %v473_v48 }
  0xe8   : > { %658 = vmatmul.msk.bf16.gmra.mxu1 %vm217_vm1, %v479_v51 }
  0xeb   : > { %v418_v52 = vpop.f32.mrf.mxu2 }
  0xec   : > { %v422_v53 = vpack.c.bf16 %v418_v52, %v416_v49 }
  0xee   : > { %649 = vmatmul.msk.bf16.gmra.mxu3 %vm217_vm1, %v422_v53 }
 0x125   : > { %v267_v54 = vpop.f32.mrf.mxu1 }
 0x126   : > { %278 = vst.msk [vmem:[%s934_s26] sm:$0xff] %vm277_vm2, %v267_v54 }
 0x12d   : > { %v269_v55 = vpop.f32.mrf.mxu1 }
 0x12e   : > { %279 = vst.msk [vmem:[%s934_s26 + $0x8] sm:$0xff] %vm277_vm2, %v269_v55 }
 0x131   : > { %v272_v56 = vpop.f32.mrf.mxu3 }
 0x132   : > { %280 = vst.msk [vmem:[%s934_s26 + $0x10] sm:$0xff] %vm277_vm2, %v272_v56 }
 0x135   : > { %v381_v57 = vpop.f32.mrf.mxu1 }
 0x136   : > { %641 = vst.msk [vmem:[%s934_s26 + $0x40] sm:$0xff] %vm277_vm2, %v381_v57 }
 0x139   : > { %v274_v58 = vpop.f32.mrf.mxu3 }
 0x13a   : > { %281 = vst.msk [vmem:[%s934_s26 + $0x18] sm:$0xff] %vm277_vm2, %v274_v58 }
 0x13d   : > { %v383_v59 = vpop.f32.mrf.mxu1 }
 0x13e   : > { %642 = vst.msk [vmem:[%s934_s26 + $0x48] sm:$0xff] %vm277_vm2, %v383_v59 }
 0x141   : > { %v324_v60 = vpop.f32.mrf.mxu3 }
 0x142   : > { %632 = vst.msk [vmem:[%s934_s26 + $0x20] sm:$0xff] %vm277_vm2, %v324_v60 }
 0x145   : > { %v386_v61 = vpop.f32.mrf.mxu1 }
 0x146   : > { %643 = vst.msk [vmem:[%s934_s26 + $0x50] sm:$0xff] %vm277_vm2, %v386_v61 }
 0x149   : > { %v326_v62 = vpop.f32.mrf.mxu3 }
 0x14a   : > { %633 = vst.msk [vmem:[%s934_s26 + $0x28] sm:$0xff] %vm277_vm2, %v326_v62 }
 0x14d   : > { %v388_v63 = vpop.f32.mrf.mxu1 }
 0x14e   : > { %644 = vst.msk [vmem:[%s934_s26 + $0x58] sm:$0xff] %vm277_vm2, %v388_v63 }
 0x151   : > { %v329_v0 = vpop.f32.mrf.mxu3 }
 0x152   : > { %634 = vst.msk [vmem:[%s934_s26 + $0x30] sm:$0xff] %vm277_vm2, %v329_v0 }
 0x155   : > { %v495_v1 = vpop.f32.mrf.mxu1 }
 0x156   : > { %659 = vst.msk [vmem:[%s934_s26 + $0x80] sm:$0xff] %vm277_vm2, %v495_v1 }
 0x159   : > { %v331_v2 = vpop.f32.mrf.mxu3 }
 0x15a   : > { %635 = vst.msk [vmem:[%s934_s26 + $0x38] sm:$0xff] %vm277_vm2, %v331_v2 }
 0x15d   : > { %v497_v3 = vpop.f32.mrf.mxu1 }
 0x15e   : > { %660 = vst.msk [vmem:[%s934_s26 + $0x88] sm:$0xff] %vm277_vm2, %v497_v3 }
 0x161   : > { %v438_v4 = vpop.f32.mrf.mxu3 }
 0x162   : > { %650 = vst.msk [vmem:[%s934_s26 + $0x60] sm:$0xff] %vm277_vm2, %v438_v4 }
 0x165   : > { %v500_v5 = vpop.f32.mrf.mxu1 }
 0x166   : > { %661 = vst.msk [vmem:[%s934_s26 + $0x90] sm:$0xff] %vm277_vm2, %v500_v5 }
 0x169   : > { %v440_v6 = vpop.f32.mrf.mxu3 }
 0x16a   : > { %651 = vst.msk [vmem:[%s934_s26 + $0x68] sm:$0xff] %vm277_vm2, %v440_v6 }
 0x16d   : > { %v502_v7 = vpop.f32.mrf.mxu1 }
 0x16e   : > { %662 = vst.msk [vmem:[%s934_s26 + $0x98] sm:$0xff] %vm277_vm2, %v502_v7 }
 0x171   : > { %v443_v8 = vpop.f32.mrf.mxu3 }
 0x172   : > { %652 = vst.msk [vmem:[%s934_s26 + $0x70] sm:$0xff] %vm277_vm2, %v443_v8 }
 0x179   : > { %v445_v9 = vpop.f32.mrf.mxu3 }
 0x17a   : > { %653 = vst.msk [vmem:[%s934_s26 + $0x78] sm:$0xff] %vm277_vm2, %v445_v9 }
 0x17b   : > { %755 = shalt.err (!%p752_p5)
}
 0x17c   : > { %s808_s19 = smov 128   ;;  %s809_s21 = smov 8  }
 0x17d   : > { %671 = dma.vmem_to_hbm [thread:$0]  (%p870_p4), %s526_s4, 2560, %s528_s5, %s511_s6, %s808_s19, %s808_s19, %s809_s21  }
 0x17e PF: > { %p677_p6 = scmp.ge.s32.totalorder %s806_s17, 2  ;;  %s542_s23 = sand.u32 1, %s786_s12  }
 0x17f   : > { %s543_s26 = scalar_lea.sflag [#allocation3], %s542_s23 }
 0x180   : > { %p674_p7 = pnand %p677_p6, %p877_p8 }
 0x182   : > { %p675_p9 = pneg %p674_p7 }
 0x184   : > { %781 = dma.done.wait (%p675_p9), %s543_s26, 2560  }
 0x185   : > { %783 = vsyncadd (%p675_p9), %s543_s26, 4294964736  ;;  %s16_s17 = sadd.s32 1, %s806_s17   ;;  %s1021_s12 = smov %s790_s13 }
 0x186   : > { %p13_p10 = scmp.ge.s32.totalorder %s16_s17, 4   ;;  %s1022_s13 = smov %s794_s14 }
 0x187   : > { %s1023_s14 = smov %s883_s25  ;;  %s1024_s15 = smov %s802_s16 }
 0x188   : > { %s1025_s16 = smov %s1027_s20  ;;  %15 = sbr.rel (!%p13_p10) target bundleno = 4 (0x4), region = 78 }
 0x18d   :  { %549 = vsyncpa [#allocation3], 1 }
 0x18e   :  { %551 = vsyncpa [#allocation3 + $0x1], 1 }

// kernel: efficient_deeplab_forward.4
= control target key start
LH: loop header
LB: loop body
LE: loop exit
PB: predicated region body
PF: predicated region fallthrough
CT: control target
= control target key end

     0   :  { %12 = vsyncpa [#allocation4], 0  ;;  %s7657_s0 = inlined_call_operand.vmem [shape: bf16[2,8,8,256], index: 0, kind: input, shape index: {}, may-alias: {0,1,2}]   ;;  %s7658_s1 = inlined_call_operand.vmem [shape: bf16[2,8,8,256], index: 1, kind: input, shape index: {}, may-alias: {0,1,2}]   ;;  %s7659_s2 = inlined_call_operand.vmem [shape: bf16[2,8,8,256], index: 2, kind: input, shape index: {}, may-alias: {0,1,2}]   ;;  %s7660_s3 = inlined_call_operand.hbm [shape: bf16[9,256,256], index: 3, kind: input, shape index: {}]   ;;  %s7661_s4 = inlined_call_operand.hbm [shape: f32[1,256], index: 4, kind: input, shape index: {}]   ;;  %s7662_s5 = inlined_call_operand.vmem [shape: bf16[256,5], index: 5, kind: input, shape index: {}]   ;;  %s7663_s6 = inlined_call_operand.hbm [shape: f32[1,5], index: 6, kind: input, shape index: {}]   ;;  %s7664_s7 = inlined_call_operand.vmem [shape: f32[2,8,8,5], index: 7, kind: output, shape index: {}]  }
   0x1   :  { %13 = vsyncpa [#allocation6], 0  ;;  %s6288_s1 = smov 0   ;;  %s6290_s2 = smov 0  }
   0x2   :  { %s6292_s24 = smov 0  }
   0x3 LB: > { %s274_s27 = sshll.u32 %s7661_s4, 4  ;;  %s4463_s28 = sadd.s32 4294967295, %s6241_s24   ;;  %s6241_s24 = sphi %s6292_s24, %s19_s24   ;;  %s6237_s2 = sphi %s6290_s2, %s7691_s2   ;;  %s6233_s1 = sphi %s6288_s1, %s7690_s1   ;;  %s275_s27 = int_to_ptr.hbm [resolvable:$true] %s274_s27 }
   0x4   : > { %p4465_p0 = scmp.ge.s32.totalorder %s6241_s24, 1  ;;  %p248_p1 = scmp.lt.s32.totalorder %s6241_s24, 3 }
   0x5   : > { %p6309_p2 = scmp.eq.s32.totalorder %s4463_s28, 0  ;;  %s6243_s8 = smov [#allocation5]  }
   0x6   : > { %p6313_p3 = pnand %p4465_p0, %p248_p1  ;;  %s276_s9 = sshll.u32 %s6243_s8, 4  ;;  %s277_s9 = int_to_ptr.vmem [resolvable:$true] %s276_s9 }
   0x7   : > { %s31_s11 = sadd.s32 1, %s6237_s2  ;;  %s259_s14 = sshll.u32 %s7660_s3, 4  ;;  %s260_s14 = int_to_ptr.hbm [resolvable:$true] %s259_s14 }
   0x8   : > { %p6047_p4 = pneg %p6313_p3  ;;  %p33_p6 = scmp.ge.s32.totalorder %s31_s11, 2 }
   0x9   : > { %s6244_s15 = smov [#allocation3]   ;;  %s289_s19 = sshll.u32 %s7663_s6, 4  ;;  %s290_s19 = int_to_ptr.hbm [resolvable:$true] %s289_s19 }
   0xa   : > { %p6321_p5 = pnand %p6309_p2, %p6047_p4  ;;  %s7693_s11 = smov (%p33_p6, %s31_s11), 0 }
   0xb   : > { %s261_s16 = sshll.u32 %s6244_s15, 4  ;;  %s6245_s20 = smov 128   ;;  %s262_s16 = int_to_ptr.vmem [resolvable:$true] %s261_s16 }
   0xc   : > { %6053 = dma.hbm_to_vmem [thread:$0]  (!%p6321_p5), %s275_s27, 32, %s277_s9, [#allocation6]  }
   0xd   : > { %s6246_s21 = smov 8   ;;  %s6247_s22 = smov [#allocation7]  }
   0xe   : > { %6050 = dma.hbm_to_vmem [thread:$0]  (!%p6321_p5), %s260_s14, 36864, %s262_s16, [#allocation4], %s6245_s20, %s6245_s20, %s6246_s21  }
   0xf   : > { %s291_s23 = sshll.u32 %s6247_s22, 4  ;;  %358 = sbr.rel (%p6313_p3) target bundleno = 941 (0x3ad), region = 48  ;;  %s292_s23 = int_to_ptr.vmem [resolvable:$true] %s291_s23 }
  0x10   : > { %6056 = dma.hbm_to_vmem [thread:$0]  (!%p6321_p5), %s290_s19, 16, %s292_s23, [#allocation6]  }
  0x14   : > { %6224 = dma.done.wait (%p6309_p2), [#allocation4], 36864  }
  0x15   : > { %6226 = vsyncadd (%p6309_p2), [#allocation4], 4294930432 }
  0x16   : > { %6228 = dma.done.wait (%p6309_p2), [#allocation6], 48  }
  0x17   : > { %6230 = vsyncadd (%p6309_p2), [#allocation6], 4294967248  ;;  %p437_p7 = scmp.lt.s32.totalorder %s6233_s1, 1  ;;  %vm492_vm0 = vcmask 1040384   ;;  %vm493_vm1 = vsmask.f32 256 }
  0x18   : > { %vm495_vm2 = vcmask 1044484   ;;  %vm496_vm3 = vsmask.f32 4352  ;;  %v4540_v0 = vld [vmem:[#allocation3 + $0x370] sm:$0xf]  ;;  %vm6356_vm4 = vmand %vm492_vm0, %vm493_vm1  ;;  %vm653_vm7 = vcmask 1043456  }
  0x19   : > { %s7695_s1 = smov (!%p437_p7, %s6233_s1), 1  ;;  %v5762_v1 = vld [vmem:[#allocation3 + $0x374] sm:$0xf0]  ;;  %v4604_v2 = vld [vmem:[#allocation3 + $0x3f0] sm:$0xf]  ;;  %vm497_vm5 = vmand %vm495_vm2, %vm496_vm3  ;;  %vm655_vm9 = vcmask 1047556  }
  0x1a   : > { %v4541_v3 = vor.u32 %v5762_v1, %v4540_v0  ;;  %v5778_v4 = vld [vmem:[#allocation3 + $0x3f4] sm:$0xf0]  ;;  %v4532_v5 = vld [vmem:[#allocation3 + $0x360] sm:$0xf]  ;;  %v5760_v6 = vld [vmem:[#allocation3 + $0x364] sm:$0xf0] }
  0x1b   : > { %v4605_v7 = vor.u32 %v5778_v4, %v4604_v2  ;;  %v4596_v8 = vld [vmem:[#allocation3 + $0x3e0] sm:$0xf]  ;;  %v5776_v9 = vld [vmem:[#allocation3 + $0x3e4] sm:$0xf0]  ;;  %v4533_v10 = vor.u32 %v5760_v6, %v4532_v5  ;;  %v4524_v13 = vld [vmem:[#allocation3 + $0x350] sm:$0xf] }
  0x1c   : > { %1054 = vmatpush.bf16.msra.mxu0 %v4541_v3  ;;  %6019 = vmatpush.bf16.msra.mxu2 %v4541_v3  ;;  %v4597_v12 = vor.u32 %v5776_v9, %v4596_v8  ;;  %v5758_v14 = vld [vmem:[#allocation3 + $0x354] sm:$0xf0]  ;;  %vm529_vm6 = vsmask.f32 7938  ;;  %v4588_v15 = vld [vmem:[#allocation3 + $0x3d0] sm:$0xf]  ;;  %vm6365_vm10 = vmor %vm497_vm5, %vm6356_vm4 }
  0x1d   : > { %1083 = vmatpush.bf16.msra.mxu1 %v4605_v7  ;;  %6027 = vmatpush.bf16.msra.mxu3 %v4605_v7  ;;  %v5774_v16 = vld [vmem:[#allocation3 + $0x3d4] sm:$0xf0]  ;;  %s5710_s25 = sshll.u32 %s7695_s1, 6  ;;  %vm531_vm8 = vsmask.f32 7954  ;;  %v4525_v17 = vor.u32 %v5758_v14, %v4524_v13  ;;  %vm6377_vm11 = vmand %vm653_vm7, %vm529_vm6  ;;  %vm2981_vm4 = vcmask 1042432  }
  0x1e   : > { %v4589_v19 = vor.u32 %v5774_v16, %v4588_v15  ;;  %v4516_v20 = vld [vmem:[#allocation3 + $0x340] sm:$0xf]  ;;  %v5756_v21 = vld [vmem:[#allocation3 + $0x344] sm:$0xf0]  ;;  %s6374_s28 = scalar_lea.vmem %s7657_s0, %s5710_s25  ;;  %vm6382_vm12 = vmand %vm655_vm9, %vm531_vm8  ;;  %vm1797_vm1 = vsmask.f32 3328  ;;  %s7630_s21 = scalar_lea.vmem %s7664_s7, %s5710_s25 }
  0x1f   : > { %v4580_v23 = vld [vmem:[#allocation3 + $0x3c0] sm:$0xf]  ;;  %v5772_v24 = vld [vmem:[#allocation3 + $0x3c4] sm:$0xf0]  ;;  %v4508_v26 = vld [vmem:[#allocation3 + $0x330] sm:$0xf]  ;;  %v4517_v29 = vor.u32 %v5756_v21, %v4516_v20 }
  0x20   : > { %1055 = vmatpush.bf16.msra.mxu0 %v4533_v10  ;;  %6020 = vmatpush.bf16.msra.mxu2 %v4533_v10  ;;  %v5754_v27 = vld [vmem:[#allocation3 + $0x334] sm:$0xf0]  ;;  %v502_v28 = vld [vmem:[#allocation2 + $0x70] sm:$0x11]  ;;  %v505_v33 = vld [vmem:[#allocation2 + $0x8] sm:$0x11]  ;;  %v4581_v35 = vor.u32 %v5772_v24, %v4580_v23 }
  0x21   : > { %1084 = vmatpush.bf16.msra.mxu1 %v4597_v12  ;;  %6028 = vmatpush.bf16.msra.mxu3 %v4597_v12  ;;  %v4572_v30 = vld [vmem:[#allocation3 + $0x3b0] sm:$0xf]  ;;  %v5770_v31 = vld [vmem:[#allocation3 + $0x3b4] sm:$0xf0]  ;;  %v503_v32 = vsel %vm6365_vm10, 0, %v502_v28  ;;  %vm530_vm13 = vmand %vm492_vm0, %vm529_vm6  ;;  %v506_v36 = vsel %vm6365_vm10, 0, %v505_v33  ;;  %v4509_v44 = vor.u32 %v5754_v27, %v4508_v26 }
  0x22   : > { %v564_v34 = vld [vmem:[%s6374_s28] sm:$0xff]  ;;  %504 = vst [vmem:[#allocation2 + $0x70] sm:$0x11] %v503_v32  ;;  %vm532_vm14 = vmand %vm495_vm2, %vm531_vm8  ;;  %v565_v37 = vld [vmem:[%s6374_s28 + $0x8] sm:$0xff]  ;;  %v4573_v55 = vor.u32 %v5770_v31, %v4572_v30  ;;  %vm1798_vm2 = vsmask.f32 7440 }
  0x23   : > { %v573_v38 = vshrl.u32 %v564_v34, 16  ;;  %v576_v39 = vshll.u32 %v564_v34, 16  ;;  %507 = vst [vmem:[#allocation2 + $0x8] sm:$0x11] %v506_v36  ;;  %vm6396_vm15 = vmor %vm532_vm14, %vm530_vm13  ;;  %v581_v41 = vshrl.u32 %v565_v37, 16  ;;  %v584_v42 = vshll.u32 %v565_v37, 16 }
  0x24   : > { %1056 = vmatpush.bf16.msra.mxu0 %v4525_v17  ;;  %6021 = vmatpush.bf16.msra.mxu2 %v4525_v17  ;;  %v514_v43 = vld [vmem:[#allocation2 + $0x38] sm:$0x11]  ;;  %v4500_v45 = vld [vmem:[#allocation3 + $0x320] sm:$0xf]  ;;  %v569_v50 = vld [vmem:[%s6374_s28 + $0x28] sm:$0xff]  ;;  %vm2982_vm5 = vcmask 1046532  }
  0x25   : > { %1085 = vmatpush.bf16.msra.mxu1 %v4589_v19  ;;  %6029 = vmatpush.bf16.msra.mxu3 %v4589_v19  ;;  %v6400_v46 = vrot.slane %v573_v38, 7  ;;  %v515_v47 = vsel %vm6365_vm10, 0, %v514_v43  ;;  %v517_v48 = vld [vmem:[#allocation2 + $0x58] sm:$0x11]  ;;  %v568_v49 = vld [vmem:[%s6374_s28 + $0x20] sm:$0xff]  ;;  %v6406_v51 = vrot.slane %v581_v41, 7  ;;  %vm6416_vm0 = vmor %vm6382_vm12, %vm6377_vm11 }
  0x26   : > { %516 = vst [vmem:[#allocation2 + $0x38] sm:$0x11] %v515_v47  ;;  %v518_v52 = vsel %vm6365_vm10, 0, %v517_v48  ;;  %v605_v53 = vshrl.u32 %v568_v49, 16  ;;  %v608_v54 = vshll.u32 %v568_v49, 16  ;;  %v613_v58 = vshrl.u32 %v569_v50, 16  ;;  %vm6720_vm3 = vmor %vm1797_vm1, %vm1798_vm2 }
  0x27   : > { %v5752_v56 = vld [vmem:[#allocation3 + $0x324] sm:$0xf0]  ;;  %v578_v57 = vor.u32 %v576_v39, %v6400_v46  ;;  %519 = vst [vmem:[#allocation2 + $0x58] sm:$0x11] %v518_v52  ;;  %v616_v59 = vshll.u32 %v569_v50, 16  ;;  %v586_v62 = vor.u32 %v584_v42, %v6406_v51  ;;  %v6455_v48 = vld [vmem:[%s6374_s28 + $0x10] sm:$0xff]  ;;  %vm7044_vm6 = vmor %vm2981_vm4, %vm2982_vm5 }
  0x28   : > { %1057 = vmatpush.bf16.msra.mxu0 %v4517_v29  ;;  %6022 = vmatpush.bf16.msra.mxu2 %v4517_v29  ;;  %v4564_v60 = vld [vmem:[#allocation3 + $0x3a0] sm:$0xf]  ;;  %v5768_v61 = vld [vmem:[#allocation3 + $0x3a4] sm:$0xf0]  ;;  %v6420_v0 = vrot.slane %v605_v53, 7  ;;  %v6422_v1 = vrot.slane %v613_v58, 7  ;;  %v4501_v2 = vor.u32 %v5752_v56, %v4500_v45 }
  0x29   : > { %1086 = vmatpush.bf16.msra.mxu1 %v4581_v35  ;;  %6030 = vmatpush.bf16.msra.mxu3 %v4581_v35  ;;  %v658_v3 = vld [vmem:[#allocation2 + $0x70] sm:$0xff]  ;;  %v4565_v5 = vor.u32 %v5768_v61, %v4564_v60  ;;  %v5750_v7 = vld [vmem:[#allocation3 + $0x314] sm:$0xf0]  ;;  %v4484_v14 = vld [vmem:[#allocation3 + $0x300] sm:$0xf]  ;;  %vm4291_vm7 = vcmask 39936  }
  0x2a   : > { %v610_v4 = vor.u32 %v608_v54, %v6420_v0  ;;  %v4492_v6 = vld [vmem:[#allocation3 + $0x310] sm:$0xf]  ;;  %v6427_v8 = vsel %vm6416_vm0, %v578_v57, %v658_v3  ;;  %v664_v9 = vld [vmem:[#allocation2 + $0x8] sm:$0xff]  ;;  %v618_v10 = vor.u32 %v616_v59, %v6422_v1  ;;  %v5766_v12 = vld [vmem:[#allocation3 + $0x394] sm:$0xf0] }
  0x2b   : > { %v4556_v11 = vld [vmem:[#allocation3 + $0x390] sm:$0xf]  ;;  %660 = vst [vmem:[#allocation2 + $0x70] sm:$0xff] %v6427_v8  ;;  %v6433_v13 = vsel %vm6416_vm0, %v586_v62, %v664_v9  ;;  %v5748_v15 = vld [vmem:[#allocation3 + $0x304] sm:$0xf0]  ;;  %v4493_v17 = vor.u32 %v5750_v7, %v4492_v6  ;;  %v862_v27 = vunpack.c.l.b16 %v6427_v8  ;;  %v863_v34 = vunpack.c.h.b16 %v6427_v8  ;;  %v6492_v6 = vld [vmem:[%s6374_s28 + $0x38] sm:$0xff] }
  0x2c   : > { %1058 = vmatpush.bf16.msra.mxu0 %v4509_v44  ;;  %6023 = vmatpush.bf16.msra.mxu2 %v4509_v44  ;;  %666 = vst [vmem:[#allocation2 + $0x8] sm:$0xff] %v6433_v13  ;;  %v4557_v21 = vor.u32 %v5766_v12, %v4556_v11  ;;  %v4548_v22 = vld [vmem:[#allocation3 + $0x380] sm:$0xf]  ;;  %v4485_v24 = vor.u32 %v5748_v15, %v4484_v14  ;;  %v5764_v25 = vld [vmem:[#allocation3 + $0x384] sm:$0xf0]  ;;  %v864_v28 = vunpack.c.l.b16 %v6433_v13  ;;  %v865_v35 = vunpack.c.h.b16 %v6433_v13  ;;  %v6473_v56 = vld [vmem:[%s6374_s28 + $0x30] sm:$0xff] }
  0x2d   : > { %1087 = vmatpush.bf16.msra.mxu1 %v4573_v55  ;;  %6031 = vmatpush.bf16.msra.mxu3 %v4573_v55  ;;  %v682_v16 = vld [vmem:[#allocation2 + $0x38] sm:$0xff]  ;;  %v5761_v26 = vld [vmem:[#allocation3 + $0x374] sm:$0xf]  ;;  %v4549_v38 = vor.u32 %v5764_v25, %v4548_v22  ;;  %v4668_v39 = vld [vmem:[#allocation3 + $0x70] sm:$0xf] }
  0x2e   : > { %v6438_v19 = vsel %vm6416_vm0, %v610_v4, %v682_v16  ;;  %v688_v20 = vld [vmem:[#allocation2 + $0x58] sm:$0xff]  ;;  %v5777_v32 = vld [vmem:[#allocation3 + $0x3f4] sm:$0xf]  ;;  %v4732_v44 = vld [vmem:[#allocation3 + $0xf0] sm:$0xf]  ;;  %v6461_v49 = vpack.c.b16 %v864_v28, %v862_v27  ;;  %v6479_v57 = vpack.c.b16 %v865_v35, %v863_v34 }
  0x2f   : > { %684 = vst [vmem:[#allocation2 + $0x38] sm:$0xff] %v6438_v19  ;;  %v6443_v23 = vsel %vm6416_vm0, %v618_v10, %v688_v20  ;;  %v870_v29 = vunpack.c.l.b16 %v6438_v19  ;;  %v4542_v31 = vld [vmem:[#allocation3 + $0x378] sm:$0xf0]  ;;  %v871_v36 = vunpack.c.h.b16 %v6438_v19  ;;  %v5730_v41 = vld [vmem:[#allocation3 + $0x74] sm:$0xf0] }
  0x30   : > { %1059 = vmatpush.bf16.msra.mxu0 %v4501_v2  ;;  %6024 = vmatpush.bf16.msra.mxu2 %v4501_v2  ;;  %690 = vst [vmem:[#allocation2 + $0x58] sm:$0xff] %v6443_v23  ;;  %v872_v30 = vunpack.c.l.b16 %v6443_v23  ;;  %v4606_v33 = vld [vmem:[#allocation3 + $0x3f8] sm:$0xf0]  ;;  %v873_v37 = vunpack.c.h.b16 %v6443_v23  ;;  %v4545_v42 = vor.u32 %v5761_v26, %v4542_v31  ;;  %v5746_v45 = vld [vmem:[#allocation3 + $0xf4] sm:$0xf0]  ;;  %v4669_v62 = vor.u32 %v5730_v41, %v4668_v39 }
  0x31   : > { %1088 = vmatpush.bf16.msra.mxu1 %v4565_v5  ;;  %6032 = vmatpush.bf16.msra.mxu3 %v4565_v5  ;;  %v4609_v43 = vor.u32 %v5777_v32, %v4606_v33  ;;  %v5759_v47 = vld [vmem:[#allocation3 + $0x364] sm:$0xf]  ;;  %v4534_v52 = vld [vmem:[#allocation3 + $0x368] sm:$0xf0]  ;;  %v6470_v55 = vld [vmem:[%s6374_s28 + $0x18] sm:$0xff]  ;;  %v4733_v2 = vor.u32 %v5746_v45, %v4732_v44  ;;  %v592_v26 = vshll.u32 %v6455_v48, 16 }
  0x32   : > { %v6467_v50 = vpack.c.b16 %v872_v30, %v870_v29  ;;  %v5775_v53 = vld [vmem:[#allocation3 + $0x3e4] sm:$0xf]  ;;  %v4598_v54 = vld [vmem:[#allocation3 + $0x3e8] sm:$0xf0]  ;;  %v6485_v58 = vpack.c.b16 %v873_v37, %v871_v36  ;;  %v6487_v59 = vld [vmem:[#allocation3 + $0x60] sm:$0xf]  ;;  %v4537_v7 = vor.u32 %v5759_v47, %v4534_v52 }
  0x33   : > { %v5728_v60 = vld [vmem:[#allocation3 + $0x64] sm:$0xf0]  ;;  %v4724_v61 = vld [vmem:[#allocation3 + $0xe0] sm:$0xf]  ;;  %v6489_v4 = vld [vmem:[#allocation3 + $0x354] sm:$0xf]  ;;  %v4601_v9 = vor.u32 %v5775_v53, %v4598_v54 }
  0x34   : > { %1060 = vmatpush.bf16.msra.mxu0 %v4493_v17  ;;  %6025 = vmatpush.bf16.msra.mxu2 %v4493_v17  ;;  %v5744_v3 = vld [vmem:[#allocation3 + $0xe4] sm:$0xf0]  ;;  %v4526_v5 = vld [vmem:[#allocation3 + $0x358] sm:$0xf0]  ;;  %v5773_v10 = vld [vmem:[#allocation3 + $0x3d4] sm:$0xf]  ;;  %v4661_v14 = vor.u32 %v5728_v60, %v6487_v59 }
  0x35   : > { %1089 = vmatpush.bf16.msra.mxu1 %v4557_v21  ;;  %6033 = vmatpush.bf16.msra.mxu3 %v4557_v21  ;;  %v4590_v11 = vld [vmem:[#allocation3 + $0x3d8] sm:$0xf0]  ;;  %v508_v12 = vld [vmem:[#allocation2 + $0x30] sm:$0x11]  ;;  %v6499_v16 = vld [vmem:[#allocation3 + $0x54] sm:$0xf0]  ;;  %v4725_v33 = vor.u32 %v5744_v3, %v4724_v61 }
  0x36   : > { %v6497_v15 = vld [vmem:[#allocation3 + $0x50] sm:$0xf]  ;;  %v509_v17 = vsel %vm6365_vm10, 0, %v508_v12  ;;  %v511_v20 = vld [vmem:[#allocation2 + $0x60] sm:$0x11]  ;;  %v589_v21 = vshrl.u32 %v6455_v48, 16  ;;  %v4593_v48 = vor.u32 %v5773_v10, %v4590_v11 }
  0x37   : > { %v4716_v22 = vld [vmem:[#allocation3 + $0xd0] sm:$0xf]  ;;  %510 = vst [vmem:[#allocation2 + $0x30] sm:$0x11] %v509_v17  ;;  %v512_v25 = vsel %vm6365_vm10, 0, %v511_v20  ;;  %v597_v31 = vshrl.u32 %v6470_v55, 16 }
  0x38   : > { %1061 = vmatpush.bf16.msra.mxu0 %v4485_v24  ;;  %6026 = vmatpush.bf16.msra.mxu2 %v4485_v24  ;;  %v5742_v24 = vld [vmem:[#allocation3 + $0xd4] sm:$0xf0]  ;;  %v621_v32 = vshrl.u32 %v6473_v56, 16  ;;  %v5755_v39 = vld [vmem:[#allocation3 + $0x344] sm:$0xf]  ;;  %v6512_v44 = vrot.slane %v589_v21, 7 }
  0x39   : > { %1090 = vmatpush.bf16.msra.mxu1 %v4549_v38  ;;  %6034 = vmatpush.bf16.msra.mxu3 %v4549_v38  ;;  %v4529_v38 = vor.u32 %v6489_v4, %v4526_v5  ;;  %v4518_v41 = vld [vmem:[#allocation3 + $0x348] sm:$0xf0]  ;;  %513 = vst [vmem:[#allocation2 + $0x60] sm:$0x11] %v512_v25  ;;  %v600_v45 = vshll.u32 %v6470_v55, 16  ;;  %v6515_v52 = vrot.slane %v597_v31, 7  ;;  %v4717_v5 = vor.u32 %v5742_v24, %v4716_v22 }
  0x3a   : > { %v520_v47 = vld [vmem:[#allocation2 + $0x68] sm:$0x11]  ;;  %v523_v54 = vld [vmem:[#allocation2 + $0x10] sm:$0x11]  ;;  %v629_v59 = vshrl.u32 %v6492_v6, 16  ;;  %v6522_v61 = vrot.slane %v621_v32, 7  ;;  %v594_v4 = vor.u32 %v592_v26, %v6512_v44 }
  0x3b   : > { %1062 = vmatmul.bf16.vlgmr.msra.gmra.mxu0 %v6461_v49  ;;  %1072 = vmatmul.bf16.vlgmr.msra.gmra.mxu2 %v6467_v50  ;;  %v521_v53 = vsel %vm6365_vm10, 0, %v520_v47  ;;  %v524_v60 = vsel %vm6365_vm10, 0, %v523_v54  ;;  %v624_v55 = vshll.u32 %v6473_v56, 16  ;;  %v5724_v3 = vld [vmem:[#allocation3 + $0x44] sm:$0xf0]  ;;  %v602_v10 = vor.u32 %v600_v45, %v6515_v52 }
  0x3c   : > { %1112 = vmatpush.bf16.msrb.mxu2 %v4545_v42  ;;  %1091 = vmatmul.bf16.vlgmr.msra.gmra.mxu1 %v6479_v57  ;;  %v5771_v42 = vld [vmem:[#allocation3 + $0x3c4] sm:$0xf]  ;;  %522 = vst [vmem:[#allocation2 + $0x68] sm:$0x11] %v521_v53  ;;  %v6529_v11 = vrot.slane %v629_v59, 7  ;;  %v632_v12 = vshll.u32 %v6492_v6, 16  ;;  %v4521_v56 = vor.u32 %v5755_v39, %v4518_v41 }
  0x3d   : > { %1141 = vmatpush.bf16.msrb.mxu3 %v4609_v43  ;;  %1349 = vmatpush.bf16.msrb.mxu0 %v4669_v62  ;;  %v4582_v43 = vld [vmem:[#allocation3 + $0x3c8] sm:$0xf0]  ;;  %v4653_v62 = vor.u32 %v6499_v16, %v6497_v15  ;;  %525 = vst [vmem:[#allocation2 + $0x10] sm:$0x11] %v524_v60  ;;  %v5753_v16 = vld [vmem:[#allocation3 + $0x334] sm:$0xf]  ;;  %v626_v21 = vor.u32 %v624_v55, %v6522_v61 }
  0x3e   : > { %1101 = vmatmul.bf16.vlgmr.msra.gmra.mxu3 %v6485_v58  ;;  %1378 = vmatpush.bf16.msrb.mxu1 %v4733_v2  ;;  %v4644_v2 = vld [vmem:[#allocation3 + $0x40] sm:$0xf]  ;;  %v4585_v15 = vor.u32 %v5771_v42, %v4582_v43  ;;  %v4510_v17 = vld [vmem:[#allocation3 + $0x338] sm:$0xf0]  ;;  %v670_v20 = vld [vmem:[#allocation2 + $0x30] sm:$0xff] }
  0x3f   : > { %v4574_v25 = vld [vmem:[#allocation3 + $0x3b8] sm:$0xf0]  ;;  %v4645_v22 = vor.u32 %v5724_v3, %v4644_v2  ;;  %v6535_v26 = vsel %vm6416_vm0, %v594_v4, %v670_v20  ;;  %v5722_v39 = vld [vmem:[#allocation3 + $0x34] sm:$0xf0]  ;;  %v4513_v43 = vor.u32 %v5753_v16, %v4510_v17  ;;  %v4700_v47 = vld [vmem:[#allocation3 + $0xb0] sm:$0xf] }
  0x40   : > { %1113 = vmatpush.bf16.msrb.mxu2 %v4537_v7  ;;  %v4708_v7 = vld [vmem:[#allocation3 + $0xc0] sm:$0xf]  ;;  %672 = vst [vmem:[#allocation2 + $0x30] sm:$0xff] %v6535_v26  ;;  %v866_v32 = vunpack.c.l.b16 %v6535_v26  ;;  %v867_v60 = vunpack.c.h.b16 %v6535_v26  ;;  %v5751_v4 = vld [vmem:[#allocation3 + $0x324] sm:$0xf] }
  0x41   : > { %1142 = vmatpush.bf16.msrb.mxu3 %v4601_v9  ;;  %1350 = vmatpush.bf16.msrb.mxu0 %v4661_v14  ;;  %v5740_v9 = vld [vmem:[#allocation3 + $0xc4] sm:$0xf0]  ;;  %v5769_v14 = vld [vmem:[#allocation3 + $0x3b4] sm:$0xf]  ;;  %v676_v31 = vld [vmem:[#allocation2 + $0x60] sm:$0xff] }
  0x42   : > { %1379 = vmatpush.bf16.msrb.mxu1 %v4725_v33  ;;  %v4709_v24 = vor.u32 %v5740_v9, %v4708_v7  ;;  %v6540_v6 = vsel %vm6416_vm0, %v602_v10, %v676_v31  ;;  %v634_v33 = vor.u32 %v632_v12, %v6529_v11  ;;  %v4577_v45 = vor.u32 %v5769_v14, %v4574_v25  ;;  %v5767_v7 = vld [vmem:[#allocation3 + $0x3a4] sm:$0xf]  ;;  %v5720_v20 = vld [vmem:[#allocation3 + $0x24] sm:$0xf0]  ;;  %v4494_v31 = vld [vmem:[#allocation3 + $0x318] sm:$0xf0] }
  0x43   : > { %678 = vst [vmem:[#allocation2 + $0x60] sm:$0xff] %v6540_v6  ;;  %v868_v41 = vunpack.c.l.b16 %v6540_v6  ;;  %v694_v42 = vld [vmem:[#allocation2 + $0x68] sm:$0xff]  ;;  %v869_v10 = vunpack.c.h.b16 %v6540_v6  ;;  %v5717_v13 = vld [vmem:[#allocation3 + $0x14] sm:$0xf]  ;;  %v5791_v19 = vld [vmem:[#allocation3 + $0x664] sm:$0xf] }
  0x44   : > { %1114 = vmatpush.bf16.msrb.mxu2 %v4529_v38  ;;  %v4636_v38 = vld [vmem:[#allocation3 + $0x30] sm:$0xf]  ;;  %v695_v53 = vsel %vm6416_vm0, %v626_v21, %v694_v42  ;;  %v4692_v21 = vld [vmem:[#allocation3 + $0xa0] sm:$0xf]  ;;  %v5736_v14 = vld [vmem:[#allocation3 + $0xa4] sm:$0xf0] }
  0x45   : > { %1143 = vmatpush.bf16.msrb.mxu3 %v4593_v48  ;;  %1351 = vmatpush.bf16.msrb.mxu0 %v4653_v62  ;;  %v5738_v48 = vld [vmem:[#allocation3 + $0xb4] sm:$0xf0]  ;;  %v700_v54 = vld [vmem:[#allocation2 + $0x10] sm:$0xff]  ;;  %v6552_v59 = vpack.c.b16 %v868_v41, %v866_v32  ;;  %696 = vst [vmem:[#allocation2 + $0x68] sm:$0xff] %v695_v53  ;;  %v874_v62 = vunpack.c.l.b16 %v695_v53  ;;  %v4637_v2 = vor.u32 %v5722_v39, %v4636_v38  ;;  %v875_v12 = vunpack.c.h.b16 %v695_v53  ;;  %v4884_v63 = vld [vmem:[#allocation3 + $0x120] sm:$0xf] }
  0x46   : > { %1380 = vmatpush.bf16.msrb.mxu1 %v4717_v5  ;;  %v6557_v55 = vsel %vm6416_vm0, %v634_v33, %v700_v54  ;;  %v4701_v3 = vor.u32 %v5738_v48, %v4700_v47  ;;  %v4502_v5 = vld [vmem:[#allocation3 + $0x328] sm:$0xf0]  ;;  %v5765_v33 = vld [vmem:[#allocation3 + $0x394] sm:$0xf]  ;;  %v5718_v47 = vld [vmem:[#allocation3 + $0x14] sm:$0xf0] }
  0x47   : > { %702 = vst [vmem:[#allocation2 + $0x10] sm:$0xff] %v6557_v55  ;;  %v7666_v9 = vunpack.c.l.b16 %v6557_v55  ;;  %v6565_v16 = vpack.c.b16 %v874_v62, %v872_v30  ;;  %v7665_v17 = vunpack.c.h.b16 %v6557_v55  ;;  %v5749_v30 = vld [vmem:[#allocation3 + $0x314] sm:$0xf]  ;;  %v4505_v39 = vor.u32 %v5751_v4, %v4502_v5  ;;  %v4684_v48 = vld [vmem:[#allocation3 + $0x90] sm:$0xf] }
  0x48   : > { %1115 = vmatpush.bf16.msrb.mxu2 %v4521_v56  ;;  %v4566_v56 = vld [vmem:[#allocation3 + $0x3a8] sm:$0xf0]  ;;  %v5734_v53 = vld [vmem:[#allocation3 + $0x94] sm:$0xf0]  ;;  %v5747_v54 = vld [vmem:[#allocation3 + $0x304] sm:$0xf] }
  0x49   : > { %1144 = vmatpush.bf16.msrb.mxu3 %v4585_v15  ;;  %1352 = vmatpush.bf16.msrb.mxu0 %v4645_v22  ;;  %v4628_v15 = vld [vmem:[#allocation3 + $0x20] sm:$0xf]  ;;  %v6570_v25 = vpack.c.b16 %v7666_v9, %v874_v62  ;;  %v6576_v22 = vpack.c.b16 %v869_v10, %v867_v60  ;;  %v6584_v38 = vpack.c.b16 %v7665_v17, %v875_v12  ;;  %v4550_v4 = vld [vmem:[#allocation3 + $0x388] sm:$0xf0]  ;;  %v5920_v18 = vld [vmem:[#allocation3 + $0x264] sm:$0xf0] }
  0x4a   : > { %1381 = vmatpush.bf16.msrb.mxu1 %v4709_v24  ;;  %v6580_v24 = vpack.c.b16 %v875_v12, %v873_v37  ;;  %v4569_v42 = vor.u32 %v5767_v7, %v4566_v56  ;;  %v4629_v23 = vor.u32 %v5720_v20, %v4628_v15  ;;  %v4693_v37 = vor.u32 %v5736_v14, %v4692_v21  ;;  %v4612_v7 = vld [vmem:[#allocation3] sm:$0xf]  ;;  %v5716_v12 = vld [vmem:[#allocation3 + $0x4] sm:$0xf0]  ;;  %v5729_v21 = vld [vmem:[#allocation3 + $0x74] sm:$0xf] }
  0x4b   : > { %1067 = vmatmul.bf16.gmra.mxu0 %v6552_v59  ;;  %1077 = vmatmul.bf16.gmra.mxu2 %v6570_v25  ;;  %v4497_v62 = vor.u32 %v5749_v30, %v4494_v31  ;;  %v499_v56 = vld [vmem:[#allocation2] sm:$0x11]  ;;  %v4685_v15 = vor.u32 %v5734_v53, %v4684_v48  ;;  %v4670_v14 = vld [vmem:[#allocation3 + $0x78] sm:$0xf0]  ;;  %v5745_v31 = vld [vmem:[#allocation3 + $0xf4] sm:$0xf] }
  0x4c   : > { %1116 = vmatpush.bf16.msrb.mxu2 %v4513_v43  ;;  %v4558_v43 = vld [vmem:[#allocation3 + $0x398] sm:$0xf0]  ;;  %1096 = vmatmul.bf16.gmra.mxu1 %v6576_v22  ;;  %v500_v20 = vsel %vm6365_vm10, 0, %v499_v56  ;;  %v4676_v9 = vld [vmem:[#allocation3 + $0x80] sm:$0xf] }
  0x4d   : > { %1145 = vmatpush.bf16.msrb.mxu3 %v4577_v45  ;;  %1353 = vmatpush.bf16.msrb.mxu0 %v4637_v2  ;;  %v4620_v45 = vld [vmem:[#allocation3 + $0x10] sm:$0xf]  ;;  %v4486_v2 = vld [vmem:[#allocation3 + $0x308] sm:$0xf0]  ;;  %v4561_v5 = vor.u32 %v5765_v33, %v4558_v43  ;;  %501 = vst [vmem:[#allocation2] sm:$0x11] %v500_v20  ;;  %v4673_v43 = vor.u32 %v5729_v21, %v4670_v14 }
  0x4e   : > { %1382 = vmatpush.bf16.msrb.mxu1 %v4701_v3  ;;  %1106 = vmatmul.bf16.gmra.mxu3 %v6584_v38  ;;  %v5763_v3 = vld [vmem:[#allocation3 + $0x384] sm:$0xf]  ;;  %v4621_v17 = vor.u32 %v5718_v47, %v4620_v45  ;;  %v4489_v30 = vor.u32 %v5747_v54, %v4486_v2  ;;  %v4726_v56 = vld [vmem:[#allocation3 + $0xe8] sm:$0xf0]  ;;  %v4654_v2 = vld [vmem:[#allocation3 + $0x58] sm:$0xf0] }
  0x4f   : > { %v4553_v33 = vor.u32 %v5763_v3, %v4550_v4  ;;  %v5727_v47 = vld [vmem:[#allocation3 + $0x64] sm:$0xf] }
  0x50   : > { %1117 = vmatpush.bf16.msrb.mxu2 %v4505_v39  ;;  %v5732_v39 = vld [vmem:[#allocation3 + $0x84] sm:$0xf0]  ;;  %v5743_v53 = vld [vmem:[#allocation3 + $0xe4] sm:$0xf] }
  0x51   : > { %1146 = vmatpush.bf16.msrb.mxu3 %v4569_v42  ;;  %1354 = vmatpush.bf16.msrb.mxu0 %v4629_v23  ;;  %v4734_v42 = vld [vmem:[#allocation3 + $0xf8] sm:$0xf0]  ;;  %v4613_v23 = vor.u32 %v5716_v12, %v4612_v7  ;;  %v4677_v45 = vor.u32 %v5732_v39, %v4676_v9  ;;  %v4729_v9 = vor.u32 %v5743_v53, %v4726_v56  ;;  %v5723_v14 = vld [vmem:[#allocation3 + $0x44] sm:$0xf]  ;;  %v4646_v39 = vld [vmem:[#allocation3 + $0x48] sm:$0xf0] }
  0x52   : > { %1383 = vmatpush.bf16.msrb.mxu1 %v4693_v37  ;;  %v4662_v37 = vld [vmem:[#allocation3 + $0x68] sm:$0xf0]  ;;  %v4737_v48 = vor.u32 %v5745_v31, %v4734_v42  ;;  %v4718_v7 = vld [vmem:[#allocation3 + $0xd8] sm:$0xf0]  ;;  %v4796_v31 = vld [vmem:[#allocation3 + $0x670] sm:$0xf]  ;;  %v4649_v8 = vor.u32 %v5723_v14, %v4646_v39 }
  0x53   : > { %v4665_v20 = vor.u32 %v5727_v47, %v4662_v37  ;;  %v5794_v42 = vld [vmem:[#allocation3 + $0x674] sm:$0xf0]  ;;  %v4788_v37 = vld [vmem:[#allocation3 + $0x660] sm:$0xf] }
  0x54   : > { %1118 = vmatpush.bf16.msrb.mxu2 %v4497_v62  ;;  %v731_v54 = vld [vmem:[#allocation2] sm:$0xff]  ;;  %v5725_v62 = vld [vmem:[#allocation3 + $0x54] sm:$0xf]  ;;  %v5806_v39 = vld [vmem:[#allocation3 + $0x6d4] sm:$0xf0] }
  0x55   : > { %1147 = vmatpush.bf16.msrb.mxu3 %v4561_v5  ;;  %1355 = vmatpush.bf16.msrb.mxu0 %v4621_v17  ;;  %v6593_v17 = vsel %vm6416_vm0, 0, %v731_v54  ;;  %v5741_v5 = vld [vmem:[#allocation3 + $0xd4] sm:$0xf]  ;;  %v4657_v12 = vor.u32 %v5725_v62, %v4654_v2  ;;  %v4852_v56 = vld [vmem:[#allocation3 + $0x6e0] sm:$0xf] }
  0x56   : > { %1384 = vmatpush.bf16.msrb.mxu1 %v4685_v15  ;;  %733 = vst [vmem:[#allocation2] sm:$0xff] %v6593_v17  ;;  %v1171_v3 = vunpack.c.l.b16 %v6593_v17  ;;  %v1172_v4 = vunpack.c.h.b16 %v6593_v17  ;;  %v5737_v54 = vld [vmem:[#allocation3 + $0xb4] sm:$0xf]  ;;  %v4702_v62 = vld [vmem:[#allocation3 + $0xb8] sm:$0xf0] }
  0x58   : > { %1119 = vmatpush.bf16.msrb.mxu2 %v4489_v30  ;;  %v6600_v15 = vpack.c.b16 %v862_v27, %v1171_v3  ;;  %v6604_v21 = vpack.c.b16 %v863_v34, %v1172_v4  ;;  %v4721_v30 = vor.u32 %v5741_v5, %v4718_v7  ;;  %v4710_v27 = vld [vmem:[#allocation3 + $0xc8] sm:$0xf0]  ;;  %v5721_v34 = vld [vmem:[#allocation3 + $0x34] sm:$0xf]  ;;  %v4780_v3 = vld [vmem:[#allocation3 + $0x650] sm:$0xf] }
  0x59   : > { %1148 = vmatpush.bf16.msrb.mxu3 %v4553_v33  ;;  %1356 = vmatpush.bf16.msrb.mxu0 %v4613_v23  ;;  %v4860_v33 = vld [vmem:[#allocation3 + $0x6f0] sm:$0xf]  ;;  %v4797_v23 = vor.u32 %v5794_v42, %v4796_v31  ;;  %v5790_v4 = vld [vmem:[#allocation3 + $0x654] sm:$0xf0]  ;;  %v5719_v7 = vld [vmem:[#allocation3 + $0x24] sm:$0xf] }
  0x5a   : > { %1385 = vmatpush.bf16.msrb.mxu1 %v4677_v45  ;;  %v5810_v45 = vld [vmem:[#allocation3 + $0x6f4] sm:$0xf0]  ;;  %v4844_v5 = vld [vmem:[#allocation3 + $0x6d0] sm:$0xf]  ;;  %v4781_v14 = vor.u32 %v5790_v4, %v4780_v3  ;;  %v4772_v42 = vld [vmem:[#allocation3 + $0x640] sm:$0xf] }
  0x5b   : > { %1120 = vmatmul.bf16.vlgmr.msrb.gmra.mxu2 %v6461_v49  ;;  %v4861_v47 = vor.u32 %v5810_v45, %v4860_v33  ;;  %v4638_v49 = vld [vmem:[#allocation3 + $0x38] sm:$0xf0]  ;;  %v4845_v31 = vor.u32 %v5806_v39, %v4844_v5  ;;  %v5788_v33 = vld [vmem:[#allocation3 + $0x644] sm:$0xf0]  ;;  %v4820_v4 = vld [vmem:[#allocation3 + $0x6a0] sm:$0xf] }
  0x5c   : > { %1407 = vmatpush.bf16.msra.mxu2 %v4673_v43  ;;  %1357 = vmatmul.bf16.vlgmr.msrb.gmra.mxu0 %v6600_v15  ;;  %v5739_v43 = vld [vmem:[#allocation3 + $0xc4] sm:$0xf]  ;;  %v4773_v45 = vor.u32 %v5788_v33, %v4772_v42  ;;  %v5782_v42 = vld [vmem:[#allocation3 + $0x614] sm:$0xf0] }
  0x5d   : > { %1436 = vmatpush.bf16.msra.mxu3 %v4737_v48  ;;  %1386 = vmatmul.bf16.vlgmr.msrb.gmra.mxu1 %v6604_v21  ;;  %v5792_v48 = vld [vmem:[#allocation3 + $0x664] sm:$0xf0]  ;;  %v4713_v53 = vor.u32 %v5739_v43, %v4710_v27  ;;  %v5735_v43 = vld [vmem:[#allocation3 + $0xa4] sm:$0xf]  ;;  %v4694_v27 = vld [vmem:[#allocation3 + $0xa8] sm:$0xf0] }
  0x5e   : > { %1149 = vmatmul.bf16.vlgmr.msrb.gmra.mxu3 %v6479_v57  ;;  %1665 = vmatpush.bf16.msra.mxu0 %v4797_v23  ;;  %v4789_v57 = vor.u32 %v5792_v48, %v4788_v37  ;;  %v6620_v37 = vpack.c.b16 %v867_v60, %v865_v35  ;;  %v4622_v35 = vld [vmem:[#allocation3 + $0x18] sm:$0xf0]  ;;  %v5733_v60 = vld [vmem:[#allocation3 + $0x94] sm:$0xf]  ;;  %v5715_v5 = vld [vmem:[#allocation3 + $0x4] sm:$0xf] }
  0x5f   : > { %1694 = vmatpush.bf16.msra.mxu1 %v4861_v47  ;;  %v5804_v47 = vld [vmem:[#allocation3 + $0x6c4] sm:$0xf0] }
  0x60   : > { %1408 = vmatpush.bf16.msra.mxu2 %v4665_v20  ;;  %v5808_v20 = vld [vmem:[#allocation3 + $0x6e4] sm:$0xf0] }
  0x61   : > { %1437 = vmatpush.bf16.msra.mxu3 %v4729_v9  ;;  %v4853_v2 = vor.u32 %v5808_v20, %v4852_v56  ;;  %v4641_v9 = vor.u32 %v5721_v34, %v4638_v49  ;;  %v4836_v34 = vld [vmem:[#allocation3 + $0x6c0] sm:$0xf]  ;;  %v6614_v49 = vpack.c.b16 %v866_v32, %v864_v28  ;;  %v4828_v56 = vld [vmem:[#allocation3 + $0x6b0] sm:$0xf]  ;;  %v5802_v32 = vld [vmem:[#allocation3 + $0x6b4] sm:$0xf0]  ;;  %v4625_v20 = vor.u32 %v5717_v13, %v4622_v35 }
  0x62   : > { %1666 = vmatpush.bf16.msra.mxu0 %v4789_v57  ;;  %v4837_v48 = vor.u32 %v5804_v47, %v4836_v34  ;;  %v5786_v57 = vld [vmem:[#allocation3 + $0x634] sm:$0xf0]  ;;  %v4862_v13 = vld [vmem:[#allocation3 + $0x6f8] sm:$0xf0]  ;;  %v5807_v35 = vld [vmem:[#allocation3 + $0x6e4] sm:$0xf] }
  0x63   : > { %1695 = vmatpush.bf16.msra.mxu1 %v4853_v2  ;;  %v5784_v2 = vld [vmem:[#allocation3 + $0x624] sm:$0xf0] }
  0x64   : > { %1409 = vmatpush.bf16.msra.mxu2 %v4657_v12  ;;  %v4630_v12 = vld [vmem:[#allocation3 + $0x28] sm:$0xf0] }
  0x65   : > { %1438 = vmatpush.bf16.msra.mxu3 %v4721_v30  ;;  %v4705_v30 = vor.u32 %v5737_v54, %v4702_v62  ;;  %v4633_v23 = vor.u32 %v5719_v7, %v4630_v12  ;;  %v4686_v54 = vld [vmem:[#allocation3 + $0x98] sm:$0xf0]  ;;  %v4756_v62 = vld [vmem:[#allocation3 + $0x620] sm:$0xf]  ;;  %v4614_v7 = vld [vmem:[#allocation3 + $0x8] sm:$0xf0] }
  0x66   : > { %1667 = vmatpush.bf16.msra.mxu0 %v4781_v14  ;;  %v4757_v3 = vor.u32 %v5784_v2, %v4756_v62  ;;  %v5731_v12 = vld [vmem:[#allocation3 + $0x84] sm:$0xf]  ;;  %v4678_v14 = vld [vmem:[#allocation3 + $0x88] sm:$0xf0]  ;;  %v4617_v39 = vor.u32 %v5715_v5, %v4614_v7  ;;  %v4846_v2 = vld [vmem:[#allocation3 + $0x6d8] sm:$0xf0] }
  0x67   : > { %1696 = vmatpush.bf16.msra.mxu1 %v4845_v31  ;;  %v4748_v31 = vld [vmem:[#allocation3 + $0x610] sm:$0xf]  ;;  %v4838_v5 = vld [vmem:[#allocation3 + $0x6c8] sm:$0xf0] }
  0x68   : > { %1410 = vmatpush.bf16.msra.mxu2 %v4649_v8  ;;  %v4697_v8 = vor.u32 %v5735_v43, %v4694_v27  ;;  %v4749_v43 = vor.u32 %v5782_v42, %v4748_v31  ;;  %v4812_v27 = vld [vmem:[#allocation3 + $0x690] sm:$0xf]  ;;  %v5785_v31 = vld [vmem:[#allocation3 + $0x634] sm:$0xf]  ;;  %v4766_v42 = vld [vmem:[#allocation3 + $0x638] sm:$0xf0] }
  0x69   : > { %1439 = vmatpush.bf16.msra.mxu3 %v4713_v53  ;;  %v4764_v53 = vld [vmem:[#allocation3 + $0x630] sm:$0xf] }
  0x6a   : > { %1668 = vmatpush.bf16.msra.mxu0 %v4773_v45  ;;  %v4765_v28 = vor.u32 %v5786_v57, %v4764_v53  ;;  %v4740_v45 = vld [vmem:[#allocation3 + $0x600] sm:$0xf]  ;;  %v5796_v53 = vld [vmem:[#allocation3 + $0x684] sm:$0xf0]  ;;  %v6630_v57 = vpack.c.b16 %v870_v29, %v868_v41  ;;  %v4798_v29 = vld [vmem:[#allocation3 + $0x678] sm:$0xf0] }
  0x6b   : > { %1125 = vmatmul.bf16.gmra.mxu2 %v6552_v59  ;;  %1697 = vmatpush.bf16.msra.mxu1 %v4837_v48  ;;  %v4829_v59 = vor.u32 %v5802_v32, %v4828_v56  ;;  %v4804_v48 = vld [vmem:[#allocation3 + $0x680] sm:$0xf]  ;;  %v6636_v56 = vpack.c.b16 %v871_v36, %v869_v10  ;;  %v5793_v32 = vld [vmem:[#allocation3 + $0x674] sm:$0xf]  ;;  %v4790_v36 = vld [vmem:[#allocation3 + $0x668] sm:$0xf0] }
  0x6c   : > { %1411 = vmatpush.bf16.msra.mxu2 %v4641_v9  ;;  %1362 = vmatmul.bf16.gmra.mxu0 %v6614_v49  ;;  %v4689_v9 = vor.u32 %v5733_v60, %v4686_v54  ;;  %v5809_v41 = vld [vmem:[#allocation3 + $0x6f4] sm:$0xf]  ;;  %v4801_v6 = vor.u32 %v5793_v32, %v4798_v29  ;;  %v4854_v60 = vld [vmem:[#allocation3 + $0x6e8] sm:$0xf0]  ;;  %v4782_v54 = vld [vmem:[#allocation3 + $0x658] sm:$0xf0] }
  0x6d   : > { %1440 = vmatpush.bf16.msra.mxu3 %v4705_v30  ;;  %1391 = vmatmul.bf16.gmra.mxu1 %v6620_v37  ;;  %v4681_v30 = vor.u32 %v5731_v12, %v4678_v14  ;;  %v4865_v10 = vor.u32 %v5809_v41, %v4862_v13  ;;  %v5826_v12 = vld [vmem:[#allocation3 + $0x174] sm:$0xf0]  ;;  %v4988_v14 = vld [vmem:[#allocation3 + $0x1f0] sm:$0xf]  ;;  %v5799_v41 = vld [vmem:[#allocation3 + $0x6a4] sm:$0xf] }
  0x6e   : > { %1154 = vmatmul.bf16.gmra.mxu3 %v6576_v22  ;;  %1669 = vmatpush.bf16.msra.mxu0 %v4765_v28  ;;  %v5800_v22 = vld [vmem:[#allocation3 + $0x6a4] sm:$0xf0]  ;;  %v4805_v28 = vor.u32 %v5796_v53, %v4804_v48  ;;  %v5783_v53 = vld [vmem:[#allocation3 + $0x624] sm:$0xf]  ;;  %v4908_v13 = vld [vmem:[#allocation3 + $0x150] sm:$0xf] }
  0x6f   : > { %1698 = vmatpush.bf16.msra.mxu1 %v4829_v59  ;;  %v4821_v33 = vor.u32 %v5800_v22, %v4820_v4  ;;  %v5805_v59 = vld [vmem:[#allocation3 + $0x6d4] sm:$0xf]  ;;  %v5803_v22 = vld [vmem:[#allocation3 + $0x6c4] sm:$0xf]  ;;  %v5840_v48 = vld [vmem:[#allocation3 + $0x1e4] sm:$0xf0] }
  0x70   : > { %1412 = vmatpush.bf16.msra.mxu2 %v4633_v23  ;;  %v5798_v23 = vld [vmem:[#allocation3 + $0x694] sm:$0xf0]  ;;  %v4849_v4 = vor.u32 %v5805_v59, %v4846_v2  ;;  %v4900_v2 = vld [vmem:[#allocation3 + $0x140] sm:$0xf] }
  0x71   : > { %1441 = vmatpush.bf16.msra.mxu3 %v4697_v8  ;;  %v5780_v8 = vld [vmem:[#allocation3 + $0x604] sm:$0xf0]  ;;  %v4813_v34 = vor.u32 %v5798_v23, %v4812_v27  ;;  %v4769_v27 = vor.u32 %v5785_v31, %v4766_v42  ;;  %v4830_v23 = vld [vmem:[#allocation3 + $0x6b8] sm:$0xf0]  ;;  %v5834_v31 = vld [vmem:[#allocation3 + $0x1b4] sm:$0xf0] }
  0x72   : > { %1670 = vmatpush.bf16.msra.mxu0 %v4757_v3  ;;  %v4741_v47 = vor.u32 %v5780_v8, %v4740_v45  ;;  %v4774_v3 = vld [vmem:[#allocation3 + $0x648] sm:$0xf0]  ;;  %v526_v45 = vld [vmem:[#allocation2 + $0x78] sm:$0x11]  ;;  %v4916_v8 = vld [vmem:[#allocation3 + $0x160] sm:$0xf] }
  0x73   : > { %1699 = vmatpush.bf16.msra.mxu1 %v4821_v33  ;;  %v5801_v33 = vld [vmem:[#allocation3 + $0x6b4] sm:$0xf]  ;;  %v4750_v42 = vld [vmem:[#allocation3 + $0x618] sm:$0xf0] }
  0x74   : > { %1413 = vmatpush.bf16.msra.mxu2 %v4625_v20  ;;  %v4793_v20 = vor.u32 %v5791_v19, %v4790_v36  ;;  %v5822_v36 = vld [vmem:[#allocation3 + $0x154] sm:$0xf0] }
  0x75   : > { %1442 = vmatpush.bf16.msra.mxu3 %v4689_v9  ;;  %v5787_v9 = vld [vmem:[#allocation3 + $0x644] sm:$0xf] }
  0x76   : > { %1671 = vmatpush.bf16.msra.mxu0 %v4749_v43  ;;  %v4777_v7 = vor.u32 %v5787_v9, %v4774_v3  ;;  %v5820_v9 = vld [vmem:[#allocation3 + $0x144] sm:$0xf0]  ;;  %v4964_v3 = vld [vmem:[#allocation3 + $0x1c0] sm:$0xf] }
  0x77   : > { %1700 = vmatpush.bf16.msra.mxu1 %v4813_v34  ;;  %v5824_v34 = vld [vmem:[#allocation3 + $0x164] sm:$0xf0] }
  0x78   : > { %1414 = vmatpush.bf16.msra.mxu2 %v4617_v39 }
  0x79   : > { %1443 = vmatpush.bf16.msra.mxu3 %v4681_v30  ;;  %v5842_v30 = vld [vmem:[#allocation3 + $0x1f4] sm:$0xf0] }
  0x7a   : > { %1672 = vmatpush.bf16.msra.mxu0 %v4741_v47  ;;  %v4989_v43 = vor.u32 %v5842_v30, %v4988_v14  ;;  %v4980_v47 = vld [vmem:[#allocation3 + $0x1e0] sm:$0xf]  ;;  %v4956_v30 = vld [vmem:[#allocation3 + $0x1b0] sm:$0xf] }
  0x7b   : > { %1130 = vmatmul.bf16.gmra.mxu2 %v6467_v50  ;;  %1701 = vmatpush.bf16.msra.mxu1 %v4805_v28  ;;  %v4857_v50 = vor.u32 %v5807_v35, %v4854_v60  ;;  %v4758_v28 = vld [vmem:[#allocation3 + $0x628] sm:$0xf0]  ;;  %v4981_v32 = vor.u32 %v5840_v48, %v4980_v47  ;;  %v5838_v35 = vld [vmem:[#allocation3 + $0x1d4] sm:$0xf0]  ;;  %v4909_v60 = vor.u32 %v5822_v36, %v4908_v13  ;;  %v5832_v48 = vld [vmem:[#allocation3 + $0x1a4] sm:$0xf0] }
  0x7c   : > { %1367 = vmatmul.bf16.gmra.mxu0 %v6630_v57  ;;  %1723 = vmatpush.bf16.msrb.mxu2 %v4801_v6  ;;  %v4761_v29 = vor.u32 %v5783_v53, %v4758_v28  ;;  %v4822_v6 = vld [vmem:[#allocation3 + $0x6a8] sm:$0xf0]  ;;  %v5814_v36 = vld [vmem:[#allocation3 + $0x114] sm:$0xf0] }
  0x7d   : > { %1396 = vmatmul.bf16.gmra.mxu1 %v6636_v56  ;;  %1752 = vmatpush.bf16.msrb.mxu3 %v4865_v10  ;;  %v4825_v19 = vor.u32 %v5799_v41, %v4822_v6  ;;  %v4972_v10 = vld [vmem:[#allocation3 + $0x1d0] sm:$0xf]  ;;  %v5795_v41 = vld [vmem:[#allocation3 + $0x684] sm:$0xf]  ;;  %v4806_v13 = vld [vmem:[#allocation3 + $0x688] sm:$0xf0] }
  0x7e   : > { %1159 = vmatmul.bf16.gmra.mxu3 %v6485_v58  ;;  %v5789_v58 = vld [vmem:[#allocation3 + $0x654] sm:$0xf] }
  0x7f   : > { %v4785_v62 = vor.u32 %v5789_v58, %v4782_v54  ;;  %2194 = vmatpush.bf16.msrb.mxu1 %v4989_v43  ;;  %v534_v58 = vld [vmem:[#allocation2 + $0x50] sm:$0x11]  ;;  %v537_v54 = vld [vmem:[#allocation2 + $0x80] sm:$0x11] }
  0x80   : > { %1724 = vmatpush.bf16.msrb.mxu2 %v4793_v20  ;;  %v4973_v20 = vor.u32 %v5838_v35, %v4972_v10  ;;  %v535_v59 = vsel %vm6396_vm15, 0, %v534_v58  ;;  %v4809_v10 = vor.u32 %v5795_v41, %v4806_v13  ;;  %v546_v41 = vld [vmem:[#allocation2 + $0x98] sm:$0x11] }
  0x81   : > { %1753 = vmatpush.bf16.msrb.mxu3 %v4857_v50  ;;  %v527_v50 = vsel %vm6365_vm10, 0, %v526_v45  ;;  %536 = vst [vmem:[#allocation2 + $0x50] sm:$0x11] %v535_v59  ;;  %v547_v13 = vsel %vm6396_vm15, 0, %v546_v41  ;;  %v5837_v41 = vld [vmem:[#allocation3 + $0x1d4] sm:$0xf] }
  0x82   : > { %528 = vst [vmem:[#allocation2 + $0x78] sm:$0x11] %v527_v50 }
  0x83   : > { %2195 = vmatpush.bf16.msrb.mxu1 %v4981_v32  ;;  %v5779_v32 = vld [vmem:[#allocation3 + $0x604] sm:$0xf]  ;;  %548 = vst [vmem:[#allocation2 + $0x98] sm:$0x11] %v547_v13  ;;  %v1846_v13 = vshll.u32 %v6535_v26, 16 }
  0x84   : > { %1725 = vmatpush.bf16.msrb.mxu2 %v4785_v62  ;;  %v538_v62 = vsel %vm6396_vm15, 0, %v537_v54  ;;  %v540_v54 = vld [vmem:[#allocation2 + $0x18] sm:$0x11] }
  0x85   : > { %1754 = vmatpush.bf16.msrb.mxu3 %v4849_v4  ;;  %539 = vst [vmem:[#allocation2 + $0x80] sm:$0x11] %v538_v62  ;;  %v4901_v4 = vor.u32 %v5820_v9, %v4900_v2  ;;  %v541_v62 = vsel %vm6396_vm15, 0, %v540_v54  ;;  %v543_v9 = vld [vmem:[#allocation2 + $0x20] sm:$0x11] }
  0x86   : > { %542 = vst [vmem:[#allocation2 + $0x18] sm:$0x11] %v541_v62  ;;  %v4918_v54 = vld [vmem:[#allocation3 + $0x168] sm:$0xf0] }
  0x87   : > { %2196 = vmatpush.bf16.msrb.mxu1 %v4973_v20  ;;  %v5830_v20 = vld [vmem:[#allocation3 + $0x194] sm:$0xf0] }
  0x88   : > { %1726 = vmatpush.bf16.msrb.mxu2 %v4777_v7  ;;  %v579_v7 = vrot.slane %v6400_v46, 4  ;;  %v5781_v46 = vld [vmem:[#allocation3 + $0x614] sm:$0xf] }
  0x89   : > { %v4753_v43 = vor.u32 %v5781_v46, %v4750_v42  ;;  %v734_v53 = vld [vmem:[#allocation2 + $0x50] sm:$0x11] }
  0x8a   : > { %v735_v50 = vsel %vm6365_vm10, 0, %v734_v53 }
  0x8b   : > { %1135 = vmatmul.bf16.gmra.mxu2 %v6570_v25  ;;  %v4841_v25 = vor.u32 %v5803_v22, %v4838_v5  ;;  %v5836_v22 = vld [vmem:[#allocation3 + $0x1c4] sm:$0xf0]  ;;  %736 = vst [vmem:[#allocation2 + $0x50] sm:$0x11] %v735_v50 }
  0x8c   : > { %1372 = vmatmul.bf16.gmra.mxu0 %v6565_v16  ;;  %1727 = vmatpush.bf16.msrb.mxu2 %v4769_v27  ;;  %v4965_v5 = vor.u32 %v5836_v22, %v4964_v3  ;;  %v5797_v27 = vld [vmem:[#allocation3 + $0x694] sm:$0xf]  ;;  %v661_v45 = vld [vmem:[#allocation2 + $0x80] sm:$0x11]  ;;  %v5812_v22 = vld [vmem:[#allocation3 + $0x104] sm:$0xf0] }
  0x8d   : > { %1401 = vmatmul.bf16.gmra.mxu1 %v6580_v24  ;;  %1755 = vmatpush.bf16.msrb.mxu3 %v4841_v25  ;;  %v763_v25 = vld [vmem:[#allocation2 + $0x78] sm:$0xff]  ;;  %v662_v47 = vsel %vm6365_vm10, %v579_v7, %v661_v45 }
  0x8e   : > { %1164 = vmatmul.bf16.gmra.mxu3 %v6584_v38  ;;  %v4924_v38 = vld [vmem:[#allocation3 + $0x170] sm:$0xf]  ;;  %2197 = vmatpush.bf16.msrb.mxu1 %v4965_v5  ;;  %v6662_v14 = vsel %vm6416_vm0, 0, %v763_v25  ;;  %663 = vst [vmem:[#allocation2 + $0x80] sm:$0x11] %v662_v47 }
  0x8f   : > { %v4925_v39 = vor.u32 %v5826_v12, %v4924_v38  ;;  %v4892_v38 = vld [vmem:[#allocation3 + $0x130] sm:$0xf]  ;;  %v5818_v12 = vld [vmem:[#allocation3 + $0x134] sm:$0xf0]  ;;  %765 = vst [vmem:[#allocation2 + $0x78] sm:$0xff] %v6662_v14  ;;  %v1499_v50 = vunpack.c.l.b16 %v6662_v14 }
  0x90   : > { %1728 = vmatpush.bf16.msrb.mxu2 %v4761_v29  ;;  %v4742_v29 = vld [vmem:[#allocation3 + $0x608] sm:$0xf0]  ;;  %v4932_v5 = vld [vmem:[#allocation3 + $0x180] sm:$0xf]  ;;  %v5828_v25 = vld [vmem:[#allocation3 + $0x184] sm:$0xf0] }
  0x91   : > { %2165 = vmatpush.bf16.msrb.mxu0 %v4925_v39  ;;  %v4893_v39 = vor.u32 %v5818_v12, %v4892_v38  ;;  %v4745_v6 = vor.u32 %v5779_v32, %v4742_v29  ;;  %v4933_v38 = vor.u32 %v5828_v25, %v4932_v5  ;;  %v544_v12 = vsel %vm6396_vm15, 0, %v543_v9 }
  0x92   : > { %545 = vst [vmem:[#allocation2 + $0x20] sm:$0x11] %v544_v12  ;;  %v1500_v9 = vunpack.c.h.b16 %v6662_v14  ;;  %v770_v5 = vld [vmem:[#allocation2 + $0x50] sm:$0x11]  ;;  %v7684_v14 = vunpack.c.h.b16 %v6557_v55 }
  0x94   : > { %1729 = vmatpush.bf16.msrb.mxu2 %v4753_v43  ;;  %v4926_v43 = vld [vmem:[#allocation3 + $0x178] sm:$0xf0] }
  0x98   : > { %1730 = vmatpush.bf16.msrb.mxu2 %v4745_v6 }
  0x99   : > { %v673_v29 = vld [vmem:[#allocation2 + $0x20] sm:$0x11] }
  0x9b   : > { %1415 = vmatmul.bf16.vlgmr.msra.gmra.mxu2 %v6600_v15  ;;  %v4833_v15 = vor.u32 %v5801_v33, %v4830_v23  ;;  %v4957_v33 = vor.u32 %v5834_v31, %v4956_v30  ;;  %v4814_v23 = vld [vmem:[#allocation3 + $0x698] sm:$0xf0]  ;;  %v587_v30 = vrot.slane %v6406_v51, 4 }
  0x9c   : > { %1673 = vmatmul.bf16.vlgmr.msra.gmra.mxu0 %v6614_v49 }
  0x9d   : > { %1702 = vmatmul.bf16.vlgmr.msra.gmra.mxu1 %v6620_v37  ;;  %1756 = vmatpush.bf16.msrb.mxu3 %v4833_v15  ;;  %v4817_v15 = vor.u32 %v5797_v27, %v4814_v23  ;;  %v5841_v27 = vld [vmem:[#allocation3 + $0x1f4] sm:$0xf] }
  0x9e   : > { %1444 = vmatmul.bf16.vlgmr.msra.gmra.mxu3 %v6604_v21  ;;  %v4917_v21 = vor.u32 %v5824_v34, %v4916_v8  ;;  %2198 = vmatpush.bf16.msrb.mxu1 %v4957_v33  ;;  %v5816_v8 = vld [vmem:[#allocation3 + $0x124] sm:$0xf0]  ;;  %v4948_v34 = vld [vmem:[#allocation3 + $0x1a0] sm:$0xf]  ;;  %v5825_v33 = vld [vmem:[#allocation3 + $0x174] sm:$0xf] }
  0x9f   : > { %v4949_v28 = vor.u32 %v5832_v48, %v4948_v34  ;;  %v6093_v23 = vld [vmem:[#allocation2 + $0x70] sm:$0xff]  ;;  %v4929_v51 = vor.u32 %v5825_v33, %v4926_v43  ;;  %v4990_v34 = vld [vmem:[#allocation3 + $0x1f8] sm:$0xf0]  ;;  %v1804_v48 = vshll.u32 %v6593_v17, 16  ;;  %v6709_v43 = vpack.c.b16 %v1500_v9, %v7684_v14 }
  0xa0   : > { %2166 = vmatpush.bf16.msrb.mxu0 %v4917_v21  ;;  %v4885_v21 = vor.u32 %v5816_v8, %v4884_v63  ;;  %v1815_v45 = vshrl.u32 %v6093_v23, 16  ;;  %v595_v63 = vrot.slane %v6512_v44, 4  ;;  %v4993_v53 = vor.u32 %v5841_v27, %v4990_v34 }
  0xa1   : > { %1757 = vmatpush.bf16.msrb.mxu3 %v4825_v19  ;;  %v4876_v19 = vld [vmem:[#allocation3 + $0x110] sm:$0xf]  ;;  %2223 = vmatpush.bf16.msra.mxu2 %v4929_v51  ;;  %v1810_v27 = vshll.u32 %v770_v5, 16 }
  0xa2   : > { %2199 = vmatpush.bf16.msrb.mxu1 %v4949_v28  ;;  %v4877_v35 = vor.u32 %v5814_v36, %v4876_v19  ;;  %v667_v28 = vld [vmem:[#allocation2 + $0x18] sm:$0x11]  ;;  %v1817_v44 = vrot.slane %v1815_v45, 4  ;;  %v674_v6 = vsel %vm6365_vm10, %v595_v63, %v673_v29  ;;  %v549_v19 = vld [vmem:[#allocation2 + $0x28] sm:$0x11]  ;;  %v611_v45 = vrot.slane %v6420_v0, 4 }
  0xa3   : > { %v668_v32 = vsel %vm6365_vm10, %v587_v30, %v667_v28  ;;  %675 = vst [vmem:[#allocation2 + $0x20] sm:$0x11] %v674_v6  ;;  %v1812_v34 = vrot.slane %v1810_v27, 5  ;;  %v4910_v0 = vld [vmem:[#allocation3 + $0x158] sm:$0xf0]  ;;  %v1843_v6 = vshrl.u32 %v6535_v26, 16 }
  0xa4   : > { %2167 = vmatpush.bf16.msrb.mxu0 %v4909_v60  ;;  %v4940_v60 = vld [vmem:[#allocation3 + $0x190] sm:$0xf]  ;;  %669 = vst [vmem:[#allocation2 + $0x18] sm:$0x11] %v668_v32 }
  0xa5   : > { %1758 = vmatpush.bf16.msrb.mxu3 %v4817_v15  ;;  %v4941_v58 = vor.u32 %v5830_v20, %v4940_v60  ;;  %v1818_v15 = vshll.u32 %v6093_v23, 16  ;;  %v550_v60 = vsel %vm6396_vm15, 0, %v549_v19  ;;  %v1845_v5 = vrot.slane %v1843_v6, 4 }
  0xa6   : > { %551 = vst [vmem:[#allocation2 + $0x28] sm:$0x11] %v550_v60 }
  0xa7   : > { %2200 = vmatpush.bf16.msrb.mxu1 %v4941_v58  ;;  %v1820_v36 = vrot.slane %v1818_v15, 5  ;;  %v5823_v58 = vld [vmem:[#allocation3 + $0x164] sm:$0xf] }
  0xa8   : > { %2168 = vmatpush.bf16.msrb.mxu0 %v4901_v4  ;;  %v4868_v4 = vld [vmem:[#allocation3 + $0x100] sm:$0xf] }
  0xa9   : > { %1759 = vmatpush.bf16.msrb.mxu3 %v4809_v10  ;;  %v4869_v7 = vor.u32 %v5812_v22, %v4868_v4  ;;  %v4921_v4 = vor.u32 %v5823_v58, %v4918_v54  ;;  %v4982_v22 = vld [vmem:[#allocation3 + $0x1e8] sm:$0xf0]  ;;  %v552_v54 = vld [vmem:[#allocation2 + $0x40] sm:$0x11] }
  0xab   : > { %1420 = vmatmul.bf16.gmra.mxu2 %v6614_v49  ;;  %2201 = vmatpush.bf16.msrb.mxu1 %v4933_v38  ;;  %v603_v38 = vrot.slane %v6515_v52, 4  ;;  %v6094_v52 = vld [vmem:[#allocation2 + $0x8] sm:$0xff] }
  0xac   : > { %1678 = vmatmul.bf16.gmra.mxu0 %v6630_v57  ;;  %2224 = vmatpush.bf16.msra.mxu2 %v4921_v4  ;;  %v1829_v15 = vshrl.u32 %v6094_v52, 16  ;;  %v1832_v63 = vshll.u32 %v6094_v52, 16  ;;  %v553_v4 = vsel %vm6396_vm15, 0, %v552_v54  ;;  %v4966_v52 = vld [vmem:[#allocation3 + $0x1c8] sm:$0xf0] }
  0xad   : > { %1707 = vmatmul.bf16.gmra.mxu1 %v6636_v56  ;;  %2169 = vmatpush.bf16.msrb.mxu0 %v4893_v39  ;;  %554 = vst [vmem:[#allocation2 + $0x40] sm:$0x11] %v553_v4  ;;  %v4894_v4 = vld [vmem:[#allocation3 + $0x138] sm:$0xf0] }
  0xae   : > { %1449 = vmatmul.bf16.gmra.mxu3 %v6620_v37  ;;  %v1834_v9 = vrot.slane %v1832_v63, 5 }
  0xaf   : > { %2252 = vmatpush.bf16.msra.mxu3 %v4993_v53 }
  0xb1   : > { %2170 = vmatpush.bf16.msrb.mxu0 %v4885_v21  ;;  %v1801_v21 = vshrl.u32 %v6593_v17, 16 }
  0xb3   : > { %v1803_v10 = vrot.slane %v1801_v21, 4 }
  0xb5   : > { %2171 = vmatpush.bf16.msrb.mxu0 %v4877_v35  ;;  %v1806_v35 = vrot.slane %v1804_v48, 5  ;;  %v5821_v48 = vld [vmem:[#allocation3 + $0x154] sm:$0xf] }
  0xb6   : > { %v4913_v29 = vor.u32 %v5821_v48, %v4910_v0 }
  0xb8   : > { %v1063_v59 = vpop.f32.mrf.mxu0  ;;  %2225 = vmatpush.bf16.msra.mxu2 %v4913_v29 }
  0xb9   : > { %v1092_v2 = vpop.f32.mrf.mxu1  ;;  %2172 = vmatpush.bf16.msrb.mxu0 %v4869_v7  ;;  %v772_v7 = vld [vmem:[#allocation2 + $0x80] sm:$0x11] }
  0xba   : > { %v6672_v3 = vadd.f32 %v1092_v2, %v1063_v59  ;;  %v5839_v59 = vld [vmem:[#allocation3 + $0x1e4] sm:$0xf]  ;;  %v1824_v23 = vshll.u32 %v772_v7, 16  ;;  %v1848_v7 = vrot.slane %v1846_v13, 5 }
  0xbb   : > { %1425 = vmatmul.bf16.gmra.mxu2 %v6630_v57  ;;  %v4985_v25 = vor.u32 %v5839_v59, %v4982_v22  ;;  %v555_v59 = vld [vmem:[#allocation2 + $0x90] sm:$0x11] }
  0xbc   : > { %1683 = vmatmul.bf16.gmra.mxu0 %v6565_v16  ;;  %v1826_v21 = vrot.slane %v1824_v23, 5  ;;  %v556_v22 = vsel %vm6396_vm15, 0, %v555_v59  ;;  %v776_v23 = vld [vmem:[#allocation2 + $0x20] sm:$0x11]  ;;  %v1849_v0 = vor.u32 %v1848_v7, %v1845_v5 }
  0xbd   : > { %1712 = vmatmul.bf16.gmra.mxu1 %v6580_v24  ;;  %2253 = vmatpush.bf16.msra.mxu3 %v4985_v25  ;;  %v774_v25 = vld [vmem:[#allocation2 + $0x18] sm:$0x11]  ;;  %557 = vst [vmem:[#allocation2 + $0x90] sm:$0x11] %v556_v22  ;;  %v5833_v22 = vld [vmem:[#allocation3 + $0x1b4] sm:$0xf] }
  0xbe   : > { %v1073_v39 = vpop.f32.mrf.mxu2  ;;  %1454 = vmatmul.bf16.gmra.mxu3 %v6636_v56  ;;  %v6096_v7 = vld [vmem:[#allocation2 + $0x60] sm:$0xff] }
  0xc0   : > { %v1065_v42 = vpop.f32.mrf.mxu0 }
  0xc1   : > { %v1102_v31 = vpop.f32.mrf.mxu3  ;;  %v1094_v8 = vpop.f32.mrf.mxu1 }
  0xc2   : > { %v6681_v46 = vadd.f32 %v1102_v31, %v1073_v39  ;;  %v6684_v47 = vadd.f32 %v1094_v8, %v1065_v42  ;;  %v7683_v39 = vunpack.c.l.b16 %v6557_v55  ;;  %v1807_v31 = vor.u32 %v1806_v35, %v1803_v10  ;;  %v679_v55 = vld [vmem:[#allocation2 + $0x98] sm:$0x11]  ;;  %v685_v10 = vld [vmem:[#allocation2 + $0x28] sm:$0x11] }
  0xc3   : > { %v1821_v42 = vor.u32 %v1820_v36, %v1817_v44  ;;  %v680_v53 = vsel %vm6365_vm10, %v603_v38, %v679_v55  ;;  %v4974_v44 = vld [vmem:[#allocation3 + $0x1d8] sm:$0xf0]  ;;  %v686_v26 = vsel %vm6365_vm10, %v611_v45, %v685_v10  ;;  %v619_v55 = vrot.slane %v6422_v1, 4  ;;  %v691_v10 = vld [vmem:[#allocation2 + $0x40] sm:$0x11] }
  0xc4   : > { %v6703_v30 = vpack.c.b16 %v1499_v50, %v7683_v39  ;;  %v1808_v8 = vrot.slane %v1807_v31, 4  ;;  %681 = vst [vmem:[#allocation2 + $0x98] sm:$0x11] %v680_v53  ;;  %v5819_v39 = vld [vmem:[#allocation3 + $0x144] sm:$0xf]  ;;  %v1852_v53 = vshll.u32 %v776_v23, 16 }
  0xc5   : > { %v1822_v51 = vrot.slane %v1821_v42, 4  ;;  %687 = vst [vmem:[#allocation2 + $0x28] sm:$0x11] %v686_v26  ;;  %v4902_v31 = vld [vmem:[#allocation3 + $0x148] sm:$0xf0]  ;;  %v627_v1 = vrot.slane %v6522_v61, 4  ;;  %v692_v54 = vsel %vm6365_vm10, %v619_v55, %v691_v10 }
  0xc6   : > { %v1075_v17 = vpop.f32.mrf.mxu2  ;;  %v1813_v50 = vsel %vm6720_vm3, %v1808_v8, %v1812_v34  ;;  %v5835_v42 = vld [vmem:[#allocation3 + $0x1c4] sm:$0xf]  ;;  %v4905_v45 = vor.u32 %v5819_v39, %v4902_v31  ;;  %v1838_v8 = vshll.u32 %v774_v25, 16  ;;  %v5116_v26 = vld [vmem:[#allocation3 + $0x4f0] sm:$0xf]  ;;  %v1850_v61 = vrot.slane %v1849_v0, 4 }
  0xc7   : > { %v6734_v58 = vsel %vm6720_vm3, %v1822_v51, %v1826_v21  ;;  %v1973_v38 = vunpack.c.l.b16 %v1813_v50  ;;  %v1974_v14 = vunpack.c.h.b16 %v1813_v50  ;;  %v4969_v51 = vor.u32 %v5835_v42, %v4966_v52  ;;  %v5858_v50 = vld [vmem:[#allocation3 + $0x474] sm:$0xf0]  ;;  %693 = vst [vmem:[#allocation2 + $0x40] sm:$0x11] %v692_v54  ;;  %v4958_v42 = vld [vmem:[#allocation3 + $0x1b8] sm:$0xf0] }
  0xc8   : > { %v1068_v2 = vpop.f32.mrf.mxu0  ;;  %v1976_v27 = vunpack.c.h.b16 %v6734_v58  ;;  %2226 = vmatpush.bf16.msra.mxu2 %v4905_v45  ;;  %v1857_v25 = vshrl.u32 %v6096_v7, 16  ;;  %v4961_v45 = vor.u32 %v5833_v22, %v4958_v42  ;;  %v5044_v52 = vld [vmem:[#allocation3 + $0x460] sm:$0xf]  ;;  %v5872_v0 = vld [vmem:[#allocation3 + $0x4e4] sm:$0xf0] }
  0xc9   : > { %v1104_v20 = vpop.f32.mrf.mxu3  ;;  %v1097_v12 = vpop.f32.mrf.mxu1  ;;  %v5854_v54 = vld [vmem:[#allocation3 + $0x454] sm:$0xf0] }
  0xca   : > { %v6697_v62 = vadd.f32 %v1104_v20, %v1075_v17  ;;  %v6705_v33 = vadd.f32 %v1097_v12, %v1068_v2  ;;  %v4977_v17 = vor.u32 %v5837_v41, %v4974_v44  ;;  %v1831_v2 = vrot.slane %v1829_v15, 4 }
  0xcb   : > { %1430 = vmatmul.bf16.gmra.mxu2 %v6565_v16  ;;  %v1975_v12 = vunpack.c.l.b16 %v6734_v58  ;;  %v6753_v6 = vpack.c.b16 %v1976_v27, %v1974_v14 }
  0xcc   : > { %1688 = vmatmul.bf16.gmra.mxu0 %v6703_v30  ;;  %2254 = vmatpush.bf16.msra.mxu3 %v4977_v17  ;;  %v1835_v63 = vor.u32 %v1834_v9, %v1831_v2  ;;  %v1840_v17 = vrot.slane %v1838_v8, 5  ;;  %v5874_v9 = vld [vmem:[#allocation3 + $0x4f4] sm:$0xf0] }
  0xcd   : > { %1717 = vmatmul.bf16.gmra.mxu1 %v6709_v43  ;;  %v6749_v48 = vpack.c.b16 %v1975_v12, %v1973_v38  ;;  %v5117_v5 = vor.u32 %v5874_v9, %v5116_v26  ;;  %v1860_v38 = vshll.u32 %v6096_v7, 16  ;;  %v5036_v26 = vld [vmem:[#allocation3 + $0x450] sm:$0xf]  ;;  %v5870_v7 = vld [vmem:[#allocation3 + $0x4d4] sm:$0xf0] }
  0xce   : > { %1459 = vmatmul.bf16.gmra.mxu3 %v6580_v24  ;;  %v1078_v28 = vpop.f32.mrf.mxu2  ;;  %v5037_v9 = vor.u32 %v5854_v54, %v5036_v26 }
  0xcf   : > { %2537 = vmatpush.bf16.msra.mxu1 %v5117_v5  ;;  %v4950_v5 = vld [vmem:[#allocation3 + $0x1a8] sm:$0xf0] }
  0xd0   : > { %v1070_v36 = vpop.f32.mrf.mxu0  ;;  %2255 = vmatpush.bf16.msra.mxu3 %v4969_v51 }
  0xd1   : > { %v1107_v19 = vpop.f32.mrf.mxu3  ;;  %v1099_v60 = vpop.f32.mrf.mxu1 }
  0xd2   : > { %v6726_v35 = vadd.f32 %v1107_v19, %v1078_v28  ;;  %v6728_v20 = vadd.f32 %v1099_v60, %v1070_v36  ;;  %v6095_v28 = vld [vmem:[#allocation2 + $0x38] sm:$0xff]  ;;  %v1836_v36 = vrot.slane %v1835_v63, 4  ;;  %v5052_v60 = vld [vmem:[#allocation3 + $0x470] sm:$0xf]  ;;  %v5108_v63 = vld [vmem:[#allocation3 + $0x4e0] sm:$0xf] }
  0xd3   : > { %v1871_v29 = vshrl.u32 %v6095_v28, 16  ;;  %v1874_v41 = vshll.u32 %v6095_v28, 16  ;;  %v5053_v2 = vor.u32 %v5858_v50, %v5052_v60  ;;  %v778_v50 = vld [vmem:[#allocation2 + $0x98] sm:$0x11] }
  0xd4   : > { %v6767_v23 = vsel %vm6720_vm3, %v1836_v36, %v1840_v17  ;;  %2256 = vmatpush.bf16.msra.mxu3 %v4961_v45  ;;  %v1862_v36 = vrot.slane %v1860_v38, 5  ;;  %v5028_v45 = vld [vmem:[#allocation3 + $0x440] sm:$0xf] }
  0xd5   : > { %2508 = vmatpush.bf16.msra.mxu0 %v5053_v2  ;;  %v1977_v10 = vunpack.c.l.b16 %v6767_v23  ;;  %v4886_v2 = vld [vmem:[#allocation3 + $0x128] sm:$0xf0] }
  0xd6   : > { %v1080_v15 = vpop.f32.mrf.mxu2 }
  0xd9   : > { %v1109_v34 = vpop.f32.mrf.mxu3  ;;  %v1358_v44 = vpop.f32.mrf.mxu0 }
  0xda   : > { %v6745_v21 = vadd.f32 %v1109_v34, %v1080_v15  ;;  %v1359_v13 = vadd.f32 %v1358_v44, %v6672_v3  ;;  %v1387_v19 = vpop.f32.mrf.mxu1  ;;  %v1854_v3 = vrot.slane %v1852_v53, 5  ;;  %v5856_v15 = vld [vmem:[#allocation3 + $0x464] sm:$0xf0]  ;;  %v1873_v53 = vrot.slane %v1871_v29, 4 }
  0xdb   : > { %1731 = vmatmul.bf16.vlgmr.msrb.gmra.mxu2 %v6614_v49  ;;  %v5817_v49 = vld [vmem:[#allocation3 + $0x134] sm:$0xf]  ;;  %v5045_v34 = vor.u32 %v5856_v15, %v5044_v52  ;;  %v5109_v44 = vor.u32 %v5872_v0, %v5108_v63  ;;  %v5852_v52 = vld [vmem:[#allocation3 + $0x444] sm:$0xf0]  ;;  %v5092_v15 = vld [vmem:[#allocation3 + $0x4c0] sm:$0xf] }
  0xdc   : > { %v6760_v59 = vadd.f32 %v1387_v19, %v1359_v13  ;;  %2173 = vmatmul.bf16.vlgmr.msrb.gmra.mxu0 %v6749_v48  ;;  %v4897_v31 = vor.u32 %v5817_v49, %v4894_v4  ;;  %v6775_v55 = vsel %vm6720_vm3, %v1850_v61, %v1854_v3  ;;  %v1876_v13 = vrot.slane %v1874_v41, 5  ;;  %v5100_v61 = vld [vmem:[#allocation3 + $0x4d0] sm:$0xf]  ;;  %v5815_v3 = vld [vmem:[#allocation3 + $0x124] sm:$0xf] }
  0xdd   : > { %2202 = vmatmul.bf16.vlgmr.msrb.gmra.mxu1 %v6753_v6  ;;  %v1859_v19 = vrot.slane %v1857_v25, 4  ;;  %2509 = vmatpush.bf16.msra.mxu0 %v5045_v34  ;;  %v1979_v60 = vunpack.c.l.b16 %v6775_v55  ;;  %v5831_v41 = vld [vmem:[#allocation3 + $0x1a4] sm:$0xf]  ;;  %v1978_v49 = vunpack.c.h.b16 %v6767_v23  ;;  %v780_v4 = vld [vmem:[#allocation2 + $0x28] sm:$0x11]  ;;  %v4889_v22 = vor.u32 %v5815_v3, %v4886_v2 }
  0xde   : > { %1760 = vmatmul.bf16.vlgmr.msrb.gmra.mxu3 %v6620_v37  ;;  %v1121_v39 = vpop.f32.mrf.mxu2  ;;  %v697_v37 = vld [vmem:[#allocation2 + $0x90] sm:$0x11]  ;;  %2227 = vmatpush.bf16.msra.mxu2 %v4897_v31  ;;  %v4953_v38 = vor.u32 %v5831_v41, %v4950_v5  ;;  %v1880_v34 = vshll.u32 %v780_v4, 16  ;;  %v5029_v0 = vor.u32 %v5852_v52, %v5028_v45  ;;  %v5850_v3 = vld [vmem:[#allocation3 + $0x434] sm:$0xf0] }
  0xdf   : > { %v698_v8 = vsel %vm6365_vm10, %v627_v1, %v697_v37  ;;  %2538 = vmatpush.bf16.msra.mxu1 %v5109_v44  ;;  %v6788_v42 = vpack.c.b16 %v1979_v60, %v1977_v10  ;;  %v1863_v37 = vor.u32 %v1862_v36, %v1859_v19  ;;  %v5813_v5 = vld [vmem:[#allocation3 + $0x114] sm:$0xf] }
  0xe0   : > { %699 = vst [vmem:[#allocation2 + $0x90] sm:$0x11] %v698_v8  ;;  %v1866_v8 = vshll.u32 %v778_v50, 16  ;;  %2257 = vmatpush.bf16.msra.mxu3 %v4953_v38  ;;  %v5849_v23 = vld [vmem:[#allocation3 + $0x434] sm:$0xf] }
  0xe1   : > { %v1150_v14 = vpop.f32.mrf.mxu3  ;;  %v1360_v28 = vpop.f32.mrf.mxu0  ;;  %2510 = vmatpush.bf16.msra.mxu0 %v5037_v9  ;;  %v1864_v26 = vrot.slane %v1863_v37, 4  ;;  %v1882_v9 = vrot.slane %v1880_v34, 5  ;;  %v5076_v34 = vld [vmem:[#allocation3 + $0x4a0] sm:$0xf] }
  0xe2   : > { %v6771_v51 = vadd.f32 %v1150_v14, %v1121_v39  ;;  %v1361_v17 = vadd.f32 %v1360_v28, %v6684_v47  ;;  %v1389_v1 = vpop.f32.mrf.mxu1  ;;  %v1980_v47 = vunpack.c.h.b16 %v6775_v55  ;;  %v5101_v39 = vor.u32 %v5870_v7, %v5100_v61  ;;  %2228 = vmatpush.bf16.msra.mxu2 %v4889_v22  ;;  %v5868_v28 = vld [vmem:[#allocation3 + $0x4c4] sm:$0xf0]  ;;  %v5020_v61 = vld [vmem:[#allocation3 + $0x430] sm:$0xf]  ;;  %v4878_v7 = vld [vmem:[#allocation3 + $0x118] sm:$0xf0] }
  0xe3   : > { %v1877_v14 = vor.u32 %v1876_v13, %v1873_v53  ;;  %v6097_v53 = vld [vmem:[#allocation2 + $0x58] sm:$0xff]  ;;  %v5093_v50 = vor.u32 %v5868_v28, %v5092_v15  ;;  %v1868_v41 = vrot.slane %v1866_v8, 5  ;;  %v5021_v4 = vor.u32 %v5850_v3, %v5020_v61  ;;  %v5084_v22 = vld [vmem:[#allocation3 + $0x4b0] sm:$0xf]  ;;  %v5012_v15 = vld [vmem:[#allocation3 + $0x420] sm:$0xf] }
  0xe4   : > { %v6780_v29 = vadd.f32 %v1389_v1, %v1361_v17  ;;  %2539 = vmatpush.bf16.msra.mxu1 %v5101_v39  ;;  %v6796_v17 = vpack.c.b16 %v1980_v47, %v1978_v49  ;;  %v1885_v13 = vshrl.u32 %v6097_v53, 16  ;;  %v1888_v19 = vshll.u32 %v6097_v53, 16  ;;  %v5848_v8 = vld [vmem:[#allocation3 + $0x424] sm:$0xf0] }
  0xe5   : > { %2511 = vmatpush.bf16.msra.mxu0 %v5029_v0  ;;  %v1878_v54 = vrot.slane %v1877_v14, 4  ;;  %v4881_v37 = vor.u32 %v5813_v5, %v4878_v7  ;;  %v4942_v14 = vld [vmem:[#allocation3 + $0x198] sm:$0xf0]  ;;  %v6809_v28 = vsel %vm6720_vm3, %v1864_v26, %v1868_v41  ;;  %v5013_v53 = vor.u32 %v5848_v8, %v5012_v15  ;;  %v5004_v5 = vld [vmem:[#allocation3 + $0x410] sm:$0xf] }
  0xe6   : > { %v1123_v25 = vpop.f32.mrf.mxu2  ;;  %v1981_v41 = vunpack.c.l.b16 %v6809_v28  ;;  %v5846_v7 = vld [vmem:[#allocation3 + $0x414] sm:$0xf0] }
  0xe7   : > { %2229 = vmatpush.bf16.msra.mxu2 %v4881_v37  ;;  %v784_v37 = vld [vmem:[#allocation2 + $0x90] sm:$0x11] }
  0xe8   : > { %2540 = vmatpush.bf16.msra.mxu1 %v5093_v50  ;;  %v1890_v50 = vrot.slane %v1888_v19, 5  ;;  %v5811_v19 = vld [vmem:[#allocation3 + $0x104] sm:$0xf] }
  0xe9   : > { %v1152_v31 = vpop.f32.mrf.mxu3  ;;  %v1363_v44 = vpop.f32.mrf.mxu0  ;;  %2512 = vmatpush.bf16.msra.mxu0 %v5021_v4 }
  0xea   : > { %v6790_v63 = vadd.f32 %v1152_v31, %v1123_v25  ;;  %v1364_v36 = vadd.f32 %v1363_v44, %v6705_v33  ;;  %v1392_v1 = vpop.f32.mrf.mxu1  ;;  %v5866_v33 = vld [vmem:[#allocation3 + $0x4b4] sm:$0xf0]  ;;  %v6098_v25 = vld [vmem:[#allocation2 + $0x68] sm:$0xff]  ;;  %v6813_v44 = vsel %vm6720_vm3, %v1878_v54, %v1882_v9  ;;  %v782_v9 = vld [vmem:[#allocation2 + $0x40] sm:$0x11] }
  0xeb   : > { %1736 = vmatmul.bf16.gmra.mxu2 %v6630_v57  ;;  %v5829_v57 = vld [vmem:[#allocation3 + $0x194] sm:$0xf]  ;;  %v1899_v38 = vshrl.u32 %v6098_v25, 16  ;;  %v1902_v39 = vshll.u32 %v6098_v25, 16  ;;  %v1983_v54 = vunpack.c.l.b16 %v6813_v44  ;;  %v4870_v25 = vld [vmem:[#allocation3 + $0x108] sm:$0xf0] }
  0xec   : > { %v6800_v2 = vadd.f32 %v1392_v1, %v1364_v36  ;;  %2178 = vmatmul.bf16.gmra.mxu0 %v6788_v42  ;;  %v4945_v52 = vor.u32 %v5829_v57, %v4942_v14  ;;  %v5864_v36 = vld [vmem:[#allocation3 + $0x4a4] sm:$0xf0]  ;;  %v1887_v1 = vrot.slane %v1885_v13, 4  ;;  %v5068_v57 = vld [vmem:[#allocation3 + $0x490] sm:$0xf]  ;;  %v4873_v14 = vor.u32 %v5811_v19, %v4870_v25 }
  0xed   : > { %2207 = vmatmul.bf16.gmra.mxu1 %v6796_v17  ;;  %v1901_v3 = vrot.slane %v1899_v38, 4  ;;  %v1904_v4 = vrot.slane %v1902_v39, 5  ;;  %2513 = vmatpush.bf16.msra.mxu0 %v5013_v53  ;;  %v5077_v26 = vor.u32 %v5864_v36, %v5076_v34  ;;  %v5827_v38 = vld [vmem:[#allocation3 + $0x184] sm:$0xf]  ;;  %v5005_v39 = vor.u32 %v5846_v7, %v5004_v5  ;;  %v5060_v5 = vld [vmem:[#allocation3 + $0x480] sm:$0xf] }
  0xee   : > { %1765 = vmatmul.bf16.gmra.mxu3 %v6636_v56  ;;  %v1126_v31 = vpop.f32.mrf.mxu2  ;;  %v5085_v56 = vor.u32 %v5866_v33, %v5084_v22  ;;  %v6826_v53 = vpack.c.b16 %v1983_v54, %v1981_v41  ;;  %v1891_v36 = vor.u32 %v1890_v50, %v1887_v1  ;;  %2230 = vmatpush.bf16.msra.mxu2 %v4873_v14  ;;  %v1894_v19 = vshll.u32 %v782_v9, 16 }
  0xef   : > { %2258 = vmatpush.bf16.msra.mxu3 %v4945_v52 }
  0xf0   : > { %2541 = vmatpush.bf16.msra.mxu1 %v5085_v56  ;;  %v4934_v56 = vld [vmem:[#allocation3 + $0x188] sm:$0xf0] }
  0xf1   : > { %v1155_v45 = vpop.f32.mrf.mxu3  ;;  %v1365_v61 = vpop.f32.mrf.mxu0  ;;  %v4937_v15 = vor.u32 %v5827_v38, %v4934_v56  ;;  %2514 = vmatpush.bf16.msra.mxu0 %v5005_v39 }
  0xf2   : > { %v6805_v0 = vadd.f32 %v1155_v45, %v1126_v31  ;;  %v1366_v22 = vadd.f32 %v1365_v61, %v6728_v20  ;;  %v1394_v33 = vpop.f32.mrf.mxu1  ;;  %v1982_v20 = vunpack.c.h.b16 %v6809_v28  ;;  %v1984_v31 = vunpack.c.h.b16 %v6813_v44  ;;  %v5862_v45 = vld [vmem:[#allocation3 + $0x494] sm:$0xf0]  ;;  %v5845_v28 = vld [vmem:[#allocation3 + $0x414] sm:$0xf] }
  0xf3   : > { %v5069_v8 = vor.u32 %v5862_v45, %v5068_v57  ;;  %v1905_v61 = vor.u32 %v1904_v4, %v1901_v3  ;;  %2259 = vmatpush.bf16.msra.mxu3 %v4937_v15  ;;  %v5860_v57 = vld [vmem:[#allocation3 + $0x484] sm:$0xf0]  ;;  %v1892_v4 = vrot.slane %v1891_v36, 4  ;;  %v5857_v45 = vld [vmem:[#allocation3 + $0x474] sm:$0xf] }
  0xf4   : > { %v6818_v13 = vadd.f32 %v1394_v33, %v1366_v22  ;;  %2542 = vmatpush.bf16.msra.mxu1 %v5077_v26  ;;  %v4996_v22 = vld [vmem:[#allocation3 + $0x400] sm:$0xf]  ;;  %v5844_v33 = vld [vmem:[#allocation3 + $0x404] sm:$0xf0]  ;;  %v1908_v26 = vshll.u32 %v784_v37, 16  ;;  %v6834_v39 = vpack.c.b16 %v1984_v31, %v1982_v20  ;;  %v5061_v3 = vor.u32 %v5860_v57, %v5060_v5 }
  0xf5   : > { %v4997_v25 = vor.u32 %v5844_v33, %v4996_v22  ;;  %v1896_v37 = vrot.slane %v1894_v19, 5  ;;  %v1906_v14 = vrot.slane %v1905_v61, 4 }
  0xf6   : > { %v1128_v52 = vpop.f32.mrf.mxu2  ;;  %v1910_v56 = vrot.slane %v1908_v26, 5 }
  0xf7   : > { %2515 = vmatpush.bf16.msra.mxu0 %v4997_v25  ;;  %v6847_v33 = vsel %vm6720_vm3, %v1892_v4, %v1896_v37  ;;  %v5871_v4 = vld [vmem:[#allocation3 + $0x4e4] sm:$0xf] }
  0xf8   : > { %2543 = vmatpush.bf16.msra.mxu1 %v5069_v8  ;;  %v6851_v61 = vsel %vm6720_vm3, %v1906_v14, %v1910_v56  ;;  %v1985_v25 = vunpack.c.l.b16 %v6847_v33  ;;  %v5110_v56 = vld [vmem:[#allocation3 + $0x4e8] sm:$0xf0] }
  0xf9   : > { %v1157_v34 = vpop.f32.mrf.mxu3  ;;  %v1368_v38 = vpop.f32.mrf.mxu0  ;;  %v1987_v57 = vunpack.c.l.b16 %v6851_v61 }
  0xfa   : > { %v6828_v7 = vadd.f32 %v1157_v34, %v1128_v52  ;;  %v1369_v1 = vadd.f32 %v1368_v38, %v6681_v46  ;;  %v1397_v50 = vpop.f32.mrf.mxu1  ;;  %v5054_v46 = vld [vmem:[#allocation3 + $0x478] sm:$0xf0]  ;;  %v5873_v52 = vld [vmem:[#allocation3 + $0x4f4] sm:$0xf]  ;;  %v1986_v38 = vunpack.c.h.b16 %v6847_v33 }
  0xfb   : > { %1741 = vmatmul.bf16.gmra.mxu2 %v6565_v16  ;;  %v5057_v8 = vor.u32 %v5857_v45, %v5054_v46  ;;  %v5118_v34 = vld [vmem:[#allocation3 + $0x4f8] sm:$0xf0]  ;;  %v5113_v46 = vor.u32 %v5871_v4, %v5110_v56  ;;  %v558_v56 = vld [vmem:[#allocation2 + $0x48] sm:$0x11] }
  0xfc   : > { %v6838_v9 = vadd.f32 %v1397_v50, %v1369_v1  ;;  %2183 = vmatmul.bf16.gmra.mxu0 %v6826_v53  ;;  %2544 = vmatpush.bf16.msra.mxu1 %v5061_v3  ;;  %v5121_v36 = vor.u32 %v5873_v52, %v5118_v34  ;;  %v1988_v1 = vunpack.c.h.b16 %v6851_v61  ;;  %v5855_v50 = vld [vmem:[#allocation3 + $0x464] sm:$0xf]  ;;  %v5046_v3 = vld [vmem:[#allocation3 + $0x468] sm:$0xf0]  ;;  %v6866_v52 = vpack.c.b16 %v1987_v57, %v1985_v25  ;;  %v5102_v4 = vld [vmem:[#allocation3 + $0x4d8] sm:$0xf0] }
  0xfd   : > { %2212 = vmatmul.bf16.gmra.mxu1 %v6834_v39  ;;  %2566 = vmatpush.bf16.msrb.mxu2 %v5057_v8  ;;  %v5049_v14 = vor.u32 %v5855_v50, %v5046_v3  ;;  %v5182_v33 = vld [vmem:[#allocation3 + $0x778] sm:$0xf0] }
  0xfe   : > { %1770 = vmatmul.bf16.gmra.mxu3 %v6580_v24  ;;  %v1131_v15 = vpop.f32.mrf.mxu2  ;;  %v6872_v8 = vpack.c.b16 %v1988_v1, %v1986_v38  ;;  %v5166_v61 = vld [vmem:[#allocation3 + $0x758] sm:$0xf0] }
  0xff   : > { %2595 = vmatpush.bf16.msrb.mxu3 %v5121_v36 }
 0x101   : > { %v1160_v16 = vpop.f32.mrf.mxu3  ;;  %v1370_v24 = vpop.f32.mrf.mxu0  ;;  %2567 = vmatpush.bf16.msrb.mxu2 %v5049_v14 }
 0x102   : > { %v6843_v22 = vadd.f32 %v1160_v16, %v1131_v15  ;;  %v1371_v5 = vadd.f32 %v1370_v24, %v6697_v62  ;;  %v1399_v19 = vpop.f32.mrf.mxu1  ;;  %v5853_v24 = vld [vmem:[#allocation3 + $0x454] sm:$0xf] }
 0x103   : > { %2596 = vmatpush.bf16.msrb.mxu3 %v5113_v46  ;;  %v559_v46 = vsel %vm6396_vm15, 0, %v558_v56  ;;  %v635_v56 = vrot.slane %v6529_v11, 4 }
 0x104   : > { %v6854_v26 = vadd.f32 %v1399_v19, %v1371_v5  ;;  %v5038_v5 = vld [vmem:[#allocation3 + $0x458] sm:$0xf0]  ;;  %v5869_v19 = vld [vmem:[#allocation3 + $0x4d4] sm:$0xf]  ;;  %560 = vst [vmem:[#allocation2 + $0x48] sm:$0x11] %v559_v46 }
 0x105   : > { %v5041_v3 = vor.u32 %v5853_v24, %v5038_v5  ;;  %v5105_v14 = vor.u32 %v5869_v19, %v5102_v4  ;;  %v5867_v24 = vld [vmem:[#allocation3 + $0x4c4] sm:$0xf] }
 0x106   : > { %v1133_v37 = vpop.f32.mrf.mxu2 }
 0x107   : > { %2568 = vmatpush.bf16.msrb.mxu2 %v5041_v3  ;;  %2597 = vmatpush.bf16.msrb.mxu3 %v5105_v14  ;;  %v6900_v14 = vpack.c.b16 %v1978_v49, %v1976_v27  ;;  %v5906_v27 = vld [vmem:[#allocation3 + $0x7f4] sm:$0xf0]  ;;  %v5865_v49 = vld [vmem:[#allocation3 + $0x4b4] sm:$0xf] }
 0x109   : > { %v1162_v45 = vpop.f32.mrf.mxu3  ;;  %v1373_v15 = vpop.f32.mrf.mxu0 }
 0x10a   : > { %v6860_v62 = vadd.f32 %v1162_v45, %v1133_v37  ;;  %v1374_v34 = vadd.f32 %v1373_v15, %v6726_v35  ;;  %v1402_v16 = vpop.f32.mrf.mxu1 }
 0x10b   : > { %1746 = vmatmul.bf16.gmra.mxu2 %v6703_v30 }
 0x10c   : > { %v6876_v36 = vadd.f32 %v1402_v16, %v1374_v34  ;;  %2188 = vmatmul.bf16.gmra.mxu0 %v6866_v52  ;;  %v5851_v34 = vld [vmem:[#allocation3 + $0x444] sm:$0xf]  ;;  %v5030_v16 = vld [vmem:[#allocation3 + $0x448] sm:$0xf0] }
 0x10d   : > { %2217 = vmatmul.bf16.gmra.mxu1 %v6872_v8  ;;  %v5033_v19 = vor.u32 %v5851_v34, %v5030_v16  ;;  %v5244_v34 = vld [vmem:[#allocation3 + $0x7f0] sm:$0xf] }
 0x10e   : > { %1775 = vmatmul.bf16.gmra.mxu3 %v6709_v43  ;;  %v1136_v50 = vpop.f32.mrf.mxu2 }
 0x10f   : > { %2569 = vmatpush.bf16.msrb.mxu2 %v5033_v19 }
 0x111   : > { %v1165_v37 = vpop.f32.mrf.mxu3  ;;  %v1375_v30 = vpop.f32.mrf.mxu0 }
 0x112   : > { %v6881_v35 = vadd.f32 %v1165_v37, %v1136_v50  ;;  %v1376_v43 = vadd.f32 %v1375_v30, %v6745_v21  ;;  %v1404_v45 = vpop.f32.mrf.mxu1  ;;  %v5094_v50 = vld [vmem:[#allocation3 + $0x4c8] sm:$0xf0]  ;;  %v6892_v21 = vpack.c.b16 %v1977_v10, %v1975_v12  ;;  %v5180_v12 = vld [vmem:[#allocation3 + $0x770] sm:$0xf]  ;;  %v5890_v10 = vld [vmem:[#allocation3 + $0x774] sm:$0xf0] }
 0x113   : > { %v5097_v3 = vor.u32 %v5867_v24, %v5094_v50  ;;  %v5181_v58 = vor.u32 %v5890_v10, %v5180_v12  ;;  %v5245_v24 = vor.u32 %v5906_v27, %v5244_v34  ;;  %v5086_v50 = vld [vmem:[#allocation3 + $0x4b8] sm:$0xf0]  ;;  %v5228_v27 = vld [vmem:[#allocation3 + $0x7d0] sm:$0xf] }
 0x114   : > { %v6886_v15 = vadd.f32 %v1404_v45, %v1376_v43  ;;  %v703_v45 = vld [vmem:[#allocation2 + $0x48] sm:$0x11] }
 0x115   : > { %2598 = vmatpush.bf16.msrb.mxu3 %v5097_v3  ;;  %v704_v16 = vsel %vm6365_vm10, %v635_v56, %v703_v45  ;;  %2839 = vmatpush.bf16.msrb.mxu0 %v5181_v58  ;;  %v5089_v3 = vor.u32 %v5865_v49, %v5086_v50  ;;  %v5888_v56 = vld [vmem:[#allocation3 + $0x764] sm:$0xf0]  ;;  %v5164_v58 = vld [vmem:[#allocation3 + $0x750] sm:$0xf] }
 0x116   : > { %v1138_v5 = vpop.f32.mrf.mxu2  ;;  %705 = vst [vmem:[#allocation2 + $0x48] sm:$0x11] %v704_v16  ;;  %2868 = vmatpush.bf16.msrb.mxu1 %v5245_v24  ;;  %v5904_v45 = vld [vmem:[#allocation3 + $0x7e4] sm:$0xf0]  ;;  %v5847_v24 = vld [vmem:[#allocation3 + $0x424] sm:$0xf] }
 0x119   : > { %v1167_v4 = vpop.f32.mrf.mxu3  ;;  %v1674_v30 = vpop.f32.mrf.mxu0  ;;  %2599 = vmatpush.bf16.msrb.mxu3 %v5089_v3  ;;  %v5078_v3 = vld [vmem:[#allocation3 + $0x4a8] sm:$0xf0] }
 0x11a   : > { %v6894_v37 = vadd.f32 %v1167_v4, %v1138_v5  ;;  %v1703_v43 = vpop.f32.mrf.mxu1 }
 0x11b   : > { %v1704_v46 = vadd.f32 %v1703_v43, %v1674_v30  ;;  %2231 = vmatmul.bf16.vlgmr.msra.gmra.mxu2 %v6749_v48  ;;  %v5022_v48 = vld [vmem:[#allocation3 + $0x438] sm:$0xf0]  ;;  %v5172_v30 = vld [vmem:[#allocation3 + $0x760] sm:$0xf] }
 0x11c   : > { %2516 = vmatmul.bf16.vlgmr.msra.gmra.mxu0 %v6892_v21  ;;  %v5025_v19 = vor.u32 %v5849_v23, %v5022_v48  ;;  %v5236_v43 = vld [vmem:[#allocation3 + $0x7e0] sm:$0xf]  ;;  %v5902_v48 = vld [vmem:[#allocation3 + $0x7d4] sm:$0xf0] }
 0x11d   : > { %v6909_v11 = vadd.f32 %v1704_v46, %v6760_v59  ;;  %2545 = vmatmul.bf16.vlgmr.msra.gmra.mxu1 %v6900_v14  ;;  %v5173_v59 = vor.u32 %v5888_v56, %v5172_v30  ;;  %v5237_v10 = vor.u32 %v5904_v45, %v5236_v43  ;;  %v5229_v50 = vor.u32 %v5902_v48, %v5228_v27  ;;  %v5884_v45 = vld [vmem:[#allocation3 + $0x744] sm:$0xf0]  ;;  %v5212_v48 = vld [vmem:[#allocation3 + $0x7b0] sm:$0xf] }
 0x11e   : > { %2260 = vmatmul.bf16.vlgmr.msra.gmra.mxu3 %v6753_v6  ;;  %v1416_v5 = vpop.f32.mrf.mxu2  ;;  %2570 = vmatpush.bf16.msrb.mxu2 %v5025_v19  ;;  %v5863_v19 = vld [vmem:[#allocation3 + $0x4a4] sm:$0xf] }
 0x11f   : > { %v1417_v6 = vadd.f32 %v1416_v5, %v6771_v51  ;;  %2840 = vmatpush.bf16.msrb.mxu0 %v5173_v59  ;;  %2869 = vmatpush.bf16.msrb.mxu1 %v5237_v10  ;;  %v5886_v51 = vld [vmem:[#allocation3 + $0x754] sm:$0xf0]  ;;  %v5014_v5 = vld [vmem:[#allocation3 + $0x428] sm:$0xf0]  ;;  %v5081_v43 = vor.u32 %v5863_v19, %v5078_v3  ;;  %v5156_v59 = vld [vmem:[#allocation3 + $0x740] sm:$0xf] }
 0x120   : > { %v5165_v23 = vor.u32 %v5886_v51, %v5164_v58  ;;  %v5157_v10 = vor.u32 %v5884_v45, %v5156_v59  ;;  %v5880_v59 = vld [vmem:[#allocation3 + $0x724] sm:$0xf0]  ;;  %v5204_v45 = vld [vmem:[#allocation3 + $0x7a0] sm:$0xf] }
 0x121   : > { %v1445_v4 = vpop.f32.mrf.mxu3  ;;  %v1676_v12 = vpop.f32.mrf.mxu0  ;;  %2600 = vmatpush.bf16.msrb.mxu3 %v5081_v43  ;;  %v5140_v43 = vld [vmem:[#allocation3 + $0x720] sm:$0xf] }
 0x122   : > { %v6913_v46 = vadd.f32 %v1445_v4, %v1417_v6  ;;  %v1705_v34 = vpop.f32.mrf.mxu1  ;;  %v5017_v4 = vor.u32 %v5847_v24, %v5014_v5  ;;  %v5898_v24 = vld [vmem:[#allocation3 + $0x7b4] sm:$0xf0]  ;;  %v5861_v5 = vld [vmem:[#allocation3 + $0x494] sm:$0xf] }
 0x123   : > { %v1706_v16 = vadd.f32 %v1705_v34, %v1676_v12  ;;  %2841 = vmatpush.bf16.msrb.mxu0 %v5165_v23  ;;  %2870 = vmatpush.bf16.msrb.mxu1 %v5229_v50  ;;  %v5220_v12 = vld [vmem:[#allocation3 + $0x7c0] sm:$0xf]  ;;  %v5900_v34 = vld [vmem:[#allocation3 + $0x7c4] sm:$0xf0]  ;;  %v5213_v19 = vor.u32 %v5898_v24, %v5212_v48  ;;  %v5878_v48 = vld [vmem:[#allocation3 + $0x714] sm:$0xf0] }
 0x124   : > { %2571 = vmatpush.bf16.msrb.mxu2 %v5017_v4  ;;  %v5221_v51 = vor.u32 %v5900_v34, %v5220_v12  ;;  %v5070_v4 = vld [vmem:[#allocation3 + $0x498] sm:$0xf0]  ;;  %v5141_v34 = vor.u32 %v5880_v59, %v5140_v43  ;;  %v786_v24 = vld [vmem:[#allocation2 + $0x48] sm:$0x11] }
 0x125   : > { %v6916_v49 = vadd.f32 %v1706_v16, %v6780_v29  ;;  %v6923_v29 = vpack.c.b16 %v1981_v41, %v1979_v60  ;;  %v5148_v60 = vld [vmem:[#allocation3 + $0x730] sm:$0xf]  ;;  %v5882_v41 = vld [vmem:[#allocation3 + $0x734] sm:$0xf0]  ;;  %v5062_v59 = vld [vmem:[#allocation3 + $0x488] sm:$0xf0] }
 0x126   : > { %v1418_v6 = vpop.f32.mrf.mxu2  ;;  %v5149_v55 = vor.u32 %v5882_v41, %v5148_v60  ;;  %v5132_v41 = vld [vmem:[#allocation3 + $0x710] sm:$0xf] }
 0x127   : > { %v1419_v30 = vadd.f32 %v1418_v6, %v6790_v63  ;;  %v6931_v63 = vpack.c.b16 %v1982_v20, %v1980_v47  ;;  %2842 = vmatpush.bf16.msrb.mxu0 %v5157_v10  ;;  %2871 = vmatpush.bf16.msrb.mxu1 %v5221_v51  ;;  %v5006_v20 = vld [vmem:[#allocation3 + $0x418] sm:$0xf0] }
 0x128   : > { %v5009_v6 = vor.u32 %v5845_v28, %v5006_v20 }
 0x129   : > { %v1447_v56 = vpop.f32.mrf.mxu3  ;;  %v1679_v58 = vpop.f32.mrf.mxu0 }
 0x12a   : > { %v6925_v16 = vadd.f32 %v1447_v56, %v1419_v30  ;;  %v1708_v27 = vpop.f32.mrf.mxu1  ;;  %v5073_v56 = vor.u32 %v5861_v5, %v5070_v4  ;;  %2572 = vmatpush.bf16.msrb.mxu2 %v5009_v6  ;;  %v5133_v5 = vor.u32 %v5878_v48, %v5132_v41  ;;  %v5843_v6 = vld [vmem:[#allocation3 + $0x404] sm:$0xf]  ;;  %v4998_v4 = vld [vmem:[#allocation3 + $0x408] sm:$0xf0]  ;;  %v6959_v48 = vpack.c.b16 %v1986_v38, %v1984_v31  ;;  %v5889_v31 = vld [vmem:[#allocation3 + $0x774] sm:$0xf] }
 0x12b   : > { %v1709_v23 = vadd.f32 %v1708_v27, %v1679_v58  ;;  %2236 = vmatmul.bf16.gmra.mxu2 %v6788_v42  ;;  %2843 = vmatpush.bf16.msrb.mxu0 %v5149_v55  ;;  %v5896_v58 = vld [vmem:[#allocation3 + $0x7a4] sm:$0xf0]  ;;  %v5196_v55 = vld [vmem:[#allocation3 + $0x790] sm:$0xf]  ;;  %v5001_v43 = vor.u32 %v5843_v6, %v4998_v4  ;;  %v5905_v38 = vld [vmem:[#allocation3 + $0x7f4] sm:$0xf] }
 0x12c   : > { %2521 = vmatmul.bf16.gmra.mxu0 %v6923_v29  ;;  %2872 = vmatpush.bf16.msrb.mxu1 %v5213_v19  ;;  %v5894_v19 = vld [vmem:[#allocation3 + $0x794] sm:$0xf0] }
 0x12d   : > { %v6937_v47 = vadd.f32 %v1709_v23, %v6800_v2  ;;  %2550 = vmatmul.bf16.gmra.mxu1 %v6931_v63  ;;  %v6099_v2 = vld [vmem:[#allocation2 + $0x10] sm:$0xff]  ;;  %2601 = vmatpush.bf16.msrb.mxu3 %v5073_v56  ;;  %v5205_v23 = vor.u32 %v5896_v58, %v5204_v45  ;;  %v5188_v58 = vld [vmem:[#allocation3 + $0x780] sm:$0xf] }
 0x12e   : > { %2265 = vmatmul.bf16.gmra.mxu3 %v6796_v17  ;;  %v1421_v50 = vpop.f32.mrf.mxu2  ;;  %v1913_v12 = vshrl.u32 %v6099_v2, 16  ;;  %v1916_v10 = vshll.u32 %v6099_v2, 16  ;;  %2573 = vmatpush.bf16.msrb.mxu2 %v5001_v43 }
 0x12f   : > { %v1422_v3 = vadd.f32 %v1421_v50, %v6805_v0  ;;  %2844 = vmatpush.bf16.msrb.mxu0 %v5141_v34 }
 0x130   : > { %2873 = vmatpush.bf16.msrb.mxu1 %v5205_v23  ;;  %v1915_v28 = vrot.slane %v1913_v12, 4  ;;  %v1918_v20 = vrot.slane %v1916_v10, 5  ;;  %v5124_v12 = vld [vmem:[#allocation3 + $0x700] sm:$0xf]  ;;  %v5876_v10 = vld [vmem:[#allocation3 + $0x704] sm:$0xf0] }
 0x131   : > { %v1450_v30 = vpop.f32.mrf.mxu3  ;;  %v1681_v27 = vpop.f32.mrf.mxu0  ;;  %v1922_v23 = vshll.u32 %v786_v24, 16 }
 0x132   : > { %v6941_v51 = vadd.f32 %v1450_v30, %v1422_v3  ;;  %v1710_v60 = vpop.f32.mrf.mxu1  ;;  %v5859_v3 = vld [vmem:[#allocation3 + $0x484] sm:$0xf]  ;;  %v5197_v30 = vor.u32 %v5894_v19, %v5196_v55  ;;  %v5246_v19 = vld [vmem:[#allocation3 + $0x7f8] sm:$0xf0] }
 0x133   : > { %v1711_v0 = vadd.f32 %v1710_v60, %v1681_v27  ;;  %2845 = vmatpush.bf16.msrb.mxu0 %v5133_v5  ;;  %v5065_v34 = vor.u32 %v5859_v3, %v5062_v59  ;;  %v1919_v27 = vor.u32 %v1918_v20, %v1915_v28  ;;  %v5125_v60 = vor.u32 %v5876_v10, %v5124_v12  ;;  %v5174_v12 = vld [vmem:[#allocation3 + $0x768] sm:$0xf0]  ;;  %v5903_v10 = vld [vmem:[#allocation3 + $0x7e4] sm:$0xf] }
 0x134   : > { %2874 = vmatpush.bf16.msrb.mxu1 %v5197_v30  ;;  %v1924_v24 = vrot.slane %v1922_v23, 5  ;;  %v5185_v20 = vor.u32 %v5889_v31, %v5182_v33  ;;  %v5249_v3 = vor.u32 %v5905_v38, %v5246_v19  ;;  %v5238_v23 = vld [vmem:[#allocation3 + $0x7e8] sm:$0xf0]  ;;  %v5901_v31 = vld [vmem:[#allocation3 + $0x7d4] sm:$0xf] }
 0x135   : > { %v6944_v50 = vadd.f32 %v1711_v0, %v6818_v13  ;;  %v6951_v13 = vpack.c.b16 %v1985_v25, %v1983_v54  ;;  %v5892_v0 = vld [vmem:[#allocation3 + $0x784] sm:$0xf0]  ;;  %2602 = vmatpush.bf16.msrb.mxu3 %v5065_v34  ;;  %v1920_v25 = vrot.slane %v1919_v27, 4  ;;  %v5887_v34 = vld [vmem:[#allocation3 + $0x764] sm:$0xf] }
 0x136   : > { %v1423_v56 = vpop.f32.mrf.mxu2  ;;  %v5189_v55 = vor.u32 %v5892_v0, %v5188_v58  ;;  %2897 = vmatpush.bf16.msra.mxu2 %v5185_v20  ;;  %v5177_v27 = vor.u32 %v5887_v34, %v5174_v12  ;;  %v5230_v38 = vld [vmem:[#allocation3 + $0x7d8] sm:$0xf0]  ;;  %v5883_v34 = vld [vmem:[#allocation3 + $0x744] sm:$0xf]  ;;  %v5158_v12 = vld [vmem:[#allocation3 + $0x748] sm:$0xf0] }
 0x137   : > { %v1424_v45 = vadd.f32 %v1423_v56, %v6828_v7  ;;  %2846 = vmatpush.bf16.msrb.mxu0 %v5125_v60  ;;  %v5233_v19 = vor.u32 %v5901_v31, %v5230_v38  ;;  %v5938_v31 = vld [vmem:[#allocation3 + $0x2f4] sm:$0xf0]  ;;  %v5881_v38 = vld [vmem:[#allocation3 + $0x734] sm:$0xf] }
 0x138   : > { %2875 = vmatpush.bf16.msrb.mxu1 %v5189_v55 }
 0x139   : > { %v1452_v2 = vpop.f32.mrf.mxu3  ;;  %v1684_v7 = vpop.f32.mrf.mxu0  ;;  %2926 = vmatpush.bf16.msra.mxu3 %v5249_v3  ;;  %v561_v3 = vld [vmem:[#allocation2 + $0x88] sm:$0x11] }
 0x13a   : > { %v6953_v41 = vadd.f32 %v1452_v2, %v1424_v45  ;;  %v1713_v5 = vpop.f32.mrf.mxu1  ;;  %2898 = vmatpush.bf16.msra.mxu2 %v5177_v27  ;;  %v5222_v27 = vld [vmem:[#allocation3 + $0x7c8] sm:$0xf0] }
 0x13b   : > { %v1714_v54 = vadd.f32 %v1713_v5, %v1684_v7  ;;  %2241 = vmatmul.bf16.gmra.mxu2 %v6826_v53  ;;  %v5241_v7 = vor.u32 %v5903_v10, %v5238_v23 }
 0x13c   : > { %2526 = vmatmul.bf16.gmra.mxu0 %v6951_v13 }
 0x13d   : > { %v6965_v44 = vadd.f32 %v1714_v54, %v6838_v9  ;;  %2555 = vmatmul.bf16.gmra.mxu1 %v6959_v48  ;;  %v6973_v9 = vsel %vm6720_vm3, %v1920_v25, %v1924_v24  ;;  %2927 = vmatpush.bf16.msra.mxu3 %v5241_v7  ;;  %v5885_v24 = vld [vmem:[#allocation3 + $0x754] sm:$0xf] }
 0x13e   : > { %2270 = vmatmul.bf16.gmra.mxu3 %v6834_v39  ;;  %v1426_v28 = vpop.f32.mrf.mxu2  ;;  %v2330_v45 = vunpack.c.l.b16 %v6973_v9 }
 0x13f   : > { %v1427_v6 = vadd.f32 %v1426_v28, %v6843_v22  ;;  %v2331_v22 = vunpack.c.h.b16 %v6973_v9  ;;  %v5917_v9 = vld [vmem:[#allocation3 + $0x254] sm:$0xf] }
 0x140   : > { %v6985_v55 = vpack.c.b16 %v2330_v45, %v1987_v57 }
 0x141   : > { %v1455_v4 = vpop.f32.mrf.mxu3  ;;  %v1686_v56 = vpop.f32.mrf.mxu0  ;;  %v6993_v54 = vpack.c.b16 %v2331_v22, %v1988_v1  ;;  %v5169_v1 = vor.u32 %v5885_v24, %v5166_v61  ;;  %2928 = vmatpush.bf16.msra.mxu3 %v5233_v19  ;;  %v5922_v24 = vld [vmem:[#allocation3 + $0x274] sm:$0xf0]  ;;  %v5382_v61 = vld [vmem:[#allocation3 + $0x2f0] sm:$0xf] }
 0x142   : > { %v6969_v30 = vadd.f32 %v1455_v4, %v1427_v6  ;;  %v1715_v43 = vpop.f32.mrf.mxu1 }
 0x143   : > { %v1716_v59 = vadd.f32 %v1715_v43, %v1686_v56  ;;  %2899 = vmatpush.bf16.msra.mxu2 %v5169_v1  ;;  %v562_v56 = vsel %vm6396_vm15, 0, %v561_v3  ;;  %v5214_v3 = vld [vmem:[#allocation3 + $0x7b8] sm:$0xf0] }
 0x144   : > { %563 = vst [vmem:[#allocation2 + $0x88] sm:$0x11] %v562_v56  ;;  %v5310_v56 = vld [vmem:[#allocation3 + $0x260] sm:$0xf] }
 0x145   : > { %v6977_v2 = vadd.f32 %v1716_v59, %v6854_v26 }
 0x146   : > { %v1428_v58 = vpop.f32.mrf.mxu2 }
 0x147   : > { %v1429_v60 = vadd.f32 %v1428_v58, %v6860_v62  ;;  %v5161_v58 = vor.u32 %v5883_v34, %v5158_v12  ;;  %v5936_v12 = vld [vmem:[#allocation3 + $0x2e4] sm:$0xf0] }
 0x149   : > { %v1457_v0 = vpop.f32.mrf.mxu3  ;;  %v1689_v5 = vpop.f32.mrf.mxu0  ;;  %2900 = vmatpush.bf16.msra.mxu2 %v5161_v58 }
 0x14a   : > { %v6987_v26 = vadd.f32 %v1457_v0, %v1429_v60  ;;  %v1718_v62 = vpop.f32.mrf.mxu1 }
 0x14b   : > { %v1719_v25 = vadd.f32 %v1718_v62, %v1689_v5  ;;  %2246 = vmatmul.bf16.gmra.mxu2 %v6866_v52  ;;  %v766_v62 = vld [vmem:[#allocation2 + $0x88] sm:$0x11] }
 0x14c   : > { %2531 = vmatmul.bf16.gmra.mxu0 %v6985_v55 }
 0x14d   : > { %v6999_v57 = vadd.f32 %v1719_v25, %v6876_v36  ;;  %2560 = vmatmul.bf16.gmra.mxu1 %v6993_v54 }
 0x14e   : > { %2275 = vmatmul.bf16.gmra.mxu3 %v6872_v8  ;;  %v1431_v33 = vpop.f32.mrf.mxu2 }
 0x14f   : > { %v1432_v28 = vadd.f32 %v1431_v33, %v6881_v35  ;;  %v5899_v35 = vld [vmem:[#allocation3 + $0x7c4] sm:$0xf]  ;;  %v767_v33 = vsel %vm6365_vm10, 0, %v766_v62  ;;  %v5934_v62 = vld [vmem:[#allocation3 + $0x2d4] sm:$0xf0] }
 0x150   : > { %v5225_v0 = vor.u32 %v5899_v35, %v5222_v27  ;;  %768 = vst [vmem:[#allocation2 + $0x88] sm:$0x11] %v767_v33 }
 0x151   : > { %v1460_v20 = vpop.f32.mrf.mxu3  ;;  %v1691_v4 = vpop.f32.mrf.mxu0 }
 0x152   : > { %v7003_v6 = vadd.f32 %v1460_v20, %v1432_v28  ;;  %v1720_v36 = vpop.f32.mrf.mxu1  ;;  %2929 = vmatpush.bf16.msra.mxu3 %v5225_v0  ;;  %v5150_v28 = vld [vmem:[#allocation3 + $0x738] sm:$0xf0]  ;;  %v5383_v20 = vor.u32 %v5938_v31, %v5382_v61  ;;  %v5918_v0 = vld [vmem:[#allocation3 + $0x254] sm:$0xf0]  ;;  %v5895_v61 = vld [vmem:[#allocation3 + $0x7a4] sm:$0xf] }
 0x153   : > { %v1721_v43 = vadd.f32 %v1720_v36, %v1691_v4  ;;  %v5153_v4 = vor.u32 %v5881_v38, %v5150_v28 }
 0x154   : > { %3278 = vmatpush.bf16.msra.mxu1 %v5383_v20  ;;  %v5916_v20 = vld [vmem:[#allocation3 + $0x244] sm:$0xf0] }
 0x155   : > { %v7008_v59 = vadd.f32 %v1721_v43, %v6886_v15  ;;  %v5318_v15 = vld [vmem:[#allocation3 + $0x270] sm:$0xf]  ;;  %v5374_v43 = vld [vmem:[#allocation3 + $0x2e0] sm:$0xf]  ;;  %2901 = vmatpush.bf16.msra.mxu2 %v5153_v4 }
 0x156   : > { %v1433_v10 = vpop.f32.mrf.mxu2 }
 0x157   : > { %v1434_v23 = vadd.f32 %v1433_v10, %v6894_v37  ;;  %v5319_v37 = vor.u32 %v5922_v24, %v5318_v15  ;;  %v5375_v10 = vor.u32 %v5936_v12, %v5374_v43  ;;  %v5879_v15 = vld [vmem:[#allocation3 + $0x724] sm:$0xf]  ;;  %v5142_v24 = vld [vmem:[#allocation3 + $0x728] sm:$0xf0]  ;;  %v5350_v12 = vld [vmem:[#allocation3 + $0x2b0] sm:$0xf] }
 0x158   : > { %v5145_v33 = vor.u32 %v5879_v15, %v5142_v24  ;;  %v5912_v24 = vld [vmem:[#allocation3 + $0x224] sm:$0xf0] }
 0x159   : > { %v1462_v60 = vpop.f32.mrf.mxu3  ;;  %v2174_v40 = vpop.f32.mrf.mxu0  ;;  %3249 = vmatpush.bf16.msra.mxu0 %v5319_v37  ;;  %3279 = vmatpush.bf16.msra.mxu1 %v5375_v10  ;;  %v5930_v10 = vld [vmem:[#allocation3 + $0x2b4] sm:$0xf0] }
 0x15a   : > { %v7011_v7 = vadd.f32 %v1462_v60, %v1434_v23  ;;  %v2203_v5 = vpop.f32.mrf.mxu1  ;;  %v5302_v60 = vld [vmem:[#allocation3 + $0x250] sm:$0xf]  ;;  %2902 = vmatpush.bf16.msra.mxu2 %v5145_v33 }
 0x15b   : > { %v2204_v25 = vadd.f32 %v2203_v5, %v2174_v40  ;;  %2574 = vmatmul.bf16.vlgmr.msrb.gmra.mxu2 %v6892_v21  ;;  %v5897_v21 = vld [vmem:[#allocation3 + $0x7b4] sm:$0xf]  ;;  %v5366_v40 = vld [vmem:[#allocation3 + $0x2d0] sm:$0xf]  ;;  %v5303_v5 = vor.u32 %v5918_v0, %v5302_v60  ;;  %v5351_v0 = vor.u32 %v5930_v10, %v5350_v12 }
 0x15c   : > { %2847 = vmatmul.bf16.vlgmr.msrb.gmra.mxu0 %v6788_v42  ;;  %v5217_v36 = vor.u32 %v5897_v21, %v5214_v3  ;;  %v5367_v37 = vor.u32 %v5934_v62, %v5366_v40  ;;  %v5294_v21 = vld [vmem:[#allocation3 + $0x240] sm:$0xf]  ;;  %v5893_v60 = vld [vmem:[#allocation3 + $0x794] sm:$0xf]  ;;  %v5270_v12 = vld [vmem:[#allocation3 + $0x210] sm:$0xf] }
 0x15d   : > { %v7019_v1 = vadd.f32 %v2204_v25, %v6909_v11  ;;  %2876 = vmatmul.bf16.vlgmr.msrb.gmra.mxu1 %v6796_v17  ;;  %v5311_v11 = vor.u32 %v5920_v18, %v5310_v56  ;;  %v5295_v3 = vor.u32 %v5916_v20, %v5294_v21  ;;  %v5334_v10 = vld [vmem:[#allocation3 + $0x290] sm:$0xf] }
 0x15e   : > { %2603 = vmatmul.bf16.vlgmr.msrb.gmra.mxu3 %v6900_v14  ;;  %v1732_v19 = vpop.f32.mrf.mxu2  ;;  %3280 = vmatpush.bf16.msra.mxu1 %v5367_v37 }
 0x15f   : > { %2930 = vmatpush.bf16.msra.mxu3 %v5217_v36  ;;  %3250 = vmatpush.bf16.msra.mxu0 %v5311_v11  ;;  %v5914_v11 = vld [vmem:[#allocation3 + $0x234] sm:$0xf0] }
 0x161   : > { %v1761_v14 = vpop.f32.mrf.mxu3  ;;  %v2176_v35 = vpop.f32.mrf.mxu0 }
 0x162   : > { %v1762_v34 = vadd.f32 %v1761_v14, %v1732_v19  ;;  %v2205_v27 = vpop.f32.mrf.mxu1  ;;  %v5358_v19 = vld [vmem:[#allocation3 + $0x2c0] sm:$0xf]  ;;  %v5932_v14 = vld [vmem:[#allocation3 + $0x2c4] sm:$0xf0] }
 0x163   : > { %v2206_v23 = vadd.f32 %v2205_v27, %v2176_v35  ;;  %3251 = vmatpush.bf16.msra.mxu0 %v5303_v5  ;;  %v5359_v36 = vor.u32 %v5932_v14, %v5358_v19  ;;  %v5198_v5 = vld [vmem:[#allocation3 + $0x798] sm:$0xf0]  ;;  %v6103_v14 = vld [vmem:[#allocation2 + $0x50] sm:$0x11] }
 0x164   : > { %v7023_v58 = vadd.f32 %v1762_v34, %v6913_v46  ;;  %v5206_v46 = vld [vmem:[#allocation3 + $0x7a8] sm:$0xf0]  ;;  %v5286_v34 = vld [vmem:[#allocation3 + $0x230] sm:$0xf]  ;;  %v5201_v15 = vor.u32 %v5893_v60, %v5198_v5  ;;  %v5875_v5 = vld [vmem:[#allocation3 + $0x704] sm:$0xf] }
 0x165   : > { %v7026_v25 = vadd.f32 %v2206_v23, %v6916_v49  ;;  %v5209_v28 = vor.u32 %v5895_v61, %v5206_v46  ;;  %3281 = vmatpush.bf16.msra.mxu1 %v5359_v36  ;;  %v5287_v35 = vor.u32 %v5914_v11, %v5286_v34  ;;  %v5134_v23 = vld [vmem:[#allocation3 + $0x718] sm:$0xf0]  ;;  %v5342_v61 = vld [vmem:[#allocation3 + $0x2a0] sm:$0xf] }
 0x166   : > { %v1734_v31 = vpop.f32.mrf.mxu2  ;;  %v6104_v36 = vld [vmem:[#allocation2 + $0x80] sm:$0x11] }
 0x167   : > { %2931 = vmatpush.bf16.msra.mxu3 %v5209_v28  ;;  %3252 = vmatpush.bf16.msra.mxu0 %v5295_v3  ;;  %v6101_v28 = vld [vmem:[#allocation2 + $0x70] sm:$0xff] }
 0x168   : > { %v5251_v21 = vrot.slane %v6101_v28, 9 }
 0x169   : > { %v1763_v38 = vpop.f32.mrf.mxu3  ;;  %v2179_v49 = vpop.f32.mrf.mxu0  ;;  %3282 = vmatpush.bf16.msra.mxu1 %v5351_v0 }
 0x16a   : > { %v1764_v4 = vadd.f32 %v1763_v38, %v1734_v31  ;;  %v2208_v18 = vpop.f32.mrf.mxu1  ;;  %v6100_v31 = vld [vmem:[#allocation2 + $0x78] sm:$0xff]  ;;  %v5928_v38 = vld [vmem:[#allocation3 + $0x2a4] sm:$0xf0] }
 0x16b   : > { %v2209_v43 = vadd.f32 %v2208_v18, %v2179_v49  ;;  %2579 = vmatmul.bf16.gmra.mxu2 %v6923_v29  ;;  %3253 = vmatpush.bf16.msra.mxu0 %v5287_v35  ;;  %v1930_v33 = vshll.u32 %v6100_v31, 16  ;;  %v5343_v19 = vor.u32 %v5928_v38, %v5342_v61  ;;  %v2986_v49 = vrot.slane %v6103_v14, 5  ;;  %v5910_v35 = vld [vmem:[#allocation3 + $0x214] sm:$0xf0]  ;;  %v5190_v61 = vld [vmem:[#allocation3 + $0x788] sm:$0xf0] }
 0x16c   : > { %v7029_v56 = vadd.f32 %v1764_v4, %v6925_v16  ;;  %2852 = vmatmul.bf16.gmra.mxu0 %v6826_v53  ;;  %v5877_v16 = vld [vmem:[#allocation3 + $0x714] sm:$0xf]  ;;  %2932 = vmatpush.bf16.msra.mxu3 %v5201_v15  ;;  %v6102_v4 = vld [vmem:[#allocation2] sm:$0xff]  ;;  %v2990_v18 = vrot.slane %v6104_v36, 5  ;;  %v5271_v0 = vor.u32 %v5910_v35, %v5270_v12 }
 0x16d   : > { %v7035_v27 = vadd.f32 %v2209_v43, %v6937_v47  ;;  %2881 = vmatmul.bf16.gmra.mxu1 %v6834_v39  ;;  %v5137_v40 = vor.u32 %v5877_v16, %v5134_v23  ;;  %v1927_v47 = vshrl.u32 %v6100_v31, 16  ;;  %v5250_v3 = vrot.slane %v6102_v4, 9  ;;  %v788_v16 = vld [vmem:[#allocation2 + $0x88] sm:$0x11]  ;;  %v5891_v15 = vld [vmem:[#allocation3 + $0x784] sm:$0xf] }
 0x16e   : > { %2608 = vmatmul.bf16.gmra.mxu3 %v6931_v63  ;;  %v1737_v29 = vpop.f32.mrf.mxu2  ;;  %v5278_v63 = vld [vmem:[#allocation3 + $0x220] sm:$0xf]  ;;  %3283 = vmatpush.bf16.msra.mxu1 %v5343_v19  ;;  %v1932_v60 = vrot.slane %v1930_v33, 5  ;;  %v5193_v31 = vor.u32 %v5891_v15, %v5190_v61  ;;  %v5908_v33 = vld [vmem:[#allocation3 + $0x204] sm:$0xf0] }
 0x16f   : > { %2903 = vmatpush.bf16.msra.mxu2 %v5137_v40  ;;  %v5279_v46 = vor.u32 %v5912_v24, %v5278_v63  ;;  %v1929_v23 = vrot.slane %v1927_v47, 4  ;;  %v5262_v47 = vld [vmem:[#allocation3 + $0x200] sm:$0xf]  ;;  %v5924_v19 = vld [vmem:[#allocation3 + $0x284] sm:$0xf0] }
 0x170   : > { %2933 = vmatpush.bf16.msra.mxu3 %v5193_v31  ;;  %v5384_v15 = vld [vmem:[#allocation3 + $0x2f8] sm:$0xf0] }
 0x171   : > { %v1766_v62 = vpop.f32.mrf.mxu3  ;;  %v2181_v20 = vpop.f32.mrf.mxu0  ;;  %3254 = vmatpush.bf16.msra.mxu0 %v5279_v46  ;;  %v5326_v46 = vld [vmem:[#allocation3 + $0x280] sm:$0xf]  ;;  %v1933_v28 = vor.u32 %v1932_v60, %v1929_v23 }
 0x172   : > { %v1767_v37 = vadd.f32 %v1766_v62, %v1737_v29  ;;  %v2210_v34 = vpop.f32.mrf.mxu1  ;;  %v5926_v29 = vld [vmem:[#allocation3 + $0x294] sm:$0xf0]  ;;  %v5126_v62 = vld [vmem:[#allocation3 + $0x708] sm:$0xf0]  ;;  %v5327_v36 = vor.u32 %v5924_v19, %v5326_v46 }
 0x173   : > { %v2211_v11 = vadd.f32 %v2210_v34, %v2181_v20  ;;  %v5129_v24 = vor.u32 %v5875_v5, %v5126_v62  ;;  %v5263_v20 = vor.u32 %v5908_v33, %v5262_v47  ;;  %v2987_v34 = vsel %vm7044_vm6, %v5250_v3, %v2986_v49 }
 0x174   : > { %v7039_v43 = vadd.f32 %v1767_v37, %v6941_v51  ;;  %v5335_v51 = vor.u32 %v5926_v29, %v5334_v10  ;;  %v3057_v10 = vunpack.c.l.b16 %v2987_v34  ;;  %v3058_v23 = vunpack.c.h.b16 %v2987_v34  ;;  %v5320_v29 = vld [vmem:[#allocation3 + $0x278] sm:$0xf0] }
 0x175   : > { %v7042_v40 = vadd.f32 %v2211_v11, %v6944_v50  ;;  %3255 = vmatpush.bf16.msra.mxu0 %v5271_v0  ;;  %v1936_v50 = vshll.u32 %v788_v16, 16  ;;  %2904 = vmatpush.bf16.msra.mxu2 %v5129_v24  ;;  %v7052_v11 = vsel %vm7044_vm6, %v5251_v21, %v2990_v18  ;;  %v1934_v21 = vrot.slane %v1933_v28, 4  ;;  %v5921_v18 = vld [vmem:[#allocation3 + $0x274] sm:$0xf]  ;;  %v5919_v28 = vld [vmem:[#allocation3 + $0x264] sm:$0xf] }
 0x176   : > { %v1739_v63 = vpop.f32.mrf.mxu2  ;;  %3284 = vmatpush.bf16.msra.mxu1 %v5335_v51  ;;  %v3059_v16 = vunpack.c.l.b16 %v7052_v11  ;;  %v3060_v0 = vunpack.c.h.b16 %v7052_v11  ;;  %v5323_v62 = vor.u32 %v5921_v18, %v5320_v29 }
 0x177   : > { %v1938_v3 = vrot.slane %v1936_v50, 5  ;;  %v5312_v50 = vld [vmem:[#allocation3 + $0x268] sm:$0xf0] }
 0x179   : > { %v1768_v37 = vpop.f32.mrf.mxu3  ;;  %v2184_v14 = vpop.f32.mrf.mxu0  ;;  %3256 = vmatpush.bf16.msra.mxu0 %v5263_v20  ;;  %3307 = vmatpush.bf16.msrb.mxu2 %v5323_v62  ;;  %v5935_v20 = vld [vmem:[#allocation3 + $0x2e4] sm:$0xf] }
 0x17a   : > { %v1769_v38 = vadd.f32 %v1768_v37, %v1739_v63  ;;  %v2213_v35 = vpop.f32.mrf.mxu1  ;;  %3285 = vmatpush.bf16.msra.mxu1 %v5327_v36  ;;  %v5376_v36 = vld [vmem:[#allocation3 + $0x2e8] sm:$0xf0] }
 0x17b   : > { %v2214_v60 = vadd.f32 %v2213_v35, %v2184_v14  ;;  %2584 = vmatmul.bf16.gmra.mxu2 %v6951_v13  ;;  %v7072_v13 = vpack.c.b16 %v3060_v0, %v3058_v23  ;;  %v5315_v14 = vor.u32 %v5919_v28, %v5312_v50  ;;  %v5379_v32 = vor.u32 %v5935_v20, %v5376_v36  ;;  %v5446_v36 = vld [vmem:[#allocation3 + $0x570] sm:$0xf] }
 0x17c   : > { %v7055_v12 = vadd.f32 %v1769_v38, %v6953_v41  ;;  %2857 = vmatmul.bf16.gmra.mxu0 %v6866_v52  ;;  %v7064_v41 = vpack.c.b16 %v3059_v16, %v3057_v10 }
 0x17d   : > { %v7067_v49 = vadd.f32 %v2214_v60, %v6965_v44  ;;  %2886 = vmatmul.bf16.gmra.mxu1 %v6872_v8  ;;  %v1939_v44 = vsel %vm6720_vm3, %v1934_v21, %v1938_v3  ;;  %3308 = vmatpush.bf16.msrb.mxu2 %v5315_v14  ;;  %v5933_v3 = vld [vmem:[#allocation3 + $0x2d4] sm:$0xf] }
 0x17e   : > { %2613 = vmatmul.bf16.gmra.mxu3 %v6959_v48  ;;  %v5937_v48 = vld [vmem:[#allocation3 + $0x2f4] sm:$0xf]  ;;  %v1742_v5 = vpop.f32.mrf.mxu2  ;;  %v2673_v33 = vunpack.c.l.b16 %v1939_v44  ;;  %v2674_v38 = vunpack.c.h.b16 %v1939_v44 }
 0x17f   : > { %v5387_v63 = vor.u32 %v5937_v48, %v5384_v15 }
 0x181   : > { %v1771_v51 = vpop.f32.mrf.mxu3  ;;  %v2186_v61 = vpop.f32.mrf.mxu0  ;;  %3336 = vmatpush.bf16.msrb.mxu3 %v5387_v63  ;;  %v5915_v63 = vld [vmem:[#allocation3 + $0x244] sm:$0xf] }
 0x182   : > { %v1772_v24 = vadd.f32 %v1771_v51, %v1742_v5  ;;  %v2215_v31 = vpop.f32.mrf.mxu1 }
 0x183   : > { %v2216_v47 = vadd.f32 %v2215_v31, %v2186_v61  ;;  %v5931_v61 = vld [vmem:[#allocation3 + $0x2c4] sm:$0xf] }
 0x184   : > { %v7077_v37 = vadd.f32 %v1772_v24, %v6969_v30  ;;  %v7084_v30 = vpack.c.b16 %v2673_v33, %v2330_v45  ;;  %v5296_v24 = vld [vmem:[#allocation3 + $0x248] sm:$0xf0] }
 0x185   : > { %v7080_v46 = vadd.f32 %v2216_v47, %v6977_v2  ;;  %v7088_v2 = vpack.c.b16 %v2674_v38, %v2331_v22  ;;  %3337 = vmatpush.bf16.msrb.mxu3 %v5379_v32  ;;  %v5304_v22 = vld [vmem:[#allocation3 + $0x258] sm:$0xf0]  ;;  %v5299_v31 = vor.u32 %v5915_v63, %v5296_v24  ;;  %v5360_v47 = vld [vmem:[#allocation3 + $0x2c8] sm:$0xf0]  ;;  %v5510_v32 = vld [vmem:[#allocation3 + $0x5f0] sm:$0xf] }
 0x186   : > { %v1744_v19 = vpop.f32.mrf.mxu2  ;;  %v5307_v29 = vor.u32 %v5917_v9, %v5304_v22  ;;  %v5363_v38 = vor.u32 %v5931_v61, %v5360_v47  ;;  %v6108_v9 = vld [vmem:[#allocation2 + $0x20] sm:$0x11]  ;;  %v5952_v63 = vld [vmem:[#allocation3 + $0x564] sm:$0xf0] }
 0x187   : > { %v5502_v24 = vld [vmem:[#allocation3 + $0x5e0] sm:$0xf] }
 0x188   : > { %3309 = vmatpush.bf16.msrb.mxu2 %v5307_v29  ;;  %v5288_v29 = vld [vmem:[#allocation3 + $0x238] sm:$0xf0] }
 0x189   : > { %v1773_v34 = vpop.f32.mrf.mxu3  ;;  %v2189_v10 = vpop.f32.mrf.mxu0 }
 0x18a   : > { %v1774_v35 = vadd.f32 %v1773_v34, %v1744_v19  ;;  %v2218_v60 = vpop.f32.mrf.mxu1  ;;  %v6105_v19 = vld [vmem:[#allocation2 + $0x8] sm:$0xff]  ;;  %v5954_v34 = vld [vmem:[#allocation3 + $0x574] sm:$0xf0] }
 0x18b   : > { %v2219_v21 = vadd.f32 %v2218_v60, %v2189_v10  ;;  %2589 = vmatmul.bf16.gmra.mxu2 %v6985_v55  ;;  %v5252_v14 = vrot.slane %v6105_v19, 9  ;;  %v6107_v60 = vld [vmem:[#allocation2 + $0x30] sm:$0xff]  ;;  %v5447_v22 = vor.u32 %v5954_v34, %v5446_v36 }
 0x18c   : > { %v7091_v23 = vadd.f32 %v1774_v35, %v6987_v26  ;;  %2862 = vmatmul.bf16.gmra.mxu0 %v7084_v30  ;;  %v5368_v26 = vld [vmem:[#allocation3 + $0x2d8] sm:$0xf0]  ;;  %3310 = vmatpush.bf16.msrb.mxu2 %v5299_v31  ;;  %v5430_v19 = vld [vmem:[#allocation3 + $0x550] sm:$0xf] }
 0x18d   : > { %v7097_v45 = vadd.f32 %v2219_v21, %v6999_v57  ;;  %2891 = vmatmul.bf16.gmra.mxu1 %v7088_v2  ;;  %v5371_v5 = vor.u32 %v5933_v3, %v5368_v26  ;;  %v6106_v35 = vld [vmem:[#allocation2 + $0x18] sm:$0x11]  ;;  %v5253_v21 = vrot.slane %v6107_v60, 9  ;;  %v5929_v26 = vld [vmem:[#allocation3 + $0x2b4] sm:$0xf]  ;;  %3592 = vmatpush.bf16.msrb.mxu0 %v5447_v22 }
 0x18e   : > { %2618 = vmatmul.bf16.gmra.mxu3 %v6993_v54  ;;  %v1747_v18 = vpop.f32.mrf.mxu2  ;;  %v2994_v10 = vrot.slane %v6106_v35, 5  ;;  %v5970_v3 = vld [vmem:[#allocation3 + $0x5f4] sm:$0xf0]  ;;  %v5494_v36 = vld [vmem:[#allocation3 + $0x5d0] sm:$0xf] }
 0x18f   : > { %3338 = vmatpush.bf16.msrb.mxu3 %v5371_v5  ;;  %v5966_v35 = vld [vmem:[#allocation3 + $0x5d4] sm:$0xf0] }
 0x190   : > { %v7118_v47 = vsel %vm7044_vm6, %v5252_v14, %v2994_v10  ;;  %v5495_v22 = vor.u32 %v5966_v35, %v5494_v36  ;;  %v6110_v36 = vld [vmem:[#allocation2 + $0x98] sm:$0x11] }
 0x191   : > { %v1776_v48 = vpop.f32.mrf.mxu3  ;;  %v2191_v55 = vpop.f32.mrf.mxu0  ;;  %v3061_v34 = vunpack.c.l.b16 %v7118_v47  ;;  %v3062_v60 = vunpack.c.h.b16 %v7118_v47  ;;  %v6111_v35 = vld [vmem:[#allocation2 + $0x38] sm:$0xff] }
 0x192   : > { %v1777_v62 = vadd.f32 %v1776_v48, %v1747_v18  ;;  %v2220_v15 = vpop.f32.mrf.mxu1  ;;  %v5511_v48 = vor.u32 %v5970_v3, %v5510_v32  ;;  %v6002_v47 = vld [vmem:[#allocation3 + $0x8f4] sm:$0xf0] }
 0x193   : > { %v2221_v57 = vadd.f32 %v2220_v15, %v2191_v55  ;;  %3339 = vmatpush.bf16.msrb.mxu3 %v5363_v38 }
 0x194   : > { %v7101_v54 = vadd.f32 %v1777_v62, %v7003_v6  ;;  %v5352_v62 = vld [vmem:[#allocation3 + $0x2b8] sm:$0xf0]  ;;  %3621 = vmatpush.bf16.msrb.mxu1 %v5511_v48 }
 0x195   : > { %v7104_v51 = vadd.f32 %v2221_v57, %v7008_v59  ;;  %v5355_v15 = vor.u32 %v5929_v26, %v5352_v62  ;;  %v5438_v57 = vld [vmem:[#allocation3 + $0x560] sm:$0xf] }
 0x196   : > { %v1749_v44 = vpop.f32.mrf.mxu2  ;;  %v5486_v62 = vld [vmem:[#allocation3 + $0x5c0] sm:$0xf] }
 0x197   : > { %3340 = vmatpush.bf16.msrb.mxu3 %v5355_v15 }
 0x199   : > { %v1778_v33 = vpop.f32.mrf.mxu3  ;;  %v2517_v50 = vpop.f32.mrf.mxu0 }
 0x19a   : > { %v1779_v28 = vadd.f32 %v1778_v33, %v1749_v44  ;;  %v2546_v20 = vpop.f32.mrf.mxu1  ;;  %v5968_v44 = vld [vmem:[#allocation3 + $0x5e4] sm:$0xf0] }
 0x19b   : > { %v2547_v59 = vadd.f32 %v2546_v20, %v2517_v50  ;;  %2905 = vmatmul.bf16.vlgmr.msra.gmra.mxu2 %v6788_v42  ;;  %v5913_v42 = vld [vmem:[#allocation3 + $0x234] sm:$0xf]  ;;  %v5503_v38 = vor.u32 %v5968_v44, %v5502_v24 }
 0x19c   : > { %v7107_v6 = vadd.f32 %v1779_v28, %v7011_v7  ;;  %3257 = vmatmul.bf16.vlgmr.msra.gmra.mxu0 %v7064_v41  ;;  %v2998_v7 = vrot.slane %v6108_v9, 5  ;;  %v5291_v5 = vor.u32 %v5913_v42, %v5288_v29  ;;  %v5280_v9 = vld [vmem:[#allocation3 + $0x228] sm:$0xf0] }
 0x19d   : > { %v7113_v18 = vadd.f32 %v2547_v59, %v7019_v1  ;;  %3286 = vmatmul.bf16.vlgmr.msra.gmra.mxu1 %v7072_v13  ;;  %v5439_v1 = vor.u32 %v5952_v63, %v5438_v57  ;;  %v5950_v59 = vld [vmem:[#allocation3 + $0x554] sm:$0xf0]  ;;  %v5344_v29 = vld [vmem:[#allocation3 + $0x2a8] sm:$0xf0]  ;;  %v5964_v57 = vld [vmem:[#allocation3 + $0x5c4] sm:$0xf0] }
 0x19e   : > { %2934 = vmatmul.bf16.vlgmr.msra.gmra.mxu3 %v6796_v17  ;;  %v2232_v17 = vpop.f32.mrf.mxu2  ;;  %3311 = vmatpush.bf16.msrb.mxu2 %v5291_v5  ;;  %v7122_v33 = vsel %vm7044_vm6, %v5253_v21, %v2998_v7  ;;  %v5431_v32 = vor.u32 %v5950_v59, %v5430_v19  ;;  %v5911_v21 = vld [vmem:[#allocation3 + $0x224] sm:$0xf]  ;;  %v5948_v5 = vld [vmem:[#allocation3 + $0x544] sm:$0xf0]  ;;  %v5946_v19 = vld [vmem:[#allocation3 + $0x534] sm:$0xf0] }
 0x19f   : > { %3593 = vmatpush.bf16.msrb.mxu0 %v5439_v1  ;;  %3622 = vmatpush.bf16.msrb.mxu1 %v5503_v38  ;;  %v3063_v14 = vunpack.c.l.b16 %v7122_v33  ;;  %v5927_v7 = vld [vmem:[#allocation3 + $0x2a4] sm:$0xf]  ;;  %v5283_v42 = vor.u32 %v5911_v21, %v5280_v9  ;;  %v5478_v59 = vld [vmem:[#allocation3 + $0x5b0] sm:$0xf]  ;;  %v6112_v21 = vld [vmem:[#allocation2 + $0x28] sm:$0x11] }
 0x1a0   : > { %v5347_v48 = vor.u32 %v5927_v7, %v5344_v29  ;;  %v3006_v9 = vrot.slane %v6112_v21, 5  ;;  %v5925_v29 = vld [vmem:[#allocation3 + $0x294] sm:$0xf]  ;;  %v5942_v21 = vld [vmem:[#allocation3 + $0x514] sm:$0xf0] }
 0x1a1   : > { %v2261_v55 = vpop.f32.mrf.mxu3  ;;  %v2519_v31 = vpop.f32.mrf.mxu0 }
 0x1a2   : > { %v2262_v61 = vadd.f32 %v2261_v55, %v2232_v17  ;;  %v2548_v50 = vpop.f32.mrf.mxu1  ;;  %v5422_v17 = vld [vmem:[#allocation3 + $0x540] sm:$0xf]  ;;  %v7138_v55 = vpack.c.b16 %v3063_v14, %v3061_v34  ;;  %3312 = vmatpush.bf16.msrb.mxu2 %v5283_v42  ;;  %3341 = vmatpush.bf16.msrb.mxu3 %v5347_v48  ;;  %v5272_v42 = vld [vmem:[#allocation3 + $0x218] sm:$0xf0] }
 0x1a3   : > { %v2549_v20 = vadd.f32 %v2548_v50, %v2519_v31  ;;  %3594 = vmatpush.bf16.msrb.mxu0 %v5431_v32  ;;  %3623 = vmatpush.bf16.msrb.mxu1 %v5495_v22  ;;  %v5423_v15 = vor.u32 %v5948_v5, %v5422_v17  ;;  %v6109_v31 = vld [vmem:[#allocation2 + $0x60] sm:$0xff]  ;;  %v3002_v32 = vrot.slane %v6110_v36, 5  ;;  %v5962_v22 = vld [vmem:[#allocation3 + $0x5b4] sm:$0xf0]  ;;  %v5336_v17 = vld [vmem:[#allocation3 + $0x298] sm:$0xf0] }
 0x1a4   : > { %v7125_v28 = vadd.f32 %v2262_v61, %v7023_v58  ;;  %v3064_v58 = vunpack.c.h.b16 %v7122_v33  ;;  %v5487_v61 = vor.u32 %v5964_v57, %v5486_v62  ;;  %v5254_v38 = vrot.slane %v6109_v31, 9  ;;  %v5470_v57 = vld [vmem:[#allocation3 + $0x5a0] sm:$0xf] }
 0x1a5   : > { %v7130_v10 = vadd.f32 %v2549_v20, %v7026_v25  ;;  %v5414_v20 = vld [vmem:[#allocation3 + $0x530] sm:$0xf]  ;;  %v5339_v62 = vor.u32 %v5925_v29, %v5336_v17  ;;  %v5264_v29 = vld [vmem:[#allocation3 + $0x208] sm:$0xf0] }
 0x1a6   : > { %v2234_v3 = vpop.f32.mrf.mxu2  ;;  %v7144_v24 = vpack.c.b16 %v3064_v58, %v3062_v60  ;;  %v5415_v7 = vor.u32 %v5946_v19, %v5414_v20  ;;  %v7158_v31 = vsel %vm7044_vm6, %v5254_v38, %v3002_v32 }
 0x1a7   : > { %3595 = vmatpush.bf16.msrb.mxu0 %v5423_v15  ;;  %3624 = vmatpush.bf16.msrb.mxu1 %v5487_v61  ;;  %v5944_v15 = vld [vmem:[#allocation3 + $0x524] sm:$0xf0] }
 0x1a8   : > { %v5960_v61 = vld [vmem:[#allocation3 + $0x5a4] sm:$0xf0]  ;;  %3342 = vmatpush.bf16.msrb.mxu3 %v5339_v62 }
 0x1a9   : > { %v2263_v26 = vpop.f32.mrf.mxu3  ;;  %v2522_v63 = vpop.f32.mrf.mxu0  ;;  %v5471_v20 = vor.u32 %v5960_v61, %v5470_v57  ;;  %v5940_v57 = vld [vmem:[#allocation3 + $0x504] sm:$0xf0] }
 0x1aa   : > { %v2264_v25 = vadd.f32 %v2263_v26, %v2234_v3  ;;  %v2551_v44 = vpop.f32.mrf.mxu1  ;;  %v5479_v26 = vor.u32 %v5962_v22, %v5478_v59  ;;  %v3065_v22 = vunpack.c.l.b16 %v7158_v31 }
 0x1ab   : > { %v2552_v50 = vadd.f32 %v2551_v44, %v2522_v63  ;;  %2910 = vmatmul.bf16.gmra.mxu2 %v6826_v53  ;;  %v5909_v53 = vld [vmem:[#allocation3 + $0x214] sm:$0xf]  ;;  %3596 = vmatpush.bf16.msrb.mxu0 %v5415_v7  ;;  %v5462_v7 = vld [vmem:[#allocation3 + $0x590] sm:$0xf] }
 0x1ac   : > { %v7147_v1 = vadd.f32 %v2264_v25, %v7029_v56  ;;  %3262 = vmatmul.bf16.gmra.mxu0 %v7138_v55  ;;  %v5255_v56 = vrot.slane %v6111_v35, 9  ;;  %v5275_v48 = vor.u32 %v5909_v53, %v5272_v42  ;;  %3625 = vmatpush.bf16.msrb.mxu1 %v5479_v26  ;;  %v5406_v25 = vld [vmem:[#allocation3 + $0x520] sm:$0xf]  ;;  %v5398_v35 = vld [vmem:[#allocation3 + $0x510] sm:$0xf] }
 0x1ad   : > { %v7153_v3 = vadd.f32 %v2552_v50, %v7035_v27  ;;  %3291 = vmatmul.bf16.gmra.mxu1 %v7144_v24  ;;  %v5407_v27 = vor.u32 %v5944_v15, %v5406_v25  ;;  %v5399_v32 = vor.u32 %v5942_v21, %v5398_v35  ;;  %v5958_v53 = vld [vmem:[#allocation3 + $0x594] sm:$0xf0]  ;;  %v5907_v42 = vld [vmem:[#allocation3 + $0x204] sm:$0xf]  ;;  %v5390_v15 = vld [vmem:[#allocation3 + $0x500] sm:$0xf] }
 0x1ae   : > { %2939 = vmatmul.bf16.gmra.mxu3 %v6834_v39  ;;  %v2237_v39 = vpop.f32.mrf.mxu2  ;;  %3313 = vmatpush.bf16.msrb.mxu2 %v5275_v48  ;;  %v7162_v50 = vsel %vm7044_vm6, %v5255_v56, %v3006_v9  ;;  %v3066_v9 = vunpack.c.h.b16 %v7158_v31  ;;  %v5923_v26 = vld [vmem:[#allocation3 + $0x284] sm:$0xf]  ;;  %v5267_v17 = vor.u32 %v5907_v42, %v5264_v29  ;;  %v5391_v61 = vor.u32 %v5940_v57, %v5390_v15  ;;  %v5512_v15 = vld [vmem:[#allocation3 + $0x5f8] sm:$0xf0] }
 0x1af   : > { %3597 = vmatpush.bf16.msrb.mxu0 %v5407_v27  ;;  %v3067_v38 = vunpack.c.l.b16 %v7162_v50  ;;  %v6114_v42 = vld [vmem:[#allocation2 + $0x40] sm:$0x11] }
 0x1b0   : > { %3626 = vmatpush.bf16.msrb.mxu1 %v5471_v20  ;;  %v3010_v29 = vrot.slane %v6114_v42, 5 }
 0x1b1   : > { %v2266_v5 = vpop.f32.mrf.mxu3  ;;  %v2524_v44 = vpop.f32.mrf.mxu0  ;;  %v7178_v27 = vpack.c.b16 %v3067_v38, %v3065_v22 }
 0x1b2   : > { %v2267_v63 = vadd.f32 %v2266_v5, %v2237_v39  ;;  %v2553_v59 = vpop.f32.mrf.mxu1  ;;  %v5463_v39 = vor.u32 %v5958_v53, %v5462_v7  ;;  %v5328_v5 = vld [vmem:[#allocation3 + $0x288] sm:$0xf0]  ;;  %3314 = vmatpush.bf16.msrb.mxu2 %v5267_v17 }
 0x1b3   : > { %v2554_v36 = vadd.f32 %v2553_v59, %v2524_v44  ;;  %3598 = vmatpush.bf16.msrb.mxu0 %v5399_v32  ;;  %v5331_v25 = vor.u32 %v5923_v26, %v5328_v5  ;;  %v5956_v44 = vld [vmem:[#allocation3 + $0x584] sm:$0xf0]  ;;  %v6113_v32 = vld [vmem:[#allocation2 + $0x58] sm:$0xff]  ;;  %v5953_v5 = vld [vmem:[#allocation3 + $0x574] sm:$0xf] }
 0x1b4   : > { %v7165_v19 = vadd.f32 %v2267_v63, %v7039_v43  ;;  %v3068_v43 = vunpack.c.h.b16 %v7162_v50  ;;  %3627 = vmatpush.bf16.msrb.mxu1 %v5463_v39  ;;  %v5454_v63 = vld [vmem:[#allocation3 + $0x580] sm:$0xf]  ;;  %v5256_v53 = vrot.slane %v6113_v32, 9  ;;  %v6115_v26 = vld [vmem:[#allocation2 + $0x68] sm:$0xff]  ;;  %v6117_v50 = vld [vmem:[#allocation2 + $0x10] sm:$0xff] }
 0x1b5   : > { %v7170_v56 = vadd.f32 %v2554_v36, %v7042_v40  ;;  %3343 = vmatpush.bf16.msrb.mxu3 %v5331_v25  ;;  %v5455_v36 = vor.u32 %v5956_v44, %v5454_v63  ;;  %v5257_v39 = vrot.slane %v6115_v26, 9  ;;  %v5951_v26 = vld [vmem:[#allocation3 + $0x564] sm:$0xf] }
 0x1b6   : > { %v2239_v48 = vpop.f32.mrf.mxu2  ;;  %v7184_v59 = vpack.c.b16 %v3068_v43, %v3066_v9  ;;  %v7198_v44 = vsel %vm7044_vm6, %v5256_v53, %v3010_v29 }
 0x1b7   : > { %3599 = vmatpush.bf16.msrb.mxu0 %v5391_v61  ;;  %v3070_v53 = vunpack.c.h.b16 %v7198_v44 }
 0x1b8   : > { %3628 = vmatpush.bf16.msrb.mxu1 %v5455_v36 }
 0x1b9   : > { %v2268_v62 = vpop.f32.mrf.mxu3  ;;  %v2527_v20 = vpop.f32.mrf.mxu0 }
 0x1ba   : > { %v2269_v40 = vadd.f32 %v2268_v62, %v2239_v48  ;;  %v2556_v21 = vpop.f32.mrf.mxu1  ;;  %v6116_v48 = vld [vmem:[#allocation2 + $0x90] sm:$0x11] }
 0x1bb   : > { %v2557_v7 = vadd.f32 %v2556_v21, %v2527_v20  ;;  %2915 = vmatmul.bf16.gmra.mxu2 %v6866_v52  ;;  %v3014_v17 = vrot.slane %v6116_v48, 5  ;;  %v5448_v52 = vld [vmem:[#allocation3 + $0x578] sm:$0xf0]  ;;  %v5969_v62 = vld [vmem:[#allocation3 + $0x5f4] sm:$0xf] }
 0x1bc   : > { %v7187_v35 = vadd.f32 %v2269_v40, %v7055_v12  ;;  %3267 = vmatmul.bf16.gmra.mxu0 %v7178_v27  ;;  %v5515_v63 = vor.u32 %v5969_v62, %v5512_v15  ;;  %v5967_v48 = vld [vmem:[#allocation3 + $0x5e4] sm:$0xf] }
 0x1bd   : > { %v7193_v12 = vadd.f32 %v2557_v7, %v7067_v49  ;;  %3296 = vmatmul.bf16.gmra.mxu1 %v7184_v59  ;;  %v7202_v49 = vsel %vm7044_vm6, %v5257_v39, %v3014_v17  ;;  %v3069_v7 = vunpack.c.l.b16 %v7198_v44  ;;  %v5440_v39 = vld [vmem:[#allocation3 + $0x568] sm:$0xf0] }
 0x1be   : > { %2944 = vmatmul.bf16.gmra.mxu3 %v6872_v8  ;;  %v2242_v25 = vpop.f32.mrf.mxu2  ;;  %v5451_v8 = vor.u32 %v5953_v5, %v5448_v52  ;;  %v3071_v32 = vunpack.c.l.b16 %v7202_v49  ;;  %v7667_v29 = vunpack.c.h.b16 %v7202_v49  ;;  %v5443_v5 = vor.u32 %v5951_v26, %v5440_v39  ;;  %v5965_v26 = vld [vmem:[#allocation3 + $0x5d4] sm:$0xf]  ;;  %v6118_v44 = vld [vmem:[#allocation2 + $0x48] sm:$0x11] }
 0x1bf   : > { %3679 = vmatpush.bf16.msra.mxu3 %v5515_v63 }
 0x1c0   : > { %3650 = vmatpush.bf16.msra.mxu2 %v5451_v8  ;;  %v7218_v8 = vpack.c.b16 %v3071_v32, %v3069_v7  ;;  %v7224_v15 = vpack.c.b16 %v7667_v29, %v3070_v53 }
 0x1c1   : > { %v2271_v57 = vpop.f32.mrf.mxu3  ;;  %v2529_v61 = vpop.f32.mrf.mxu0 }
 0x1c2   : > { %v2272_v40 = vadd.f32 %v2271_v57, %v2242_v25  ;;  %v2558_v36 = vpop.f32.mrf.mxu1 }
 0x1c3   : > { %v2559_v21 = vadd.f32 %v2558_v36, %v2529_v61  ;;  %v5949_v36 = vld [vmem:[#allocation3 + $0x554] sm:$0xf] }
 0x1c4   : > { %v7205_v20 = vadd.f32 %v2272_v40, %v7077_v37  ;;  %v5504_v37 = vld [vmem:[#allocation3 + $0x5e8] sm:$0xf0]  ;;  %3651 = vmatpush.bf16.msra.mxu2 %v5443_v5 }
 0x1c5   : > { %v7210_v42 = vadd.f32 %v2559_v21, %v7080_v46  ;;  %v5507_v62 = vor.u32 %v5967_v48, %v5504_v37  ;;  %v5432_v21 = vld [vmem:[#allocation3 + $0x558] sm:$0xf0] }
 0x1c6   : > { %v2244_v17 = vpop.f32.mrf.mxu2  ;;  %v5435_v48 = vor.u32 %v5949_v36, %v5432_v21  ;;  %v5488_v21 = vld [vmem:[#allocation3 + $0x5c8] sm:$0xf0] }
 0x1c7   : > { %3680 = vmatpush.bf16.msra.mxu3 %v5507_v62 }
 0x1c8   : > { %3652 = vmatpush.bf16.msra.mxu2 %v5435_v48 }
 0x1c9   : > { %v2273_v52 = vpop.f32.mrf.mxu3  ;;  %v2532_v46 = vpop.f32.mrf.mxu0 }
 0x1ca   : > { %v2274_v25 = vadd.f32 %v2273_v52, %v2244_v17  ;;  %v2561_v63 = vpop.f32.mrf.mxu1 }
 0x1cb   : > { %v2562_v40 = vadd.f32 %v2561_v63, %v2532_v46  ;;  %2920 = vmatmul.bf16.gmra.mxu2 %v7084_v30  ;;  %v5424_v46 = vld [vmem:[#allocation3 + $0x548] sm:$0xf0]  ;;  %v5963_v63 = vld [vmem:[#allocation3 + $0x5c4] sm:$0xf] }
 0x1cc   : > { %v7227_v57 = vadd.f32 %v2274_v25, %v7091_v23  ;;  %3272 = vmatmul.bf16.gmra.mxu0 %v7218_v8  ;;  %v5496_v23 = vld [vmem:[#allocation3 + $0x5d8] sm:$0xf0]  ;;  %v5947_v25 = vld [vmem:[#allocation3 + $0x544] sm:$0xf] }
 0x1cd   : > { %v7233_v61 = vadd.f32 %v2562_v40, %v7097_v45  ;;  %3301 = vmatmul.bf16.gmra.mxu1 %v7224_v15  ;;  %v5499_v5 = vor.u32 %v5965_v26, %v5496_v23  ;;  %v5427_v36 = vor.u32 %v5947_v25, %v5424_v46  ;;  %v5491_v26 = vor.u32 %v5963_v63, %v5488_v21  ;;  %v5984_v63 = vld [vmem:[#allocation3 + $0x864] sm:$0xf0] }
 0x1ce   : > { %2949 = vmatmul.bf16.gmra.mxu3 %v7088_v2  ;;  %v2247_v39 = vpop.f32.mrf.mxu2  ;;  %v6000_v21 = vld [vmem:[#allocation3 + $0x8e4] sm:$0xf0] }
 0x1cf   : > { %3681 = vmatpush.bf16.msra.mxu3 %v5499_v5  ;;  %3653 = vmatpush.bf16.msra.mxu2 %v5427_v36 }
 0x1d1   : > { %v2276_v17 = vpop.f32.mrf.mxu3  ;;  %v2534_v30 = vpop.f32.mrf.mxu0 }
 0x1d2   : > { %v2277_v37 = vadd.f32 %v2276_v17, %v2247_v39  ;;  %v2563_v52 = vpop.f32.mrf.mxu1  ;;  %v7246_v39 = vpack.c.b16 %v3061_v34, %v3059_v16  ;;  %v5986_v16 = vld [vmem:[#allocation3 + $0x874] sm:$0xf0]  ;;  %v5638_v34 = vld [vmem:[#allocation3 + $0x8f0] sm:$0xf] }
 0x1d3   : > { %v2564_v45 = vadd.f32 %v2563_v52, %v2534_v30  ;;  %3682 = vmatpush.bf16.msra.mxu3 %v5491_v26  ;;  %v5639_v30 = vor.u32 %v6002_v47, %v5638_v34  ;;  %v5622_v34 = vld [vmem:[#allocation3 + $0x8d0] sm:$0xf]  ;;  %v5998_v47 = vld [vmem:[#allocation3 + $0x8d4] sm:$0xf0] }
 0x1d4   : > { %v7237_v2 = vadd.f32 %v2277_v37, %v7101_v54  ;;  %v5574_v37 = vld [vmem:[#allocation3 + $0x870] sm:$0xf] }
 0x1d5   : > { %v7240_v62 = vadd.f32 %v2564_v45, %v7104_v51  ;;  %v7252_v51 = vpack.c.b16 %v3062_v60, %v3060_v0  ;;  %v5575_v11 = vor.u32 %v5986_v16, %v5574_v37  ;;  %v5416_v60 = vld [vmem:[#allocation3 + $0x538] sm:$0xf0]  ;;  %3952 = vmatpush.bf16.msra.mxu1 %v5639_v30  ;;  %v5558_v37 = vld [vmem:[#allocation3 + $0x850] sm:$0xf]  ;;  %v5982_v16 = vld [vmem:[#allocation3 + $0x854] sm:$0xf0] }
 0x1d6   : > { %v2249_v40 = vpop.f32.mrf.mxu2  ;;  %v5480_v45 = vld [vmem:[#allocation3 + $0x5b8] sm:$0xf0]  ;;  %v5959_v30 = vld [vmem:[#allocation3 + $0x5a4] sm:$0xf] }
 0x1d7   : > { %3923 = vmatpush.bf16.msra.mxu0 %v5575_v11  ;;  %v5559_v11 = vor.u32 %v5982_v16, %v5558_v37 }
 0x1d9   : > { %v2278_v29 = vpop.f32.mrf.mxu3  ;;  %v2848_v48 = vpop.f32.mrf.mxu0 }
 0x1da   : > { %v2279_v54 = vadd.f32 %v2278_v29, %v2249_v40  ;;  %v2877_v17 = vpop.f32.mrf.mxu1  ;;  %v5961_v29 = vld [vmem:[#allocation3 + $0x5b4] sm:$0xf]  ;;  %v5630_v40 = vld [vmem:[#allocation3 + $0x8e0] sm:$0xf] }
 0x1db   : > { %v2878_v5 = vadd.f32 %v2877_v17, %v2848_v48  ;;  %3315 = vmatmul.bf16.vlgmr.msrb.gmra.mxu2 %v7064_v41  ;;  %v5483_v46 = vor.u32 %v5961_v29, %v5480_v45  ;;  %v5408_v29 = vld [vmem:[#allocation3 + $0x528] sm:$0xf0] }
 0x1dc   : > { %v7255_v23 = vadd.f32 %v2279_v54, %v7107_v6  ;;  %3600 = vmatmul.bf16.vlgmr.msrb.gmra.mxu0 %v7246_v39  ;;  %v5945_v6 = vld [vmem:[#allocation3 + $0x534] sm:$0xf]  ;;  %v5631_v54 = vor.u32 %v6000_v21, %v5630_v40  ;;  %v5614_v40 = vld [vmem:[#allocation3 + $0x8c0] sm:$0xf]  ;;  %v5996_v21 = vld [vmem:[#allocation3 + $0x8c4] sm:$0xf0] }
 0x1dd   : > { %v7261_v0 = vadd.f32 %v2878_v5, %v7113_v18  ;;  %3629 = vmatmul.bf16.vlgmr.msrb.gmra.mxu1 %v7252_v51  ;;  %v5419_v41 = vor.u32 %v5945_v6, %v5416_v60  ;;  %3683 = vmatpush.bf16.msra.mxu3 %v5483_v46  ;;  %v5943_v60 = vld [vmem:[#allocation3 + $0x524] sm:$0xf] }
 0x1de   : > { %3344 = vmatmul.bf16.vlgmr.msrb.gmra.mxu3 %v7072_v13  ;;  %v2575_v52 = vpop.f32.mrf.mxu2  ;;  %v5566_v13 = vld [vmem:[#allocation3 + $0x860] sm:$0xf]  ;;  %3953 = vmatpush.bf16.msra.mxu1 %v5631_v54  ;;  %v5411_v45 = vor.u32 %v5943_v60, %v5408_v29  ;;  %v7280_v54 = vpack.c.b16 %v3066_v9, %v3064_v58  ;;  %v5994_v58 = vld [vmem:[#allocation3 + $0x8b4] sm:$0xf0]  ;;  %v5400_v9 = vld [vmem:[#allocation3 + $0x518] sm:$0xf0] }
 0x1df   : > { %3654 = vmatpush.bf16.msra.mxu2 %v5419_v41  ;;  %v5567_v18 = vor.u32 %v5984_v63, %v5566_v13  ;;  %v5550_v13 = vld [vmem:[#allocation3 + $0x840] sm:$0xf]  ;;  %v5980_v63 = vld [vmem:[#allocation3 + $0x844] sm:$0xf0] }
 0x1e1   : > { %v2604_v25 = vpop.f32.mrf.mxu3  ;;  %v2850_v26 = vpop.f32.mrf.mxu0  ;;  %3924 = vmatpush.bf16.msra.mxu0 %v5567_v18  ;;  %v5551_v18 = vor.u32 %v5980_v63, %v5550_v13  ;;  %v5992_v13 = vld [vmem:[#allocation3 + $0x8a4] sm:$0xf0] }
 0x1e2   : > { %v2605_v36 = vadd.f32 %v2604_v25, %v2575_v52  ;;  %v2879_v17 = vpop.f32.mrf.mxu1  ;;  %v5623_v52 = vor.u32 %v5998_v47, %v5622_v34  ;;  %v5606_v34 = vld [vmem:[#allocation3 + $0x8b0] sm:$0xf] }
 0x1e3   : > { %v2880_v5 = vadd.f32 %v2879_v17, %v2850_v26  ;;  %3655 = vmatpush.bf16.msra.mxu2 %v5411_v45  ;;  %v5615_v17 = vor.u32 %v5996_v21, %v5614_v40  ;;  %v5607_v47 = vor.u32 %v5994_v58, %v5606_v34  ;;  %v5534_v45 = vld [vmem:[#allocation3 + $0x820] sm:$0xf]  ;;  %v5939_v34 = vld [vmem:[#allocation3 + $0x504] sm:$0xf] }
 0x1e4   : > { %v7265_v48 = vadd.f32 %v2605_v36, %v7125_v28  ;;  %v5472_v28 = vld [vmem:[#allocation3 + $0x5a8] sm:$0xf0]  ;;  %3954 = vmatpush.bf16.msra.mxu1 %v5623_v52  ;;  %v5955_v58 = vld [vmem:[#allocation3 + $0x584] sm:$0xf] }
 0x1e5   : > { %v7268_v6 = vadd.f32 %v2880_v5, %v7130_v10  ;;  %3925 = vmatpush.bf16.msra.mxu0 %v5559_v11  ;;  %v5475_v46 = vor.u32 %v5959_v30, %v5472_v28  ;;  %v7274_v10 = vpack.c.b16 %v3065_v22, %v3063_v14  ;;  %v5542_v14 = vld [vmem:[#allocation3 + $0x830] sm:$0xf]  ;;  %v5978_v22 = vld [vmem:[#allocation3 + $0x834] sm:$0xf0]  ;;  %v5957_v11 = vld [vmem:[#allocation3 + $0x594] sm:$0xf] }
 0x1e6   : > { %v2577_v41 = vpop.f32.mrf.mxu2  ;;  %v5543_v33 = vor.u32 %v5978_v22, %v5542_v14  ;;  %v5464_v30 = vld [vmem:[#allocation3 + $0x598] sm:$0xf0]  ;;  %v5976_v28 = vld [vmem:[#allocation3 + $0x824] sm:$0xf0]  ;;  %v5990_v14 = vld [vmem:[#allocation3 + $0x894] sm:$0xf0] }
 0x1e7   : > { %3684 = vmatpush.bf16.msra.mxu3 %v5475_v46 }
 0x1e8   : > { %3955 = vmatpush.bf16.msra.mxu1 %v5615_v17  ;;  %v5974_v17 = vld [vmem:[#allocation3 + $0x814] sm:$0xf0] }
 0x1e9   : > { %v2606_v25 = vpop.f32.mrf.mxu3  ;;  %v2853_v26 = vpop.f32.mrf.mxu0  ;;  %3926 = vmatpush.bf16.msra.mxu0 %v5551_v18 }
 0x1ea   : > { %v2607_v36 = vadd.f32 %v2606_v25, %v2577_v41  ;;  %v2882_v37 = vpop.f32.mrf.mxu1  ;;  %v5467_v41 = vor.u32 %v5957_v11, %v5464_v30  ;;  %v5598_v25 = vld [vmem:[#allocation3 + $0x8a0] sm:$0xf]  ;;  %v5972_v30 = vld [vmem:[#allocation3 + $0x804] sm:$0xf0] }
 0x1eb   : > { %v2883_v16 = vadd.f32 %v2882_v37, %v2853_v26  ;;  %3320 = vmatmul.bf16.gmra.mxu2 %v7138_v55  ;;  %v5599_v40 = vor.u32 %v5992_v13, %v5598_v25  ;;  %v5526_v26 = vld [vmem:[#allocation3 + $0x810] sm:$0xf] }
 0x1ec   : > { %v7283_v5 = vadd.f32 %v2607_v36, %v7147_v1  ;;  %3605 = vmatmul.bf16.gmra.mxu0 %v7274_v10  ;;  %v5941_v1 = vld [vmem:[#allocation3 + $0x514] sm:$0xf]  ;;  %3956 = vmatpush.bf16.msra.mxu1 %v5607_v47  ;;  %v5590_v37 = vld [vmem:[#allocation3 + $0x890] sm:$0xf] }
 0x1ed   : > { %v7289_v31 = vadd.f32 %v2883_v16, %v7153_v3  ;;  %3634 = vmatmul.bf16.gmra.mxu1 %v7280_v54  ;;  %v5403_v29 = vor.u32 %v5941_v1, %v5400_v9  ;;  %3927 = vmatpush.bf16.msra.mxu0 %v5543_v33  ;;  %v5535_v3 = vor.u32 %v5976_v28, %v5534_v45  ;;  %v5392_v33 = vld [vmem:[#allocation3 + $0x508] sm:$0xf0]  ;;  %v5988_v28 = vld [vmem:[#allocation3 + $0x884] sm:$0xf0] }
 0x1ee   : > { %3349 = vmatmul.bf16.gmra.mxu3 %v7144_v24  ;;  %v2580_v60 = vpop.f32.mrf.mxu2  ;;  %v5527_v16 = vor.u32 %v5974_v17, %v5526_v26  ;;  %v5591_v1 = vor.u32 %v5990_v14, %v5590_v37  ;;  %v5395_v11 = vor.u32 %v5939_v34, %v5392_v33  ;;  %v5640_v17 = vld [vmem:[#allocation3 + $0x8f8] sm:$0xf0] }
 0x1ef   : > { %3656 = vmatpush.bf16.msra.mxu2 %v5403_v29  ;;  %3685 = vmatpush.bf16.msra.mxu3 %v5467_v41  ;;  %v5518_v29 = vld [vmem:[#allocation3 + $0x800] sm:$0xf] }
 0x1f0   : > { %3957 = vmatpush.bf16.msra.mxu1 %v5599_v40  ;;  %v5519_v45 = vor.u32 %v5972_v30, %v5518_v29  ;;  %v5999_v29 = vld [vmem:[#allocation3 + $0x8e4] sm:$0xf] }
 0x1f1   : > { %v2609_v52 = vpop.f32.mrf.mxu3  ;;  %v2855_v63 = vpop.f32.mrf.mxu0  ;;  %3928 = vmatpush.bf16.msra.mxu0 %v5535_v3 }
 0x1f2   : > { %v2610_v46 = vadd.f32 %v2609_v52, %v2580_v60  ;;  %v2884_v18 = vpop.f32.mrf.mxu1  ;;  %v5582_v52 = vld [vmem:[#allocation3 + $0x880] sm:$0xf] }
 0x1f3   : > { %v2885_v21 = vadd.f32 %v2884_v18, %v2855_v63  ;;  %3657 = vmatpush.bf16.msra.mxu2 %v5395_v11  ;;  %v5583_v3 = vor.u32 %v5988_v28, %v5582_v52  ;;  %v6001_v18 = vld [vmem:[#allocation3 + $0x8f4] sm:$0xf] }
 0x1f4   : > { %v7293_v36 = vadd.f32 %v2610_v46, %v7165_v19  ;;  %v5456_v19 = vld [vmem:[#allocation3 + $0x588] sm:$0xf0]  ;;  %3958 = vmatpush.bf16.msra.mxu1 %v5591_v1  ;;  %v7308_v46 = vpack.c.b16 %v3070_v53, %v3068_v43  ;;  %v3018_v43 = vrot.slane %v6118_v44, 5  ;;  %v5576_v53 = vld [vmem:[#allocation3 + $0x878] sm:$0xf0] }
 0x1f5   : > { %v7296_v22 = vadd.f32 %v2885_v21, %v7170_v56  ;;  %3929 = vmatpush.bf16.msra.mxu0 %v5527_v16  ;;  %v5459_v60 = vor.u32 %v5955_v58, %v5456_v19  ;;  %v7302_v56 = vpack.c.b16 %v3069_v7, %v3067_v38  ;;  %v5258_v38 = vrot.slane %v6117_v50, 9  ;;  %v5560_v44 = vld [vmem:[#allocation3 + $0x858] sm:$0xf0] }
 0x1f6   : > { %v2582_v9 = vpop.f32.mrf.mxu2  ;;  %v5643_v16 = vor.u32 %v6001_v18, %v5640_v17 }
 0x1f7   : > { %3686 = vmatpush.bf16.msra.mxu3 %v5459_v60  ;;  %v7322_v33 = vsel %vm7044_vm6, %v5258_v38, %v3018_v43  ;;  %v5568_v60 = vld [vmem:[#allocation3 + $0x868] sm:$0xf0]  ;;  %v5997_v43 = vld [vmem:[#allocation3 + $0x8d4] sm:$0xf] }
 0x1f8   : > { %3959 = vmatpush.bf16.msra.mxu1 %v5583_v3  ;;  %v3415_v19 = vunpack.c.h.b16 %v7322_v33  ;;  %v7689_v3 = vunpack.c.h.b16 %v7202_v49  ;;  %v5981_v49 = vld [vmem:[#allocation3 + $0x854] sm:$0xf] }
 0x1f9   : > { %v2611_v47 = vpop.f32.mrf.mxu3  ;;  %v2858_v25 = vpop.f32.mrf.mxu0  ;;  %3930 = vmatpush.bf16.msra.mxu0 %v5519_v45 }
 0x1fa   : > { %v2612_v41 = vadd.f32 %v2611_v47, %v2582_v9  ;;  %v2887_v63 = vpop.f32.mrf.mxu1  ;;  %v3414_v9 = vunpack.c.l.b16 %v7322_v33  ;;  %v5983_v47 = vld [vmem:[#allocation3 + $0x864] sm:$0xf] }
 0x1fb   : > { %v2888_v40 = vadd.f32 %v2887_v63, %v2858_v25  ;;  %3325 = vmatmul.bf16.gmra.mxu2 %v7178_v27  ;;  %4010 = vmatpush.bf16.msrb.mxu3 %v5643_v16  ;;  %v5571_v52 = vor.u32 %v5983_v47, %v5568_v60  ;;  %v7342_v63 = vpack.c.b16 %v3415_v19, %v7689_v3  ;;  %v5544_v3 = vld [vmem:[#allocation3 + $0x838] sm:$0xf0] }
 0x1fc   : > { %v7311_v13 = vadd.f32 %v2612_v41, %v7187_v35  ;;  %3610 = vmatmul.bf16.gmra.mxu0 %v7302_v56  ;;  %v5985_v35 = vld [vmem:[#allocation3 + $0x874] sm:$0xf]  ;;  %v5632_v41 = vld [vmem:[#allocation3 + $0x8e8] sm:$0xf0] }
 0x1fd   : > { %v7317_v7 = vadd.f32 %v2888_v40, %v7193_v12  ;;  %3639 = vmatmul.bf16.gmra.mxu1 %v7308_v46  ;;  %v5579_v26 = vor.u32 %v5985_v35, %v5576_v53  ;;  %v5635_v28 = vor.u32 %v5999_v29, %v5632_v41  ;;  %v5563_v53 = vor.u32 %v5981_v49, %v5560_v44  ;;  %v5616_v29 = vld [vmem:[#allocation3 + $0x8c8] sm:$0xf0] }
 0x1fe   : > { %3354 = vmatmul.bf16.gmra.mxu3 %v7184_v59  ;;  %v2585_v21 = vpop.f32.mrf.mxu2 }
 0x1ff   : > { %3981 = vmatpush.bf16.msrb.mxu2 %v5579_v26  ;;  %4011 = vmatpush.bf16.msrb.mxu3 %v5635_v28 }
 0x201   : > { %v2614_v37 = vpop.f32.mrf.mxu3  ;;  %v2860_v34 = vpop.f32.mrf.mxu0 }
 0x202   : > { %v2615_v14 = vadd.f32 %v2614_v37, %v2585_v21  ;;  %v2889_v58 = vpop.f32.mrf.mxu1 }
 0x203   : > { %v2890_v1 = vadd.f32 %v2889_v58, %v2860_v34  ;;  %3982 = vmatpush.bf16.msrb.mxu2 %v5571_v52  ;;  %v5979_v34 = vld [vmem:[#allocation3 + $0x844] sm:$0xf]  ;;  %v5552_v58 = vld [vmem:[#allocation3 + $0x848] sm:$0xf0] }
 0x204   : > { %v7325_v12 = vadd.f32 %v2615_v14, %v7205_v20  ;;  %v7336_v20 = vpack.c.b16 %v3414_v9, %v3071_v32  ;;  %v5555_v60 = vor.u32 %v5979_v34, %v5552_v58 }
 0x205   : > { %v7329_v11 = vadd.f32 %v2890_v1, %v7210_v42  ;;  %v5995_v1 = vld [vmem:[#allocation3 + $0x8c4] sm:$0xf] }
 0x206   : > { %v2587_v30 = vpop.f32.mrf.mxu2  ;;  %v5619_v52 = vor.u32 %v5995_v1, %v5616_v29  ;;  %v5973_v29 = vld [vmem:[#allocation3 + $0x814] sm:$0xf] }
 0x207   : > { %3983 = vmatpush.bf16.msrb.mxu2 %v5563_v53  ;;  %v5975_v53 = vld [vmem:[#allocation3 + $0x824] sm:$0xf] }
 0x209   : > { %v2616_v45 = vpop.f32.mrf.mxu3  ;;  %v2863_v42 = vpop.f32.mrf.mxu0 }
 0x20a   : > { %v2617_v25 = vadd.f32 %v2616_v45, %v2587_v30  ;;  %v2892_v50 = vpop.f32.mrf.mxu1 }
 0x20b   : > { %v2893_v38 = vadd.f32 %v2892_v50, %v2863_v42  ;;  %3330 = vmatmul.bf16.gmra.mxu2 %v7218_v8  ;;  %v5977_v42 = vld [vmem:[#allocation3 + $0x834] sm:$0xf] }
 0x20c   : > { %v7345_v40 = vadd.f32 %v2617_v25, %v7227_v57  ;;  %3615 = vmatmul.bf16.gmra.mxu0 %v7336_v20  ;;  %v5624_v57 = vld [vmem:[#allocation3 + $0x8d8] sm:$0xf0]  ;;  %3984 = vmatpush.bf16.msrb.mxu2 %v5555_v60  ;;  %v5993_v50 = vld [vmem:[#allocation3 + $0x8b4] sm:$0xf]  ;;  %v5547_v49 = vor.u32 %v5977_v42, %v5544_v3  ;;  %v5971_v3 = vld [vmem:[#allocation3 + $0x804] sm:$0xf] }
 0x20d   : > { %v7351_v32 = vadd.f32 %v2893_v38, %v7233_v61  ;;  %3644 = vmatmul.bf16.gmra.mxu1 %v7342_v63  ;;  %v5627_v21 = vor.u32 %v5997_v43, %v5624_v57  ;;  %v5536_v57 = vld [vmem:[#allocation3 + $0x828] sm:$0xf0] }
 0x20e   : > { %3359 = vmatmul.bf16.gmra.mxu3 %v7224_v15  ;;  %v2590_v35 = vpop.f32.mrf.mxu2 }
 0x20f   : > { %4012 = vmatpush.bf16.msrb.mxu3 %v5627_v21 }
 0x210   : > { %3985 = vmatpush.bf16.msrb.mxu2 %v5547_v49 }
 0x211   : > { %v2619_v18 = vpop.f32.mrf.mxu3  ;;  %v2865_v17 = vpop.f32.mrf.mxu0 }
 0x212   : > { %v2620_v26 = vadd.f32 %v2619_v18, %v2590_v35  ;;  %v2894_v16 = vpop.f32.mrf.mxu1  ;;  %v5991_v18 = vld [vmem:[#allocation3 + $0x8a4] sm:$0xf] }
 0x213   : > { %v2895_v61 = vadd.f32 %v2894_v16, %v2865_v17  ;;  %4013 = vmatpush.bf16.msrb.mxu3 %v5619_v52  ;;  %v5600_v17 = vld [vmem:[#allocation3 + $0x8a8] sm:$0xf0]  ;;  %v5989_v52 = vld [vmem:[#allocation3 + $0x894] sm:$0xf] }
 0x214   : > { %v7355_v37 = vadd.f32 %v2620_v26, %v7237_v2  ;;  %v5539_v26 = vor.u32 %v5975_v53, %v5536_v57 }
 0x215   : > { %v7358_v14 = vadd.f32 %v2895_v61, %v7240_v62  ;;  %v5603_v61 = vor.u32 %v5991_v18, %v5600_v17  ;;  %v6119_v17 = vld [vmem:[#allocation2 + $0x78] sm:$0xff] }
 0x216   : > { %v2592_v47 = vpop.f32.mrf.mxu2  ;;  %3986 = vmatpush.bf16.msrb.mxu2 %v5539_v26 }
 0x219   : > { %v2621_v30 = vpop.f32.mrf.mxu3  ;;  %v3258_v45 = vpop.f32.mrf.mxu0 }
 0x21a   : > { %v2622_v41 = vadd.f32 %v2621_v30, %v2592_v47  ;;  %v3287_v28 = vpop.f32.mrf.mxu1  ;;  %v5528_v30 = vld [vmem:[#allocation3 + $0x818] sm:$0xf0] }
 0x21b   : > { %v3288_v25 = vadd.f32 %v3287_v28, %v3258_v45  ;;  %3658 = vmatmul.bf16.vlgmr.msra.gmra.mxu2 %v7246_v39  ;;  %v5531_v45 = vor.u32 %v5973_v29, %v5528_v30 }
 0x21c   : > { %v7361_v2 = vadd.f32 %v2622_v41, %v7255_v23  ;;  %3931 = vmatmul.bf16.vlgmr.msra.gmra.mxu0 %v7138_v55  ;;  %v5608_v23 = vld [vmem:[#allocation3 + $0x8b8] sm:$0xf0] }
 0x21d   : > { %v7367_v62 = vadd.f32 %v3288_v25, %v7261_v0  ;;  %3960 = vmatmul.bf16.vlgmr.msra.gmra.mxu1 %v7144_v24  ;;  %v5611_v43 = vor.u32 %v5993_v50, %v5608_v23  ;;  %3987 = vmatpush.bf16.msrb.mxu2 %v5531_v45  ;;  %v5520_v50 = vld [vmem:[#allocation3 + $0x808] sm:$0xf0] }
 0x21e   : > { %3687 = vmatmul.bf16.vlgmr.msra.gmra.mxu3 %v7252_v51  ;;  %v2906_v38 = vpop.f32.mrf.mxu2  ;;  %v5523_v23 = vor.u32 %v5971_v3, %v5520_v50 }
 0x21f   : > { %4014 = vmatpush.bf16.msrb.mxu3 %v5611_v43 }
 0x221   : > { %v2935_v44 = vpop.f32.mrf.mxu3  ;;  %v7370_v39 = vpop.f32.mrf.mxu0  ;;  %3988 = vmatpush.bf16.msrb.mxu2 %v5523_v23 }
 0x222   : > { %v2936_v35 = vadd.f32 %v2935_v44, %v2906_v38  ;;  %v7375_v0 = vpop.f32.mrf.mxu1  ;;  %v5987_v38 = vld [vmem:[#allocation3 + $0x884] sm:$0xf]  ;;  %v5584_v44 = vld [vmem:[#allocation3 + $0x888] sm:$0xf0] }
 0x223   : > { %4015 = vmatpush.bf16.msrb.mxu3 %v5603_v61  ;;  %v6120_v61 = vld [vmem:[#allocation2 + $0x88] sm:$0x11] }
 0x224   : > { %v7373_v51 = vadd.f32 %v2936_v35, %v7265_v48  ;;  %v5587_v35 = vor.u32 %v5987_v38, %v5584_v44 }
 0x226   : > { %v2908_v21 = vpop.f32.mrf.mxu2 }
 0x229   : > { %v2937_v16 = vpop.f32.mrf.mxu3  ;;  %v3263_v58 = vpop.f32.mrf.mxu0 }
 0x22a   : > { %v2938_v34 = vadd.f32 %v2937_v16, %v2908_v21  ;;  %v3292_v47 = vpop.f32.mrf.mxu1  ;;  %v5259_v16 = vrot.slane %v6119_v17, 9 }
 0x22b   : > { %v3293_v48 = vadd.f32 %v3292_v47, %v3263_v58  ;;  %3663 = vmatmul.bf16.gmra.mxu2 %v7274_v10 }
 0x22c   : > { %v7378_v1 = vadd.f32 %v2938_v34, %v7283_v5  ;;  %3936 = vmatmul.bf16.gmra.mxu0 %v7178_v27  ;;  %v5592_v5 = vld [vmem:[#allocation3 + $0x898] sm:$0xf0]  ;;  %v3022_v34 = vrot.slane %v6120_v61, 5 }
 0x22d   : > { %v7384_v60 = vadd.f32 %v3293_v48, %v7289_v31  ;;  %3965 = vmatmul.bf16.gmra.mxu1 %v7184_v59  ;;  %v5595_v25 = vor.u32 %v5989_v52, %v5592_v5 }
 0x22e   : > { %3692 = vmatmul.bf16.gmra.mxu3 %v7280_v54  ;;  %v2911_v41 = vpop.f32.mrf.mxu2 }
 0x22f   : > { %4016 = vmatpush.bf16.msrb.mxu3 %v5595_v25 }
 0x231   : > { %v2940_v28 = vpop.f32.mrf.mxu3  ;;  %v7387_v10 = vpop.f32.mrf.mxu0 }
 0x232   : > { %v2941_v42 = vadd.f32 %v2940_v28, %v2911_v41  ;;  %v7392_v31 = vpop.f32.mrf.mxu1 }
 0x233   : > { %4017 = vmatpush.bf16.msrb.mxu3 %v5587_v35 }
 0x234   : > { %v7390_v54 = vadd.f32 %v2941_v42, %v7293_v36 }
 0x236   : > { %v2913_v49 = vpop.f32.mrf.mxu2 }
 0x239   : > { %v2942_v43 = vpop.f32.mrf.mxu3  ;;  %v3268_v57 = vpop.f32.mrf.mxu0 }
 0x23a   : > { %v2943_v53 = vadd.f32 %v2942_v43, %v2913_v49  ;;  %v3297_v21 = vpop.f32.mrf.mxu1 }
 0x23b   : > { %v3298_v36 = vadd.f32 %v3297_v21, %v3268_v57  ;;  %3668 = vmatmul.bf16.gmra.mxu2 %v7302_v56  ;;  %v3023_v56 = vsel %vm7044_vm6, %v5259_v16, %v3022_v34 }
 0x23c   : > { %v7395_v18 = vadd.f32 %v2943_v53, %v7311_v13  ;;  %3941 = vmatmul.bf16.gmra.mxu0 %v7218_v8  ;;  %v3758_v30 = vunpack.c.h.b16 %v3023_v56 }
 0x23d   : > { %v7401_v26 = vadd.f32 %v3298_v36, %v7317_v7  ;;  %3970 = vmatmul.bf16.gmra.mxu1 %v7224_v15  ;;  %v3757_v7 = vunpack.c.l.b16 %v3023_v56 }
 0x23e   : > { %3697 = vmatmul.bf16.gmra.mxu3 %v7308_v46  ;;  %v2916_v58 = vpop.f32.mrf.mxu2  ;;  %v7419_v25 = vpack.c.b16 %v3758_v30, %v3415_v19 }
 0x23f   : > { %v7415_v5 = vpack.c.b16 %v3757_v7, %v3414_v9 }
 0x241   : > { %v2945_v13 = vpop.f32.mrf.mxu3  ;;  %v7404_v48 = vpop.f32.mrf.mxu0 }
 0x242   : > { %v2946_v47 = vadd.f32 %v2945_v13, %v2916_v58  ;;  %v7411_v29 = vpop.f32.mrf.mxu1 }
 0x244   : > { %v7409_v46 = vadd.f32 %v2946_v47, %v7325_v12 }
 0x246   : > { %v2918_v52 = vpop.f32.mrf.mxu2 }
 0x249   : > { %v2947_v41 = vpop.f32.mrf.mxu3  ;;  %v3273_v28 = vpop.f32.mrf.mxu0 }
 0x24a   : > { %v2948_v45 = vadd.f32 %v2947_v41, %v2918_v52  ;;  %v3302_v12 = vpop.f32.mrf.mxu1 }
 0x24b   : > { %v3303_v42 = vadd.f32 %v3302_v12, %v3273_v28  ;;  %3673 = vmatmul.bf16.gmra.mxu2 %v7336_v20 }
 0x24c   : > { %v7422_v4 = vadd.f32 %v2948_v45, %v7345_v40  ;;  %3946 = vmatmul.bf16.gmra.mxu0 %v7415_v5  ;;  %v6007_v45 = vld [vmem:[%s7662_s5 + $0x20] sm:$0xff] }
 0x24d   : > { %v7428_v3 = vadd.f32 %v3303_v42, %v7351_v32  ;;  %3975 = vmatmul.bf16.gmra.mxu1 %v7419_v25 }
 0x24e   : > { %3702 = vmatmul.bf16.gmra.mxu3 %v7342_v63  ;;  %v2921_v9 = vpop.f32.mrf.mxu2 }
 0x251   : > { %v2950_v33 = vpop.f32.mrf.mxu3  ;;  %v7431_v50 = vpop.f32.mrf.mxu0 }
 0x252   : > { %v2951_v19 = vadd.f32 %v2950_v33, %v2921_v9  ;;  %v7436_v38 = vpop.f32.mrf.mxu1  ;;  %v6006_v9 = vld [vmem:[%s7662_s5 + $0x18] sm:$0xff] }
 0x254   : > { %v7434_v40 = vadd.f32 %v2951_v19, %v7355_v37 }
 0x256   : > { %v2923_v20 = vpop.f32.mrf.mxu2 }
 0x259   : > { %v2952_v49 = vpop.f32.mrf.mxu3  ;;  %v3601_v23 = vpop.f32.mrf.mxu0 }
 0x25a   : > { %v2953_v63 = vadd.f32 %v2952_v49, %v2923_v20  ;;  %v3630_v32 = vpop.f32.mrf.mxu1 }
 0x25b   : > { %v3631_v43 = vadd.f32 %v3630_v32, %v3601_v23  ;;  %3989 = vmatmul.bf16.vlgmr.msrb.gmra.mxu2 %v7138_v55 }
 0x25c   : > { %v7439_v44 = vadd.f32 %v2953_v63, %v7361_v2 }
 0x25d   : > { %v7444_v35 = vadd.f32 %v3631_v43, %v7367_v62 }
 0x25e   : > { %4018 = vmatmul.bf16.vlgmr.msrb.gmra.mxu3 %v7144_v24  ;;  %v3316_v37 = vpop.f32.mrf.mxu2 }
 0x261   : > { %v3345_v53 = vpop.f32.mrf.mxu3  ;;  %v7446_v21 = vpop.f32.mrf.mxu0 }
 0x262   : > { %v3346_v57 = vadd.f32 %v3345_v53, %v3316_v37  ;;  %v7451_v17 = vpop.f32.mrf.mxu1  ;;  %v6003_v37 = vld [vmem:[%s7662_s5] sm:$0xff] }
 0x264   : > { %v7449_v36 = vadd.f32 %v3346_v57, %v7373_v51  ;;  %v6010_v51 = vld [vmem:[%s7662_s5 + $0x38] sm:$0xff] }
 0x265   : > { %4233 = vmatpush.bf16.msrb.mxu0 %v6010_v51 }
 0x266   : > { %v3318_v2 = vpop.f32.mrf.mxu2 }
 0x269   : > { %v3347_v16 = vpop.f32.mrf.mxu3  ;;  %v3606_v34 = vpop.f32.mrf.mxu0 }
 0x26a   : > { %v3348_v61 = vadd.f32 %v3347_v16, %v3318_v2  ;;  %v3635_v24 = vpop.f32.mrf.mxu1 }
 0x26b   : > { %v3636_v62 = vadd.f32 %v3635_v24, %v3606_v34  ;;  %3994 = vmatmul.bf16.gmra.mxu2 %v7178_v27 }
 0x26c   : > { %v7454_v55 = vadd.f32 %v3348_v61, %v7378_v1  ;;  %v6009_v1 = vld [vmem:[%s7662_s5 + $0x30] sm:$0xff] }
 0x26d   : > { %v7462_v58 = vadd.f32 %v3636_v62, %v7384_v60  ;;  %4234 = vmatpush.bf16.msrb.mxu0 %v6009_v1  ;;  %v6008_v60 = vld [vmem:[%s7662_s5 + $0x28] sm:$0xff] }
 0x26e   : > { %4023 = vmatmul.bf16.gmra.mxu3 %v7184_v59  ;;  %v3321_v13 = vpop.f32.mrf.mxu2 }
 0x271   : > { %v3350_v47 = vpop.f32.mrf.mxu3  ;;  %v7467_v7 = vpop.f32.mrf.mxu0  ;;  %4235 = vmatpush.bf16.msrb.mxu0 %v6008_v60  ;;  %v3290_v60 = vadd.f32 %v7375_v0, %v7370_v39  ;;  %v6017_v39 = vld [vmem:[%s7662_s5 + $0x70] sm:$0xff] }
 0x272   : > { %v3351_v56 = vadd.f32 %v3350_v47, %v3321_v13  ;;  %v7472_v59 = vpop.f32.mrf.mxu1 }
 0x274   : > { %v7470_v27 = vadd.f32 %v3351_v56, %v7390_v54 }
 0x275   : > { %4236 = vmatpush.bf16.msrb.mxu0 %v6007_v45 }
 0x276   : > { %v3323_v30 = vpop.f32.mrf.mxu2 }
 0x279   : > { %v3352_v52 = vpop.f32.mrf.mxu3  ;;  %v3611_v28 = vpop.f32.mrf.mxu0  ;;  %4237 = vmatpush.bf16.msrb.mxu0 %v6006_v9 }
 0x27a   : > { %v3353_v41 = vadd.f32 %v3352_v52, %v3323_v30  ;;  %v3640_v54 = vpop.f32.mrf.mxu1  ;;  %v7530_v30 = vld [vmem:[#allocation5] sm:$0x3] }
 0x27b   : > { %v3641_v42 = vadd.f32 %v3640_v54, %v3611_v28  ;;  %3999 = vmatmul.bf16.gmra.mxu2 %v7218_v8  ;;  %v3367_v54 = vadd.f32 %v3290_v60, %v7268_v6 }
 0x27c   : > { %v7481_v12 = vadd.f32 %v3353_v41, %v7395_v18  ;;  %v6005_v18 = vld [vmem:[%s7662_s5 + $0x10] sm:$0xff]  ;;  %v3633_v41 = vadd.f32 %v7451_v17, %v7446_v21 }
 0x27d   : > { %v7489_v33 = vadd.f32 %v3641_v42, %v7401_v26  ;;  %4238 = vmatpush.bf16.msrb.mxu0 %v6005_v18  ;;  %v6004_v26 = vld [vmem:[%s7662_s5 + $0x8] sm:$0xff] }
 0x27e   : > { %4028 = vmatmul.bf16.gmra.mxu3 %v7224_v15  ;;  %v3326_v19 = vpop.f32.mrf.mxu2 }
 0x281   : > { %v3355_v20 = vpop.f32.mrf.mxu3  ;;  %v7494_v63 = vpop.f32.mrf.mxu0  ;;  %4239 = vmatpush.bf16.msrb.mxu0 %v6004_v26 }
 0x282   : > { %v3356_v49 = vadd.f32 %v3355_v20, %v3326_v19  ;;  %v7499_v15 = vpop.f32.mrf.mxu1  ;;  %v3710_v20 = vadd.f32 %v3633_v41, %v3367_v54  ;;  %v6013_v54 = vld [vmem:[%s7662_s5 + $0x50] sm:$0xff] }
 0x284   : > { %v7497_v8 = vadd.f32 %v3356_v49, %v7409_v46 }
 0x285   : > { %4240 = vmatpush.bf16.msrb.mxu0 %v6003_v37 }
 0x286   : > { %v3328_v23 = vpop.f32.mrf.mxu2 }
 0x289   : > { %v3357_v32 = vpop.f32.mrf.mxu3  ;;  %v3616_v53 = vpop.f32.mrf.mxu0 }
 0x28a   : > { %v3358_v43 = vadd.f32 %v3357_v32, %v3328_v23  ;;  %v3645_v46 = vpop.f32.mrf.mxu1 }
 0x28b   : > { %v3646_v2 = vadd.f32 %v3645_v46, %v3616_v53  ;;  %4004 = vmatmul.bf16.gmra.mxu2 %v7415_v5  ;;  %v6018_v5 = vld [vmem:[%s7662_s5 + $0x78] sm:$0xff]  ;;  %v3295_v53 = vadd.f32 %v7392_v31, %v7387_v10 }
 0x28c   : > { %v7508_v57 = vadd.f32 %v3358_v43, %v7422_v4  ;;  %4262 = vmatpush.bf16.msrb.mxu1 %v6018_v5 }
 0x28d   : > { %v7513_v16 = vadd.f32 %v3646_v2, %v7428_v3 }
 0x28e   : > { %4033 = vmatmul.bf16.gmra.mxu3 %v7419_v25  ;;  %v3331_v61 = vpop.f32.mrf.mxu2 }
 0x290   : > { %4263 = vmatpush.bf16.msrb.mxu1 %v6017_v39 }
 0x291   : > { %v3360_v34 = vpop.f32.mrf.mxu3  ;;  %v7515_v62 = vpop.f32.mrf.mxu0 }
 0x292   : > { %v3361_v24 = vadd.f32 %v3360_v34, %v3331_v61  ;;  %v7520_v4 = vpop.f32.mrf.mxu1  ;;  %v3638_v61 = vadd.f32 %v7472_v59, %v7467_v7 }
 0x294   : > { %v7518_v51 = vadd.f32 %v3361_v24, %v7434_v40 }
 0x296   : > { %v3333_v13 = vpop.f32.mrf.mxu2 }
 0x299   : > { %v3362_v47 = vpop.f32.mrf.mxu3  ;;  %v3932_v1 = vpop.f32.mrf.mxu0 }
 0x29a   : > { %v3363_v56 = vadd.f32 %v3362_v47, %v3333_v13  ;;  %v3961_v3 = vpop.f32.mrf.mxu1  ;;  %v3371_v13 = vadd.f32 %v3295_v53, %v7296_v22 }
 0x29b   : > { %v3962_v40 = vadd.f32 %v3961_v3, %v3932_v1  ;;  %v6015_v1 = vld [vmem:[%s7662_s5 + $0x60] sm:$0xff] }
 0x29c   : > { %v7526_v25 = vadd.f32 %v3363_v56, %v7439_v44  ;;  %v7537_v44 = vperm.slane %v7530_v30, 0  ;;  %v3714_v31 = vadd.f32 %v3638_v61, %v3371_v13  ;;  %v3648_v13 = vadd.f32 %v7520_v4, %v7515_v62 }
 0x29d   : > { %v4039_v42 = vadd.f32 %v3962_v40, %v7444_v35 }
 0x29e   : > { %v3659_v52 = vpop.f32.mrf.mxu2 }
 0x29f   : > { %v4061_v17 = vadd.f32 %v7537_v44, %v4039_v42  ;;  %v3300_v42 = vadd.f32 %v7411_v29, %v7404_v48 }
 0x2a1   : > { %v3688_v45 = vpop.f32.mrf.mxu3  ;;  %v3934_v9 = vpop.f32.mrf.mxu0  ;;  %v4077_v26 = vmax.f32 %v4061_v17, 0.0  ;;  %v3375_v17 = vadd.f32 %v3300_v42, %v7329_v11 }
 0x2a2   : > { %v3689_v28 = vadd.f32 %v3688_v45, %v3659_v52  ;;  %v3963_v19 = vpop.f32.mrf.mxu1 }
 0x2a3   : > { %v3964_v21 = vadd.f32 %v3963_v19, %v3934_v9  ;;  %v3643_v19 = vadd.f32 %v7499_v15, %v7494_v63  ;;  %v6012_v63 = vld [vmem:[%s7662_s5 + $0x48] sm:$0xff] }
 0x2a4   : > { %v7543_v0 = vadd.f32 %v3689_v28, %v7449_v36  ;;  %v6016_v36 = vld [vmem:[%s7662_s5 + $0x68] sm:$0xff] }
 0x2a5   : > { %v4041_v6 = vadd.f32 %v3964_v21, %v3710_v20  ;;  %4264 = vmatpush.bf16.msrb.mxu1 %v6016_v36 }
 0x2a6   : > { %v7546_v49 = vpop.f32.mrf.mxu2 }
 0x2a7   : > { %v4063_v35 = vadd.f32 %v7537_v44, %v4041_v6 }
 0x2a9   : > { %v7549_v18 = vpop.f32.mrf.mxu3  ;;  %v4079_v23 = vmax.f32 %v4063_v35, 0.0  ;;  %v3937_v32 = vpop.f32.mrf.mxu0  ;;  %4265 = vmatpush.bf16.msrb.mxu1 %v6015_v1 }
 0x2aa   : > { %v3966_v43 = vpop.f32.mrf.mxu1 }
 0x2ab   : > { %v4093_v37 = vpack.c.bf16 %v4079_v23, %v4077_v26  ;;  %v3967_v46 = vadd.f32 %v3966_v43, %v3937_v32  ;;  %v3718_v32 = vadd.f32 %v3643_v19, %v3375_v17 }
 0x2ad   : > { %4241 = vmatmul.bf16.vlgmr.msrb.gmra.mxu0 %v4093_v37  ;;  %v4043_v47 = vadd.f32 %v3967_v46, %v7462_v58 }
 0x2ae   : > { %v3664_v2 = vpop.f32.mrf.mxu2 }
 0x2af   : > { %v4065_v7 = vadd.f32 %v7537_v44, %v4043_v47 }
 0x2b1   : > { %v3693_v34 = vpop.f32.mrf.mxu3  ;;  %v3939_v56 = vpop.f32.mrf.mxu0  ;;  %v4081_v40 = vmax.f32 %v4065_v7, 0.0 }
 0x2b2   : > { %v3694_v24 = vadd.f32 %v3693_v34, %v3664_v2  ;;  %v3968_v10 = vpop.f32.mrf.mxu1  ;;  %v3305_v2 = vadd.f32 %v7436_v38, %v7431_v50 }
 0x2b3   : > { %v3969_v3 = vadd.f32 %v3968_v10, %v3939_v56 }
 0x2b4   : > { %v7564_v5 = vadd.f32 %v3694_v24, %v7470_v27  ;;  %v6014_v27 = vld [vmem:[%s7662_s5 + $0x58] sm:$0xff]  ;;  %v6011_v24 = vld [vmem:[%s7662_s5 + $0x40] sm:$0xff]  ;;  %v3379_v1 = vadd.f32 %v3305_v2, %v7358_v14 }
 0x2b5   : > { %v4045_v59 = vadd.f32 %v3969_v3, %v3714_v31  ;;  %4266 = vmatpush.bf16.msrb.mxu1 %v6014_v27 }
 0x2b6   : > { %v7567_v60 = vpop.f32.mrf.mxu2  ;;  %v3722_v3 = vadd.f32 %v3648_v13, %v3379_v1 }
 0x2b7   : > { %v4067_v22 = vadd.f32 %v7537_v44, %v4045_v59 }
 0x2b9   : > { %v7570_v58 = vpop.f32.mrf.mxu3  ;;  %v4083_v52 = vmax.f32 %v4067_v22, 0.0  ;;  %v3942_v41 = vpop.f32.mrf.mxu0  ;;  %4267 = vmatpush.bf16.msrb.mxu1 %v6013_v54  ;;  %v4058_v54 = vperm.slane %v7530_v30, 1 }
 0x2ba   : > { %v3971_v45 = vpop.f32.mrf.mxu1 }
 0x2bb   : > { %v4095_v28 = vpack.c.bf16 %v4083_v52, %v4081_v40  ;;  %v3972_v9 = vadd.f32 %v3971_v45, %v3942_v41 }
 0x2bd   : > { %4246 = vmatmul.bf16.gmra.mxu0 %v4095_v28  ;;  %v4047_v6 = vadd.f32 %v3972_v9, %v7489_v33  ;;  %4268 = vmatpush.bf16.msrb.mxu1 %v6012_v63 }
 0x2be   : > { %v3669_v39 = vpop.f32.mrf.mxu2 }
 0x2bf   : > { %v4069_v29 = vadd.f32 %v7537_v44, %v4047_v6 }
 0x2c1   : > { %v3698_v20 = vpop.f32.mrf.mxu3  ;;  %v3944_v35 = vpop.f32.mrf.mxu0  ;;  %v4085_v33 = vmax.f32 %v4069_v29, 0.0  ;;  %4269 = vmatpush.bf16.msrb.mxu1 %v6011_v24 }
 0x2c2   : > { %v3699_v21 = vadd.f32 %v3698_v20, %v3669_v39  ;;  %v3973_v23 = vpop.f32.mrf.mxu1 }
 0x2c3   : > { %v3974_v48 = vadd.f32 %v3973_v23, %v3944_v35 }
 0x2c4   : > { %v7585_v26 = vadd.f32 %v3699_v21, %v7497_v8 }
 0x2c5   : > { %v4049_v36 = vadd.f32 %v3974_v48, %v3718_v32 }
 0x2c6   : > { %v7588_v43 = vpop.f32.mrf.mxu2 }
 0x2c7   : > { %v4071_v11 = vadd.f32 %v7537_v44, %v4049_v36 }
 0x2c9   : > { %v7594_v15 = vpop.f32.mrf.mxu3  ;;  %v4087_v8 = vmax.f32 %v4071_v11, 0.0  ;;  %v3947_v37 = vpop.f32.mrf.mxu0 }
 0x2ca   : > { %v3976_v53 = vpop.f32.mrf.mxu1 }
 0x2cb   : > { %v4097_v46 = vpack.c.bf16 %v4087_v8, %v4085_v33  ;;  %v3977_v61 = vadd.f32 %v3976_v53, %v3947_v37 }
 0x2cd   : > { %4251 = vmatmul.bf16.gmra.mxu0 %v4097_v46  ;;  %v4051_v10 = vadd.f32 %v3977_v61, %v7513_v16 }
 0x2ce   : > { %v3674_v34 = vpop.f32.mrf.mxu2 }
 0x2cf   : > { %v4073_v59 = vadd.f32 %v7537_v44, %v4051_v10 }
 0x2d1   : > { %v3703_v47 = vpop.f32.mrf.mxu3  ;;  %v3949_v31 = vpop.f32.mrf.mxu0  ;;  %v4089_v52 = vmax.f32 %v4073_v59, 0.0 }
 0x2d2   : > { %v3704_v56 = vadd.f32 %v3703_v47, %v3674_v34  ;;  %v3978_v38 = vpop.f32.mrf.mxu1 }
 0x2d3   : > { %v3979_v7 = vadd.f32 %v3978_v38, %v3949_v31 }
 0x2d4   : > { %v7606_v50 = vadd.f32 %v3704_v56, %v7518_v51  ;;  %v3691_v51 = vadd.f32 %v7549_v18, %v7546_v49 }
 0x2d5   : > { %v4053_v22 = vadd.f32 %v3979_v7, %v3722_v3 }
 0x2d6   : > { %v3676_v40 = vpop.f32.mrf.mxu2  ;;  %v3711_v39 = vadd.f32 %v3691_v51, %v7454_v55  ;;  %v6092_v51 = vld [vmem:[#allocation7] ss:$0 sm:$0xff] }
 0x2d7   : > { %v4075_v62 = vadd.f32 %v7537_v44, %v4053_v22 }
 0x2d9   : > { %v3705_v4 = vpop.f32.mrf.mxu3  ;;  %v4091_v41 = vmax.f32 %v4075_v62, 0.0 }
 0x2da   : > { %v3706_v7 = vadd.f32 %v3705_v4, %v3676_v40 }
 0x2db   : > { %v4099_v27 = vpack.c.bf16 %v4091_v41, %v4089_v52 }
 0x2dc   : > { %v3723_v59 = vadd.f32 %v3706_v7, %v7526_v25 }
 0x2dd   : > { %4256 = vmatmul.bf16.gmra.mxu0 %v4099_v27 }
 0x2de   : > { %v3990_v14 = vpop.f32.mrf.mxu2 }
 0x2e1   : > { %v4019_v16 = vpop.f32.mrf.mxu3 }
 0x2e2   : > { %v4020_v45 = vadd.f32 %v4019_v16, %v3990_v14 }
 0x2e4   : > { %v4040_v28 = vadd.f32 %v4020_v45, %v7543_v0  ;;  %v3696_v0 = vadd.f32 %v7570_v58, %v7567_v60  ;;  %v3701_v60 = vadd.f32 %v7594_v15, %v7588_v43 }
 0x2e6   : > { %v3992_v42 = vpop.f32.mrf.mxu2  ;;  %v4062_v19 = vadd.f32 %v4058_v54, %v4040_v28  ;;  %v3715_v55 = vadd.f32 %v3696_v0, %v7481_v12  ;;  %v3719_v12 = vadd.f32 %v3701_v60, %v7508_v57 }
 0x2e8   : > { %v4078_v17 = vmax.f32 %v4062_v19, 0.0 }
 0x2e9   : > { %v4021_v9 = vpop.f32.mrf.mxu3 }
 0x2ea   : > { %v4022_v44 = vadd.f32 %v4021_v9, %v3992_v42 }
 0x2ec   : > { %v4042_v20 = vadd.f32 %v4022_v44, %v3711_v39 }
 0x2ee   : > { %v4064_v21 = vadd.f32 %v4058_v54, %v4042_v20  ;;  %v3995_v35 = vpop.f32.mrf.mxu2 }
 0x2f0   : > { %v4080_v6 = vmax.f32 %v4064_v21, 0.0 }
 0x2f1   : > { %v4024_v23 = vpop.f32.mrf.mxu3 }
 0x2f2   : > { %v4094_v32 = vpack.c.bf16 %v4080_v6, %v4078_v17  ;;  %v4025_v48 = vadd.f32 %v4024_v23, %v3995_v35 }
 0x2f4   : > { %4270 = vmatmul.bf16.vlgmr.msrb.gmra.mxu1 %v4094_v32  ;;  %v4044_v30 = vadd.f32 %v4025_v48, %v7564_v5 }
 0x2f6   : > { %v3997_v49 = vpop.f32.mrf.mxu2  ;;  %v4066_v36 = vadd.f32 %v4058_v54, %v4044_v30 }
 0x2f8   : > { %v4082_v33 = vmax.f32 %v4066_v36, 0.0 }
 0x2f9   : > { %v4026_v18 = vpop.f32.mrf.mxu3 }
 0x2fa   : > { %v4027_v29 = vadd.f32 %v4026_v18, %v3997_v49 }
 0x2fc   : > { %v4046_v63 = vadd.f32 %v4027_v29, %v3715_v55 }
 0x2fe   : > { %v4068_v11 = vadd.f32 %v4058_v54, %v4046_v63  ;;  %v4000_v37 = vpop.f32.mrf.mxu2 }
 0x300   : > { %v4084_v8 = vmax.f32 %v4068_v11, 0.0 }
 0x301   : > { %v4029_v53 = vpop.f32.mrf.mxu3 }
 0x302   : > { %v4096_v46 = vpack.c.bf16 %v4084_v8, %v4082_v33  ;;  %v4030_v2 = vadd.f32 %v4029_v53, %v4000_v37 }
 0x304   : > { %4275 = vmatmul.bf16.gmra.mxu1 %v4096_v46  ;;  %v4048_v5 = vadd.f32 %v4030_v2, %v7585_v26 }
 0x306   : > { %v4002_v58 = vpop.f32.mrf.mxu2  ;;  %v4070_v24 = vadd.f32 %v4058_v54, %v4048_v5 }
 0x308   : > { %v4086_v56 = vmax.f32 %v4070_v24, 0.0 }
 0x309   : > { %v4031_v61 = vpop.f32.mrf.mxu3 }
 0x30a   : > { %v4032_v34 = vadd.f32 %v4031_v61, %v4002_v58 }
 0x30c   : > { %v4050_v13 = vadd.f32 %v4032_v34, %v3719_v12 }
 0x30e   : > { %v4072_v47 = vadd.f32 %v4058_v54, %v4050_v13  ;;  %v4005_v10 = vpop.f32.mrf.mxu2 }
 0x310   : > { %v4088_v1 = vmax.f32 %v4072_v47, 0.0 }
 0x311   : > { %v4034_v31 = vpop.f32.mrf.mxu3 }
 0x312   : > { %v4098_v38 = vpack.c.bf16 %v4088_v1, %v4086_v56  ;;  %v4035_v3 = vadd.f32 %v4034_v31, %v4005_v10 }
 0x314   : > { %4280 = vmatmul.bf16.gmra.mxu1 %v4098_v38  ;;  %v4052_v43 = vadd.f32 %v4035_v3, %v7606_v50 }
 0x316   : > { %v4007_v26 = vpop.f32.mrf.mxu2  ;;  %v4074_v22 = vadd.f32 %v4058_v54, %v4052_v43 }
 0x318   : > { %v4090_v41 = vmax.f32 %v4074_v22, 0.0 }
 0x319   : > { %v4036_v15 = vpop.f32.mrf.mxu3 }
 0x31a   : > { %v4037_v57 = vadd.f32 %v4036_v15, %v4007_v26 }
 0x31c   : > { %v4054_v62 = vadd.f32 %v4037_v57, %v3723_v59 }
 0x31e   : > { %v4076_v52 = vadd.f32 %v4058_v54, %v4054_v62 }
 0x320   : > { %v4092_v27 = vmax.f32 %v4076_v52, 0.0 }
 0x322   : > { %v4100_v14 = vpack.c.bf16 %v4092_v27, %v4090_v41 }
 0x324   : > { %4285 = vmatmul.bf16.gmra.mxu1 %v4100_v14 }
 0x32a   : > { %v4242_v16 = vpop.f32.mrf.mxu0 }
 0x32b   : > { %v4243_v28 = vadd.f32 %v6092_v51, %v4242_v16 }
 0x332   : > { %v4244_v45 = vpop.f32.mrf.mxu0 }
 0x333   : > { %v4245_v4 = vadd.f32 %v6092_v51, %v4244_v45 }
 0x33a   : > { %v4247_v40 = vpop.f32.mrf.mxu0 }
 0x33b   : > { %v4248_v39 = vadd.f32 %v6092_v51, %v4247_v40 }
 0x342   : > { %v4249_v9 = vpop.f32.mrf.mxu0 }
 0x343   : > { %v4250_v21 = vadd.f32 %v6092_v51, %v4249_v9 }
 0x34a   : > { %v4252_v20 = vpop.f32.mrf.mxu0 }
 0x34b   : > { %v4253_v35 = vadd.f32 %v6092_v51, %v4252_v20 }
 0x352   : > { %v4254_v23 = vpop.f32.mrf.mxu0 }
 0x353   : > { %v4255_v0 = vadd.f32 %v6092_v51, %v4254_v23 }
 0x35a   : > { %v4257_v18 = vpop.f32.mrf.mxu0 }
 0x35b   : > { %v4258_v55 = vadd.f32 %v6092_v51, %v4257_v18 }
 0x362   : > { %v4259_v63 = vpop.f32.mrf.mxu0 }
 0x363   : > { %v4260_v11 = vadd.f32 %v6092_v51, %v4259_v63 }
 0x371   : > { %v4271_v25 = vpop.f32.mrf.mxu1 }
 0x372   : > { %v4272_v50 = vadd.f32 %v4271_v25, %v4243_v28 }
 0x374   : > { %4292 = vst.msk [vmem:[%s7630_s21] sm:$0xff] %vm4291_vm7, %v4272_v50 }
 0x379   : > { %v4273_v54 = vpop.f32.mrf.mxu1 }
 0x37a   : > { %v4274_v42 = vadd.f32 %v4273_v54, %v4245_v4 }
 0x37c   : > { %4293 = vst.msk [vmem:[%s7630_s21 + $0x8] sm:$0xff] %vm4291_vm7, %v4274_v42 }
 0x381   : > { %v4276_v44 = vpop.f32.mrf.mxu1 }
 0x382   : > { %v4277_v19 = vadd.f32 %v4276_v44, %v4248_v39 }
 0x384   : > { %4294 = vst.msk [vmem:[%s7630_s21 + $0x10] sm:$0xff] %vm4291_vm7, %v4277_v19 }
 0x389   : > { %v4278_v17 = vpop.f32.mrf.mxu1 }
 0x38a   : > { %v4279_v6 = vadd.f32 %v4278_v17, %v4250_v21 }
 0x38c   : > { %4295 = vst.msk [vmem:[%s7630_s21 + $0x18] sm:$0xff] %vm4291_vm7, %v4279_v6 }
 0x391   : > { %v4281_v32 = vpop.f32.mrf.mxu1 }
 0x392   : > { %v4282_v48 = vadd.f32 %v4281_v32, %v4253_v35 }
 0x394   : > { %4296 = vst.msk [vmem:[%s7630_s21 + $0x20] sm:$0xff] %vm4291_vm7, %v4282_v48 }
 0x399   : > { %v4283_v30 = vpop.f32.mrf.mxu1 }
 0x39a   : > { %v4284_v49 = vadd.f32 %v4283_v30, %v4255_v0 }
 0x39c   : > { %4297 = vst.msk [vmem:[%s7630_s21 + $0x28] sm:$0xff] %vm4291_vm7, %v4284_v49 }
 0x3a1   : > { %v4286_v29 = vpop.f32.mrf.mxu1 }
 0x3a2   : > { %v4287_v36 = vadd.f32 %v4286_v29, %v4258_v55 }
 0x3a4   : > { %4298 = vst.msk [vmem:[%s7630_s21 + $0x30] sm:$0xff] %vm4291_vm7, %v4287_v36 }
 0x3a9   : > { %v4288_v33 = vpop.f32.mrf.mxu1 }
 0x3aa   : > { %v4289_v8 = vadd.f32 %v4288_v33, %v4260_v11 }
 0x3ac   : > { %4299 = vst.msk [vmem:[%s7630_s21 + $0x38] sm:$0xff] %vm4291_vm7, %v4289_v8 }
 0x3ad PF: > { %s19_s24 = sadd.s32 1, %s6241_s24   ;;  %s7690_s1 = smov %s6237_s2 }
 0x3ae   : > { %p16_p8 = scmp.ge.s32.totalorder %s19_s24, 4   ;;  %s7691_s2 = smov %s7693_s11 }
 0x3b0   :  { %18 = sbr.rel (!%p16_p8) target bundleno = 3 (0x3), region = 124 }
 0x3b5   :  { %4330 = vsyncpa [#allocation4], 1 }
 0x3b6   :  { %4332 = vsyncpa [#allocation4 + $0x1], 1 }
 0x3b7   :  { %4333 = vsyncpa [#allocation6], 1 }

// kernel: efficient_deeplab_forward.3
= control target key start
LH: loop header
LB: loop body
LE: loop exit
PB: predicated region body
PF: predicated region fallthrough
CT: control target
= control target key end

     0   :  { %13 = vsyncpa [#allocation3], 0  ;;  %s11681_s0 = inlined_call_operand.vmem [shape: bf16[2,2,2560], index: 0, kind: input, shape index: {}]   ;;  %s11682_s1 = inlined_call_operand.vmem [shape: bf16[2,10,10,16], index: 1, kind: input, shape index: {}]   ;;  %s11683_s2 = inlined_call_operand.vmem [shape: bf16[10,2], index: 2, kind: input, shape index: {}]   ;;  %s11684_s3 = inlined_call_operand.vmem [shape: bf16[16,8], index: 3, kind: input, shape index: {}]   ;;  %s11685_s4 = inlined_call_operand.hbm [shape: f32[1,8], index: 4, kind: input, shape index: {}]   ;;  %s11686_s5 = inlined_call_operand.hbm [shape: bf16[9,256,256], index: 5, kind: input, shape index: {}]   ;;  %s11687_s6 = inlined_call_operand.hbm [shape: bf16[9,8,256], index: 6, kind: input, shape index: {}]   ;;  %s11688_s7 = inlined_call_operand.hbm [shape: f32[1,256], index: 7, kind: input, shape index: {}]   ;;  %s11689_s8 = inlined_call_operand.vmem [shape: bf16[2,8,8,256], index: 8, kind: output, shape index: {}]  }
   0x1   :  { %14 = vsyncpa [#allocation5], 0 }
   0x2   :  { %15 = vsyncpa [#allocation8], 0  ;;  %s8668_s27 = smov 0   ;;  %s8670_s28 = smov 0  }
   0x3   :  { %s8672_s29 = smov 0  }
   0x4 LB: > { %s273_s10 = sshll.u32 %s11686_s5, 4  ;;  %s6772_s11 = sadd.s32 4294967295, %s8608_s29   ;;  %s8608_s29 = sphi %s8672_s29, %s21_s29   ;;  %s8604_s28 = sphi %s8670_s28, %s12181_s28   ;;  %s8600_s27 = sphi %s8668_s27, %s12180_s27   ;;  %s274_s10 = int_to_ptr.hbm [resolvable:$true] %s273_s10 }
   0x5   : > { %p6774_p0 = scmp.ge.s32.totalorder %s8608_s29, 1  ;;  %p244_p1 = scmp.lt.s32.totalorder %s8608_s29, 3 }
   0x6   : > { %p8689_p2 = scmp.eq.s32.totalorder %s6772_s11, 0  ;;  %s8610_s14 = smov [#allocation4]  }
   0x7   : > { %p8693_p3 = pnand %p6774_p0, %p244_p1  ;;  %s275_s15 = sshll.u32 %s8610_s14, 4  ;;  %s276_s15 = int_to_ptr.vmem [resolvable:$true] %s275_s15 }
   0x8   : > { %s33_s17 = sadd.s32 1, %s8604_s28  ;;  %s8611_s18 = smov 128  }
   0x9   : > { %p8394_p4 = pneg %p8693_p3  ;;  %p35_p6 = scmp.ge.s32.totalorder %s33_s17, 2 }
   0xa   : > { %s8612_s19 = smov 8   ;;  %s262_s22 = sshll.u32 %s11685_s4, 4  ;;  %s263_s22 = int_to_ptr.hbm [resolvable:$true] %s262_s22 }
   0xb   : > { %p8701_p5 = pnand %p8689_p2, %p8394_p4  ;;  %s12183_s17 = smov (%p35_p6, %s33_s17), 0 }
   0xc   : > { %s8613_s23 = smov [#allocation2]   ;;  %s287_s30 = sshll.u32 %s11687_s6, 4  ;;  %s288_s30 = int_to_ptr.hbm [resolvable:$true] %s287_s30 }
   0xd   : > { %8400 = dma.hbm_to_vmem [thread:$0]  (!%p8701_p5), %s274_s10, 36864, %s276_s15, [#allocation5], %s8611_s18, %s8611_s18, %s8612_s19  }
   0xe   : > { %s264_s24 = sshll.u32 %s8613_s23, 4  ;;  %s8614_s9 = smov [#allocation6]   ;;  %s265_s24 = int_to_ptr.vmem [resolvable:$true] %s264_s24 }
   0xf   : > { %8397 = dma.hbm_to_vmem [thread:$0]  (!%p8701_p5), %s263_s22, 16, %s265_s24, [#allocation3]  }
  0x10   : > { %s289_s10 = sshll.u32 %s8614_s9, 4  ;;  %s302_s15 = sshll.u32 %s11688_s7, 4  ;;  %s290_s10 = int_to_ptr.vmem [resolvable:$true] %s289_s10  ;;  %s303_s15 = int_to_ptr.hbm [resolvable:$true] %s302_s15 }
  0x11   : > { %8403 = dma.hbm_to_vmem [thread:$0]  (!%p8701_p5), %s288_s30, 1152, %s290_s10, [#allocation5], %s8611_s18, %s8611_s18, %s8612_s19  }
  0x12   : > { %s8615_s20 = smov [#allocation7]   ;;  %332 = sbr.rel (%p8693_p3) target bundleno = 1366 (0x556), region = 52 }
  0x13   : > { %s304_s21 = sshll.u32 %s8615_s20, 4  ;;  %s305_s21 = int_to_ptr.vmem [resolvable:$true] %s304_s21 }
  0x14   : > { %8406 = dma.hbm_to_vmem [thread:$0]  (!%p8701_p5), %s303_s15, 32, %s305_s21, [#allocation8]  }
  0x17   : > { %8587 = dma.done.wait (%p8689_p2), [#allocation3], 16  }
  0x18   : > { %8589 = vsyncadd (%p8689_p2), [#allocation3], 4294967280 }
  0x19   : > { %8591 = dma.done.wait (%p8689_p2), [#allocation5], 38016  }
  0x1a   : > { %8593 = vsyncadd (%p8689_p2), [#allocation5], 4294929280 }
  0x1b   : > { %8595 = dma.done.wait (%p8689_p2), [#allocation8], 32  }
  0x1c   : > { %8597 = vsyncadd (%p8689_p2), [#allocation8], 4294967264  ;;  %p391_p7 = scmp.lt.s32.totalorder %s8600_s27, 1  ;;  %vm457_vm0 = vcmask 1040384   ;;  %v6790_v1 = vld [vmem:[%s11683_s2] sm:$0xf] }
  0x1d   : > { %v8086_v2 = vld [vmem:[%s11683_s2] sm:$0x10]  ;;  %vm453_vm1 = vcmask 15360   ;;  %vm1289_vm2 = vcmask 1041409   ;;  %vm1293_vm3 = vcmask 1042434   ;;  %vm1297_vm4 = vcmask 1043459  }
  0x1e   : > { %s12185_s27 = smov (!%p391_p7, %s8600_s27), 1  ;;  %v8759_v12 = vor.u32 %v8086_v2, %v6790_v1  ;;  %v8087_v1 = vld [vmem:[%s11684_s3] sm:$0xff]  ;;  %vm1545_vm5 = vcmask 130048   ;;  %vm779_vm6 = vcmask 1047556   ;;  %vm2385_vm8 = vcmask 1043456  }
  0x1f   : > { %s8376_s13 = smul.u32 20, %s12185_s27  ;;  %vm2372_vm10 = vcmask 64512   ;;  %vm3608_vm11 = vsmask.f32 3328  ;;  %vm3609_vm12 = vsmask.f32 7440 }
  0x20   : > { %s8377_s25 = smul.u32 80, %s12185_s27  ;;  %vm9429_vm13 = vmor %vm3608_vm11, %vm3609_vm12  ;;  %vm5191_vm14 = vcmask 1042432   ;;  %vm5192_vm15 = vcmask 1046532   ;;  %s8085_s14 = sshll.u32 %s12185_s27, 6 }
  0x21   : > { %s8747_s19 = scalar_lea.vmem %s11681_s0, %s8376_s13  ;;  %s11624_s21 = scalar_lea.vmem %s11689_s8, %s8085_s14 }
  0x22   : > { %v419_v0 = vld [vmem:[%s8747_s19] sm:$0xff]  ;;  %v420_v3 = vld [vmem:[%s8747_s19 + $0x8] sm:$0xff]  ;;  %v421_v36 = vld [vmem:[%s8747_s19 + $0x10] sm:$0xf]  ;;  %s8807_s9 = scalar_lea.vmem %s11682_s1, %s8377_s25 }
  0x23   : > { %428 = vst [vmem:[#allocation1] ss:$9 sm:$0xff] %v419_v0  ;;  %v1226_v46 = vld [vmem:[%s8807_s9] sm:$0xf]  ;;  %v1227_v47 = vld [vmem:[%s8807_s9 + $0x4] sm:$0x1] }
  0x24   : > { %v1228_v48 = vld [vmem:[%s8807_s9 + $0x8] sm:$0xf]  ;;  %v1266_v49 = vrot.slane %v1226_v46, 3  ;;  %v1267_v50 = vrot.slane %v1227_v47, 3  ;;  %v1229_v2 = vld [vmem:[%s8807_s9 + $0xc] sm:$0x1] }
  0x25   : > { %v1268_v51 = vrot.slane %v1228_v48, 3 }
  0x26   : > { %v1288_v52 = vsel %vm457_vm0, %v1226_v46, %v1266_v49  ;;  %v1290_v53 = vsel %vm1289_vm2, %v1226_v46, %v1266_v49  ;;  %v1294_v54 = vsel %vm1293_vm3, %v1226_v46, %v1266_v49  ;;  %v1298_v55 = vsel %vm1297_vm4, %v1226_v46, %v1266_v49  ;;  %v1237_v46 = vld [vmem:[%s8807_s9 + $0x2c] sm:$0x1] }
  0x27   : > { %v1292_v56 = vrot.slane %v1290_v53, 1  ;;  %v1296_v57 = vrot.slane %v1294_v54, 2  ;;  %v1300_v58 = vrot.slane %v1298_v55, 3  ;;  %v1303_v59 = vsel %vm457_vm0, %v1227_v47, %v1267_v50 }
  0x28   : > { %v1307_v60 = vsel %vm1289_vm2, %v1228_v48, %v1268_v51  ;;  %v1310_v61 = vsel %vm1293_vm3, %v1228_v48, %v1268_v51  ;;  %v1306_v62 = vsel %vm457_vm0, %v1228_v48, %v1268_v51 }
  0x29   : > { %v1309_v63 = vrot.slane %v1307_v60, 1  ;;  %v1312_v0 = vrot.slane %v1310_v61, 2 }
  0x2a   : > { %v429_v4 = vld [vmem:[#allocation1] sm:$0xff]  ;;  %v430_v5 = vld [vmem:[#allocation1 + $0x9] sm:$0xff]  ;;  %v431_v6 = vld [vmem:[#allocation1 + $0x12] sm:$0xff] }
  0x2b   : > { %v432_v7 = vld [vmem:[#allocation1 + $0x1b] sm:$0xff]  ;;  %v433_v8 = vld [vmem:[#allocation1 + $0x24] sm:$0xff]  ;;  %v434_v9 = vld [vmem:[#allocation1 + $0x2d] sm:$0xff]  ;;  %v458_v10 = vsel %vm457_vm0, %v429_v4, 0  ;;  %v460_v11 = vsel %vm457_vm0, %v430_v5, 0  ;;  %v462_v13 = vsel %vm457_vm0, %v431_v6, 0  ;;  %v1313_v5 = vsel %vm1297_vm4, %v1228_v48, %v1268_v51 }
  0x2c   : > { %v435_v14 = vld [vmem:[#allocation1 + $0x36] sm:$0xff]  ;;  %v436_v15 = vld [vmem:[#allocation1 + $0x3f] sm:$0xff]  ;;  %505 = vmatpush.bf16.msra.mxu0 %v458_v10  ;;  %519 = vmatpush.bf16.msra.mxu1 %v460_v11  ;;  %v464_v16 = vsel %vm457_vm0, %v432_v7, 0  ;;  %v468_v17 = vsel %vm457_vm0, %v434_v9, 0  ;;  %v466_v19 = vsel %vm457_vm0, %v433_v8, 0  ;;  %v1269_v7 = vrot.slane %v1229_v2, 3 }
  0x2d   : > { %438 = vst [vmem:[#allocation1] ss:$9 sm:$0xff] %v420_v3  ;;  %533 = vmatpush.bf16.msra.mxu2 %v462_v13  ;;  %v472_v18 = vsel %vm457_vm0, %v436_v15, 0  ;;  %v470_v20 = vsel %vm457_vm0, %v435_v14, 0  ;;  %v1230_v3 = vld [vmem:[%s8807_s9 + $0x10] sm:$0xf] }
  0x2e   : > { %603 = vmatpush.bf16.msra.mxu3 %v472_v18  ;;  %v1231_v4 = vld [vmem:[%s8807_s9 + $0x14] sm:$0x1]  ;;  %v1232_v6 = vld [vmem:[%s8807_s9 + $0x18] sm:$0xf]  ;;  %v1270_v8 = vrot.slane %v1230_v3, 3  ;;  %v1315_v9 = vrot.slane %v1313_v5, 3  ;;  %v1318_v14 = vsel %vm457_vm0, %v1229_v2, %v1269_v7 }
  0x2f   : > { %6792 = vmatmul.msk.bf16.vlgmr.msra.gmra.mxu0 %vm453_vm1, %v8759_v12  ;;  %6793 = vmatmul.msk.bf16.vlgmr.msra.gmra.mxu1 %vm453_vm1, %v8759_v12  ;;  %v1271_v11 = vrot.slane %v1231_v4, 3  ;;  %v1272_v13 = vrot.slane %v1232_v6, 3  ;;  %v1277_v51 = vrot.slane %v1237_v46, 3  ;;  %v1241_v2 = vld [vmem:[%s8807_s9 + $0x3c] sm:$0x1] }
  0x30   : > { %547 = vmatpush.bf16.msrb.mxu0 %v464_v16  ;;  %575 = vmatpush.bf16.msrb.mxu1 %v468_v17  ;;  %v1321_v15 = vsel %vm457_vm0, %v1230_v3, %v1270_v8  ;;  %v1322_v16 = vsel %vm1289_vm2, %v1230_v3, %v1270_v8  ;;  %v1325_v17 = vsel %vm1293_vm3, %v1230_v3, %v1270_v8 }
  0x31   : > { %6794 = vmatmul.msk.bf16.vlgmr.msra.gmra.mxu2 %vm453_vm1, %v8759_v12  ;;  %6799 = vmatmul.msk.bf16.vlgmr.msra.gmra.mxu3 %vm453_vm1, %v8759_v12  ;;  %v1324_v18 = vrot.slane %v1322_v16, 1  ;;  %v1378_v60 = vsel %vm457_vm0, %v1237_v46, %v1277_v51 }
  0x32   : > { %589 = vmatpush.bf16.msrb.mxu2 %v470_v20  ;;  %v1328_v20 = vsel %vm1297_vm4, %v1230_v3, %v1270_v8 }
  0x34   : > { %561 = vmatpush.bf16.msra.mxu0 %v466_v19  ;;  %v442_v21 = vld [vmem:[#allocation1 + $0x1b] sm:$0xff]  ;;  %v440_v22 = vld [vmem:[#allocation1 + $0x9] sm:$0xff]  ;;  %v441_v25 = vld [vmem:[#allocation1 + $0x12] sm:$0xff]  ;;  %v1327_v19 = vrot.slane %v1325_v17, 2 }
  0x35   : > { %v480_v23 = vsel %vm457_vm0, %v442_v21, 0  ;;  %v476_v24 = vsel %vm457_vm0, %v440_v22, 0  ;;  %v446_v26 = vld [vmem:[#allocation1 + $0x3f] sm:$0xff]  ;;  %v478_v27 = vsel %vm457_vm0, %v441_v25, 0  ;;  %v444_v30 = vld [vmem:[#allocation1 + $0x2d] sm:$0xff]  ;;  %v445_v33 = vld [vmem:[#allocation1 + $0x36] sm:$0xff]  ;;  %v1333_v22 = vsel %vm457_vm0, %v1231_v4, %v1271_v11 }
  0x36   : > { %659 = vmatpush.bf16.msrb.mxu3 %v480_v23  ;;  %631 = vmatpush.bf16.msra.mxu1 %v476_v24  ;;  %v488_v28 = vsel %vm457_vm0, %v446_v26, 0  ;;  %v439_v29 = vld [vmem:[#allocation1] sm:$0xff]  ;;  %v484_v32 = vsel %vm457_vm0, %v444_v30, 0  ;;  %v486_v34 = vsel %vm457_vm0, %v445_v33, 0  ;;  %v1330_v21 = vrot.slane %v1328_v20, 3 }
  0x37   : > { %645 = vmatpush.bf16.msra.mxu2 %v478_v27  ;;  %v474_v31 = vsel %vm457_vm0, %v439_v29, 0  ;;  %v443_v35 = vld [vmem:[#allocation1 + $0x24] sm:$0xff]  ;;  %v1336_v23 = vsel %vm457_vm0, %v1232_v6, %v1272_v13  ;;  %v1234_v24 = vld [vmem:[%s8807_s9 + $0x20] sm:$0xf]  ;;  %v1233_v26 = vld [vmem:[%s8807_s9 + $0x1c] sm:$0x1]  ;;  %v1340_v29 = vsel %vm1293_vm3, %v1232_v6, %v1272_v13  ;;  %v1343_v30 = vsel %vm1297_vm4, %v1232_v6, %v1272_v13 }
  0x38   : > { %448 = vst [vmem:[#allocation1] ss:$9 sm:$0xff] %v421_v36  ;;  %v482_v37 = vsel %vm457_vm0, %v443_v35, 0  ;;  %v1274_v25 = vrot.slane %v1234_v24, 3  ;;  %v1273_v27 = vrot.slane %v1233_v26, 3  ;;  %v1345_v33 = vrot.slane %v1343_v30, 3 }
  0x3a   : > { %715 = vmatpush.bf16.msra.mxu3 %v488_v28  ;;  %v1337_v28 = vsel %vm1289_vm2, %v1232_v6, %v1272_v13  ;;  %v1355_v36 = vsel %vm1293_vm3, %v1234_v24, %v1274_v25  ;;  %v1281_v13 = vrot.slane %v1241_v2, 3 }
  0x3f   : > { %6795 = vmatmul.msk.bf16.vlgmr.msrb.gmra.mxu0 %vm453_vm1, %v8759_v12  ;;  %6797 = vmatmul.msk.bf16.vlgmr.msrb.gmra.mxu1 %vm453_vm1, %v8759_v12  ;;  %v452_v38 = vld [vmem:[#allocation1 + $0x1b] sm:$0xff]  ;;  %v451_v39 = vld [vmem:[#allocation1 + $0x12] sm:$0xff]  ;;  %v450_v42 = vld [vmem:[#allocation1 + $0x9] sm:$0xff] }
  0x40   : > { %617 = vmatpush.bf16.msrb.mxu0 %v474_v31  ;;  %687 = vmatpush.bf16.msrb.mxu1 %v484_v32  ;;  %v494_v40 = vsel %vm457_vm0, %v451_v39, 0  ;;  %v496_v41 = vsel %vm457_vm0, %v452_v38, 0  ;;  %v492_v43 = vsel %vm457_vm0, %v450_v42, 0  ;;  %v449_v44 = vld [vmem:[#allocation1] sm:$0xff]  ;;  %v1339_v31 = vrot.slane %v1337_v28, 1 }
  0x41   : > { %6798 = vmatmul.msk.bf16.vlgmr.msrb.gmra.mxu2 %vm453_vm1, %v8759_v12  ;;  %6803 = vmatmul.msk.bf16.vlgmr.msrb.gmra.mxu3 %vm453_vm1, %v8759_v12  ;;  %v490_v45 = vsel %vm457_vm0, %v449_v44, 0  ;;  %1445 = vst [vmem:[#allocation1] ss:$9 sm:$0xff] %v1288_v52  ;;  %v1342_v32 = vrot.slane %v1340_v29, 2  ;;  %v1351_v38 = vsel %vm457_vm0, %v1234_v24, %v1274_v25  ;;  %v1236_v42 = vld [vmem:[%s8807_s9 + $0x28] sm:$0xf] }
  0x42   : > { %701 = vmatpush.bf16.msrb.mxu2 %v486_v34  ;;  %771 = vmatpush.bf16.msrb.mxu3 %v496_v41  ;;  %1456 = vst [vmem:[#allocation1 + $0x4] ss:$9 sm:$0xff] %v1303_v59  ;;  %v1352_v34 = vsel %vm1289_vm2, %v1234_v24, %v1274_v25  ;;  %v1276_v44 = vrot.slane %v1236_v42, 3  ;;  %v1243_v29 = vld [vmem:[%s8807_s9 + $0x44] sm:$0x1] }
  0x43   : > { %1448 = vst [vmem:[#allocation1 + $0x1] ss:$9 sm:$0xff] %v1292_v56  ;;  %v1354_v39 = vrot.slane %v1352_v34, 1 }
  0x44   : > { %1451 = vst [vmem:[#allocation1 + $0x2] ss:$9 sm:$0xff] %v1296_v57  ;;  %v1367_v49 = vsel %vm1289_vm2, %v1236_v42, %v1276_v44  ;;  %v1370_v50 = vsel %vm1293_vm3, %v1236_v42, %v1276_v44  ;;  %v1373_v53 = vsel %vm1297_vm4, %v1236_v42, %v1276_v44  ;;  %v1366_v56 = vsel %vm457_vm0, %v1236_v42, %v1276_v44 }
  0x45   : > { %1454 = vst [vmem:[#allocation1 + $0x3] ss:$9 sm:$0xff] %v1300_v58  ;;  %v1369_v52 = vrot.slane %v1367_v49, 1  ;;  %v1372_v57 = vrot.slane %v1370_v50, 2  ;;  %v1375_v58 = vrot.slane %v1373_v53, 3 }
  0x46   : > { %1458 = vst [vmem:[#allocation1 + $0x5] ss:$9 sm:$0xff] %v1306_v62 }
  0x47   : > { %1461 = vst [vmem:[#allocation1 + $0x6] ss:$9 sm:$0xff] %v1309_v63  ;;  %v1240_v63 = vld [vmem:[%s8807_s9 + $0x38] sm:$0xf] }
  0x48   : > { %1464 = vst [vmem:[#allocation1 + $0x7] ss:$9 sm:$0xff] %v1312_v0  ;;  %v1280_v0 = vrot.slane %v1240_v63, 3 }
  0x4a   : > { %v1397_v8 = vsel %vm1289_vm2, %v1240_v63, %v1280_v0  ;;  %v1403_v16 = vsel %vm1297_vm4, %v1240_v63, %v1280_v0 }
  0x4f   : > { %6796 = vmatmul.msk.bf16.vlgmr.msra.gmra.mxu0 %vm453_vm1, %v8759_v12  ;;  %6801 = vmatmul.msk.bf16.vlgmr.msra.gmra.mxu1 %vm453_vm1, %v8759_v12  ;;  %v1465_v10 = vld [vmem:[#allocation1] sm:$0xff] }
  0x50   : > { %673 = vmatpush.bf16.msra.mxu0 %v482_v37  ;;  %743 = vmatpush.bf16.msra.mxu1 %v492_v43  ;;  %1467 = vst [vmem:[#allocation1] ss:$9 sm:$0xff] %v1315_v9  ;;  %v1358_v37 = vsel %vm1297_vm4, %v1234_v24, %v1274_v25  ;;  %v1238_v43 = vld [vmem:[%s8807_s9 + $0x30] sm:$0xf]  ;;  %v1400_v9 = vsel %vm1293_vm3, %v1240_v63, %v1280_v0 }
  0x51   : > { %6802 = vmatmul.msk.bf16.vlgmr.msra.gmra.mxu2 %vm453_vm1, %v8759_v12  ;;  %6807 = vmatmul.msk.bf16.vlgmr.msra.gmra.mxu3 %vm453_vm1, %v8759_v12  ;;  %1468 = vst [vmem:[#allocation1 + $0x1] ss:$9 sm:$0xff] %v1318_v14  ;;  %v1360_v41 = vrot.slane %v1358_v37, 3  ;;  %v1278_v47 = vrot.slane %v1238_v43, 3  ;;  %v1396_v14 = vsel %vm457_vm0, %v1240_v63, %v1280_v0  ;;  %v1402_v17 = vrot.slane %v1400_v9, 2 }
  0x52   : > { %757 = vmatpush.bf16.msra.mxu2 %v494_v40  ;;  %1469 = vst [vmem:[#allocation1 + $0x2] ss:$9 sm:$0xff] %v1321_v15  ;;  %v1357_v40 = vrot.slane %v1355_v36, 2  ;;  %v1399_v15 = vrot.slane %v1397_v8, 1  ;;  %v6897_v63 = vld [vmem:[#allocation4 + $0x60] sm:$0xf] }
  0x53   : > { %1471 = vst [vmem:[#allocation1 + $0x3] ss:$9 sm:$0xff] %v1324_v18  ;;  %v1382_v59 = vsel %vm1289_vm2, %v1238_v43, %v1278_v47  ;;  %v1381_v61 = vsel %vm457_vm0, %v1238_v43, %v1278_v47  ;;  %v1385_v4 = vsel %vm1293_vm3, %v1238_v43, %v1278_v47  ;;  %v1388_v5 = vsel %vm1297_vm4, %v1238_v43, %v1278_v47  ;;  %v8101_v0 = vld [vmem:[#allocation4 + $0x64] sm:$0xf0] }
  0x54   : > { %1473 = vst [vmem:[#allocation1 + $0x4] ss:$9 sm:$0xff] %v1327_v19  ;;  %v1384_v62 = vrot.slane %v1382_v59, 1  ;;  %v1387_v6 = vrot.slane %v1385_v4, 2  ;;  %v1390_v7 = vrot.slane %v1388_v5, 3  ;;  %v1405_v18 = vrot.slane %v1403_v16, 3 }
  0x55   : > { %1475 = vst [vmem:[#allocation1 + $0x5] ss:$9 sm:$0xff] %v1330_v21  ;;  %v1408_v21 = vsel %vm457_vm0, %v1241_v2, %v1281_v13  ;;  %v6898_v4 = vor.u32 %v8101_v0, %v6897_v63 }
  0x56   : > { %1476 = vst [vmem:[#allocation1 + $0x6] ss:$9 sm:$0xff] %v1333_v22  ;;  %v1242_v22 = vld [vmem:[%s8807_s9 + $0x40] sm:$0xf] }
  0x57   : > { %1477 = vst [vmem:[#allocation1 + $0x7] ss:$9 sm:$0xff] %v1336_v23  ;;  %v8896_v23 = vld [vmem:[%s8807_s9 + $0x48] sm:$0xf]  ;;  %v1282_v25 = vrot.slane %v1242_v22, 3 }
  0x59   : > { %v1418_v34 = vsel %vm1297_vm4, %v1242_v22, %v1282_v25 }
  0x5e   : > { %v1478_v35 = vld [vmem:[#allocation1] sm:$0xff] }
  0x5f   : > { %6800 = vmatmul.msk.bf16.vlgmr.msrb.gmra.mxu0 %vm453_vm1, %v8759_v12  ;;  %6805 = vmatmul.msk.bf16.vlgmr.msrb.gmra.mxu1 %vm453_vm1, %v8759_v12  ;;  %1480 = vst [vmem:[#allocation1] ss:$9 sm:$0xff] %v1339_v31  ;;  %v1283_v31 = vrot.slane %v1243_v29, 3 }
  0x60   : > { %729 = vmatpush.bf16.msrb.mxu0 %v490_v45  ;;  %1482 = vst [vmem:[#allocation1 + $0x1] ss:$9 sm:$0xff] %v1342_v32  ;;  %v1235_v45 = vld [vmem:[%s8807_s9 + $0x24] sm:$0x1]  ;;  %v1412_v32 = vsel %vm1289_vm2, %v1242_v22, %v1282_v25 }
  0x61   : > { %6806 = vmatmul.msk.bf16.vlgmr.msrb.gmra.mxu2 %vm453_vm1, %v8759_v12  ;;  %6811 = vmatmul.msk.bf16.vlgmr.msrb.gmra.mxu3 %vm453_vm1, %v8759_v12  ;;  %1484 = vst [vmem:[#allocation1 + $0x2] ss:$9 sm:$0xff] %v1345_v33  ;;  %v1275_v48 = vrot.slane %v1235_v45, 3  ;;  %v1415_v33 = vsel %vm1293_vm3, %v1242_v22, %v1282_v25  ;;  %v1423_v44 = vsel %vm457_vm0, %v1243_v29, %v1283_v31 }
  0x62   : > { %1486 = vst [vmem:[#allocation1 + $0x4] ss:$9 sm:$0xff] %v1351_v38  ;;  %v1417_v37 = vrot.slane %v1415_v33, 2 }
  0x63   : > { %1488 = vst [vmem:[#allocation1 + $0x5] ss:$9 sm:$0xff] %v1354_v39  ;;  %v1363_v55 = vsel %vm457_vm0, %v1235_v45, %v1275_v48  ;;  %v1411_v39 = vsel %vm457_vm0, %v1242_v22, %v1282_v25 }
  0x64   : > { %1490 = vst [vmem:[#allocation1 + $0x6] ss:$9 sm:$0xff] %v1357_v40  ;;  %v1420_v40 = vrot.slane %v1418_v34, 3 }
  0x65   : > { %1492 = vst [vmem:[#allocation1 + $0x7] ss:$9 sm:$0xff] %v1360_v41 }
  0x6f   : > { %6804 = vmatmul.msk.bf16.vlgmr.msra.gmra.mxu0 %vm453_vm1, %v8759_v12  ;;  %6809 = vmatmul.msk.bf16.vlgmr.msra.gmra.mxu1 %vm453_vm1, %v8759_v12 }
  0x70   : > { %1567 = vmatpush.bf16.msra.mxu0 %v8087_v1  ;;  %v1239_v1 = vld [vmem:[%s8807_s9 + $0x34] sm:$0x1] }
  0x71   : > { %6810 = vmatmul.msk.bf16.vlgmr.msra.gmra.mxu2 %vm453_vm1, %v8759_v12  ;;  %v1279_v3 = vrot.slane %v1239_v1, 3 }
  0x73   : > { %v1393_v11 = vsel %vm457_vm0, %v1239_v1, %v1279_v3 }
  0x7f   : > { %6808 = vmatmul.msk.bf16.vlgmr.msrb.gmra.mxu0 %vm453_vm1, %v8759_v12  ;;  %v1348_v12 = vsel %vm457_vm0, %v1233_v26, %v1273_v27  ;;  %v8901_v26 = vrot.slane %v8896_v23, 3 }
  0x80   : > { %1485 = vst [vmem:[#allocation1 + $0x3] ss:$9 sm:$0xff] %v1348_v12  ;;  %v1414_v12 = vrot.slane %v1412_v32, 1 }
  0x81   : > { %v1427_v41 = vsel %vm1289_vm2, %v8896_v23, %v8901_v26  ;;  %v1430_v42 = vsel %vm1293_vm3, %v8896_v23, %v8901_v26  ;;  %v1426_v46 = vsel %vm457_vm0, %v8896_v23, %v8901_v26  ;;  %v1433_v16 = vsel %vm1297_vm4, %v8896_v23, %v8901_v26 }
  0x82   : > { %v1429_v47 = vrot.slane %v1427_v41, 1  ;;  %v1432_v49 = vrot.slane %v1430_v42, 2 }
  0x87   : > { %v1493_v54 = vld [vmem:[#allocation1] sm:$0xff] }
  0x88   : > { %1494 = vst [vmem:[#allocation1] ss:$9 sm:$0xff] %v1363_v55  ;;  %v6905_v55 = vld [vmem:[#allocation4 + $0x70] sm:$0xf] }
  0x89   : > { %1495 = vst [vmem:[#allocation1 + $0x1] ss:$9 sm:$0xff] %v1366_v56 }
  0x8a   : > { %1497 = vst [vmem:[#allocation1 + $0x2] ss:$9 sm:$0xff] %v1369_v52 }
  0x8b   : > { %1499 = vst [vmem:[#allocation1 + $0x3] ss:$9 sm:$0xff] %v1372_v57  ;;  %v8103_v57 = vld [vmem:[#allocation4 + $0x74] sm:$0xf0] }
  0x8c   : > { %1501 = vst [vmem:[#allocation1 + $0x4] ss:$9 sm:$0xff] %v1375_v58  ;;  %v6906_v59 = vor.u32 %v8103_v57, %v6905_v55 }
  0x8d   : > { %1502 = vst [vmem:[#allocation1 + $0x5] ss:$9 sm:$0xff] %v1378_v60 }
  0x8e   : > { %1503 = vst [vmem:[#allocation1 + $0x6] ss:$9 sm:$0xff] %v1381_v61  ;;  %2650 = vmatpush.bf16.msra.mxu3 %v6906_v59 }
  0x8f   : > { %6816 = vmatmul.msk.bf16.vlgmr.msra.gmra.mxu0 %vm1545_vm5, %v1465_v10  ;;  %1505 = vst [vmem:[#allocation1 + $0x7] ss:$9 sm:$0xff] %v1384_v62 }
  0x92   : > { %2651 = vmatpush.bf16.msra.mxu3 %v6898_v4 }
  0x96   : > { %v8883_v10 = vld [vmem:[#allocation1] sm:$0xff] }
  0x97   : > { %1508 = vst [vmem:[#allocation1] ss:$9 sm:$0xff] %v1387_v6 }
  0x98   : > { %1510 = vst [vmem:[#allocation1 + $0x1] ss:$9 sm:$0xff] %v1390_v7 }
  0x99   : > { %1511 = vst [vmem:[#allocation1 + $0x2] ss:$9 sm:$0xff] %v1393_v11  ;;  %v8099_v11 = vld [vmem:[#allocation4 + $0x54] sm:$0xf0] }
  0x9a   : > { %1512 = vst [vmem:[#allocation1 + $0x3] ss:$9 sm:$0xff] %v1396_v14 }
  0x9b   : > { %1514 = vst [vmem:[#allocation1 + $0x4] ss:$9 sm:$0xff] %v1399_v15 }
  0x9c   : > { %1516 = vst [vmem:[#allocation1 + $0x5] ss:$9 sm:$0xff] %v1402_v17  ;;  %v6881_v17 = vld [vmem:[#allocation4 + $0x40] sm:$0xf] }
  0x9d   : > { %1518 = vst [vmem:[#allocation1 + $0x6] ss:$9 sm:$0xff] %v1405_v18  ;;  %v8097_v18 = vld [vmem:[#allocation4 + $0x44] sm:$0xf0] }
  0x9e   : > { %1519 = vst [vmem:[#allocation1 + $0x7] ss:$9 sm:$0xff] %v1408_v21  ;;  %v1435_v21 = vrot.slane %v1433_v16, 3  ;;  %v6882_v22 = vor.u32 %v8097_v18, %v6881_v17 }
  0x9f   : > { %6817 = vmatmul.msk.bf16.gmra.mxu0 %vm1545_vm5, %v1478_v35  ;;  %v8616_v35 = vmov 1983009808  }
  0xa0   : > { %v784_v36 = vunpack.c.l.s4 %v8616_v35 }
  0xa2   : > { %v8924_v45 = vunpack.c.0.s8 %v784_v36  ;;  %v6873_v36 = vld [vmem:[#allocation4 + $0x30] sm:$0xf] }
  0xa5   : > { %v8913_v38 = vld [vmem:[#allocation1] sm:$0xff] }
  0xa6   : > { %1521 = vst [vmem:[#allocation1] ss:$9 sm:$0xff] %v1411_v39 }
  0xa7   : > { %1523 = vst [vmem:[#allocation1 + $0x1] ss:$9 sm:$0xff] %v1414_v12  ;;  %v8095_v12 = vld [vmem:[#allocation4 + $0x34] sm:$0xf0] }
  0xa8   : > { %1525 = vst [vmem:[#allocation1 + $0x2] ss:$9 sm:$0xff] %v1417_v37 }
  0xa9   : > { %1527 = vst [vmem:[#allocation1 + $0x3] ss:$9 sm:$0xff] %v1420_v40  ;;  %v6874_v40 = vor.u32 %v8095_v12, %v6873_v36 }
  0xaa   : > { %1528 = vst [vmem:[#allocation1 + $0x4] ss:$9 sm:$0xff] %v1423_v44 }
  0xab   : > { %1529 = vst [vmem:[#allocation1 + $0x5] ss:$9 sm:$0xff] %v1426_v46  ;;  %v6865_v46 = vld [vmem:[#allocation4 + $0x20] sm:$0xf] }
  0xac   : > { %v8888_v19 = vpop.f32.mrf.mxu0  ;;  %v8890_v20 = vpop.f32.mrf.mxu1  ;;  %1531 = vst [vmem:[#allocation1 + $0x6] ss:$9 sm:$0xff] %v1429_v47  ;;  %v8093_v47 = vld [vmem:[#allocation4 + $0x24] sm:$0xf0] }
  0xad   : > { %v993_v43 = vrot.slane %v8890_v20, 4  ;;  %1533 = vst [vmem:[#allocation1 + $0x7] ss:$9 sm:$0xff] %v1432_v49  ;;  %v781_v25 = vrot.slane %v8888_v19, 4 }
  0xaf   : > { %6818 = vmatmul.msk.bf16.gmra.mxu0 %vm1545_vm5, %v1493_v54 }
  0xb4   : > { %v8898_v24 = vpop.f32.mrf.mxu2  ;;  %v8903_v27 = vpop.f32.mrf.mxu0  ;;  %v8962_v31 = vld [vmem:[#allocation1] sm:$0xff] }
  0xb5   : > { %v8905_v28 = vpop.f32.mrf.mxu1  ;;  %v8908_v30 = vpop.f32.mrf.mxu3  ;;  %v793_v60 = vrot.slane %v8898_v24, 4  ;;  %1536 = vst [vmem:[#allocation1] ss:$9 sm:$0xff] %v1435_v21 }
  0xb6   : > { %v1003_v15 = vrot.slane %v8908_v30, 4 }
  0xbc   : > { %v8929_v48 = vpop.f32.mrf.mxu2  ;;  %v549_v50 = vpop.f32.mrf.mxu0 }
  0xbd   : > { %v8931_v51 = vpop.f32.mrf.mxu1  ;;  %v1005_v52 = vrot.slane %v549_v50, 4  ;;  %v8935_v54 = vpop.f32.mrf.mxu3 }
  0xbe   : > { %v994_v53 = vsel %vm779_vm6, %v8931_v51, %v993_v43  ;;  %v991_v35 = vrot.slane %v8931_v51, 4  ;;  %v1161_v37 = vrot.slane %v8935_v54, 4 }
  0xbf   : > { %v1002_v56 = vperm.slane %v994_v53, %v8924_v45  ;;  %v1006_v58 = vsel %vm779_vm6, %v8908_v30, %v1005_v52  ;;  %6819 = vmatmul.msk.bf16.gmra.mxu0 %vm1545_vm5, %v8883_v10  ;;  %v6889_v10 = vld [vmem:[#allocation4 + $0x50] sm:$0xf]  ;;  %v1004_v30 = vsel %vm779_vm6, %v1003_v15, %v549_v50  ;;  %v8617_v52 = vmov 1934713408  }
  0xc0   : > { %v1014_v61 = vperm.slane %v1006_v58, %v8924_v45  ;;  %v6890_v14 = vor.u32 %v8099_v11, %v6889_v10  ;;  %v8976_v41 = vperm.slane %v1004_v30, %v8924_v45  ;;  %v992_v44 = vsel %vm779_vm6, %v991_v35, %v8890_v20 }
  0xc1   : > { %v1053_v62 = vrot.slane %v1002_v56, 4  ;;  %v832_v53 = vunpack.c.l.s4 %v8617_v52  ;;  %v8992_v20 = vperm.slane %v992_v44, %v8924_v45 }
  0xc2   : > { %v1051_v1 = vrot.slane %v1014_v61, 4  ;;  %2652 = vmatpush.bf16.msra.mxu3 %v6890_v14 }
  0xc3   : > { %v8945_v2 = vsel %vm779_vm6, %v1014_v61, %v1053_v62 }
  0xc4   : > { %v8947_v3 = vpop.f32.mrf.mxu2  ;;  %v8950_v5 = vsel %vm779_vm6, %v1051_v1, %v1002_v56  ;;  %v551_v6 = vpop.f32.mrf.mxu0  ;;  %v1039_v56 = vrot.slane %v8976_v41, 4  ;;  %v9000_v1 = vunpack.c.0.s8 %v832_v53 }
  0xc5   : > { %v579_v7 = vpop.f32.mrf.mxu1  ;;  %v794_v8 = vsel %vm779_vm6, %v8947_v3, %v793_v60  ;;  %v8954_v9 = vpop.f32.mrf.mxu3  ;;  %v1162_v49 = vsel %vm779_vm6, %v1161_v37, %v551_v6  ;;  %v791_v54 = vrot.slane %v8947_v3, 4  ;;  %v6857_v6 = vld [vmem:[#allocation4 + $0x10] sm:$0xf] }
  0xc6   : > { %v802_v13 = vperm.slane %v794_v8, %v8924_v45  ;;  %2653 = vmatpush.bf16.msra.mxu3 %v6882_v22  ;;  %v1155_v50 = vrot.slane %v579_v7, 4  ;;  %v1166_v60 = vperm.slane %v1162_v49, %v8924_v45  ;;  %v1029_v61 = vrot.slane %v8954_v9, 4  ;;  %v8091_v7 = vld [vmem:[#allocation4 + $0x14] sm:$0xf0]  ;;  %v6849_v22 = vld [vmem:[#allocation4] sm:$0xf] }
  0xc7   : > { %v792_v3 = vsel %vm779_vm6, %v791_v54, %v8898_v24  ;;  %v1040_v8 = vsel %vm779_vm6, %v1039_v56, %v8992_v20  ;;  %v1041_v56 = vrot.slane %v8992_v20, 4  ;;  %v1245_v20 = vld [vmem:[%s8807_s9 + $0x4c] sm:$0x1] }
  0xc8   : > { %v839_v32 = vrot.slane %v802_v13, 4  ;;  %v1156_v63 = vsel %vm779_vm6, %v1155_v50, %v8905_v28  ;;  %v1179_v14 = vrot.slane %v1166_v60, 4  ;;  %v9012_v24 = vperm.slane %v792_v3, %v8924_v45 }
  0xc9   : > { %v1160_v28 = vperm.slane %v1156_v63, %v8924_v45 }
  0xca   : > { %2654 = vmatpush.bf16.msra.mxu3 %v6874_v40 }
  0xcc   : > { %v593_v29 = vpop.f32.mrf.mxu2  ;;  %v563_v33 = vpop.f32.mrf.mxu0 }
  0xcd   : > { %v8964_v34 = vpop.f32.mrf.mxu1  ;;  %v782_v23 = vsel %vm779_vm6, %v563_v33, %v781_v25  ;;  %v8969_v26 = vpop.f32.mrf.mxu3  ;;  %v949_v57 = vrot.slane %v593_v29, 4  ;;  %v778_v4 = vrot.slane %v563_v33, 4  ;;  %v8089_v25 = vld [vmem:[#allocation4 + $0x4] sm:$0xf0]  ;;  %v9022_v29 = vperm.slane %v1040_v8, %v9000_v1 }
  0xce   : > { %v790_v39 = vperm.slane %v782_v23, %v8924_v45  ;;  %v1017_v15 = vrot.slane %v8964_v34, 4  ;;  %v6850_v35 = vor.u32 %v8089_v25, %v6849_v22 }
  0xcf   : > { %6820 = vmatmul.msk.bf16.gmra.mxu0 %vm1545_vm5, %v8913_v38  ;;  %v6866_v38 = vor.u32 %v8093_v47, %v6865_v46  ;;  %v950_v10 = vsel %vm779_vm6, %v949_v57, %v8929_v48  ;;  %v780_v18 = vsel %vm779_vm6, %v778_v4, %v8888_v19  ;;  %v1180_v19 = vsel %vm779_vm6, %v1179_v14, %v1160_v28 }
  0xd0   : > { %v8979_v42 = vsel %vm779_vm6, %v839_v32, %v790_v39  ;;  %v841_v43 = vrot.slane %v790_v39, 4  ;;  %v954_v48 = vperm.slane %v950_v10, %v8924_v45  ;;  %v9036_v39 = vperm.slane %v8945_v2, %v9000_v1 }
  0xd1   : > { %2655 = vmatpush.bf16.msra.mxu3 %v6866_v38  ;;  %v9040_v40 = vperm.slane %v780_v18, %v8924_v45  ;;  %v9050_v2 = vperm.slane %v8950_v5, %v9000_v1  ;;  %v9053_v50 = vperm.slane %v1180_v19, %v9000_v1  ;;  %v9066_v57 = vperm.slane %v8979_v42, %v9000_v1 }
  0xd2   : > { %v8985_v51 = vsel %vm779_vm6, %v802_v13, %v841_v43  ;;  %v6858_v13 = vor.u32 %v8091_v7, %v6857_v6  ;;  %v967_v44 = vrot.slane %v954_v48, 4 }
  0xd3   : > { %v1097_v63 = vrot.slane %v9050_v2, 4  ;;  %v9081_v8 = vperm.slane %v8985_v51, %v9000_v1  ;;  %v885_v14 = vrot.slane %v9066_v57, 4 }
  0xd4   : > { %v8988_v55 = vpop.f32.mrf.mxu2  ;;  %v565_v58 = vpop.f32.mrf.mxu0 }
  0xd5   : > { %v8994_v59 = vpop.f32.mrf.mxu1  ;;  %v717_v62 = vpop.f32.mrf.mxu3  ;;  %v943_v11 = vrot.slane %v565_v58, 4  ;;  %2656 = vmatpush.bf16.msra.mxu3 %v6858_v13  ;;  %v817_v53 = vrot.slane %v8988_v55, 4  ;;  %v1101_v58 = vrot.slane %v9036_v39, 4  ;;  %v829_v13 = vrot.slane %v9040_v40, 4 }
  0xd6   : > { %v1027_v0 = vrot.slane %v717_v62, 4  ;;  %v1030_v16 = vsel %vm779_vm6, %v717_v62, %v1029_v61  ;;  %v889_v19 = vrot.slane %v9081_v8, 4 }
  0xd7   : > { %v944_v32 = vsel %vm779_vm6, %v943_v11, %v8903_v27  ;;  %v1038_v33 = vperm.slane %v1030_v16, %v8924_v45  ;;  %v827_v27 = vrot.slane %v9012_v24, 4 }
  0xd8   : > { %v1028_v17 = vsel %vm779_vm6, %v1027_v0, %v8954_v9  ;;  %v948_v46 = vperm.slane %v944_v32, %v8924_v45  ;;  %v1193_v0 = vrot.slane %v9053_v50, 4 }
  0xd9   : > { %v9031_v23 = vperm.slane %v1028_v17, %v8924_v45  ;;  %2657 = vmatpush.bf16.msra.mxu3 %v6850_v35  ;;  %v1075_v38 = vrot.slane %v1038_v33, 4  ;;  %v828_v5 = vsel %vm779_vm6, %v827_v27, %v9040_v40 }
  0xda   : > { %v9077_v42 = vperm.slane %v828_v5, %v9000_v1 }
  0xdc   : > { %v9019_v21 = vpop.f32.mrf.mxu2  ;;  %v9027_v30 = vpop.f32.mrf.mxu0  ;;  %v877_v35 = vrot.slane %v9077_v42, 4 }
  0xdd   : > { %v689_v9 = vpop.f32.mrf.mxu1  ;;  %v719_v37 = vpop.f32.mrf.mxu3 }
  0xde   : > { %v1015_v36 = vrot.slane %v689_v9, 4  ;;  %v1018_v12 = vsel %vm779_vm6, %v689_v9, %v1017_v15  ;;  %v1173_v43 = vrot.slane %v719_v37, 4 }
  0xdf   : > { %v1026_v49 = vperm.slane %v1018_v12, %v8924_v45  ;;  %6821 = vmatmul.msk.bf16.gmra.mxu0 %vm1545_vm5, %v8962_v31  ;;  %v1089_v31 = vrot.slane %v9022_v29, 4 }
  0xe0   : > { %v1016_v47 = vsel %vm779_vm6, %v1015_v36, %v8964_v34  ;;  %v1174_v52 = vsel %vm779_vm6, %v1173_v43, %v8969_v26  ;;  %v1063_v34 = vrot.slane %v9031_v23, 4  ;;  %v968_v26 = vsel %vm779_vm6, %v967_v44, %v948_v46 }
  0xe1   : > { %v1022_v54 = vperm.slane %v1016_v47, %v8924_v45  ;;  %v1077_v60 = vrot.slane %v1026_v49, 4  ;;  %v1178_v61 = vperm.slane %v1174_v52, %v8924_v45  ;;  %v1076_v3 = vsel %vm779_vm6, %v1075_v38, %v1026_v49 }
  0xe2   : > { %v9088_v28 = vperm.slane %v968_v26, %v9000_v1  ;;  %v1082_v18 = vperm.slane %v1076_v3, %v9000_v1 }
  0xe3   : > { %v1064_v10 = vsel %vm779_vm6, %v1063_v34, %v1022_v54  ;;  %v1078_v17 = vsel %vm779_vm6, %v1038_v33, %v1077_v60  ;;  %v1185_v48 = vrot.slane %v1178_v61, 4  ;;  %v1065_v22 = vrot.slane %v1022_v54, 4 }
  0xe4   : > { %v703_v62 = vpop.f32.mrf.mxu2  ;;  %v9074_v4 = vpop.f32.mrf.mxu0  ;;  %v1070_v25 = vperm.slane %v1064_v10, %v9000_v1  ;;  %v981_v12 = vrot.slane %v9088_v28, 4  ;;  %v1086_v37 = vperm.slane %v1078_v17, %v9000_v1  ;;  %v1098_v43 = vsel %vm779_vm6, %v1082_v18, %v1097_v63 }
  0xe5   : > { %v691_v6 = vpop.f32.mrf.mxu1  ;;  %v815_v7 = vrot.slane %v703_v62, 4  ;;  %v818_v11 = vsel %vm779_vm6, %v703_v62, %v817_v53  ;;  %v773_v16 = vpop.f32.mrf.mxu3  ;;  %v9114_v49 = vsel %vm779_vm6, %v9031_v23, %v1065_v22 }
  0xe6   : > { %v1167_v15 = vrot.slane %v691_v6, 4  ;;  %v826_v9 = vperm.slane %v818_v11, %v8924_v45  ;;  %v9102_v36 = vperm.slane %v773_v16, %v8924_v45  ;;  %v1113_v47 = vrot.slane %v773_v16, 4 }
  0xe7   : > { %v816_v51 = vsel %vm779_vm6, %v815_v7, %v8988_v55  ;;  %v805_v55 = vrot.slane %v9027_v30, 4  ;;  %v1087_v38 = vrot.slane %v1070_v25, 4  ;;  %v9122_v62 = vsel %vm779_vm6, %v1070_v25, %v1089_v31 }
  0xe8   : > { %v1168_v32 = vsel %vm779_vm6, %v1167_v15, %v8994_v59  ;;  %v9108_v27 = vperm.slane %v816_v51, %v8924_v45  ;;  %v1095_v59 = vrot.slane %v1082_v18, 4  ;;  %v863_v53 = vrot.slane %v826_v9, 4 }
  0xe9   : > { %v1172_v33 = vperm.slane %v1168_v32, %v8924_v45  ;;  %v1123_v61 = vrot.slane %v9102_v36, 4  ;;  %v1114_v10 = vsel %vm779_vm6, 0.0, %v1113_v47  ;;  %v1099_v17 = vrot.slane %v1086_v37, 4 }
  0xea   : > { %v851_v63 = vrot.slane %v9108_v27, 4  ;;  %v1096_v6 = vsel %vm779_vm6, %v1095_v59, %v9050_v2  ;;  %v1122_v25 = vperm.slane %v1114_v10, %v8924_v45 }
  0xeb   : > { %v1186_v44 = vsel %vm779_vm6, %v1185_v48, %v1172_v33  ;;  %v1100_v47 = vsel %vm779_vm6, %v1099_v17, %v9036_v39 }
  0xec   : > { %v705_v46 = vpop.f32.mrf.mxu2  ;;  %v9117_v52 = vperm.slane %v1186_v44, %v9000_v1  ;;  %v675_v34 = vpop.f32.mrf.mxu0  ;;  %v1088_v44 = vsel %vm779_vm6, %v1087_v38, %v9022_v29 }
  0xed   : > { %v745_v54 = vpop.f32.mrf.mxu1  ;;  %v803_v5 = vrot.slane %v675_v34, 4  ;;  %v806_v26 = vsel %vm779_vm6, %v675_v34, %v805_v55  ;;  %v961_v60 = vrot.slane %v705_v46, 4 }
  0xee   : > { %v9126_v23 = vsel %vm779_vm6, %v9117_v52, %v1193_v0  ;;  %v814_v3 = vperm.slane %v806_v26, %v8924_v45  ;;  %v1108_v11 = vperm.slane %v745_v54, %v8924_v45  ;;  %v1103_v16 = vrot.slane %v745_v54, 4 }
  0xef   : > { %v804_v7 = vsel %vm779_vm6, %v803_v5, %v9027_v30  ;;  %v962_v48 = vsel %vm779_vm6, %v961_v60, %v9019_v21  ;;  %v1102_v30 = vsel %vm779_vm6, %v1086_v37, %v1101_v58  ;;  %v1135_v60 = vrot.slane %v1122_v25, 4 }
  0xf0   : > { %v810_v31 = vperm.slane %v804_v7, %v8924_v45  ;;  %v864_v15 = vsel %vm779_vm6, %v863_v53, %v814_v3  ;;  %v865_v0 = vrot.slane %v814_v3, 4  ;;  %v1124_v2 = vsel %vm779_vm6, %v1123_v61, %v1108_v11 }
  0xf1   : > { %v870_v18 = vperm.slane %v864_v15, %v9000_v1  ;;  %v966_v58 = vperm.slane %v962_v48, %v8924_v45  ;;  %v1125_v29 = vrot.slane %v1108_v11, 4  ;;  %v1130_v15 = vperm.slane %v1124_v2, %v9000_v1 }
  0xf2   : > { %v852_v51 = vsel %vm779_vm6, %v851_v63, %v810_v31  ;;  %v866_v22 = vsel %vm779_vm6, %v826_v9, %v865_v0  ;;  %v1104_v9 = vsel %vm779_vm6, 0.0, %v1103_v16  ;;  %v853_v63 = vrot.slane %v810_v31, 4 }
  0xf3   : > { %v858_v32 = vperm.slane %v852_v51, %v9000_v1  ;;  %v874_v33 = vperm.slane %v866_v22, %v9000_v1  ;;  %v883_v55 = vrot.slane %v870_v18, 4  ;;  %v886_v59 = vsel %vm779_vm6, %v870_v18, %v885_v14 }
  0xf4   : > { %v759_v21 = vpop.f32.mrf.mxu2  ;;  %v9153_v46 = vpack.c.bf16 %v1098_v43, %v886_v59  ;;  %v677_v37 = vpop.f32.mrf.mxu0  ;;  %v1112_v61 = vperm.slane %v1104_v9, %v8924_v45  ;;  %v973_v3 = vrot.slane %v966_v58, 4  ;;  %v854_v17 = vsel %vm779_vm6, %v9108_v27, %v853_v63 }
  0xf5   : > { %v875_v53 = vrot.slane %v858_v32, 4  ;;  %v884_v34 = vsel %vm779_vm6, %v883_v55, %v9066_v57  ;;  %v901_v54 = vrot.slane %v759_v21, 4  ;;  %v887_v14 = vrot.slane %v874_v33, 4 }
  0xf6   : > { %v890_v5 = vsel %vm779_vm6, %v874_v33, %v889_v19  ;;  %v9162_v26 = vpack.c.bf16 %v1096_v6, %v884_v34  ;;  %v906_v38 = vperm.slane %v759_v21, %v8924_v45  ;;  %v955_v57 = vrot.slane %v677_v37, 4 }
  0xf7   : > { %v9164_v43 = vpack.c.bf16 %v1102_v30, %v890_v5  ;;  %v888_v39 = vsel %vm779_vm6, %v887_v14, %v9081_v8  ;;  %v876_v7 = vsel %vm779_vm6, %v875_v53, %v9077_v42  ;;  %v878_v19 = vsel %vm779_vm6, %v858_v32, %v877_v35 }
  0xf8   : > { %v9175_v6 = vpack.c.bf16 %v1100_v47, %v888_v39  ;;  %v902_v10 = vsel %vm779_vm6, 0.0, %v901_v54  ;;  %v956_v11 = vsel %vm779_vm6, %v955_v57, %v9074_v4  ;;  %v1126_v8 = vsel %vm779_vm6, %v9102_v36, %v1125_v29 }
  0xf9   : > { %v910_v31 = vperm.slane %v902_v10, %v8924_v45  ;;  %v960_v0 = vperm.slane %v956_v11, %v8924_v45  ;;  %v911_v16 = vrot.slane %v906_v38, 4  ;;  %v1136_v42 = vsel %vm779_vm6, %v1135_v60, %v1112_v61 }
  0xfa   : > { %v1137_v35 = vrot.slane %v1112_v61, 4  ;;  %v9188_v18 = vpack.c.bf16 %v1088_v44, %v876_v7  ;;  %v1134_v4 = vperm.slane %v1126_v8, %v9000_v1  ;;  %v1142_v30 = vperm.slane %v1136_v42, %v9000_v1 }
  0xfb   : > { %v974_v36 = vsel %vm779_vm6, %v973_v3, %v960_v0  ;;  %v9196_v32 = vpack.c.bf16 %v9122_v62, %v878_v19  ;;  %v923_v27 = vrot.slane %v910_v31, 4  ;;  %v1147_v55 = vrot.slane %v1130_v15, 4 }
  0xfc   : > { %11827 = vst [vmem:[#allocation12_spill] sm:$0xff] %v9188_v18  ;;  %v731_v48 = vpop.f32.mrf.mxu0  ;;  %v1138_v22 = vsel %vm779_vm6, %v1122_v25, %v1137_v35  ;;  %v9199_v33 = vperm.slane %v974_v36, %v9000_v1  ;;  %v1149_v9 = vrot.slane %v1134_v4, 4  ;;  %v1151_v34 = vrot.slane %v1142_v30, 4 }
  0xfd   : > { %v891_v51 = vrot.slane %v731_v48, 4  ;;  %v896_v2 = vperm.slane %v731_v48, %v8924_v45  ;;  %11828 = vst [vmem:[#allocation13_spill] sm:$0xff] %v9196_v32  ;;  %v1146_v58 = vperm.slane %v1138_v22, %v9000_v1  ;;  %v2458_v54 = vunpack.c.l.b16 %v9188_v18 }
  0xfe   : > { %v982_v25 = vsel %vm779_vm6, %v9199_v33, %v981_v12  ;;  %v1148_v12 = vsel %vm779_vm6, 0.0, %v1147_v55  ;;  %v1152_v11 = vsel %vm779_vm6, 0.0, %v1151_v34  ;;  %v1074_v36 = vperm.slane %v9114_v49, %v9000_v1  ;;  %v775_v55 = vpop.f32.mrf.mxu3 }
  0xff   : > { %v892_v59 = vsel %vm779_vm6, 0.0, %v891_v51  ;;  %v912_v21 = vsel %vm779_vm6, %v911_v16, %v896_v2  ;;  %v913_v44 = vrot.slane %v896_v2, 4  ;;  %v9211_v47 = vpack.c.bf16 %v9126_v23, %v982_v25  ;;  %v761_v2 = vpop.f32.mrf.mxu2 }
 0x100   : > { %v900_v62 = vperm.slane %v892_v59, %v8924_v45  ;;  %v918_v37 = vperm.slane %v912_v21, %v9000_v1  ;;  %v1153_v61 = vrot.slane %v1146_v58, 4  ;;  %v9254_v59 = vld [vmem:[#allocation2] ss:$0 sm:$0xff]  ;;  %v983_v21 = vrot.slane %v761_v2, 4 }
 0x101   : > { %11829 = vst [vmem:[#allocation14_spill] sm:$0xff] %v9211_v47  ;;  %v914_v53 = vsel %vm779_vm6, %v906_v38, %v913_v44  ;;  %v1150_v38 = vsel %vm779_vm6, 0.0, %v1149_v9  ;;  %v1091_v44 = vrot.slane %v1074_v36, 4  ;;  %v1285_v25 = vrot.slane %v1245_v20, 3 }
 0x102   : > { %v922_v14 = vperm.slane %v914_v53, %v9000_v1  ;;  %v924_v5 = vsel %vm779_vm6, %v923_v27, %v900_v62  ;;  %v925_v29 = vrot.slane %v900_v62, 4  ;;  %v935_v60 = vrot.slane %v918_v37, 4 }
 0x103   : > { %v930_v45 = vperm.slane %v924_v5, %v9000_v1  ;;  %v9219_v63 = vpack.c.bf16 %v1130_v15, %v918_v37  ;;  %v1154_v15 = vsel %vm779_vm6, 0.0, %v1153_v61  ;;  %v2460_v27 = vunpack.c.l.b16 %v9196_v32 }
 0x104   : > { %v926_v23 = vsel %vm779_vm6, %v910_v31, %v925_v29  ;;  %v937_v39 = vrot.slane %v922_v14, 4  ;;  %v9223_v3 = vpack.c.bf16 %v1134_v4, %v922_v14  ;;  %v733_v57 = vpop.f32.mrf.mxu0  ;;  %v936_v19 = vsel %vm779_vm6, 0.0, %v935_v60 }
 0x105   : > { %11830 = vst [vmem:[#allocation15_spill] sm:$0xff] %v9219_v63  ;;  %v934_v7 = vperm.slane %v926_v23, %v9000_v1  ;;  %v939_v10 = vrot.slane %v930_v45, 4  ;;  %v9230_v0 = vpack.c.bf16 %v1148_v12, %v936_v19  ;;  %v9232_v31 = vpack.c.bf16 %v1142_v30, %v930_v45 }
 0x106   : > { %v938_v8 = vsel %vm779_vm6, 0.0, %v937_v39  ;;  %v1042_v4 = vsel %vm779_vm6, %v8976_v41, %v1041_v56  ;;  %v830_v30 = vsel %vm779_vm6, %v9012_v24, %v829_v13  ;;  %v862_v41 = vperm.slane %v854_v17, %v9000_v1  ;;  %v747_v24 = vpop.f32.mrf.mxu1 }
 0x107   : > { %11831 = vst [vmem:[#allocation16_spill] sm:$0xff] %v9230_v0  ;;  %v940_v16 = vsel %vm779_vm6, 0.0, %v939_v10  ;;  %v941_v42 = vrot.slane %v934_v7, 4  ;;  %v9235_v35 = vpack.c.bf16 %v1150_v38, %v938_v8  ;;  %v9237_v48 = vpack.c.bf16 %v1146_v58, %v934_v7 }
 0x108   : > { %v9245_v51 = vpack.c.bf16 %v1152_v11, %v940_v16  ;;  %v1050_v49 = vperm.slane %v1042_v4, %v9000_v1  ;;  %v9262_v40 = vpack.c.b16 %v2460_v27, %v2458_v54  ;;  %v838_v13 = vperm.slane %v830_v30, %v9000_v1 }
 0x109   : > { %v942_v22 = vsel %vm779_vm6, 0.0, %v941_v42  ;;  %v1195_v58 = vrot.slane %v775_v55, 4  ;;  %v984_v17 = vsel %vm779_vm6, %v983_v21, %v733_v57  ;;  %v879_v9 = vrot.slane %v862_v41, 4 }
 0x10a   : > { %v9257_v56 = vpack.c.bf16 %v1154_v15, %v942_v22  ;;  %11832 = vst [vmem:[#allocation17_spill] sm:$0xff] %v9262_v40  ;;  %2658 = vmatmul.bf16.vlgmr.msra.gmra.mxu3 %v9262_v40  ;;  %v9269_v53 = vperm.slane %v984_v17, %v9000_v1  ;;  %v1438_v54 = vsel %vm457_vm0, %v1245_v20, %v1285_v25  ;;  %v1093_v14 = vrot.slane %v1050_v49, 4  ;;  %v6971_v17 = vld [vmem:[#allocation4 + $0xf8] sm:$0xf0]  ;;  %vm9783_vm0 = vmor %vm5191_vm14, %vm5192_vm15 }
 0x10b   : > { %v1196_v34 = vsel %vm779_vm6, %v1195_v58, %v747_v24  ;;  %1537 = vst [vmem:[#allocation1 + $0x1] ss:$9 sm:$0xff] %v1438_v54  ;;  %v1713_v12 = vlaneseq  ;;  %v881_v45 = vrot.slane %v838_v13, 4  ;;  %v8618_v61 = vmov 269488144  }
 0x10c   : > { %v1569_v62 = vpop.f32.mrf.mxu0  ;;  %v9274_v5 = vperm.slane %v1196_v34, %v9000_v1  ;;  %v989_v60 = vrot.slane %v9269_v53, 4  ;;  %v1851_v23 = vunpack.c.l.s4 %v8618_v61  ;;  %v8619_v39 = vmov 842150450   ;;  %v6963_v61 = vld [vmem:[#allocation4 + $0xe8] sm:$0xf0] }
 0x10d   : > { %v1570_v37 = vadd.f32 %v9254_v59, %v1569_v62  ;;  %v9277_v38 = vunpack.c.l.s4 %v8619_v39  ;;  %v1094_v57 = vsel %vm779_vm6, %v1074_v36, %v1093_v14  ;;  %v1092_v19 = vsel %vm779_vm6, %v1091_v44, %v1050_v49  ;;  %v8118_v62 = vld [vmem:[#allocation4 + $0xf4] sm:$0xf] }
 0x10e   : > { %v1201_v7 = vrot.slane %v9274_v5, 4  ;;  %v880_v1 = vsel %vm779_vm6, %v879_v9, %v838_v13  ;;  %v882_v10 = vsel %vm779_vm6, %v862_v41, %v881_v45  ;;  %v990_v11 = vsel %vm779_vm6, 0.0, %v989_v60  ;;  %v8116_v60 = vld [vmem:[#allocation4 + $0xe4] sm:$0xf] }
 0x10f   : > { %v1603_v29 = vmax.f32 %v1570_v37, 0.0  ;;  %v9286_v16 = vshrl.u32 %v1713_v12, 7  ;;  %v9290_v4 = vunpack.c.0.s8 %v1851_v23  ;;  %v1856_v36 = vunpack.c.0.s8 %v9277_v38  ;;  %v2346_v38 = vld [vmem:[#allocation6] sm:$0xff] }
 0x110   : > { %v1202_v8 = vsel %vm779_vm6, 0.0, %v1201_v7  ;;  %v8620_v2 = vmov 1414812756   ;;  %v9293_v55 = vpack.c.bf16 %v1094_v57, %v882_v10  ;;  %v9295_v20 = vpack.c.bf16 %v1092_v19, %v880_v1 }
 0x111   : > { %v1629_v15 = vrot.slane %v1603_v29, 2  ;;  %v9288_v42 = vpack.c.bf16 %v1202_v8, %v990_v11  ;;  %v1859_v30 = vunpack.c.l.s4 %v8620_v2  ;;  %v8621_v49 = vmov 0.0   ;;  %v8114_v2 = vld [vmem:[#allocation4 + $0xd4] sm:$0xf] }
 0x112   : > { %v1538_v41 = vld [vmem:[#allocation1] sm:$0xff]  ;;  %v9299_v21 = vperm.slane %v8621_v49, %v9290_v4  ;;  %v9302_v24 = vperm.slane %v8621_v49, %v1856_v36  ;;  %v1630_v13 = vrot.slane %v1603_v29, 4  ;;  %v8622_v58 = vmov 1987475062  }
 0x113   : > { %11833 = vst [vmem:[#allocation18_spill] sm:$0xff] %v9288_v42  ;;  %v1860_v44 = vunpack.c.0.s8 %v1859_v30  ;;  %v1863_v25 = vunpack.c.l.s4 %v8622_v58  ;;  %6822 = vmatmul.msk.bf16.gmra.mxu0 %vm1545_vm5, %v1538_v41  ;;  %v1631_v37 = vrot.slane %v1603_v29, 6  ;;  %vm1746_vm7 = vcmp.ge.s32.totalorder %v9286_v16, 1  ;;  %v6955_v30 = vld [vmem:[#allocation4 + $0xd8] sm:$0xf0] }
 0x114   : > { %v1571_v22 = vpop.f32.mrf.mxu0  ;;  %v2100_v9 = vmul.f32 %v9299_v21, %v1603_v29  ;;  %v2101_v34 = vmul.f32 %v9302_v24, %v1629_v15  ;;  %v2462_v12 = vunpack.c.l.b16 %v9295_v20  ;;  %v2464_v45 = vunpack.c.l.b16 %v9293_v55 }
 0x115   : > { %v9309_v54 = vperm.slane %v8621_v49, %v1860_v44  ;;  %v1864_v14 = vunpack.c.0.s8 %v1863_v25  ;;  %v1572_v23 = vadd.f32 %v9254_v59, %v1571_v22  ;;  %v6974_v39 = vor.u32 %v8118_v62, %v6971_v17 }
 0x116   : > { %2200 = vst [vmem:[#allocation1] ss:$4 sm:$0xff] %v2100_v9  ;;  %v9320_v7 = vpack.c.b16 %v2464_v45, %v2462_v12  ;;  %v6823_v19 = vsel %vm1746_vm7, 1.0, %v8621_v49  ;;  %v9327_v1 = vpack.c.b16 %v2462_v12, %v2460_v27  ;;  %v6966_v8 = vor.u32 %v8116_v60, %v6963_v61  ;;  %v8112_v60 = vld [vmem:[#allocation4 + $0xc4] sm:$0xf] }
 0x117   : > { %v9315_v57 = vperm.slane %v8621_v49, %v1864_v14  ;;  %v2102_v29 = vmul.f32 %v9309_v54, %v1630_v13  ;;  %2202 = vst [vmem:[#allocation1 + $0x1] ss:$4 sm:$0xff] %v2101_v34  ;;  %v1604_v10 = vmax.f32 %v1572_v23, 0.0  ;;  %2737 = vmatpush.bf16.msrb.mxu3 %v6974_v39  ;;  %v2369_v22 = vunpack.c.h.b16 %v2346_v38  ;;  %v6947_v61 = vld [vmem:[#allocation4 + $0xc8] sm:$0xf0] }
 0x118   : > { %11835 = vst [vmem:[#allocation20_spill] sm:$0xff] %v9320_v7  ;;  %v9334_v58 = vperm.slane %v6823_v19, %v9290_v4  ;;  %v9336_v62 = vperm.slane %v6823_v19, %v1856_v36  ;;  %v2368_v9 = vunpack.c.l.b16 %v2346_v38  ;;  %v9338_v34 = vperm.slane %v6823_v19, %v1860_v44 }
 0x119   : > { %11834 = vst [vmem:[#allocation19_spill] sm:$0xff] %v9315_v57  ;;  %v2103_v15 = vmul.f32 %v9315_v57, %v1631_v37  ;;  %v2104_v41 = vmul.f32 %v9299_v21, %v1604_v10  ;;  %v1632_v27 = vrot.slane %v1604_v10, 2  ;;  %v2371_v25 = vpack.c.b16 %v2369_v22, %v2369_v22 }
 0x11a   : > { %11836 = vst [vmem:[#allocation21_spill] sm:$0xff] %v9327_v1  ;;  %2663 = vmatmul.bf16.gmra.mxu3 %v9320_v7  ;;  %v1633_v17 = vrot.slane %v1604_v10, 4  ;;  %v6958_v37 = vor.u32 %v8114_v2, %v6955_v30  ;;  %v1634_v12 = vrot.slane %v1604_v10, 6  ;;  %v9340_v23 = vperm.slane %v6823_v19, %v1864_v14  ;;  %v6907_v2 = vld [vmem:[#allocation4 + $0x78] sm:$0xf0] }
 0x11b   : > { %2204 = vst [vmem:[#allocation1 + $0x2] ss:$4 sm:$0xff] %v2102_v29  ;;  %2738 = vmatpush.bf16.msrb.mxu3 %v6966_v8  ;;  %v2390_v29 = vsel %vm2385_vm8, %v2371_v25, 0  ;;  %v2105_v36 = vmul.f32 %v9334_v58, %v1632_v27  ;;  %v8102_v8 = vld [vmem:[#allocation4 + $0x74] sm:$0xf]  ;;  %v1715_v44 = vadd.s32 8, %v9286_v16  ;;  %v6950_v14 = vor.u32 %v8112_v60, %v6947_v61 }
 0x11c   : > { %v1574_v11 = vpop.f32.mrf.mxu0  ;;  %2206 = vst [vmem:[#allocation1 + $0x3] ss:$4 sm:$0xff] %v2103_v15  ;;  %v9345_v15 = vld [vmem:[#allocation6 + $0x18] sm:$0xff]  ;;  %2428 = vmatpush.bf16.msrb.mxu2 %v2390_v29  ;;  %v2106_v38 = vmul.f32 %v9336_v62, %v1633_v17  ;;  %v2107_v30 = vmul.f32 %v9338_v34, %v1634_v12  ;;  %v6910_v25 = vor.u32 %v8102_v8, %v6907_v2  ;;  %v2466_v17 = vunpack.c.l.b16 %v9162_v26  ;;  %v8108_v61 = vld [vmem:[#allocation4 + $0xa4] sm:$0xf] }
 0x11d   : > { %v1575_v13 = vadd.f32 %v9254_v59, %v1574_v11  ;;  %2208 = vst [vmem:[#allocation1 + $0x20] ss:$4 sm:$0xff] %v2104_v41  ;;  %v2370_v11 = vpack.c.b16 %v2368_v9, %v2368_v9  ;;  %v8110_v41 = vld [vmem:[#allocation4 + $0xb4] sm:$0xf]  ;;  %v2808_v27 = vunpack.c.l.b16 %v9345_v15  ;;  %vm1769_vm9 = vcmp.le.s32.totalorder %v1715_v44, 8 }
 0x11e   : > { %v11690_v12 = vunpack.c.l.b16 %v9175_v6  ;;  %v2468_v29 = vunpack.c.l.b16 %v9153_v46  ;;  %v6931_v8 = vld [vmem:[#allocation4 + $0xa8] sm:$0xf0]  ;;  %v6824_v2 = vsel %vm1769_vm9, 1.0, %v8621_v49  ;;  %v3643_v47 = vshll.u32 %v9295_v20, 16 }
 0x11f   : > { %v9342_v39 = vmax.f32 %v1575_v13, 0.0  ;;  %2739 = vmatpush.bf16.msrb.mxu3 %v6958_v37  ;;  %v2387_v19 = vsel %vm2385_vm8, %v2370_v11, 0  ;;  %v6939_v13 = vld [vmem:[#allocation4 + $0xb8] sm:$0xf0]  ;;  %v2810_v37 = vpack.c.b16 %v2808_v27, %v2808_v27  ;;  %v9378_v27 = vperm.slane %v6824_v2, %v9290_v4 }
 0x120   : > { %2399 = vmatpush.bf16.msrb.mxu1 %v2387_v19  ;;  %2708 = vmatpush.bf16.msra.mxu2 %v6910_v25  ;;  %v6942_v60 = vor.u32 %v8110_v41, %v6939_v13  ;;  %v9364_v44 = vpack.c.b16 %v2468_v29, %v2466_v17  ;;  %v9368_v19 = vpack.c.b16 %v2466_v17, %v2464_v45  ;;  %v8106_v41 = vld [vmem:[#allocation4 + $0x94] sm:$0xf]  ;;  %v6923_v13 = vld [vmem:[#allocation4 + $0x98] sm:$0xf0]  ;;  %v6969_v25 = vld [vmem:[#allocation4 + $0xf0] sm:$0xf] }
 0x121   : > { %v2108_v16 = vmul.f32 %v9340_v23, %v9342_v39  ;;  %v1635_v45 = vrot.slane %v9342_v39, 2  ;;  %v6926_v4 = vor.u32 %v8106_v41, %v6923_v13 }
 0x122   : > { %11837 = vst [vmem:[#allocation22_spill] sm:$0xff] %v9364_v44 }
 0x123   : > { %v2209_v9 = vld.sshfl [vmem:[#allocation1] sm:$0xff pattern:$0x73625140]  ;;  %2740 = vmatpush.bf16.msrb.mxu3 %v6950_v14  ;;  %v6934_v14 = vor.u32 %v8108_v61, %v6931_v8  ;;  %11838 = vst [vmem:[#allocation23_spill] sm:$0xff] %v9368_v19  ;;  %v6961_v8 = vld [vmem:[#allocation4 + $0xe0] sm:$0xf] }
 0x124   : > { %v1576_v10 = vpop.f32.mrf.mxu0  ;;  %2211 = vst [vmem:[#allocation1] ss:$4 sm:$0xff] %v2105_v36  ;;  %v2825_v36 = vsel %vm2385_vm8, %v2810_v37, 0  ;;  %v8100_v37 = vld [vmem:[#allocation4 + $0x64] sm:$0xf] }
 0x125   : > { %v1577_v22 = vadd.f32 %v9254_v59, %v1576_v10  ;;  %2212 = vst [vmem:[#allocation1 + $0x1] ss:$4 sm:$0xff] %v2106_v38  ;;  %v1636_v10 = vrot.slane %v9342_v39, 4  ;;  %2837 = vmatpush.bf16.msrb.mxu0 %v2825_v36  ;;  %v6891_v19 = vld [vmem:[#allocation4 + $0x58] sm:$0xf0] }
 0x126   : > { %2213 = vst [vmem:[#allocation1 + $0x2] ss:$4 sm:$0xff] %v2107_v30  ;;  %v9372_v30 = vpack.c.b16 %v11690_v12, %v2468_v29  ;;  %v6899_v29 = vld [vmem:[#allocation4 + $0x68] sm:$0xf0]  ;;  %v9385_v12 = vpack.c.bf16 %v2209_v9, %v2209_v9 }
 0x127   : > { %v9359_v11 = vmax.f32 %v1577_v22, 0.0  ;;  %2214 = vst [vmem:[#allocation1 + $0x3] ss:$4 sm:$0xff] %v2108_v16  ;;  %2741 = vmatpush.bf16.msrb.mxu3 %v6942_v60  ;;  %v1637_v22 = vrot.slane %v9342_v39, 6  ;;  %v8119_v16 = vld [vmem:[#allocation4 + $0xf4] sm:$0xf0]  ;;  %v2110_v17 = vmul.f32 %v9334_v58, %v1636_v10  ;;  %v6902_v2 = vor.u32 %v8100_v37, %v6899_v29 }
 0x128   : > { %11839 = vst [vmem:[#allocation24_spill] sm:$0xff] %v9372_v30  ;;  %v6970_v61 = vor.u32 %v8119_v16, %v6969_v25  ;;  %v8117_v30 = vld [vmem:[#allocation4 + $0xe4] sm:$0xf0]  ;;  %v8104_v25 = vld [vmem:[#allocation4 + $0x84] sm:$0xf] }
 0x129   : > { %v1638_v49 = vrot.slane %v9359_v11, 2  ;;  %v2112_v36 = vmul.f32 %v9338_v34, %v9359_v11  ;;  %11840 = vst [vmem:[#allocation25_spill] sm:$0xff] %v9385_v12  ;;  %v2111_v39 = vmul.f32 %v9336_v62, %v1637_v22  ;;  %v6915_v16 = vld [vmem:[#allocation4 + $0x88] sm:$0xf0]  ;;  %2709 = vmatpush.bf16.msra.mxu2 %v6902_v2  ;;  %v6962_v9 = vor.u32 %v8117_v30, %v6961_v8 }
 0x12a   : > { %2668 = vmatmul.bf16.gmra.mxu3 %v9364_v44  ;;  %v8098_v44 = vld [vmem:[#allocation4 + $0x54] sm:$0xf]  ;;  %2679 = vmatpush.bf16.msra.mxu1 %v6970_v61  ;;  %v2355_v22 = vunpack.c.l.b16 %v9385_v12  ;;  %v6918_v37 = vor.u32 %v8104_v25, %v6915_v16  ;;  %v11698_v8 = vunpack.c.l.b16 %v9164_v43  ;;  %v3629_v2 = vshll.u32 %v9196_v32, 16 }
 0x12b   : > { %2742 = vmatpush.bf16.msrb.mxu3 %v6934_v14  ;;  %v2113_v10 = vmul.f32 %v9340_v23, %v1638_v49  ;;  %v6894_v7 = vor.u32 %v8098_v44, %v6891_v19  ;;  %v2109_v14 = vmul.f32 %v9378_v27, %v1635_v45  ;;  %v9397_v44 = vld.sshfl [vmem:[#allocation1 + $0x20] sm:$0xff pattern:$0x73625140]  ;;  %v3612_v19 = vshrl.u32 %v9188_v18, 16 }
 0x12c   : > { %v1579_v38 = vpop.f32.mrf.mxu0  ;;  %11842 = vst [vmem:[#allocation27_spill] sm:$0xff] %v9397_v44  ;;  %v3615_v45 = vshll.u32 %v9188_v18, 16  ;;  %v3635_v25 = vshll.u32 %v9230_v0, 16 }
 0x12d   : > { %v1580_v60 = vadd.f32 %v9254_v59, %v1579_v38  ;;  %2710 = vmatpush.bf16.msra.mxu2 %v6894_v7  ;;  %2215 = vst [vmem:[#allocation1 + $0x20] ss:$4 sm:$0xff] %v2109_v14 }
 0x12e   : > { %v2216_v57 = vld.sshfl [vmem:[#allocation1] sm:$0xff pattern:$0x73625140]  ;;  %2680 = vmatpush.bf16.msra.mxu1 %v6962_v9  ;;  %v11843_v9 = vunpack.c.l.b16 %v9175_v6 }
 0x12f   : > { %2218 = vst [vmem:[#allocation1] ss:$4 sm:$0xff] %v2110_v17  ;;  %v9389_v38 = vpack.c.bf16 %v2216_v57, %v2216_v57  ;;  %v9392_v41 = vmax.f32 %v1580_v60, 0.0  ;;  %2743 = vmatpush.bf16.msrb.mxu3 %v6926_v4  ;;  %v1640_v57 = vrot.slane %v9359_v11, 6  ;;  %v3626_v17 = vshrl.u32 %v9196_v32, 16 }
 0x130   : > { %2219 = vst [vmem:[#allocation1 + $0x1] ss:$4 sm:$0xff] %v2111_v39  ;;  %v3621_v60 = vshll.u32 %v9219_v63, 16  ;;  %v3617_v4 = vrot.slane %v3615_v45, 5  ;;  %v1639_v39 = vrot.slane %v9359_v11, 4  ;;  %v9417_v14 = vpack.c.b16 %v11698_v8, %v11843_v9 }
 0x131   : > { %11841 = vst [vmem:[#allocation26_spill] sm:$0xff] %v9389_v38  ;;  %v2356_v49 = vunpack.c.l.b16 %v9389_v38  ;;  %v1641_v61 = vrot.slane %v9392_v41, 2  ;;  %v1642_v29 = vrot.slane %v9392_v41, 4  ;;  %v2115_v16 = vmul.f32 %v9334_v58, %v1640_v57 }
 0x132   : > { %2220 = vst [vmem:[#allocation1 + $0x2] ss:$4 sm:$0xff] %v2112_v36  ;;  %v3614_v36 = vrot.slane %v3612_v19, 4  ;;  %v3623_v19 = vrot.slane %v3621_v60, 5  ;;  %v2116_v11 = vmul.f32 %v9336_v62, %v9392_v41  ;;  %v2114_v44 = vmul.f32 %v9378_v27, %v1639_v39 }
 0x133   : > { %2221 = vst [vmem:[#allocation1 + $0x3] ss:$4 sm:$0xff] %v2113_v10  ;;  %v2363_v30 = vpack.c.b16 %v2356_v49, %v2355_v22  ;;  %2744 = vmatpush.bf16.msrb.mxu3 %v6918_v37  ;;  %v3628_v10 = vrot.slane %v3626_v17, 4  ;;  %v3631_v22 = vrot.slane %v3629_v2, 5  ;;  %v2118_v37 = vmul.f32 %v9340_v23, %v1642_v29  ;;  %v8115_v2 = vld [vmem:[#allocation4 + $0xd4] sm:$0xf0] }
 0x134   : > { %v1581_v13 = vpop.f32.mrf.mxu0  ;;  %11844 = vst [vmem:[#allocation28_spill] sm:$0xff] %v9417_v14 }
 0x135   : > { %6839 = vmatmul.msk.bf16.vlgmr.msrb.gmra.mxu1 %vm2372_vm10, %v2363_v30  ;;  %6843 = vmatmul.msk.bf16.vlgmr.msrb.gmra.mxu2 %vm2372_vm10, %v2363_v30  ;;  %v1582_v7 = vadd.f32 %v9254_v59, %v1581_v13  ;;  %v2117_v13 = vmul.f32 %v9338_v34, %v1641_v61  ;;  %v3618_v30 = vor.u32 %v3617_v4, %v3614_v36  ;;  %v6953_v61 = vld [vmem:[#allocation4 + $0xd0] sm:$0xf]  ;;  %v8096_v36 = vld [vmem:[#allocation4 + $0x44] sm:$0xf]  ;;  %v6883_v4 = vld [vmem:[#allocation4 + $0x48] sm:$0xf0] }
 0x136   : > { %v3632_v8 = vor.u32 %v3631_v22, %v3628_v10  ;;  %v6954_v60 = vor.u32 %v8115_v2, %v6953_v61 }
 0x137   : > { %v1608_v57 = vmax.f32 %v1582_v7, 0.0  ;;  %v3637_v7 = vrot.slane %v3635_v25, 5  ;;  %v3619_v12 = vrot.slane %v3618_v30, 4  ;;  %v1643_v25 = vrot.slane %v9392_v41, 6 }
 0x138   : > { %2681 = vmatpush.bf16.msra.mxu1 %v6954_v60  ;;  %v3633_v61 = vrot.slane %v3632_v8, 4  ;;  %v8094_v60 = vld [vmem:[#allocation4 + $0x34] sm:$0xf] }
 0x139   : > { %v1644_v22 = vrot.slane %v1608_v57, 2  ;;  %v1645_v2 = vrot.slane %v1608_v57, 4 }
 0x13a   : > { %v2223_v45 = vld.sshfl [vmem:[#allocation1] sm:$0xff pattern:$0x73625140]  ;;  %2673 = vmatmul.bf16.gmra.mxu3 %v9417_v14  ;;  %v1646_v14 = vrot.slane %v1608_v57, 6 }
 0x13b   : > { %v9425_v9 = vpack.c.bf16 %v2223_v45, %v2223_v45  ;;  %2225 = vst [vmem:[#allocation1] ss:$4 sm:$0xff] %v2115_v16  ;;  %v6886_v45 = vor.u32 %v8096_v36, %v6883_v4  ;;  %v2217_v16 = vld.sshfl [vmem:[#allocation1 + $0x20] sm:$0xff pattern:$0x73625140]  ;;  %v2121_v4 = vmul.f32 %v9336_v62, %v1644_v22  ;;  %v11707_v22 = vunpack.c.h.b16 %v9196_v32 }
 0x13c   : > { %v1584_v17 = vpop.f32.mrf.mxu0  ;;  %2226 = vst [vmem:[#allocation1 + $0x1] ss:$4 sm:$0xff] %v2116_v11  ;;  %v3624_v11 = vsel %vm9429_vm13, %v3619_v12, %v3623_v19  ;;  %v2120_v19 = vmul.f32 %v9334_v58, %v1608_v57  ;;  %v2123_v42 = vmul.f32 %v9340_v23, %v1646_v14  ;;  %v7043_v32 = vld [vmem:[#allocation4 + $0x378] sm:$0xf0] }
 0x13d   : > { %11845 = vst [vmem:[#allocation29_spill] sm:$0xff] %v9425_v9  ;;  %v2357_v39 = vunpack.c.l.b16 %v9425_v9  ;;  %2711 = vmatpush.bf16.msra.mxu2 %v6886_v45  ;;  %v4020_v36 = vunpack.c.h.b16 %v3624_v11  ;;  %v4019_v8 = vunpack.c.l.b16 %v3624_v11 }
 0x13e   : > { %2227 = vst [vmem:[#allocation1 + $0x2] ss:$4 sm:$0xff] %v2117_v13  ;;  %v1585_v13 = vadd.f32 %v9254_v59, %v1584_v17  ;;  %v2459_v17 = vunpack.c.h.b16 %v9188_v18 }
 0x13f   : > { %2228 = vst [vmem:[#allocation1 + $0x3] ss:$4 sm:$0xff] %v2118_v37  ;;  %v9434_v10 = vpack.c.b16 %v2357_v39, %v2356_v49  ;;  %v9444_v49 = vsel %vm9429_vm13, %v3633_v61, %v3637_v7  ;;  %v6945_v37 = vld [vmem:[#allocation4 + $0xc0] sm:$0xf]  ;;  %v2122_v7 = vmul.f32 %v9338_v34, %v1645_v2 }
 0x140   : > { %2222 = vst [vmem:[#allocation1 + $0x20] ss:$4 sm:$0xff] %v2114_v44  ;;  %v8113_v44 = vld [vmem:[#allocation4 + $0xc4] sm:$0xf0]  ;;  %v11709_v12 = vunpack.c.h.b16 %v9444_v49  ;;  %v11708_v41 = vunpack.c.l.b16 %v9444_v49  ;;  %v9461_v57 = vmax.f32 %v1585_v13, 0.0  ;;  %v9472_v13 = vpack.c.b16 %v11707_v22, %v2459_v17 }
 0x141   : > { %11848 = vst [vmem:[#allocation30_spill] sm:$0xff] %v9434_v10  ;;  %6975 = vmatmul.msk.bf16.vlgmr.msrb.gmra.mxu0 %vm2372_vm10, %v9434_v10  ;;  %v6946_v45 = vor.u32 %v8113_v44, %v6945_v37  ;;  %v6875_v10 = vld [vmem:[#allocation4 + $0x38] sm:$0xf0]  ;;  %v3766_v37 = vshrl.u32 %v9389_v38, 16  ;;  %v7105_v22 = vld [vmem:[#allocation4 + $0x3f0] sm:$0xf] }
 0x142   : > { %v6878_v61 = vor.u32 %v8094_v60, %v6875_v10  ;;  %v9454_v1 = vpack.c.b16 %v11709_v12, %v4020_v36  ;;  %v9458_v11 = vpack.c.b16 %v11708_v41, %v4019_v8  ;;  %v2119_v10 = vmul.f32 %v9378_v27, %v1643_v25  ;;  %11852 = vst [vmem:[#allocation34_spill] sm:$0xff] %v9472_v13  ;;  %v8151_v41 = vld [vmem:[#allocation4 + $0x3f4] sm:$0xf0]  ;;  %v6937_v12 = vld [vmem:[#allocation4 + $0xb0] sm:$0xf] }
 0x143   : > { %2682 = vmatpush.bf16.msra.mxu1 %v6946_v45  ;;  %v3769_v60 = vshll.u32 %v9389_v38, 16  ;;  %v3640_v8 = vshrl.u32 %v9295_v20, 16  ;;  %v1648_v25 = vrot.slane %v9461_v57, 4  ;;  %v9489_v38 = vpack.c.bf16 %v2217_v16, %v2217_v16 }
 0x144   : > { %v1586_v30 = vpop.f32.mrf.mxu0  ;;  %11849 = vst [vmem:[#allocation31_spill] sm:$0xff] %v9454_v1  ;;  %2712 = vmatpush.bf16.msra.mxu2 %v6878_v61  ;;  %v8149_v1 = vld [vmem:[#allocation4 + $0x3e4] sm:$0xf0] }
 0x145   : > { %11850 = vst [vmem:[#allocation32_spill] sm:$0xff] %v9458_v11  ;;  %v1587_v44 = vadd.f32 %v9254_v59, %v1586_v30  ;;  %v1649_v30 = vrot.slane %v9461_v57, 6  ;;  %v3771_v61 = vrot.slane %v3769_v60, 5  ;;  %v7097_v11 = vld [vmem:[#allocation4 + $0x3e0] sm:$0xf]  ;;  %v2126_v16 = vmul.f32 %v9336_v62, %v1648_v25 }
 0x146   : > { %v2230_v18 = vld.sshfl [vmem:[#allocation1] sm:$0xff pattern:$0x73625140]  ;;  %11854 = vst [vmem:[#allocation36_spill] sm:$0xff] %v9489_v38  ;;  %v7098_v40 = vor.u32 %v8149_v1, %v7097_v11 }
 0x147   : > { %v9466_v2 = vpack.c.bf16 %v2230_v18, %v2230_v18  ;;  %2232 = vst [vmem:[#allocation1] ss:$4 sm:$0xff] %v2120_v19  ;;  %v2224_v14 = vld.sshfl [vmem:[#allocation1 + $0x20] sm:$0xff pattern:$0x73625140]  ;;  %v1647_v18 = vrot.slane %v9461_v57, 2 }
 0x148   : > { %2233 = vst [vmem:[#allocation1 + $0x1] ss:$4 sm:$0xff] %v2121_v4  ;;  %v9479_v19 = vrot.slane %v3766_v37, 4  ;;  %v9485_v17 = vmax.f32 %v1587_v44, 0.0  ;;  %v8092_v37 = vld [vmem:[#allocation4 + $0x24] sm:$0xf]  ;;  %v9498_v0 = vpack.c.bf16 %v2224_v14, %v2224_v14 }
 0x149   : > { %11851 = vst [vmem:[#allocation33_spill] sm:$0xff] %v9466_v2  ;;  %v11711_v36 = vunpack.c.l.b16 %v9466_v2  ;;  %v6867_v44 = vld [vmem:[#allocation4 + $0x28] sm:$0xf0] }
 0x14a   : > { %2234 = vst [vmem:[#allocation1 + $0x2] ss:$4 sm:$0xff] %v2122_v7  ;;  %v3780_v7 = vshrl.u32 %v9425_v9, 16  ;;  %2745 = vmatmul.bf16.vlgmr.msrb.gmra.mxu3 %v9472_v13  ;;  %v8134_v13 = vld [vmem:[#allocation4 + $0x374] sm:$0xf]  ;;  %v2128_v25 = vmul.f32 %v9340_v23, %v9485_v17  ;;  %v3772_v14 = vor.u32 %v3771_v61, %v9479_v19  ;;  %v3649_v19 = vshll.u32 %v9223_v3, 16 }
 0x14b   : > { %2235 = vst [vmem:[#allocation1 + $0x3] ss:$4 sm:$0xff] %v2123_v42  ;;  %v9483_v4 = vpack.c.b16 %v11711_v36, %v2357_v39  ;;  %v7106_v42 = vor.u32 %v8151_v41, %v7105_v22  ;;  %v8111_v39 = vld [vmem:[#allocation4 + $0xb4] sm:$0xf0]  ;;  %v6870_v36 = vor.u32 %v8092_v37, %v6867_v44  ;;  %v3783_v41 = vshll.u32 %v9425_v9, 16 }
 0x14c   : > { %v1589_v45 = vpop.f32.mrf.mxu0  ;;  %2229 = vst [vmem:[#allocation1 + $0x20] ss:$4 sm:$0xff] %v2119_v10  ;;  %v2125_v10 = vmul.f32 %v9334_v58, %v1647_v18  ;;  %v6938_v60 = vor.u32 %v8111_v39, %v6937_v12  ;;  %v2127_v22 = vmul.f32 %v9338_v34, %v1649_v30  ;;  %v7089_v12 = vld [vmem:[#allocation4 + $0x3d0] sm:$0xf]  ;;  %v8147_v39 = vld [vmem:[#allocation4 + $0x3d4] sm:$0xf0]  ;;  %v7046_v11 = vor.u32 %v8134_v13, %v7043_v32 }
 0x14d   : > { %11853 = vst [vmem:[#allocation35_spill] sm:$0xff] %v9483_v4  ;;  %6840 = vmatmul.msk.bf16.gmra.mxu1 %vm2372_vm10, %v9483_v4  ;;  %6844 = vmatmul.msk.bf16.gmra.mxu2 %vm2372_vm10, %v9483_v4  ;;  %v1590_v18 = vadd.f32 %v9254_v59, %v1589_v45  ;;  %v3775_v37 = vshll.u32 %v9489_v38, 16  ;;  %v3782_v44 = vrot.slane %v3780_v7, 4  ;;  %v2124_v30 = vmul.f32 %v9378_v27, %v9461_v57 }
 0x14e   : > { %3096 = vmatpush.bf16.msra.mxu3 %v7106_v42  ;;  %11855 = vst [vmem:[#allocation37_spill] sm:$0xff] %v9498_v0  ;;  %2683 = vmatpush.bf16.msra.mxu1 %v6938_v60  ;;  %v8132_v42 = vld [vmem:[#allocation4 + $0x364] sm:$0xf]  ;;  %v3642_v45 = vrot.slane %v3640_v8, 4  ;;  %v3645_v60 = vrot.slane %v3643_v47, 5  ;;  %v7090_v4 = vor.u32 %v8147_v39, %v7089_v12  ;;  %v3785_v32 = vrot.slane %v3783_v41, 5 }
 0x14f   : > { %2713 = vmatpush.bf16.msra.mxu2 %v6870_v36  ;;  %v7035_v36 = vld [vmem:[#allocation4 + $0x368] sm:$0xf0]  ;;  %3125 = vmatpush.bf16.msra.mxu0 %v7046_v11  ;;  %v3789_v13 = vshll.u32 %v9498_v0, 16  ;;  %v9514_v57 = vmax.f32 %v1590_v18, 0.0  ;;  %v11726_v8 = vunpack.c.h.b16 %v9295_v20  ;;  %v3773_v47 = vrot.slane %v3772_v14, 4 }
 0x150   : > { %v7038_v63 = vor.u32 %v8132_v42, %v7035_v36  ;;  %v11857_v41 = vunpack.c.l.b16 %v9466_v2  ;;  %v3777_v18 = vrot.slane %v3775_v37, 5  ;;  %v3651_v11 = vrot.slane %v3649_v19, 5  ;;  %v8090_v37 = vld [vmem:[#allocation4 + $0x14] sm:$0xf]  ;;  %v7081_v19 = vld [vmem:[#allocation4 + $0x3c0] sm:$0xf] }
 0x151   : > { %v1650_v42 = vrot.slane %v9485_v17, 2  ;;  %v1653_v14 = vrot.slane %v9514_v57, 2 }
 0x152   : > { %v2237_v1 = vld.sshfl [vmem:[#allocation1] sm:$0xff pattern:$0x73625140]  ;;  %3097 = vmatpush.bf16.msra.mxu3 %v7098_v40  ;;  %v3786_v40 = vor.u32 %v3785_v32, %v3782_v44 }
 0x153   : > { %v9509_v9 = vpack.c.bf16 %v2237_v1, %v2237_v1  ;;  %2239 = vst [vmem:[#allocation1] ss:$4 sm:$0xff] %v2125_v10  ;;  %v9517_v7 = vld.sshfl [vmem:[#allocation1 + $0x20] sm:$0xff pattern:$0x73625140]  ;;  %v1651_v10 = vrot.slane %v9485_v17, 4  ;;  %3126 = vmatpush.bf16.msra.mxu0 %v7038_v63  ;;  %v3646_v1 = vor.u32 %v3645_v60, %v3642_v45 }
 0x154   : > { %2240 = vst [vmem:[#allocation1 + $0x1] ss:$4 sm:$0xff] %v2126_v16  ;;  %v1591_v38 = vpop.f32.mrf.mxu0  ;;  %v1652_v16 = vrot.slane %v9485_v17, 6  ;;  %v3787_v39 = vrot.slane %v3786_v40, 4  ;;  %v8109_v63 = vld [vmem:[#allocation4 + $0xa4] sm:$0xf0] }
 0x155   : > { %11856 = vst [vmem:[#allocation38_spill] sm:$0xff] %v9509_v9  ;;  %v11727_v61 = vunpack.c.l.b16 %v9509_v9  ;;  %v2130_v36 = vmul.f32 %v9334_v58, %v1651_v10  ;;  %v1592_v60 = vadd.f32 %v9254_v59, %v1591_v38  ;;  %v8145_v40 = vld [vmem:[#allocation4 + $0x3c4] sm:$0xf0] }
 0x156   : > { %2241 = vst [vmem:[#allocation1 + $0x2] ss:$4 sm:$0xff] %v2127_v22  ;;  %v11725_v22 = vunpack.c.h.b16 %v9293_v55  ;;  %3098 = vmatpush.bf16.msra.mxu3 %v7090_v4  ;;  %v6929_v4 = vld [vmem:[#allocation4 + $0xa0] sm:$0xf]  ;;  %v2131_v45 = vmul.f32 %v9336_v62, %v1652_v16 }
 0x157   : > { %2242 = vst [vmem:[#allocation1 + $0x3] ss:$4 sm:$0xff] %v2128_v25  ;;  %v9525_v12 = vpack.c.b16 %v11727_v61, %v11857_v41  ;;  %v3791_v25 = vrot.slane %v3789_v13, 5  ;;  %v6930_v32 = vor.u32 %v8109_v63, %v6929_v4  ;;  %v6859_v13 = vld [vmem:[#allocation4 + $0x18] sm:$0xf0]  ;;  %v2132_v41 = vmul.f32 %v9338_v34, %v9514_v57 }
 0x158   : > { %2236 = vst [vmem:[#allocation1 + $0x20] ss:$4 sm:$0xff] %v2124_v30  ;;  %v9536_v44 = vpack.c.b16 %v11725_v22, %v11726_v8  ;;  %v3778_v30 = vsel %vm9429_vm13, %v3773_v47, %v3777_v18  ;;  %v6862_v22 = vor.u32 %v8090_v37, %v6859_v13  ;;  %v7082_v8 = vor.u32 %v8145_v40, %v7081_v19  ;;  %v8130_v61 = vld [vmem:[#allocation4 + $0x354] sm:$0xf]  ;;  %v7027_v47 = vld [vmem:[#allocation4 + $0x358] sm:$0xf0] }
 0x159   : > { %6976 = vmatmul.msk.bf16.gmra.mxu0 %vm2372_vm10, %v9525_v12  ;;  %v3792_v17 = vsel %vm9429_vm13, %v3787_v39, %v3791_v25  ;;  %v3647_v18 = vrot.slane %v3646_v1, 4  ;;  %v2133_v39 = vmul.f32 %v9340_v23, %v1653_v14  ;;  %2684 = vmatpush.bf16.msra.mxu1 %v6930_v32  ;;  %v7030_v38 = vor.u32 %v8130_v61, %v7027_v47  ;;  %v7073_v25 = vld [vmem:[#allocation4 + $0x3b0] sm:$0xf]  ;;  %v8143_v37 = vld [vmem:[#allocation4 + $0x3b4] sm:$0xf0] }
 0x15a   : > { %2750 = vmatmul.bf16.gmra.mxu3 %v9536_v44  ;;  %v9549_v4 = vunpack.c.l.b16 %v3778_v30  ;;  %v9551_v63 = vunpack.c.l.b16 %v3792_v17  ;;  %2714 = vmatpush.bf16.msra.mxu2 %v6862_v22  ;;  %v8128_v1 = vld [vmem:[#allocation4 + $0x344] sm:$0xf]  ;;  %v9559_v13 = vmax.f32 %v1592_v60, 0.0  ;;  %v7074_v61 = vor.u32 %v8143_v37, %v7073_v25  ;;  %v7019_v30 = vld [vmem:[#allocation4 + $0x348] sm:$0xf0] }
 0x15b   : > { %3099 = vmatpush.bf16.msra.mxu3 %v7082_v8  ;;  %v9557_v14 = vsel %vm9429_vm13, %v3647_v18, %v3651_v11  ;;  %3127 = vmatpush.bf16.msra.mxu0 %v7030_v38  ;;  %v7022_v32 = vor.u32 %v8128_v1, %v7019_v30  ;;  %v6921_v11 = vld [vmem:[#allocation4 + $0x90] sm:$0xf]  ;;  %v8107_v19 = vld [vmem:[#allocation4 + $0x94] sm:$0xf0]  ;;  %v11861_v40 = vunpack.c.l.b16 %v9509_v9  ;;  %v8088_v18 = vld [vmem:[#allocation4 + $0x4] sm:$0xf] }
 0x15c   : > { %v1594_v16 = vpop.f32.mrf.mxu0  ;;  %11858 = vst [vmem:[#allocation39_spill] sm:$0xff] %v9551_v63  ;;  %v9563_v17 = vpack.c.b16 %v9551_v63, %v9549_v4  ;;  %v11732_v60 = vunpack.c.l.b16 %v9557_v14  ;;  %v1654_v38 = vrot.slane %v9514_v57, 4  ;;  %v1657_v25 = vrot.slane %v9559_v13, 4  ;;  %v7065_v1 = vld [vmem:[#allocation4 + $0x3a0] sm:$0xf] }
 0x15d   : > { %v1595_v22 = vadd.f32 %v9254_v59, %v1594_v16  ;;  %v1655_v59 = vrot.slane %v9514_v57, 6  ;;  %v8126_v30 = vld [vmem:[#allocation4 + $0x334] sm:$0xf]  ;;  %v6995_v63 = vld [vmem:[#allocation4 + $0x318] sm:$0xf0] }
 0x15e   : > { %v2244_v10 = vld.sshfl [vmem:[#allocation1] sm:$0xff pattern:$0x73625140]  ;;  %11860 = vst [vmem:[#allocation41_spill] sm:$0xff] %v9563_v17  ;;  %v6913_v17 = vld [vmem:[#allocation4 + $0x80] sm:$0xf] }
 0x15f   : > { %v9553_v0 = vpack.c.bf16 %v2244_v10, %v2244_v10  ;;  %2246 = vst [vmem:[#allocation1] ss:$4 sm:$0xff] %v2130_v36  ;;  %v2129_v36 = vmul.f32 %v9378_v27, %v1650_v42  ;;  %3100 = vmatpush.bf16.msra.mxu3 %v7074_v61  ;;  %v6922_v42 = vor.u32 %v8107_v19, %v6921_v11  ;;  %v1656_v10 = vrot.slane %v9559_v13, 2  ;;  %v9578_v16 = vld.sshfl [vmem:[#allocation1 + $0x20] sm:$0xff pattern:$0x73625140] }
 0x160   : > { %2247 = vst [vmem:[#allocation1 + $0x1] ss:$4 sm:$0xff] %v2131_v45  ;;  %v11731_v45 = vunpack.c.h.b16 %v9557_v14  ;;  %3128 = vmatpush.bf16.msra.mxu0 %v7022_v32  ;;  %v9586_v37 = vmax.f32 %v1595_v22, 0.0  ;;  %v8141_v61 = vld [vmem:[#allocation4 + $0x3a4] sm:$0xf0]  ;;  %v11863_v32 = vunpack.c.h.b16 %v9444_v49  ;;  %v11865_v11 = vunpack.c.l.b16 %v9444_v49 }
 0x161   : > { %11859 = vst [vmem:[#allocation40_spill] sm:$0xff] %v9553_v0  ;;  %v11729_v8 = vunpack.c.l.b16 %v9553_v0  ;;  %2685 = vmatpush.bf16.msra.mxu1 %v6922_v42  ;;  %v7057_v42 = vld [vmem:[#allocation4 + $0x390] sm:$0xf]  ;;  %v2136_v49 = vmul.f32 %v9336_v62, %v9559_v13 }
 0x162   : > { %2248 = vst [vmem:[#allocation1 + $0x2] ss:$4 sm:$0xff] %v2132_v41  ;;  %v6851_v41 = vld [vmem:[#allocation4 + $0x8] sm:$0xf0]  ;;  %v9592_v57 = vpack.c.b16 %v11731_v45, %v11863_v32  ;;  %v9598_v19 = vpack.c.b16 %v11732_v60, %v11865_v11  ;;  %v8105_v32 = vld [vmem:[#allocation4 + $0x84] sm:$0xf0]  ;;  %v2138_v11 = vmul.f32 %v9340_v23, %v1657_v25  ;;  %v2134_v25 = vmul.f32 %v9378_v27, %v1654_v38 }
 0x163   : > { %2249 = vst [vmem:[#allocation1 + $0x3] ss:$4 sm:$0xff] %v2133_v39  ;;  %v9574_v47 = vpack.c.b16 %v11729_v8, %v11861_v40  ;;  %v6854_v39 = vor.u32 %v8088_v18, %v6851_v41  ;;  %v7011_v40 = vld [vmem:[#allocation4 + $0x338] sm:$0xf0]  ;;  %v8139_v18 = vld [vmem:[#allocation4 + $0x394] sm:$0xf0]  ;;  %v2135_v41 = vmul.f32 %v9334_v58, %v1655_v59  ;;  %v11735_v59 = vunpack.c.h.b16 %v9153_v46 }
 0x164   : > { %11862 = vst [vmem:[#allocation42_spill] sm:$0xff] %v9578_v16  ;;  %v7014_v8 = vor.u32 %v8126_v30, %v7011_v40  ;;  %v3654_v45 = vshrl.u32 %v9293_v55, 16  ;;  %v1659_v22 = vrot.slane %v9586_v37, 2  ;;  %v3657_v30 = vshll.u32 %v9293_v55, 16  ;;  %v7003_v40 = vld [vmem:[#allocation4 + $0x328] sm:$0xf0] }
 0x165   : > { %6841 = vmatmul.msk.bf16.gmra.mxu1 %vm2372_vm10, %v9574_v47  ;;  %6845 = vmatmul.msk.bf16.gmra.mxu2 %vm2372_vm10, %v9574_v47  ;;  %2243 = vst [vmem:[#allocation1 + $0x20] ss:$4 sm:$0xff] %v2129_v36  ;;  %v7066_v36 = vor.u32 %v8141_v61, %v7065_v1  ;;  %v7058_v1 = vor.u32 %v8139_v18, %v7057_v42  ;;  %v8135_v42 = vld [vmem:[#allocation4 + $0x374] sm:$0xf0]  ;;  %v1660_v38 = vrot.slane %v9586_v37, 4 }
 0x166   : > { %2715 = vmatpush.bf16.msra.mxu2 %v6854_v39  ;;  %11864 = vst [vmem:[#allocation43_spill] sm:$0xff] %v9592_v57  ;;  %v2137_v39 = vmul.f32 %v9338_v34, %v1656_v10  ;;  %v6914_v61 = vor.u32 %v8105_v32, %v6913_v17  ;;  %3129 = vmatpush.bf16.msra.mxu0 %v7014_v8  ;;  %v8124_v10 = vld [vmem:[#allocation4 + $0x324] sm:$0xf]  ;;  %v7049_v8 = vld [vmem:[#allocation4 + $0x380] sm:$0xf]  ;;  %v3659_v16 = vrot.slane %v3657_v30, 5 }
 0x167   : > { %11866 = vst [vmem:[#allocation44_spill] sm:$0xff] %v9598_v19  ;;  %3101 = vmatpush.bf16.msra.mxu3 %v7066_v36  ;;  %v7041_v19 = vld [vmem:[#allocation4 + $0x370] sm:$0xf]  ;;  %v11868_v36 = vunpack.c.h.b16 %v9162_v26  ;;  %v7006_v18 = vor.u32 %v8124_v10, %v7003_v40  ;;  %v8137_v32 = vld [vmem:[#allocation4 + $0x384] sm:$0xf0]  ;;  %v1661_v40 = vrot.slane %v9586_v37, 6 }
 0x168   : > { %2686 = vmatpush.bf16.msra.mxu1 %v6914_v61  ;;  %v1658_v61 = vrot.slane %v9559_v13, 6  ;;  %v3656_v13 = vrot.slane %v3654_v45, 4  ;;  %v3663_v45 = vshll.u32 %v9235_v35, 16  ;;  %v3668_v30 = vshrl.u32 %v9162_v26, 16 }
 0x169   : > { %v9617_v17 = vpack.c.b16 %v11735_v59, %v11868_v36  ;;  %v11869_v36 = vunpack.c.l.b16 %v9553_v0 }
 0x16a   : > { %v2251_v60 = vld.sshfl [vmem:[#allocation1] sm:$0xff pattern:$0x73625140]  ;;  %3130 = vmatpush.bf16.msra.mxu0 %v7006_v18  ;;  %v7033_v18 = vld [vmem:[#allocation4 + $0x360] sm:$0xf] }
 0x16b   : > { %v9609_v57 = vpack.c.bf16 %v2251_v60, %v2251_v60  ;;  %2253 = vst [vmem:[#allocation1] ss:$4 sm:$0xff] %v2135_v41  ;;  %3102 = vmatpush.bf16.msra.mxu3 %v7058_v1  ;;  %v7042_v41 = vor.u32 %v8135_v42, %v7041_v19  ;;  %v8120_v1 = vld [vmem:[#allocation4 + $0x304] sm:$0xf]  ;;  %v6987_v42 = vld [vmem:[#allocation4 + $0x308] sm:$0xf0] }
 0x16c   : > { %2254 = vst [vmem:[#allocation1 + $0x1] ss:$4 sm:$0xff] %v2136_v49  ;;  %v8122_v49 = vld [vmem:[#allocation4 + $0x314] sm:$0xf]  ;;  %2755 = vmatmul.bf16.gmra.mxu3 %v9617_v17 }
 0x16d   : > { %11867 = vst [vmem:[#allocation45_spill] sm:$0xff] %v9609_v57  ;;  %v11737_v60 = vunpack.c.l.b16 %v9609_v57  ;;  %3067 = vmatpush.bf16.msrb.mxu2 %v7042_v41  ;;  %v6998_v19 = vor.u32 %v8122_v49, %v6995_v63  ;;  %v9629_v10 = vld.sshfl [vmem:[#allocation1 + $0x20] sm:$0xff pattern:$0x73625140]  ;;  %v2809_v63 = vunpack.c.h.b16 %v9345_v15  ;;  %v8133_v41 = vld [vmem:[#allocation4 + $0x364] sm:$0xf0]  ;;  %v2142_v49 = vmul.f32 %v9338_v34, %v1660_v38 }
 0x16e   : > { %2255 = vst [vmem:[#allocation1 + $0x2] ss:$4 sm:$0xff] %v2137_v39  ;;  %v7050_v39 = vor.u32 %v8137_v32, %v7049_v8  ;;  %v2140_v8 = vmul.f32 %v9334_v58, %v9586_v37  ;;  %v2141_v32 = vmul.f32 %v9336_v62, %v1659_v22  ;;  %v6990_v58 = vor.u32 %v8120_v1, %v6987_v42 }
 0x16f   : > { %2256 = vst [vmem:[#allocation1 + $0x3] ss:$4 sm:$0xff] %v2138_v11  ;;  %v9627_v59 = vpack.c.b16 %v11737_v60, %v11869_v36  ;;  %v1596_v11 = vpop.f32.mrf.mxu0  ;;  %v9640_v36 = vld [vmem:[#allocation2] ss:$0 sm:$0xff]  ;;  %3131 = vmatpush.bf16.msra.mxu0 %v6998_v19  ;;  %v2811_v37 = vpack.c.b16 %v2809_v63, %v2809_v63  ;;  %v3660_v62 = vor.u32 %v3659_v16, %v3656_v13  ;;  %v3665_v22 = vrot.slane %v3663_v45, 5 }
 0x170   : > { %11870 = vst [vmem:[#allocation46_spill] sm:$0xff] %v9629_v10  ;;  %3103 = vmatpush.bf16.msra.mxu3 %v7050_v39  ;;  %v1597_v60 = vadd.f32 %v9640_v36, %v1596_v11  ;;  %v2143_v15 = vmul.f32 %v9340_v23, %v1661_v40  ;;  %v2139_v10 = vmul.f32 %v9378_v27, %v1658_v61  ;;  %v3677_v11 = vshll.u32 %v9232_v31, 16 }
 0x171   : > { %6977 = vmatmul.msk.bf16.gmra.mxu0 %vm2372_vm10, %v9627_v59  ;;  %2250 = vst [vmem:[#allocation1 + $0x20] ss:$4 sm:$0xff] %v2134_v25  ;;  %v7034_v25 = vor.u32 %v8133_v41, %v7033_v18  ;;  %v2828_v34 = vsel %vm2385_vm8, %v2811_v37, 0  ;;  %v3661_v38 = vrot.slane %v3660_v62, 4  ;;  %v3670_v19 = vrot.slane %v3668_v30, 4 }
 0x172   : > { %v1614_v18 = vmax.f32 %v1597_v60, 0.0  ;;  %2866 = vmatpush.bf16.msrb.mxu1 %v2828_v34  ;;  %v3671_v16 = vshll.u32 %v9162_v26, 16  ;;  %v3682_v13 = vshrl.u32 %v9153_v46, 16  ;;  %v979_v40 = vrot.slane %v9199_v33, 4  ;;  %v8131_v62 = vld [vmem:[#allocation4 + $0x354] sm:$0xf0] }
 0x173   : > { %3068 = vmatpush.bf16.msrb.mxu2 %v7034_v25  ;;  %3132 = vmatpush.bf16.msra.mxu0 %v6990_v58  ;;  %v9656_v61 = vsel %vm9429_vm13, %v3661_v38, %v3665_v22  ;;  %v11742_v42 = vunpack.c.h.b16 %v9175_v6  ;;  %v11872_v63 = vunpack.c.l.b16 %v9609_v57  ;;  %v3679_v25 = vrot.slane %v3677_v11, 5 }
 0x174   : > { %v1662_v60 = vrot.slane %v1614_v18, 2  ;;  %v4025_v45 = vunpack.c.l.b16 %v9656_v61  ;;  %v1664_v30 = vrot.slane %v1614_v18, 6  ;;  %v11740_v33 = vunpack.c.h.b16 %v9164_v43 }
 0x175   : > { %v11873_v58 = vunpack.c.h.b16 %v9557_v14  ;;  %v11875_v22 = vunpack.c.l.b16 %v9557_v14  ;;  %v3684_v34 = vrot.slane %v3682_v13, 4  ;;  %v3685_v38 = vshll.u32 %v9153_v46, 16 }
 0x176   : > { %v2258_v39 = vld.sshfl [vmem:[#allocation1] sm:$0xff pattern:$0x73625140]  ;;  %v9689_v11 = vpack.c.bf16 %v9274_v5, %v9269_v53  ;;  %v980_v53 = vsel %vm779_vm6, %v979_v40, %v9088_v28  ;;  %v2147_v5 = vmul.f32 %v9309_v54, %v1664_v30 }
 0x177   : > { %v9646_v0 = vpack.c.bf16 %v2258_v39, %v2258_v39  ;;  %2260 = vst [vmem:[#allocation1] ss:$4 sm:$0xff] %v2140_v8  ;;  %v4026_v8 = vunpack.c.h.b16 %v9656_v61  ;;  %v3687_v13 = vrot.slane %v3685_v38, 5 }
 0x178   : > { %2261 = vst [vmem:[#allocation1 + $0x1] ss:$4 sm:$0xff] %v2141_v32  ;;  %v9652_v1 = vld.sshfl [vmem:[#allocation1 + $0x20] sm:$0xff pattern:$0x73625140]  ;;  %v1663_v32 = vrot.slane %v1614_v18, 4 }
 0x179   : > { %11871 = vst [vmem:[#allocation47_spill] sm:$0xff] %v9646_v0  ;;  %v2362_v23 = vunpack.c.l.b16 %v9646_v0  ;;  %v9674_v37 = vpack.c.b16 %v4026_v8, %v11873_v58  ;;  %v1191_v58 = vrot.slane %v9117_v52, 4  ;;  %v3696_v52 = vshrl.u32 %v9175_v6, 16 }
 0x17a   : > { %2262 = vst [vmem:[#allocation1 + $0x2] ss:$4 sm:$0xff] %v2142_v49  ;;  %v3673_v49 = vrot.slane %v3671_v16, 5  ;;  %v2145_v16 = vmul.f32 %v9299_v21, %v1662_v60 }
 0x17b   : > { %2263 = vst [vmem:[#allocation1 + $0x3] ss:$4 sm:$0xff] %v2143_v15  ;;  %v9666_v41 = vpack.c.b16 %v2362_v23, %v11872_v63  ;;  %v9684_v15 = vpack.c.b16 %v4025_v45, %v11875_v22  ;;  %v9696_v63 = vpack.c.b16 %v11740_v33, %v11742_v42  ;;  %v2144_v22 = vmul.f32 %v9378_v27, %v1614_v18  ;;  %v7017_v27 = vld [vmem:[#allocation4 + $0x340] sm:$0xf]  ;;  %v8129_v18 = vld [vmem:[#allocation4 + $0x344] sm:$0xf0] }
 0x17c   : > { %2257 = vst [vmem:[#allocation1 + $0x20] ss:$4 sm:$0xff] %v2139_v10  ;;  %v7025_v10 = vld [vmem:[#allocation4 + $0x350] sm:$0xf]  ;;  %v3674_v39 = vor.u32 %v3673_v49, %v3670_v19  ;;  %v2146_v19 = vmul.f32 %v9302_v24, %v1663_v32  ;;  %v3691_v49 = vshll.u32 %v9245_v51, 16  ;;  %v3699_v24 = vshll.u32 %v9175_v6, 16 }
 0x17d   : > { %11874 = vst [vmem:[#allocation48_spill] sm:$0xff] %v9674_v37  ;;  %6842 = vmatmul.msk.bf16.gmra.mxu1 %vm2372_vm10, %v9666_v41  ;;  %6846 = vmatmul.msk.bf16.gmra.mxu2 %vm2372_vm10, %v9666_v41  ;;  %v7026_v14 = vor.u32 %v8131_v62, %v7025_v10  ;;  %v3688_v10 = vor.u32 %v3687_v13, %v3684_v34  ;;  %v3733_v32 = vshll.u32 %v9689_v11, 16  ;;  %v3705_v13 = vshll.u32 %v9237_v48, 16  ;;  %v11887_v42 = vld [vmem:[#allocation34_spill] sm:$0xff] }
 0x17e   : > { %11876 = vst [vmem:[#allocation49_spill] sm:$0xff] %v9684_v15  ;;  %2760 = vmatmul.bf16.gmra.mxu3 %v9696_v63  ;;  %v3675_v60 = vrot.slane %v3674_v39, 4  ;;  %v3693_v54 = vrot.slane %v3691_v49, 5  ;;  %v1192_v40 = vsel %vm779_vm6, %v1191_v58, %v9053_v50  ;;  %v7018_v39 = vor.u32 %v8129_v18, %v7017_v27 }
 0x17f   : > { %3069 = vmatpush.bf16.msrb.mxu2 %v7026_v14  ;;  %v9716_v34 = vpack.c.bf16 %v1192_v40, %v980_v53  ;;  %v3698_v14 = vrot.slane %v3696_v52, 4  ;;  %v3713_v49 = vshll.u32 %v9164_v43, 16  ;;  %v11878_v40 = vld [vmem:[#allocation15_spill] sm:$0xff] }
 0x180   : > { %v3680_v28 = vsel %vm9429_vm13, %v3675_v60, %v3679_v25  ;;  %v3701_v25 = vrot.slane %v3699_v24, 5  ;;  %v5196_v27 = vrot.slane %v11878_v40, 5 }
 0x181   : > { %v3715_v24 = vrot.slane %v3713_v49, 5 }
 0x182   : > { %v2265_v33 = vld.sshfl [vmem:[#allocation1] sm:$0xff pattern:$0x73625140] }
 0x183   : > { %v9709_v62 = vpack.c.bf16 %v2265_v33, %v2265_v33  ;;  %2267 = vst [vmem:[#allocation1] ss:$4 sm:$0xff] %v2145_v16  ;;  %v9718_v38 = vld.sshfl [vmem:[#allocation1 + $0x20] sm:$0xff pattern:$0x73625140]  ;;  %v3689_v33 = vrot.slane %v3688_v10, 4  ;;  %v4028_v16 = vunpack.c.h.b16 %v3680_v28  ;;  %3070 = vmatpush.bf16.msrb.mxu2 %v7018_v39 }
 0x184   : > { %2268 = vst [vmem:[#allocation1 + $0x1] ss:$4 sm:$0xff] %v2146_v19  ;;  %v3710_v19 = vshrl.u32 %v9164_v43, 16  ;;  %v3707_v10 = vrot.slane %v3705_v13, 5  ;;  %v3724_v13 = vshrl.u32 %v9716_v34, 16 }
 0x185   : > { %11877 = vst [vmem:[#allocation50_spill] sm:$0xff] %v9709_v62  ;;  %v11741_v30 = vunpack.c.l.b16 %v9709_v62  ;;  %v3694_v58 = vsel %vm9429_vm13, %v3689_v33, %v3693_v54  ;;  %v11881_v33 = vld [vmem:[#allocation16_spill] sm:$0xff]  ;;  %v9750_v49 = vpack.c.b16 %v4028_v16, %v4026_v8 }
 0x186   : > { %2269 = vst [vmem:[#allocation1 + $0x2] ss:$4 sm:$0xff] %v2147_v5  ;;  %v4030_v53 = vunpack.c.h.b16 %v3694_v58  ;;  %v4027_v5 = vunpack.c.l.b16 %v3680_v28  ;;  %v4029_v60 = vunpack.c.l.b16 %v3694_v58  ;;  %v3712_v52 = vrot.slane %v3710_v19, 4 }
 0x187   : > { %2264 = vst [vmem:[#allocation1 + $0x20] ss:$4 sm:$0xff] %v2144_v22  ;;  %v9725_v50 = vpack.c.b16 %v11741_v30, %v2362_v23  ;;  %v3702_v22 = vor.u32 %v3701_v25, %v3698_v14  ;;  %v3719_v23 = vshll.u32 %v9257_v56, 16  ;;  %v5200_v30 = vrot.slane %v11881_v33, 5 }
 0x188   : > { %v9735_v18 = vpack.c.b16 %v4030_v53, %v4028_v16  ;;  %v9737_v54 = vpack.c.b16 %v4029_v60, %v4027_v5  ;;  %v3716_v28 = vor.u32 %v3715_v24, %v3712_v52  ;;  %v9742_v14 = vpack.c.b16 %v4027_v5, %v4025_v45  ;;  %11883 = vst [vmem:[#allocation52_spill] sm:$0xff] %v9750_v49  ;;  %v11884_v24 = vld [vmem:[#allocation13_spill] sm:$0xff]  ;;  %v11893_v49 = vld [vmem:[#allocation18_spill] sm:$0xff] }
 0x189   : > { %6978 = vmatmul.msk.bf16.gmra.mxu0 %vm2372_vm10, %v9725_v50  ;;  %v3703_v39 = vrot.slane %v3702_v22, 4  ;;  %v3721_v58 = vrot.slane %v3719_v23, 5  ;;  %v3727_v19 = vshll.u32 %v9716_v34, 16  ;;  %v3735_v22 = vrot.slane %v3733_v32, 5 }
 0x18a   : > { %11879 = vst [vmem:[#allocation15_spill] sm:$0xff] %v9735_v18  ;;  %v3717_v40 = vrot.slane %v3716_v28, 4  ;;  %v11885_v23 = vunpack.c.h.b16 %v11884_v24  ;;  %v11886_v45 = vunpack.c.h.b16 %v9295_v20  ;;  %v3747_v18 = vshll.u32 %v11893_v49, 16 }
 0x18b   : > { %11880 = vst [vmem:[#allocation51_spill] sm:$0xff] %v9737_v54  ;;  %v3708_v25 = vsel %vm9429_vm13, %v3703_v39, %v3707_v10  ;;  %v11888_v10 = vld [vmem:[#allocation17_spill] sm:$0xff]  ;;  %v3726_v54 = vrot.slane %v3724_v13, 4  ;;  %v3729_v61 = vrot.slane %v3727_v19, 5 }
 0x18c   : > { %11882 = vst [vmem:[#allocation16_spill] sm:$0xff] %v9742_v14  ;;  %v4032_v33 = vunpack.c.h.b16 %v3708_v25  ;;  %v4031_v52 = vunpack.c.l.b16 %v3708_v25  ;;  %v9756_v5 = vpack.c.b16 %v11886_v45, %v11885_v23  ;;  %v7009_v39 = vld [vmem:[#allocation4 + $0x330] sm:$0xf]  ;;  %v8127_v14 = vld [vmem:[#allocation4 + $0x334] sm:$0xf0]  ;;  %v9762_v32 = vsel %vm9429_vm13, %v3717_v40, %v3721_v58 }
 0x18d   : > { %2687 = vmatmul.bf16.vlgmr.msra.gmra.mxu1 %v11887_v42  ;;  %2716 = vmatmul.bf16.vlgmr.msra.gmra.mxu2 %v11888_v10  ;;  %v7010_v8 = vor.u32 %v8127_v14, %v7009_v39  ;;  %11889 = vst [vmem:[#allocation13_spill] sm:$0xff] %v9762_v32  ;;  %v11748_v25 = vunpack.c.h.b16 %v9762_v32  ;;  %v11749_v23 = vunpack.c.l.b16 %v9762_v32  ;;  %v3730_v42 = vor.u32 %v3729_v61, %v3726_v54  ;;  %v11892_v45 = vld [vmem:[#allocation14_spill] sm:$0xff]  ;;  %v11899_v39 = vld [vmem:[#allocation12_spill] sm:$0xff] }
 0x18e   : > { %v9764_v16 = vpack.c.b16 %v4031_v52, %v4029_v60  ;;  %v9766_v28 = vpack.c.b16 %v4032_v33, %v4030_v53  ;;  %v3738_v10 = vshrl.u32 %v11892_v45, 16  ;;  %3104 = vmatmul.bf16.vlgmr.msra.gmra.mxu3 %v9756_v5  ;;  %v3741_v14 = vshll.u32 %v11892_v45, 16 }
 0x18f   : > { %3071 = vmatpush.bf16.msrb.mxu2 %v7010_v8  ;;  %v5204_v60 = vrot.slane %v9223_v3, 5  ;;  %v9777_v53 = vpack.c.b16 %v11748_v25, %v4032_v33  ;;  %v9781_v54 = vpack.c.b16 %v11749_v23, %v4031_v52  ;;  %v3731_v13 = vrot.slane %v3730_v42, 4  ;;  %v9789_v3 = vpop.f32.mrf.mxu3  ;;  %v8125_v33 = vld [vmem:[#allocation4 + $0x324] sm:$0xf0] }
 0x190   : > { %11890 = vst [vmem:[#allocation34_spill] sm:$0xff] %v9764_v16  ;;  %v3740_v58 = vrot.slane %v3738_v10, 4  ;;  %v3743_v19 = vrot.slane %v3741_v14, 5  ;;  %v11896_v40 = vmov 0  ;;  %v7655_v61 = vrot.slane %v11899_v39, 9 }
 0x191   : > { %11891 = vst [vmem:[#allocation17_spill] sm:$0xff] %v9766_v28  ;;  %v11897_v40 = vsel %vm9783_vm0, 4294967295, %v11896_v40  ;;  %v7656_v8 = vrot.slane %v11884_v24, 9  ;;  %v7001_v28 = vld [vmem:[#allocation4 + $0x320] sm:$0xf]  ;;  %v7657_v25 = vrot.slane %v9295_v20, 9  ;;  %v9795_v42 = vsel %vm9429_vm13, %v3731_v13, %v3735_v22 }
 0x192   : > { %11894 = vst [vmem:[#allocation14_spill] sm:$0xff] %v9777_v53  ;;  %v5208_v52 = vrot.slane %v9235_v35, 5  ;;  %v3749_v23 = vrot.slane %v3747_v18, 5  ;;  %v7002_v10 = vor.u32 %v8125_v33, %v7001_v28  ;;  %v3744_v14 = vor.u32 %v3743_v19, %v3740_v58  ;;  %v11901_v13 = vld [vmem:[#allocation21_spill] sm:$0xff]  ;;  %v1599_v19 = vpop.f32.mrf.mxu0 }
 0x193   : > { %11895 = vst [vmem:[#allocation18_spill] sm:$0xff] %v9781_v54  ;;  %v9799_v39 = vsel %vm9783_vm0, %v7655_v61, %v5196_v27  ;;  %v9803_v24 = vsel %vm9783_vm0, %v7656_v8, %v5200_v30  ;;  %v9807_v20 = vsel %vm9783_vm0, %v7657_v25, %v5204_v60  ;;  %v7658_v35 = vrot.slane %v9293_v55, 9  ;;  %v7177_v25 = vld [vmem:[#allocation4 + $0x670] sm:$0xf]  ;;  %v8167_v60 = vld [vmem:[#allocation4 + $0x674] sm:$0xf0] }
 0x194   : > { %11898 = vst [vmem:[#allocation53_spill] sm:$0xff] %v11897_v40  ;;  %v5212_v18 = vrot.slane %v9232_v31, 5  ;;  %3072 = vmatpush.bf16.msrb.mxu2 %v7002_v10  ;;  %v3745_v22 = vrot.slane %v3744_v14, 4  ;;  %v5414_v58 = vunpack.c.l.b16 %v9803_v24  ;;  %v5416_v30 = vunpack.c.l.b16 %v9807_v20  ;;  %v7169_v61 = vld [vmem:[#allocation4 + $0x660] sm:$0xf] }
 0x195   : > { %11900 = vst [vmem:[#allocation12_spill] sm:$0xff] %v9795_v42  ;;  %v9815_v27 = vsel %vm9783_vm0, %v7658_v35, %v5208_v52  ;;  %v5412_v33 = vunpack.c.l.b16 %v9799_v39  ;;  %v7178_v14 = vor.u32 %v8167_v60, %v7177_v25  ;;  %v9825_v52 = vadd.f32 %v9640_v36, %v1599_v19  ;;  %v8165_v35 = vld [vmem:[#allocation4 + $0x664] sm:$0xf0] }
 0x196   : > { %v3750_v8 = vsel %vm9429_vm13, %v3745_v22, %v3749_v23  ;;  %v11755_v10 = vunpack.c.l.b16 %v9815_v27  ;;  %v7170_v16 = vor.u32 %v8165_v35, %v7169_v61  ;;  %v9833_v53 = vpack.c.b16 %v5416_v30, %v5414_v58 }
 0x197   : > { %v4884_v28 = vunpack.c.h.b16 %v3750_v8  ;;  %v4883_v32 = vunpack.c.l.b16 %v3750_v8  ;;  %v9827_v54 = vpack.c.b16 %v5414_v58, %v5412_v33  ;;  %v9835_v23 = vpop.f32.mrf.mxu3  ;;  %3476 = vmatpush.bf16.msrb.mxu0 %v7178_v14  ;;  %v11760_v22 = vmax.f32 %v9825_v52, 0.0  ;;  %v11909_v14 = vld [vmem:[#allocation20_spill] sm:$0xff] }
 0x198   : > { %v9831_v31 = vpack.c.b16 %v11755_v10, %v5416_v30  ;;  %11904 = vst [vmem:[#allocation55_spill] sm:$0xff] %v9833_v53  ;;  %v11905_v36 = vunpack.c.h.b16 %v9795_v42  ;;  %v11907_v60 = vunpack.c.l.b16 %v9795_v42  ;;  %v7659_v61 = vrot.slane %v9162_v26, 9 }
 0x199   : > { %3133 = vmatmul.bf16.vlgmr.msra.gmra.mxu0 %v11901_v13  ;;  %11902 = vst [vmem:[#allocation21_spill] sm:$0xff] %v9827_v54  ;;  %v7660_v8 = vrot.slane %v9153_v46, 9  ;;  %v5216_v58 = vrot.slane %v9245_v51, 5  ;;  %v7661_v30 = vrot.slane %v9175_v6, 9  ;;  %v5220_v33 = vrot.slane %v9237_v48, 5 }
 0x19a   : > { %11903 = vst [vmem:[#allocation54_spill] sm:$0xff] %v9831_v31  ;;  %v9840_v25 = vpack.c.b16 %v4884_v28, %v11905_v36  ;;  %v9844_v19 = vpack.c.b16 %v4883_v32, %v11907_v60  ;;  %v11910_v28 = vld [vmem:[#allocation19_spill] sm:$0xff]  ;;  %v6993_v32 = vld [vmem:[#allocation4 + $0x310] sm:$0xf]  ;;  %v8123_v36 = vld [vmem:[#allocation4 + $0x314] sm:$0xf0]  ;;  %v5213_v60 = vsel %vm9783_vm0, %v7659_v61, %v5212_v18  ;;  %v11911_v10 = vunpack.c.h.b16 %v9293_v55 }
 0x19b   : > { %v2148_v35 = vmul.f32 %v11910_v28, %v11760_v22  ;;  %v11912_v51 = vunpack.c.h.b16 %v9162_v26  ;;  %v6994_v48 = vor.u32 %v8123_v36, %v6993_v32  ;;  %v7161_v31 = vld [vmem:[#allocation4 + $0x650] sm:$0xf]  ;;  %v8163_v54 = vld [vmem:[#allocation4 + $0x654] sm:$0xf0]  ;;  %v5221_v28 = vsel %vm9783_vm0, %v7661_v30, %v5220_v33  ;;  %3477 = vmatpush.bf16.msrb.mxu0 %v7170_v16  ;;  %v1601_v26 = vpop.f32.mrf.mxu0  ;;  %v7153_v55 = vld [vmem:[#allocation4 + $0x640] sm:$0xf] }
 0x19c   : > { %11906 = vst [vmem:[#allocation56_spill] sm:$0xff] %v9840_v25  ;;  %v7162_v22 = vor.u32 %v8163_v54, %v7161_v31  ;;  %v5420_v25 = vunpack.c.l.b16 %v5213_v60  ;;  %v7662_v61 = vrot.slane %v9164_v43, 9  ;;  %v5224_v32 = vrot.slane %v9257_v56, 5 }
 0x19d   : > { %11908 = vst [vmem:[#allocation57_spill] sm:$0xff] %v9844_v19  ;;  %2692 = vmatmul.bf16.gmra.mxu1 %v9536_v44  ;;  %2721 = vmatmul.bf16.gmra.mxu2 %v11909_v14  ;;  %v9862_v53 = vpack.c.b16 %v11912_v51, %v11911_v10  ;;  %v5217_v19 = vsel %vm9783_vm0, %v7660_v8, %v5216_v58  ;;  %v8161_v10 = vld [vmem:[#allocation4 + $0x644] sm:$0xf0]  ;;  %v5413_v8 = vunpack.c.h.b16 %v9799_v39  ;;  %v5415_v58 = vunpack.c.h.b16 %v9803_v24  ;;  %v6985_v39 = vld [vmem:[#allocation4 + $0x300] sm:$0xf] }
 0x19e   : > { %2270 = vst [vmem:[#allocation1 + $0x3] ss:$4 sm:$0xff] %v2148_v35  ;;  %v5422_v18 = vunpack.c.l.b16 %v5217_v19  ;;  %3073 = vmatpush.bf16.msrb.mxu2 %v6994_v48  ;;  %v5228_v30 = vrot.slane %v9689_v11, 5  ;;  %v5424_v54 = vunpack.c.l.b16 %v5221_v28  ;;  %v5417_v31 = vunpack.c.h.b16 %v9807_v20  ;;  %v8121_v24 = vld [vmem:[#allocation4 + $0x304] sm:$0xf0] }
 0x19f   : > { %3109 = vmatmul.bf16.gmra.mxu3 %v9862_v53  ;;  %v7154_v33 = vor.u32 %v8161_v10, %v7153_v55  ;;  %v5225_v35 = vsel %vm9783_vm0, %v7662_v61, %v5224_v32  ;;  %v9879_v36 = vpack.c.b16 %v5415_v58, %v5413_v8  ;;  %v5419_v51 = vunpack.c.h.b16 %v9815_v27  ;;  %v9882_v56 = vpop.f32.mrf.mxu3  ;;  %3478 = vmatpush.bf16.msrb.mxu0 %v7162_v22 }
 0x1a0   : > { %v9874_v16 = vpack.c.b16 %v5422_v18, %v5420_v25  ;;  %v5426_v48 = vunpack.c.l.b16 %v5225_v35  ;;  %v9884_v11 = vpack.c.b16 %v5417_v31, %v5415_v58  ;;  %v5421_v26 = vunpack.c.h.b16 %v5213_v60 }
 0x1a1   : > { %11914 = vst [vmem:[#allocation58_spill] sm:$0xff] %v9879_v36  ;;  %v5232_v20 = vrot.slane %v11893_v49, 5  ;;  %v6986_v55 = vor.u32 %v8121_v24, %v6985_v39  ;;  %v9887_v10 = vpack.c.b16 %v5419_v51, %v5417_v31  ;;  %v5425_v61 = vunpack.c.h.b16 %v5221_v28  ;;  %v11925_v39 = vld [vmem:[#allocation23_spill] sm:$0xff] }
 0x1a2   : > { %11913 = vst [vmem:[#allocation19_spill] sm:$0xff] %v9874_v16  ;;  %v5423_v16 = vunpack.c.h.b16 %v5217_v19  ;;  %v9889_v32 = vpack.c.b16 %v5426_v48, %v5424_v54  ;;  %v5427_v36 = vunpack.c.h.b16 %v5225_v35  ;;  %v9893_v42 = vpack.c.b16 %v5421_v26, %v5419_v51  ;;  %v7145_v35 = vld [vmem:[#allocation4 + $0x630] sm:$0xf]  ;;  %v8159_v51 = vld [vmem:[#allocation4 + $0x634] sm:$0xf0] }
 0x1a3   : > { %11915 = vst [vmem:[#allocation59_spill] sm:$0xff] %v9884_v11  ;;  %3074 = vmatpush.bf16.msrb.mxu2 %v6986_v55  ;;  %v11920_v22 = vunpack.c.l.b16 %v9815_v27  ;;  %v9901_v19 = vpack.c.b16 %v5424_v54, %v5422_v18  ;;  %v7663_v49 = vrot.slane %v9716_v34, 9  ;;  %3479 = vmatpush.bf16.msrb.mxu0 %v7154_v33  ;;  %v7664_v31 = vrot.slane %v11892_v45, 9  ;;  %v7137_v24 = vld [vmem:[#allocation4 + $0x620] sm:$0xf] }
 0x1a4   : > { %11916 = vst [vmem:[#allocation60_spill] sm:$0xff] %v9887_v10  ;;  %v9891_v8 = vpack.c.b16 %v5423_v16, %v5421_v26  ;;  %v9899_v60 = vpack.c.b16 %v5425_v61, %v5423_v16  ;;  %v9904_v28 = vpack.c.b16 %v5427_v36, %v5425_v61  ;;  %v8157_v16 = vld [vmem:[#allocation4 + $0x624] sm:$0xf0] }
 0x1a5   : > { %11917 = vst [vmem:[#allocation61_spill] sm:$0xff] %v9889_v32  ;;  %v9897_v58 = vpack.c.b16 %v5420_v25, %v11920_v22  ;;  %v5229_v27 = vsel %vm9783_vm0, %v7663_v49, %v5228_v30  ;;  %v7146_v25 = vor.u32 %v8159_v51, %v7145_v35  ;;  %v5233_v54 = vsel %vm9783_vm0, %v7664_v31, %v5232_v20  ;;  %v11930_v49 = vld [vmem:[#allocation22_spill] sm:$0xff]  ;;  %v3233_v35 = vld [vmem:[#allocation6 + $0x30] sm:$0xff] }
 0x1a6   : > { %11918 = vst [vmem:[#allocation62_spill] sm:$0xff] %v9891_v8  ;;  %v5858_v26 = vunpack.c.h.b16 %v5229_v27  ;;  %v5857_v18 = vunpack.c.l.b16 %v5229_v27  ;;  %v6276_v33 = vunpack.c.l.b16 %v5233_v54  ;;  %v6277_v55 = vunpack.c.h.b16 %v5233_v54  ;;  %v7129_v20 = vld [vmem:[#allocation4 + $0x610] sm:$0xf]  ;;  %v8155_v31 = vld [vmem:[#allocation4 + $0x614] sm:$0xf0] }
 0x1a7   : > { %11919 = vst [vmem:[#allocation63_spill] sm:$0xff] %v9893_v42  ;;  %v9912_v61 = vpop.f32.mrf.mxu3  ;;  %3480 = vmatpush.bf16.msrb.mxu0 %v7146_v25  ;;  %v7138_v22 = vor.u32 %v8157_v16, %v7137_v24  ;;  %v11931_v51 = vunpack.c.h.b16 %v9153_v46  ;;  %v11932_v27 = vunpack.c.h.b16 %v9175_v6  ;;  %v8150_v46 = vld [vmem:[#allocation4 + $0x3f4] sm:$0xf]  ;;  %v7107_v6 = vld [vmem:[#allocation4 + $0x3f8] sm:$0xf0] }
 0x1a8   : > { %11921 = vst [vmem:[#allocation64_spill] sm:$0xff] %v9897_v58  ;;  %v9918_v58 = vpack.c.b16 %v6276_v33, %v5857_v18  ;;  %v9920_v30 = vpack.c.b16 %v6277_v55, %v5858_v26  ;;  %v7121_v33 = vld [vmem:[#allocation4 + $0x600] sm:$0xf]  ;;  %v8153_v55 = vld [vmem:[#allocation4 + $0x604] sm:$0xf0] }
 0x1a9   : > { %11922 = vst [vmem:[#allocation65_spill] sm:$0xff] %v9899_v60  ;;  %3138 = vmatmul.bf16.gmra.mxu0 %v11925_v39  ;;  %v9916_v60 = vpack.c.b16 %v5857_v18, %v5426_v48  ;;  %v9928_v24 = vpack.c.b16 %v11932_v27, %v11931_v51  ;;  %v3239_v48 = vunpack.c.h.b16 %v3233_v35  ;;  %v11933_v51 = vld [vmem:[#allocation24_spill] sm:$0xff]  ;;  %v7075_v42 = vld [vmem:[#allocation4 + $0x3b8] sm:$0xf0] }
 0x1aa   : > { %11923 = vst [vmem:[#allocation66_spill] sm:$0xff] %v9901_v19  ;;  %v9914_v19 = vpack.c.b16 %v5858_v26, %v5427_v36  ;;  %v3238_v36 = vunpack.c.l.b16 %v3233_v35  ;;  %v7130_v26 = vor.u32 %v8155_v31, %v7129_v20  ;;  %v7110_v35 = vor.u32 %v8150_v46, %v7107_v6  ;;  %v7091_v46 = vld [vmem:[#allocation4 + $0x3d8] sm:$0xf0] }
 0x1ab   : > { %11924 = vst [vmem:[#allocation67_spill] sm:$0xff] %v9904_v28  ;;  %3481 = vmatpush.bf16.msrb.mxu0 %v7138_v22  ;;  %v3241_v16 = vpack.c.b16 %v3239_v48, %v3239_v48  ;;  %v7122_v22 = vor.u32 %v8153_v55, %v7121_v33  ;;  %v11770_v31 = vunpack.c.h.b16 %v9716_v34  ;;  %v11934_v48 = vld [vmem:[#allocation28_spill] sm:$0xff]  ;;  %v8146_v55 = vld [vmem:[#allocation4 + $0x3d4] sm:$0xf] }
 0x1ac   : > { %11926 = vst [vmem:[#allocation23_spill] sm:$0xff] %v9914_v19  ;;  %v3240_v25 = vpack.c.b16 %v3238_v36, %v3238_v36  ;;  %3154 = vmatpush.bf16.msra.mxu1 %v7110_v35  ;;  %v7094_v6 = vor.u32 %v8146_v55, %v7091_v46  ;;  %v11936_v35 = vunpack.c.l.b16 %v9164_v43  ;;  %v7083_v55 = vld [vmem:[#allocation4 + $0x3c8] sm:$0xf0] }
 0x1ad   : > { %11927 = vst [vmem:[#allocation68_spill] sm:$0xff] %v9916_v60  ;;  %2697 = vmatmul.bf16.gmra.mxu1 %v9617_v17  ;;  %2726 = vmatmul.bf16.gmra.mxu2 %v11930_v49  ;;  %v3249_v54 = vsel %vm2385_vm8, %v3241_v16, 0  ;;  %v7099_v16 = vld [vmem:[#allocation4 + $0x3e8] sm:$0xf0] }
 0x1ae   : > { %11928 = vst [vmem:[#allocation69_spill] sm:$0xff] %v9918_v58  ;;  %v3246_v18 = vsel %vm2385_vm8, %v3240_v25, 0  ;;  %3287 = vmatpush.bf16.msrb.mxu3 %v3249_v54  ;;  %v8148_v25 = vld [vmem:[#allocation4 + $0x3e4] sm:$0xf]  ;;  %v7243_v58 = vld [vmem:[#allocation4 + $0x6f8] sm:$0xf0] }
 0x1af   : > { %11929 = vst [vmem:[#allocation70_spill] sm:$0xff] %v9920_v30  ;;  %3114 = vmatmul.bf16.gmra.mxu3 %v9928_v24  ;;  %v9933_v30 = vpop.f32.mrf.mxu3  ;;  %3258 = vmatpush.bf16.msra.mxu2 %v3246_v18  ;;  %v7102_v54 = vor.u32 %v8148_v25, %v7099_v16 }
 0x1b0   : > { %3482 = vmatpush.bf16.msrb.mxu0 %v7130_v26  ;;  %v11935_v26 = vunpack.c.h.b16 %v9164_v43  ;;  %v8144_v43 = vld [vmem:[#allocation4 + $0x3c4] sm:$0xf] }
 0x1b1   : > { %3155 = vmatpush.bf16.msra.mxu1 %v7102_v54  ;;  %v11938_v54 = vld [vmem:[#allocation30_spill] sm:$0xff] }
 0x1b2   : > { %v2401_v27 = vpop.f32.mrf.mxu1  ;;  %v9948_v18 = vpack.c.b16 %v11770_v31, %v11935_v26 }
 0x1b3   : > { %v9937_v20 = vadd.f32 %v9789_v3, %v2401_v27  ;;  %v11771_v3 = vunpack.c.l.b16 %v9716_v34 }
 0x1b4   : > { %3483 = vmatpush.bf16.msrb.mxu0 %v7122_v22 }
 0x1b5   : > { %v9958_v22 = vpack.c.b16 %v11771_v3, %v11936_v35  ;;  %3156 = vmatpush.bf16.msra.mxu1 %v7094_v6  ;;  %v7086_v35 = vor.u32 %v8144_v43, %v7083_v55  ;;  %v11939_v6 = vld [vmem:[#allocation35_spill] sm:$0xff]  ;;  %v8182_v3 = vld [vmem:[#allocation4 + $0x6f4] sm:$0xf]  ;;  %v7235_v43 = vld [vmem:[#allocation4 + $0x6e8] sm:$0xf0] }
 0x1b6   : > { %v7246_v60 = vor.u32 %v8182_v3, %v7243_v58  ;;  %v8178_v55 = vld [vmem:[#allocation4 + $0x6d4] sm:$0xf]  ;;  %v11941_v58 = vmax.f32 %v9825_v52, 0.0 }
 0x1b7   : > { %v9940_v36 = vpop.f32.mrf.mxu3 }
 0x1b8   : > { %v9963_v25 = vpop.f32.mrf.mxu2  ;;  %3563 = vmatpush.bf16.msra.mxu3 %v7246_v60  ;;  %v1665_v3 = vrot.slane %v11941_v58, 2  ;;  %v7219_v58 = vld [vmem:[#allocation4 + $0x6c8] sm:$0xf0] }
 0x1b9   : > { %3143 = vmatmul.bf16.gmra.mxu0 %v11933_v51  ;;  %3157 = vmatpush.bf16.msra.mxu1 %v7086_v35  ;;  %v7227_v35 = vld [vmem:[#allocation4 + $0x6d8] sm:$0xf0] }
 0x1ba   : > { %v9960_v27 = vpop.f32.mrf.mxu1  ;;  %v7230_v60 = vor.u32 %v8178_v55, %v7227_v35  ;;  %v7211_v35 = vld [vmem:[#allocation4 + $0x6b8] sm:$0xf0] }
 0x1bd   : > { %2702 = vmatmul.bf16.gmra.mxu1 %v9696_v63  ;;  %2731 = vmatmul.bf16.gmra.mxu2 %v11934_v48 }
 0x1be   : > { %v9965_v16 = vpop.f32.mrf.mxu0 }
 0x1bf   : > { %3119 = vmatmul.bf16.gmra.mxu3 %v9948_v18  ;;  %v9952_v33 = vpop.f32.mrf.mxu3  ;;  %11937 = vst [vmem:[#allocation24_spill] sm:$0xff] %v9965_v16 }
 0x1c6   : > { %v9981_v28 = vpop.f32.mrf.mxu0 }
 0x1c7   : > { %v9967_v26 = vpop.f32.mrf.mxu3  ;;  %11940 = vst [vmem:[#allocation30_spill] sm:$0xff] %v9981_v28 }
 0x1c9   : > { %3148 = vmatmul.bf16.gmra.mxu0 %v9958_v22 }
 0x1ca   : > { %v2406_v46 = vpop.f32.mrf.mxu1 }
 0x1cb   : > { %v9973_v31 = vadd.f32 %v9882_v56, %v2406_v46  ;;  %v8180_v56 = vld [vmem:[#allocation4 + $0x6e4] sm:$0xf] }
 0x1cc   : > { %v7238_v46 = vor.u32 %v8180_v56, %v7235_v43  ;;  %v8176_v56 = vld [vmem:[#allocation4 + $0x6c4] sm:$0xf]  ;;  %v2149_v43 = vmul.f32 %v9299_v21, %v1665_v3 }
 0x1cd   : > { %6979 = vmatmul.msk.bf16.vlgmr.msrb.gmra.mxu1 %vm2372_vm10, %v11938_v54  ;;  %3075 = vmatmul.bf16.vlgmr.msrb.gmra.mxu2 %v11901_v13  ;;  %v8142_v54 = vld [vmem:[#allocation4 + $0x3b4] sm:$0xf]  ;;  %v9979_v13 = vpop.f32.mrf.mxu2  ;;  %v7222_v55 = vor.u32 %v8176_v56, %v7219_v58  ;;  %v7203_v58 = vld [vmem:[#allocation4 + $0x6a8] sm:$0xf0] }
 0x1ce   : > { %v7078_v11 = vor.u32 %v8142_v54, %v7075_v42  ;;  %3564 = vmatpush.bf16.msra.mxu3 %v7238_v46  ;;  %v7067_v54 = vld [vmem:[#allocation4 + $0x3a8] sm:$0xf0]  ;;  %v8174_v46 = vld [vmem:[#allocation4 + $0x6b4] sm:$0xf] }
 0x1cf   : > { %7115 = vmatmul.msk.bf16.vlgmr.msrb.gmra.mxu3 %vm2372_vm10, %v11939_v6  ;;  %v9977_v19 = vpop.f32.mrf.mxu3  ;;  %v7214_v40 = vor.u32 %v8174_v46, %v7211_v35  ;;  %v7195_v46 = vld [vmem:[#allocation4 + $0x698] sm:$0xf0] }
 0x1d0   : > { %3158 = vmatpush.bf16.msra.mxu1 %v7078_v11  ;;  %v8140_v11 = vld [vmem:[#allocation4 + $0x3a4] sm:$0xf] }
 0x1d1   : > { %v7070_v52 = vor.u32 %v8140_v11, %v7067_v54  ;;  %v8138_v11 = vld [vmem:[#allocation4 + $0x394] sm:$0xf] }
 0x1d2   : > { %v9990_v42 = vpop.f32.mrf.mxu1  ;;  %3565 = vmatpush.bf16.msra.mxu3 %v7230_v60  ;;  %v7059_v60 = vld [vmem:[#allocation4 + $0x398] sm:$0xf0] }
 0x1d3   : > { %v7062_v56 = vor.u32 %v8138_v11, %v7059_v60  ;;  %v8136_v11 = vld [vmem:[#allocation4 + $0x384] sm:$0xf]  ;;  %v7051_v60 = vld [vmem:[#allocation4 + $0x388] sm:$0xf0] }
 0x1d4   : > { %3159 = vmatpush.bf16.msra.mxu1 %v7070_v52  ;;  %v8172_v52 = vld [vmem:[#allocation4 + $0x6a4] sm:$0xf] }
 0x1d5   : > { %v9988_v10 = vpop.f32.mrf.mxu2 }
 0x1d6   : > { %v9996_v32 = vpop.f32.mrf.mxu0  ;;  %3566 = vmatpush.bf16.msra.mxu3 %v7222_v55  ;;  %v7206_v55 = vor.u32 %v8172_v52, %v7203_v58  ;;  %v7054_v52 = vor.u32 %v8136_v11, %v7051_v60  ;;  %v7179_v58 = vld [vmem:[#allocation4 + $0x678] sm:$0xf0]  ;;  %v8183_v11 = vld [vmem:[#allocation4 + $0x6f4] sm:$0xf0] }
 0x1d7   : > { %v9986_v8 = vpop.f32.mrf.mxu3  ;;  %11942 = vst [vmem:[#allocation35_spill] sm:$0xff] %v9996_v32  ;;  %v7187_v32 = vld [vmem:[#allocation4 + $0x688] sm:$0xf0] }
 0x1d8   : > { %3160 = vmatpush.bf16.msra.mxu1 %v7062_v56  ;;  %v8166_v56 = vld [vmem:[#allocation4 + $0x674] sm:$0xf] }
 0x1d9   : > { %3484 = vmatmul.bf16.vlgmr.msrb.gmra.mxu0 %v11909_v14 }
 0x1da   : > { %3567 = vmatpush.bf16.msra.mxu3 %v7214_v40 }
 0x1dc   : > { %3161 = vmatpush.bf16.msra.mxu1 %v7054_v52 }
 0x1dd   : > { %6980 = vmatmul.msk.bf16.gmra.mxu1 %vm2372_vm10, %v9525_v12  ;;  %3080 = vmatmul.bf16.gmra.mxu2 %v11925_v39  ;;  %v10000_v12 = vld.sshfl [vmem:[#allocation1 + $0x20] sm:$0xff pattern:$0x73625140]  ;;  %v10007_v54 = vpop.f32.mrf.mxu2 }
 0x1de   : > { %11943 = vst [vmem:[#allocation71_spill] sm:$0xff] %v10000_v12  ;;  %v10010_v12 = vpop.f32.mrf.mxu0  ;;  %3568 = vmatpush.bf16.msra.mxu3 %v7206_v55 }
 0x1df   : > { %7116 = vmatmul.msk.bf16.gmra.mxu3 %vm2372_vm10, %v9574_v47  ;;  %2271 = vst [vmem:[#allocation1 + $0x20] ss:$4 sm:$0xff] %v2149_v43  ;;  %v10002_v39 = vpop.f32.mrf.mxu3  ;;  %v8170_v43 = vld [vmem:[#allocation4 + $0x694] sm:$0xf] }
 0x1e0   : > { %11944 = vst [vmem:[#allocation72_spill] sm:$0xff] %v10010_v12  ;;  %v8168_v12 = vld [vmem:[#allocation4 + $0x684] sm:$0xf] }
 0x1e1   : > { %v7190_v55 = vor.u32 %v8168_v12, %v7187_v32  ;;  %v8164_v12 = vld [vmem:[#allocation4 + $0x664] sm:$0xf] }
 0x1e2   : > { %v2411_v21 = vpop.f32.mrf.mxu1 }
 0x1e3   : > { %v10005_v3 = vadd.f32 %v9933_v30, %v2411_v21  ;;  %v7198_v30 = vor.u32 %v8170_v43, %v7195_v46  ;;  %v7182_v43 = vor.u32 %v8166_v56, %v7179_v58  ;;  %v10028_v46 = vld [vmem:[#allocation6 + $0x8] sm:$0xff] }
 0x1e4   : > { %v7171_v56 = vld [vmem:[#allocation4 + $0x668] sm:$0xf0] }
 0x1e5   : > { %3569 = vmatpush.bf16.msra.mxu3 %v7198_v30  ;;  %3534 = vmatpush.bf16.msrb.mxu2 %v7182_v43  ;;  %v3939_v30 = vunpack.c.l.b16 %v10028_v46  ;;  %v7174_v58 = vor.u32 %v8164_v12, %v7171_v56 }
 0x1e7   : > { %v10012_v35 = vpop.f32.mrf.mxu3 }
 0x1e8   : > { %v10020_v15 = vpop.f32.mrf.mxu2 }
 0x1e9   : > { %3489 = vmatmul.bf16.gmra.mxu0 %v11930_v49  ;;  %3570 = vmatpush.bf16.msra.mxu3 %v7190_v55 }
 0x1ea   : > { %v2413_v21 = vpop.f32.mrf.mxu1  ;;  %3535 = vmatpush.bf16.msrb.mxu2 %v7174_v58 }
 0x1eb   : > { %v10018_v40 = vadd.f32 %v9940_v36, %v2413_v21  ;;  %v2272_v36 = vld.sshfl [vmem:[#allocation1] sm:$0xff pattern:$0x73625140]  ;;  %v7241_v21 = vld [vmem:[#allocation4 + $0x6f0] sm:$0xf] }
 0x1ec   : > { %v10030_v60 = vpack.c.bf16 %v2272_v36, %v2272_v36  ;;  %v7242_v32 = vor.u32 %v8183_v11, %v7241_v21  ;;  %v11948_v11 = vunpack.c.l.b16 %v9709_v62  ;;  %v8160_v62 = vld [vmem:[#allocation4 + $0x644] sm:$0xf] }
 0x1ed   : > { %6981 = vmatmul.msk.bf16.gmra.mxu1 %vm2372_vm10, %v9627_v59  ;;  %3085 = vmatmul.bf16.gmra.mxu2 %v11933_v51 }
 0x1ee   : > { %v10024_v59 = vpop.f32.mrf.mxu0  ;;  %11946 = vst [vmem:[#allocation74_spill] sm:$0xff] %v10030_v60  ;;  %v3235_v43 = vunpack.c.l.b16 %v10030_v60  ;;  %3505 = vmatpush.bf16.msrb.mxu1 %v7242_v32  ;;  %v8181_v32 = vld [vmem:[#allocation4 + $0x6e4] sm:$0xf0] }
 0x1ef   : > { %7117 = vmatmul.msk.bf16.gmra.mxu3 %vm2372_vm10, %v9666_v41  ;;  %11945 = vst [vmem:[#allocation73_spill] sm:$0xff] %v10024_v59  ;;  %v10026_v51 = vpop.f32.mrf.mxu3  ;;  %v3941_v59 = vpack.c.b16 %v3939_v30, %v3939_v30  ;;  %v7233_v30 = vld [vmem:[#allocation4 + $0x6e0] sm:$0xf] }
 0x1f0   : > { %v10034_v52 = vpop.f32.mrf.mxu2  ;;  %v10047_v12 = vpack.c.b16 %v3235_v43, %v11948_v11  ;;  %v7234_v56 = vor.u32 %v8181_v32, %v7233_v30  ;;  %v3310_v30 = vunpack.c.l.b16 %v11892_v45  ;;  %v11952_v32 = vld [vmem:[#allocation27_spill] sm:$0xff] }
 0x1f1   : > { %v3956_v37 = vsel %vm2385_vm8, %v3941_v59, 0  ;;  %v8162_v59 = vld [vmem:[#allocation4 + $0x654] sm:$0xf] }
 0x1f2   : > { %3968 = vmatpush.bf16.msra.mxu0 %v3956_v37  ;;  %3506 = vmatpush.bf16.msrb.mxu1 %v7234_v56  ;;  %v7225_v56 = vld [vmem:[#allocation4 + $0x6d0] sm:$0xf] }
 0x1f6   : > { %v10041_v49 = vpop.f32.mrf.mxu0 }
 0x1f7   : > { %11947 = vst [vmem:[#allocation75_spill] sm:$0xff] %v10041_v49  ;;  %v10043_v21 = vpop.f32.mrf.mxu3 }
 0x1f9   : > { %3494 = vmatmul.bf16.gmra.mxu0 %v11934_v48  ;;  %v7155_v48 = vld [vmem:[#allocation4 + $0x648] sm:$0xf0] }
 0x1fa   : > { %v2416_v55 = vpop.f32.mrf.mxu1 }
 0x1fb   : > { %v10039_v36 = vadd.f32 %v9952_v33, %v2416_v55  ;;  %v7163_v33 = vld [vmem:[#allocation4 + $0x658] sm:$0xf0] }
 0x1fc   : > { %v7166_v58 = vor.u32 %v8162_v59, %v7163_v33  ;;  %v10066_v59 = vpack.c.bf16 %v11952_v32, %v11952_v32 }
 0x1fd   : > { %6982 = vmatmul.msk.bf16.gmra.mxu1 %vm2372_vm10, %v9725_v50  ;;  %3090 = vmatmul.bf16.gmra.mxu2 %v9958_v22  ;;  %v11951_v22 = vld [vmem:[#allocation25_spill] sm:$0xff] }
 0x1fe   : > { %3536 = vmatpush.bf16.msrb.mxu2 %v7166_v58  ;;  %v3752_v11 = vshrl.u32 %v11951_v22, 16  ;;  %v3755_v60 = vshll.u32 %v11951_v22, 16  ;;  %11953 = vst [vmem:[#allocation27_spill] sm:$0xff] %v10066_v59  ;;  %v8179_v58 = vld [vmem:[#allocation4 + $0x6d4] sm:$0xf0]  ;;  %v7158_v22 = vor.u32 %v8160_v62, %v7155_v48  ;;  %v3761_v32 = vshll.u32 %v10066_v59, 16 }
 0x1ff   : > { %7118 = vmatmul.msk.bf16.gmra.mxu3 %vm2372_vm10, %v10047_v12  ;;  %v7226_v49 = vor.u32 %v8179_v58, %v7225_v56  ;;  %v7217_v62 = vld [vmem:[#allocation4 + $0x6c0] sm:$0xf]  ;;  %v8177_v48 = vld [vmem:[#allocation4 + $0x6c4] sm:$0xf0] }
 0x200   : > { %v10052_v55 = vpop.f32.mrf.mxu2  ;;  %v3754_v28 = vrot.slane %v3752_v11, 4  ;;  %v3757_v16 = vrot.slane %v3755_v60, 5  ;;  %v3763_v56 = vrot.slane %v3761_v32, 5  ;;  %v8158_v60 = vld [vmem:[#allocation4 + $0x634] sm:$0xf] }
 0x201   : > { %v10059_v50 = vpop.f32.mrf.mxu3  ;;  %3507 = vmatpush.bf16.msrb.mxu1 %v7226_v49  ;;  %v3794_v49 = vshrl.u32 %v9466_v2, 16  ;;  %v7147_v11 = vld [vmem:[#allocation4 + $0x638] sm:$0xf0] }
 0x202   : > { %v2418_v37 = vpop.f32.mrf.mxu1  ;;  %11950 = vst [vmem:[#allocation77_spill] sm:$0xff] %v10059_v50  ;;  %3537 = vmatpush.bf16.msrb.mxu2 %v7158_v22  ;;  %v3797_v22 = vshll.u32 %v9466_v2, 16 }
 0x203   : > { %v10057_v43 = vadd.f32 %v9967_v26, %v2418_v37  ;;  %v11955_v26 = vunpack.c.l.b16 %v9716_v34  ;;  %v3796_v59 = vrot.slane %v3794_v49, 4  ;;  %v8175_v49 = vld [vmem:[#allocation4 + $0x6b4] sm:$0xf0] }
 0x204   : > { %v3799_v2 = vrot.slane %v3797_v22, 5  ;;  %v8156_v22 = vld [vmem:[#allocation4 + $0x624] sm:$0xf] }
 0x205   : > { %11949 = vst [vmem:[#allocation76_spill] sm:$0xff] %v10057_v43  ;;  %v10072_v37 = vpack.c.b16 %v3310_v30, %v11955_v26  ;;  %v3758_v30 = vor.u32 %v3757_v16, %v3754_v28  ;;  %v7150_v26 = vor.u32 %v8158_v60, %v7147_v11  ;;  %v10105_v60 = vpack.c.bf16 %v9517_v7, %v9517_v7  ;;  %v7209_v11 = vld [vmem:[#allocation4 + $0x6b0] sm:$0xf] }
 0x206   : > { %v10068_v33 = vpop.f32.mrf.mxu0 }
 0x207   : > { %11954 = vst [vmem:[#allocation78_spill] sm:$0xff] %v10068_v33  ;;  %3538 = vmatpush.bf16.msrb.mxu2 %v7150_v26  ;;  %v7210_v26 = vor.u32 %v8175_v49, %v7209_v11 }
 0x208   : > { %v10075_v14 = vpop.f32.mrf.mxu2  ;;  %11958 = vst [vmem:[#allocation81_spill] sm:$0xff] %v10105_v60 }
 0x209   : > { %3499 = vmatmul.bf16.gmra.mxu0 %v10072_v37  ;;  %v10081_v50 = vpop.f32.mrf.mxu3 }
 0x20a   : > { %v2688_v33 = vpop.f32.mrf.mxu1 }
 0x20b   : > { %v10079_v43 = vadd.f32 %v2688_v33, %v9937_v20  ;;  %v7218_v20 = vor.u32 %v8177_v48, %v7217_v62  ;;  %v3759_v33 = vrot.slane %v3758_v30, 4 }
 0x20d   : > { %11956 = vst [vmem:[#allocation79_spill] sm:$0xff] %v10079_v43  ;;  %3162 = vmatmul.bf16.vlgmr.msra.gmra.mxu1 %v9756_v5  ;;  %7111 = vmatmul.msk.bf16.vlgmr.msra.gmra.mxu2 %vm2372_vm10, %v11939_v6  ;;  %v2662_v5 = vadd.f32 %v9835_v23, %v9960_v27  ;;  %v3764_v6 = vsel %vm9429_vm13, %v3759_v33, %v3763_v56  ;;  %v7377_v23 = vld [vmem:[#allocation4 + $0x1f0] sm:$0xf]  ;;  %v8215_v27 = vld [vmem:[#allocation4 + $0x1f4] sm:$0xf0] }
 0x20e   : > { %v10083_v58 = vpop.f32.mrf.mxu0  ;;  %3508 = vmatpush.bf16.msrb.mxu1 %v7218_v20  ;;  %v7378_v20 = vor.u32 %v8215_v27, %v7377_v23  ;;  %v3800_v33 = vor.u32 %v3799_v2, %v3796_v59  ;;  %v8198_v23 = vld [vmem:[#allocation4 + $0x174] sm:$0xf]  ;;  %v2667_v43 = vadd.f32 %v9912_v61, %v9990_v42 }
 0x20f   : > { %3571 = vmatmul.bf16.vlgmr.msra.gmra.mxu3 %v9536_v44 }
 0x210   : > { %v2717_v28 = vpop.f32.mrf.mxu2  ;;  %4240 = vmatpush.bf16.msrb.mxu3 %v7378_v20  ;;  %v3801_v59 = vrot.slane %v3800_v33, 4 }
 0x211   : > { %v2718_v16 = vadd.f32 %v2717_v28, %v9963_v25  ;;  %v10101_v48 = vpop.f32.mrf.mxu3  ;;  %v3926_v25 = vunpack.c.l.b16 %v3764_v6  ;;  %v7139_v28 = vld [vmem:[#allocation4 + $0x628] sm:$0xf0]  ;;  %v7369_v6 = vld [vmem:[#allocation4 + $0x1e0] sm:$0xf] }
 0x212   : > { %v2690_v32 = vpop.f32.mrf.mxu1  ;;  %v7142_v7 = vor.u32 %v8156_v22, %v7139_v28  ;;  %3509 = vmatpush.bf16.msrb.mxu1 %v7210_v26  ;;  %v3808_v28 = vshrl.u32 %v9509_v9, 16 }
 0x213   : > { %v10097_v62 = vadd.f32 %v9977_v19, %v2718_v16  ;;  %v10099_v30 = vadd.f32 %v2690_v32, %v2662_v5  ;;  %v10110_v19 = vpack.c.b16 %v9549_v4, %v3926_v25  ;;  %v3803_v5 = vshll.u32 %v10105_v60, 16  ;;  %v8213_v32 = vld [vmem:[#allocation4 + $0x1e4] sm:$0xf0]  ;;  %v7315_v25 = vld [vmem:[#allocation4 + $0x178] sm:$0xf0] }
 0x214   : > { %3539 = vmatpush.bf16.msrb.mxu2 %v7142_v7  ;;  %v7370_v4 = vor.u32 %v8213_v32, %v7369_v6  ;;  %v7318_v20 = vor.u32 %v8198_v23, %v7315_v25  ;;  %v7361_v60 = vld [vmem:[#allocation4 + $0x1d0] sm:$0xf]  ;;  %v3811_v7 = vshll.u32 %v9509_v9, 16  ;;  %v7201_v23 = vld [vmem:[#allocation4 + $0x6a0] sm:$0xf] }
 0x215   : > { %11957 = vst [vmem:[#allocation80_spill] sm:$0xff] %v10099_v30  ;;  %v3805_v26 = vrot.slane %v3803_v5, 5  ;;  %v7307_v5 = vld [vmem:[#allocation4 + $0x168] sm:$0xf0]  ;;  %v8154_v25 = vld [vmem:[#allocation4 + $0x614] sm:$0xf] }
 0x216   : > { %v10107_v56 = vpop.f32.mrf.mxu0  ;;  %4241 = vmatpush.bf16.msrb.mxu3 %v7370_v4  ;;  %4269 = vmatpush.bf16.msrb.mxu0 %v7318_v20  ;;  %v8173_v4 = vld [vmem:[#allocation4 + $0x6a4] sm:$0xf0] }
 0x217   : > { %v3806_v9 = vsel %vm9429_vm13, %v3801_v59, %v3805_v26  ;;  %v7202_v20 = vor.u32 %v8173_v4, %v7201_v23  ;;  %v11963_v4 = vld [vmem:[#allocation46_spill] sm:$0xff] }
 0x218   : > { %v2719_v16 = vpop.f32.mrf.mxu2  ;;  %v10143_v23 = vunpack.c.l.b16 %v3806_v9 }
 0x219   : > { %7247 = vmatmul.msk.bf16.vlgmr.msra.gmra.mxu0 %vm2372_vm10, %v10110_v19  ;;  %v2720_v27 = vadd.f32 %v2719_v16, %v9979_v13  ;;  %v10122_v22 = vpop.f32.mrf.mxu3  ;;  %v8211_v13 = vld [vmem:[#allocation4 + $0x1d4] sm:$0xf0]  ;;  %v11960_v16 = vld [vmem:[#allocation40_spill] sm:$0xff]  ;;  %3510 = vmatpush.bf16.msrb.mxu1 %v7202_v20 }
 0x21a   : > { %v2693_v2 = vpop.f32.mrf.mxu1  ;;  %v3822_v6 = vshrl.u32 %v11960_v16, 16  ;;  %v3825_v33 = vshll.u32 %v11960_v16, 16  ;;  %v8209_v16 = vld [vmem:[#allocation4 + $0x1c4] sm:$0xf0]  ;;  %v8207_v20 = vld [vmem:[#allocation4 + $0x1b4] sm:$0xf0] }
 0x21b   : > { %v10117_v11 = vadd.f32 %v9986_v8, %v2720_v27  ;;  %v10120_v49 = vadd.f32 %v2693_v2, %v9973_v31  ;;  %v7362_v8 = vor.u32 %v8211_v13, %v7361_v60  ;;  %v8196_v31 = vld [vmem:[#allocation4 + $0x164] sm:$0xf]  ;;  %v7131_v2 = vld [vmem:[#allocation4 + $0x618] sm:$0xf0]  ;;  %v7353_v13 = vld [vmem:[#allocation4 + $0x1c0] sm:$0xf] }
 0x21c   : > { %v7310_v27 = vor.u32 %v8196_v31, %v7307_v5  ;;  %v7134_v60 = vor.u32 %v8154_v25, %v7131_v2  ;;  %v7354_v31 = vor.u32 %v8209_v16, %v7353_v13  ;;  %v7299_v5 = vld [vmem:[#allocation4 + $0x158] sm:$0xf0]  ;;  %v10147_v25 = vpack.c.bf16 %v11963_v4, %v11963_v4 }
 0x21d   : > { %11959 = vst [vmem:[#allocation82_spill] sm:$0xff] %v10120_v49  ;;  %3167 = vmatmul.bf16.gmra.mxu1 %v9862_v53  ;;  %7112 = vmatmul.msk.bf16.gmra.mxu2 %vm2372_vm10, %v9574_v47  ;;  %v8194_v49 = vld [vmem:[#allocation4 + $0x154] sm:$0xf]  ;;  %v11961_v47 = vld [vmem:[#allocation42_spill] sm:$0xff]  ;;  %v3810_v2 = vrot.slane %v3808_v28, 4  ;;  %v3827_v42 = vrot.slane %v3825_v33, 5 }
 0x21e   : > { %v10128_v32 = vpop.f32.mrf.mxu0  ;;  %4242 = vmatpush.bf16.msrb.mxu3 %v7362_v8  ;;  %v10138_v30 = vpack.c.bf16 %v11961_v47, %v11961_v47  ;;  %4270 = vmatpush.bf16.msrb.mxu0 %v7310_v27  ;;  %v7302_v26 = vor.u32 %v8194_v49, %v7299_v5  ;;  %11964 = vst [vmem:[#allocation46_spill] sm:$0xff] %v10147_v25  ;;  %v3813_v47 = vrot.slane %v3811_v7, 5  ;;  %v7345_v49 = vld [vmem:[#allocation4 + $0x1b0] sm:$0xf]  ;;  %v8192_v28 = vld [vmem:[#allocation4 + $0x144] sm:$0xf] }
 0x21f   : > { %3576 = vmatmul.bf16.gmra.mxu3 %v9617_v17  ;;  %3540 = vmatpush.bf16.msrb.mxu2 %v7134_v60  ;;  %v7346_v60 = vor.u32 %v8207_v20, %v7345_v49  ;;  %v7291_v7 = vld [vmem:[#allocation4 + $0x148] sm:$0xf0]  ;;  %v8152_v33 = vld [vmem:[#allocation4 + $0x604] sm:$0xf]  ;;  %v3831_v4 = vshll.u32 %v10147_v25, 16 }
 0x220   : > { %v2722_v53 = vpop.f32.mrf.mxu2  ;;  %11962 = vst [vmem:[#allocation42_spill] sm:$0xff] %v10138_v30  ;;  %v3817_v9 = vshll.u32 %v10138_v30, 16  ;;  %v3814_v5 = vor.u32 %v3813_v47, %v3810_v2  ;;  %v7337_v30 = vld [vmem:[#allocation4 + $0x1a0] sm:$0xf]  ;;  %v7283_v47 = vld [vmem:[#allocation4 + $0x138] sm:$0xf0] }
 0x221   : > { %v2723_v59 = vadd.f32 %v2722_v53, %v9988_v10  ;;  %v3824_v10 = vrot.slane %v3822_v6, 4  ;;  %v7193_v53 = vld [vmem:[#allocation4 + $0x690] sm:$0xf]  ;;  %v8171_v6 = vld [vmem:[#allocation4 + $0x694] sm:$0xf0] }
 0x222   : > { %v2695_v8 = vpop.f32.mrf.mxu1  ;;  %v10154_v61 = vpop.f32.mrf.mxu3  ;;  %4243 = vmatpush.bf16.msrb.mxu3 %v7354_v31  ;;  %4271 = vmatpush.bf16.msrb.mxu0 %v7302_v26  ;;  %v7123_v31 = vld [vmem:[#allocation4 + $0x608] sm:$0xf0]  ;;  %v7194_v26 = vor.u32 %v8171_v6, %v7193_v53  ;;  %v3819_v6 = vrot.slane %v3817_v9, 5  ;;  %v8188_v9 = vld [vmem:[#allocation4 + $0x124] sm:$0xf] }
 0x223   : > { %v10150_v16 = vadd.f32 %v10002_v39, %v2723_v59  ;;  %v10152_v27 = vadd.f32 %v2695_v8, %v2667_v43  ;;  %v11967_v39 = vld [vmem:[#allocation39_spill] sm:$0xff]  ;;  %v7294_v59 = vor.u32 %v8192_v28, %v7291_v7  ;;  %v3828_v8 = vor.u32 %v3827_v42, %v3824_v10 }
 0x224   : > { %v10161_v43 = vpack.c.b16 %v10143_v23, %v11967_v39  ;;  %v7126_v49 = vor.u32 %v8152_v33, %v7123_v31  ;;  %3511 = vmatpush.bf16.msrb.mxu1 %v7194_v26  ;;  %v3815_v10 = vrot.slane %v3814_v5, 4  ;;  %v3833_v31 = vrot.slane %v3831_v4, 5  ;;  %v7275_v26 = vld [vmem:[#allocation4 + $0x128] sm:$0xf0]  ;;  %v8199_v4 = vld [vmem:[#allocation4 + $0x174] sm:$0xf0] }
 0x225   : > { %11965 = vst [vmem:[#allocation83_spill] sm:$0xff] %v10150_v16  ;;  %v8190_v16 = vld [vmem:[#allocation4 + $0x134] sm:$0xf]  ;;  %v3829_v33 = vrot.slane %v3828_v8, 4  ;;  %v7257_v25 = vld [vmem:[#allocation4 + $0x100] sm:$0xf] }
 0x226   : > { %11966 = vst [vmem:[#allocation84_spill] sm:$0xff] %v10152_v27  ;;  %v10157_v13 = vpop.f32.mrf.mxu0  ;;  %4244 = vmatpush.bf16.msrb.mxu3 %v7346_v60  ;;  %v8205_v27 = vld [vmem:[#allocation4 + $0x1a4] sm:$0xf0]  ;;  %4272 = vmatpush.bf16.msrb.mxu0 %v7294_v59  ;;  %v7286_v42 = vor.u32 %v8190_v16, %v7283_v47  ;;  %v8203_v59 = vld [vmem:[#allocation4 + $0x194] sm:$0xf0] }
 0x227   : > { %11968 = vst [vmem:[#allocation39_spill] sm:$0xff] %v10161_v43  ;;  %v7338_v2 = vor.u32 %v8205_v27, %v7337_v30  ;;  %3541 = vmatpush.bf16.msrb.mxu2 %v7126_v49  ;;  %v3850_v30 = vshrl.u32 %v9646_v0, 16  ;;  %v3853_v27 = vshll.u32 %v9646_v0, 16  ;;  %v7313_v49 = vld [vmem:[#allocation4 + $0x170] sm:$0xf] }
 0x228   : > { %v2724_v20 = vpop.f32.mrf.mxu2  ;;  %v7321_v47 = vld [vmem:[#allocation4 + $0x180] sm:$0xf] }
 0x229   : > { %7248 = vmatmul.msk.bf16.gmra.mxu0 %vm2372_vm10, %v10161_v43  ;;  %v2725_v39 = vadd.f32 %v2724_v20, %v10007_v54  ;;  %v7329_v54 = vld [vmem:[#allocation4 + $0x190] sm:$0xf]  ;;  %v3834_v20 = vsel %vm9429_vm13, %v3829_v33, %v3833_v31  ;;  %v3820_v33 = vsel %vm9429_vm13, %v3815_v10, %v3819_v6 }
 0x22a   : > { %v2698_v28 = vpop.f32.mrf.mxu1  ;;  %v10173_v53 = vpop.f32.mrf.mxu3  ;;  %4245 = vmatpush.bf16.msrb.mxu3 %v7338_v2  ;;  %v7330_v5 = vor.u32 %v8203_v59, %v7329_v54  ;;  %4273 = vmatpush.bf16.msrb.mxu0 %v7286_v42  ;;  %v7314_v2 = vor.u32 %v8199_v4, %v7313_v49  ;;  %v3839_v42 = vshll.u32 %v9609_v57, 16  ;;  %v3852_v4 = vrot.slane %v3850_v30, 4 }
 0x22b   : > { %v10168_v60 = vadd.f32 %v10012_v35, %v2725_v39  ;;  %v10171_v7 = vadd.f32 %v2698_v28, %v10005_v3  ;;  %v7185_v3 = vld [vmem:[#allocation4 + $0x680] sm:$0xf]  ;;  %v8169_v35 = vld [vmem:[#allocation4 + $0x684] sm:$0xf0]  ;;  %v7278_v39 = vor.u32 %v8188_v9, %v7275_v26 }
 0x22c   : > { %v7186_v8 = vor.u32 %v8169_v35, %v7185_v3  ;;  %v8201_v28 = vld [vmem:[#allocation4 + $0x184] sm:$0xf0]  ;;  %v7267_v3 = vld [vmem:[#allocation4 + $0x118] sm:$0xf0]  ;;  %4211 = vmatpush.bf16.msra.mxu2 %v7314_v2  ;;  %v3841_v6 = vrot.slane %v3839_v42, 5 }
 0x22d   : > { %3172 = vmatmul.bf16.gmra.mxu1 %v9928_v24  ;;  %7113 = vmatmul.msk.bf16.gmra.mxu2 %vm2372_vm10, %v9666_v41  ;;  %v8186_v24 = vld [vmem:[#allocation4 + $0x114] sm:$0xf]  ;;  %v3836_v41 = vshrl.u32 %v9609_v57, 16  ;;  %v7322_v59 = vor.u32 %v8201_v28, %v7321_v47  ;;  %v3855_v47 = vrot.slane %v3853_v27, 5  ;;  %v7305_v28 = vld [vmem:[#allocation4 + $0x160] sm:$0xf] }
 0x22e   : > { %v10177_v16 = vpop.f32.mrf.mxu0  ;;  %4246 = vmatpush.bf16.msrb.mxu3 %v7330_v5  ;;  %3512 = vmatpush.bf16.msrb.mxu1 %v7186_v8  ;;  %v10190_v5 = vunpack.c.l.b16 %v3834_v20  ;;  %v7270_v9 = vor.u32 %v8186_v24, %v7267_v3  ;;  %v10206_v20 = vpack.c.bf16 %v9718_v38, %v9718_v38  ;;  %v8197_v24 = vld [vmem:[#allocation4 + $0x164] sm:$0xf0] }
 0x22f   : > { %3581 = vmatmul.bf16.gmra.mxu3 %v9696_v63  ;;  %4274 = vmatpush.bf16.msrb.mxu0 %v7278_v39  ;;  %v3838_v10 = vrot.slane %v3836_v41, 4  ;;  %v7259_v39 = vld [vmem:[#allocation4 + $0x108] sm:$0xf0]  ;;  %v3856_v41 = vor.u32 %v3855_v47, %v3852_v4  ;;  %v7306_v38 = vor.u32 %v8197_v24, %v7305_v28 }
 0x230   : > { %v2727_v54 = vpop.f32.mrf.mxu2  ;;  %11970 = vst [vmem:[#allocation86_spill] sm:$0xff] %v10206_v20 }
 0x231   : > { %v2728_v35 = vadd.f32 %v2727_v54, %v10020_v15  ;;  %v10200_v15 = vunpack.c.l.b16 %v3820_v33  ;;  %v10215_v54 = vpack.c.bf16 %v9652_v1, %v9652_v1  ;;  %v3842_v3 = vor.u32 %v3841_v6, %v3838_v10  ;;  %4212 = vmatpush.bf16.msra.mxu2 %v7306_v38 }
 0x232   : > { %v2700_v31 = vpop.f32.mrf.mxu1  ;;  %v10198_v8 = vpop.f32.mrf.mxu3  ;;  %4247 = vmatpush.bf16.msrb.mxu3 %v7322_v59  ;;  %v3311_v10 = vunpack.c.h.b16 %v11892_v45 }
 0x233   : > { %v10193_v26 = vadd.f32 %v10026_v51, %v2728_v35  ;;  %v10196_v49 = vadd.f32 %v2700_v31, %v10018_v40  ;;  %v8184_v51 = vld [vmem:[#allocation4 + $0x104] sm:$0xf]  ;;  %v3940_v40 = vunpack.c.h.b16 %v10028_v46  ;;  %v10211_v30 = vpack.c.b16 %v10190_v5, %v10200_v15  ;;  %4275 = vmatpush.bf16.msrb.mxu0 %v7270_v9  ;;  %11972 = vst [vmem:[#allocation88_spill] sm:$0xff] %v10215_v54 }
 0x234   : > { %v7262_v27 = vor.u32 %v8184_v51, %v7259_v39  ;;  %v3859_v35 = vshll.u32 %v10206_v20, 16  ;;  %v3845_v47 = vshll.u32 %v10215_v54, 16  ;;  %v3843_v51 = vrot.slane %v3842_v3, 4  ;;  %v7297_v39 = vld [vmem:[#allocation4 + $0x150] sm:$0xf] }
 0x235   : > { %11969 = vst [vmem:[#allocation85_spill] sm:$0xff] %v10196_v49  ;;  %v3942_v42 = vpack.c.b16 %v3940_v40, %v3940_v40  ;;  %v8195_v40 = vld [vmem:[#allocation4 + $0x154] sm:$0xf0]  ;;  %v8229_v54 = vld [vmem:[#allocation4 + $0x464] sm:$0xf0] }
 0x236   : > { %v10202_v2 = vpop.f32.mrf.mxu0  ;;  %11971 = vst [vmem:[#allocation87_spill] sm:$0xff] %v10211_v30  ;;  %v3847_v24 = vrot.slane %v3845_v47, 5  ;;  %v7289_v47 = vld [vmem:[#allocation4 + $0x140] sm:$0xf] }
 0x237   : > { %v3959_v33 = vsel %vm2385_vm8, %v3942_v42, 0  ;;  %4276 = vmatpush.bf16.msrb.mxu0 %v7262_v27  ;;  %v7298_v27 = vor.u32 %v8195_v40, %v7297_v39 }
 0x238   : > { %v2729_v59 = vpop.f32.mrf.mxu2  ;;  %3997 = vmatpush.bf16.msra.mxu1 %v3959_v33 }
 0x239   : > { %7249 = vmatmul.msk.bf16.gmra.mxu0 %vm2372_vm10, %v10211_v30  ;;  %v2730_v46 = vadd.f32 %v2729_v59, %v10034_v52  ;;  %v3857_v52 = vrot.slane %v3856_v41, 4  ;;  %4213 = vmatpush.bf16.msra.mxu2 %v7298_v27 }
 0x23a   : > { %v2703_v31 = vpop.f32.mrf.mxu1  ;;  %v10228_v4 = vpop.f32.mrf.mxu3 }
 0x23b   : > { %v10223_v1 = vadd.f32 %v10043_v21, %v2730_v46  ;;  %v10226_v9 = vadd.f32 %v2703_v31, %v10039_v36  ;;  %v3861_v21 = vrot.slane %v3859_v35, 5  ;;  %v11974_v36 = vunpack.c.h.b16 %v9716_v34  ;;  %v11975_v34 = vld [vmem:[#allocation77_spill] sm:$0xff]  ;;  %v11976_v46 = vld [vmem:[#allocation76_spill] sm:$0xff] }
 0x23d   : > { %11973 = vst [vmem:[#allocation89_spill] sm:$0xff] %v10226_v9  ;;  %3177 = vmatmul.bf16.gmra.mxu1 %v9948_v18  ;;  %7114 = vmatmul.msk.bf16.gmra.mxu2 %vm2372_vm10, %v10047_v12  ;;  %v10239_v28 = vpack.c.b16 %v3311_v10, %v11974_v36  ;;  %v3862_v45 = vsel %vm9429_vm13, %v3857_v52, %v3861_v21 }
 0x23e   : > { %v10232_v6 = vpop.f32.mrf.mxu0  ;;  %v3848_v12 = vsel %vm9429_vm13, %v3843_v51, %v3847_v24  ;;  %v10247_v38 = vunpack.c.l.b16 %v3862_v45  ;;  %v11978_v45 = vld [vmem:[#allocation20_spill] sm:$0xff] }
 0x23f   : > { %3586 = vmatmul.bf16.gmra.mxu3 %v10239_v28  ;;  %v10257_v33 = vunpack.c.l.b16 %v3848_v12 }
 0x240   : > { %v2732_v41 = vpop.f32.mrf.mxu2 }
 0x241   : > { %v2733_v18 = vadd.f32 %v2732_v41, %v10052_v55  ;;  %v8193_v55 = vld [vmem:[#allocation4 + $0x144] sm:$0xf0]  ;;  %v10263_v52 = vpack.c.b16 %v10247_v38, %v10257_v33  ;;  %v7281_v41 = vld [vmem:[#allocation4 + $0x130] sm:$0xf] }
 0x242   : > { %v2705_v42 = vpop.f32.mrf.mxu1  ;;  %v10255_v35 = vpop.f32.mrf.mxu3  ;;  %v7290_v10 = vor.u32 %v8193_v55, %v7289_v47 }
 0x243   : > { %v10250_v59 = vadd.f32 %v11975_v34, %v2733_v18  ;;  %v10253_v3 = vadd.f32 %v2705_v42, %v11976_v46  ;;  %v8191_v18 = vld [vmem:[#allocation4 + $0x134] sm:$0xf0] }
 0x244   : > { %4214 = vmatpush.bf16.msra.mxu2 %v7290_v10  ;;  %v7282_v12 = vor.u32 %v8191_v18, %v7281_v41  ;;  %v7273_v10 = vld [vmem:[#allocation4 + $0x120] sm:$0xf]  ;;  %v7449_v41 = vld [vmem:[#allocation4 + $0x470] sm:$0xf]  ;;  %v8231_v18 = vld [vmem:[#allocation4 + $0x474] sm:$0xf0] }
 0x245   : > { %11977 = vst [vmem:[#allocation77_spill] sm:$0xff] %v10253_v3 }
 0x246   : > { %v10259_v31 = vpop.f32.mrf.mxu0 }
 0x248   : > { %v2734_v51 = vpop.f32.mrf.mxu2  ;;  %4215 = vmatpush.bf16.msra.mxu2 %v7282_v12  ;;  %v11982_v12 = vld [vmem:[#allocation30_spill] sm:$0xff] }
 0x249   : > { %7250 = vmatmul.msk.bf16.gmra.mxu0 %vm2372_vm10, %v10263_v52  ;;  %v2735_v21 = vadd.f32 %v2734_v51, %v10075_v14  ;;  %v11979_v14 = vld [vmem:[#allocation31_spill] sm:$0xff] }
 0x24a   : > { %v2868_v39 = vpop.f32.mrf.mxu1  ;;  %v10274_v27 = vpop.f32.mrf.mxu3  ;;  %v8189_v51 = vld [vmem:[#allocation4 + $0x124] sm:$0xf0] }
 0x24b   : > { %v10269_v40 = vadd.f32 %v10081_v50, %v2735_v21  ;;  %v10272_v36 = vadd.f32 %v10107_v56, %v2868_v39  ;;  %v11980_v50 = vld [vmem:[#allocation24_spill] sm:$0xff]  ;;  %v7274_v21 = vor.u32 %v8189_v51, %v7273_v10  ;;  %v11984_v51 = vld [vmem:[#allocation22_spill] sm:$0xff] }
 0x24c   : > { %v11981_v39 = vld [vmem:[#allocation32_spill] sm:$0xff] }
 0x24d   : > { %3513 = vmatmul.bf16.vlgmr.msrb.gmra.mxu1 %v9536_v44  ;;  %3542 = vmatmul.bf16.vlgmr.msrb.gmra.mxu2 %v11978_v45 }
 0x24e   : > { %v10276_v24 = vpop.f32.mrf.mxu0  ;;  %4216 = vmatpush.bf16.msra.mxu2 %v7274_v21  ;;  %v7441_v21 = vld [vmem:[#allocation4 + $0x460] sm:$0xf] }
 0x24f   : > { %4248 = vmatmul.bf16.vlgmr.msrb.gmra.mxu3 %v11979_v14 }
 0x250   : > { %v3076_v42 = vpop.f32.mrf.mxu2 }
 0x251   : > { %v3077_v34 = vadd.f32 %v3076_v42, %v11980_v50 }
 0x252   : > { %v2870_v46 = vpop.f32.mrf.mxu1  ;;  %v10288_v55 = vpop.f32.mrf.mxu3 }
 0x253   : > { %v10283_v56 = vadd.f32 %v10101_v48, %v3077_v34  ;;  %v10286_v47 = vadd.f32 %v10128_v32, %v2870_v46  ;;  %v7450_v48 = vor.u32 %v8231_v18, %v7449_v41  ;;  %v7442_v41 = vor.u32 %v8229_v54, %v7441_v21  ;;  %v8187_v18 = vld [vmem:[#allocation4 + $0x114] sm:$0xf0] }
 0x255   : > { %4642 = vmatpush.bf16.msra.mxu0 %v7450_v48  ;;  %v11986_v48 = vld [vmem:[#allocation35_spill] sm:$0xff] }
 0x256   : > { %v10290_v44 = vpop.f32.mrf.mxu0 }
 0x258   : > { %v3078_v45 = vpop.f32.mrf.mxu2 }
 0x259   : > { %4277 = vmatmul.bf16.vlgmr.msrb.gmra.mxu0 %v11981_v39  ;;  %v3079_v42 = vadd.f32 %v3078_v45, %v11982_v12  ;;  %v7265_v45 = vld [vmem:[#allocation4 + $0x110] sm:$0xf] }
 0x25a   : > { %v2873_v50 = vpop.f32.mrf.mxu1  ;;  %v10300_v46 = vpop.f32.mrf.mxu3  ;;  %v7433_v12 = vld [vmem:[#allocation4 + $0x450] sm:$0xf]  ;;  %4643 = vmatpush.bf16.msra.mxu0 %v7442_v41 }
 0x25b   : > { %v10295_v32 = vadd.f32 %v10122_v22, %v3079_v42  ;;  %v10298_v34 = vadd.f32 %v10157_v13, %v2873_v50  ;;  %11983 = vst [vmem:[#allocation76_spill] sm:$0xff] %v10300_v46  ;;  %v8227_v22 = vld [vmem:[#allocation4 + $0x454] sm:$0xf0]  ;;  %v7266_v42 = vor.u32 %v8187_v18, %v7265_v45  ;;  %v11985_v13 = vld [vmem:[#allocation48_spill] sm:$0xff]  ;;  %v7425_v45 = vld [vmem:[#allocation4 + $0x440] sm:$0xf] }
 0x25c   : > { %v7434_v50 = vor.u32 %v8227_v22, %v7433_v12  ;;  %v8225_v18 = vld [vmem:[#allocation4 + $0x444] sm:$0xf0] }
 0x25d   : > { %3518 = vmatmul.bf16.gmra.mxu1 %v9617_v17  ;;  %3547 = vmatmul.bf16.gmra.mxu2 %v11984_v51  ;;  %v7426_v41 = vor.u32 %v8225_v18, %v7425_v45  ;;  %v8185_v12 = vld [vmem:[#allocation4 + $0x104] sm:$0xf0] }
 0x25e   : > { %v10302_v10 = vpop.f32.mrf.mxu0  ;;  %4217 = vmatpush.bf16.msra.mxu2 %v7266_v42  ;;  %4644 = vmatpush.bf16.msra.mxu0 %v7434_v50  ;;  %v7258_v22 = vor.u32 %v8185_v12, %v7257_v25  ;;  %v11991_v18 = vld [vmem:[#allocation28_spill] sm:$0xff]  ;;  %v7409_v12 = vld [vmem:[#allocation4 + $0x420] sm:$0xf] }
 0x25f   : > { %4253 = vmatmul.bf16.gmra.mxu3 %v11985_v13  ;;  %v11993_v13 = vld [vmem:[#allocation73_spill] sm:$0xff] }
 0x260   : > { %v3081_v57 = vpop.f32.mrf.mxu2 }
 0x261   : > { %v3082_v20 = vadd.f32 %v3081_v57, %v11986_v48  ;;  %v11988_v57 = vld [vmem:[#allocation49_spill] sm:$0xff] }
 0x262   : > { %v2875_v0 = vpop.f32.mrf.mxu1  ;;  %v10314_v54 = vpop.f32.mrf.mxu3  ;;  %v7417_v48 = vld [vmem:[#allocation4 + $0x430] sm:$0xf]  ;;  %4645 = vmatpush.bf16.msra.mxu0 %v7426_v41  ;;  %4218 = vmatpush.bf16.msra.mxu2 %v7258_v22  ;;  %v4377_v41 = vld [vmem:[#allocation6 + $0x20] sm:$0xff] }
 0x263   : > { %v10309_v17 = vadd.f32 %v10154_v61, %v3082_v20  ;;  %v10312_v51 = vadd.f32 %v10177_v16, %v2875_v0  ;;  %11987 = vst [vmem:[#allocation20_spill] sm:$0xff] %v10314_v54  ;;  %v8223_v61 = vld [vmem:[#allocation4 + $0x434] sm:$0xf0]  ;;  %v11989_v20 = vld [vmem:[#allocation72_spill] sm:$0xff] }
 0x264   : > { %v7418_v16 = vor.u32 %v8223_v61, %v7417_v48  ;;  %v4384_v48 = vunpack.c.l.b16 %v4377_v41  ;;  %v4385_v61 = vunpack.c.h.b16 %v4377_v41 }
 0x266   : > { %v10316_v21 = vpop.f32.mrf.mxu0  ;;  %4646 = vmatpush.bf16.msra.mxu0 %v7418_v16 }
 0x268   : > { %v3083_v42 = vpop.f32.mrf.mxu2 }
 0x269   : > { %4282 = vmatmul.bf16.gmra.mxu0 %v11988_v57  ;;  %v3084_v3 = vadd.f32 %v3083_v42, %v11989_v20  ;;  %v8221_v42 = vld [vmem:[#allocation4 + $0x424] sm:$0xf0] }
 0x26a   : > { %v2878_v0 = vpop.f32.mrf.mxu1  ;;  %v10326_v45 = vpop.f32.mrf.mxu3  ;;  %v7410_v22 = vor.u32 %v8221_v42, %v7409_v12 }
 0x26b   : > { %v10321_v50 = vadd.f32 %v10173_v53, %v3084_v3  ;;  %v10324_v54 = vadd.f32 %v10202_v2, %v2878_v0  ;;  %11990 = vst [vmem:[#allocation31_spill] sm:$0xff] %v10326_v45  ;;  %v7401_v53 = vld [vmem:[#allocation4 + $0x410] sm:$0xf]  ;;  %v8219_v3 = vld [vmem:[#allocation4 + $0x414] sm:$0xf0]  ;;  %v11992_v2 = vld [vmem:[#allocation15_spill] sm:$0xff]  ;;  %v4386_v0 = vpack.c.b16 %v4384_v48, %v4384_v48  ;;  %v4387_v45 = vpack.c.b16 %v4385_v61, %v4385_v61 }
 0x26c   : > { %4647 = vmatpush.bf16.msra.mxu0 %v7410_v22  ;;  %v7402_v49 = vor.u32 %v8219_v3, %v7401_v53  ;;  %v8217_v48 = vld [vmem:[#allocation4 + $0x404] sm:$0xf0]  ;;  %v8214_v22 = vld [vmem:[#allocation4 + $0x1f4] sm:$0xf] }
 0x26d   : > { %3523 = vmatmul.bf16.gmra.mxu1 %v9696_v63  ;;  %3552 = vmatmul.bf16.gmra.mxu2 %v11991_v18  ;;  %v4401_v63 = vsel %vm2385_vm8, %v4386_v0, 0  ;;  %v4404_v18 = vsel %vm2385_vm8, %v4387_v45, 0  ;;  %v11994_v53 = vld [vmem:[#allocation51_spill] sm:$0xff] }
 0x26e   : > { %v10328_v25 = vpop.f32.mrf.mxu0  ;;  %4413 = vmatpush.bf16.msrb.mxu2 %v4401_v63  ;;  %4442 = vmatpush.bf16.msra.mxu3 %v4404_v18  ;;  %v8212_v18 = vld [vmem:[#allocation4 + $0x1e4] sm:$0xf] }
 0x26f   : > { %4258 = vmatmul.bf16.gmra.mxu3 %v11992_v2 }
 0x270   : > { %v3086_v20 = vpop.f32.mrf.mxu2  ;;  %4648 = vmatpush.bf16.msra.mxu0 %v7402_v49 }
 0x271   : > { %v3087_v9 = vadd.f32 %v3086_v20, %v11993_v13  ;;  %v7393_v13 = vld [vmem:[#allocation4 + $0x400] sm:$0xf]  ;;  %v7379_v20 = vld [vmem:[#allocation4 + $0x1f8] sm:$0xf0] }
 0x272   : > { %v2880_v46 = vpop.f32.mrf.mxu1  ;;  %v10342_v42 = vpop.f32.mrf.mxu3  ;;  %v7394_v61 = vor.u32 %v8217_v48, %v7393_v13  ;;  %v7382_v45 = vor.u32 %v8214_v22, %v7379_v20  ;;  %v7371_v13 = vld [vmem:[#allocation4 + $0x1e8] sm:$0xf0]  ;;  %v11996_v20 = vld [vmem:[#allocation14_spill] sm:$0xff] }
 0x273   : > { %v10337_v16 = vadd.f32 %v10198_v8, %v3087_v9  ;;  %v10340_v12 = vadd.f32 %v10232_v6, %v2880_v46  ;;  %v11995_v9 = vld [vmem:[#allocation75_spill] sm:$0xff]  ;;  %v7374_v48 = vor.u32 %v8212_v18, %v7371_v13  ;;  %v11999_v18 = vld [vmem:[#allocation18_spill] sm:$0xff] }
 0x274   : > { %4298 = vmatpush.bf16.msrb.mxu1 %v7382_v45  ;;  %4649 = vmatpush.bf16.msra.mxu0 %v7394_v61 }
 0x276   : > { %v10344_v41 = vpop.f32.mrf.mxu0 }
 0x278   : > { %v3088_v8 = vpop.f32.mrf.mxu2  ;;  %4299 = vmatpush.bf16.msrb.mxu1 %v7374_v48 }
 0x279   : > { %4287 = vmatmul.bf16.gmra.mxu0 %v11994_v53  ;;  %v3089_v3 = vadd.f32 %v3088_v8, %v11995_v9 }
 0x27a   : > { %v2883_v6 = vpop.f32.mrf.mxu1  ;;  %v10354_v63 = vpop.f32.mrf.mxu3 }
 0x27b   : > { %v10349_v46 = vadd.f32 %v10228_v4, %v3089_v3  ;;  %v10352_v0 = vadd.f32 %v10259_v31, %v2883_v6  ;;  %v11997_v4 = vld [vmem:[#allocation78_spill] sm:$0xff] }
 0x27c   : > { %v7363_v3 = vld [vmem:[#allocation4 + $0x1d8] sm:$0xf0] }
 0x27d   : > { %3528 = vmatmul.bf16.gmra.mxu1 %v10239_v28  ;;  %3557 = vmatmul.bf16.gmra.mxu2 %v10072_v37  ;;  %v8210_v37 = vld [vmem:[#allocation4 + $0x1d4] sm:$0xf] }
 0x27e   : > { %v10356_v49 = vpop.f32.mrf.mxu0  ;;  %v7366_v6 = vor.u32 %v8210_v37, %v7363_v3  ;;  %v8208_v37 = vld [vmem:[#allocation4 + $0x1c4] sm:$0xf] }
 0x27f   : > { %4263 = vmatmul.bf16.gmra.mxu3 %v11996_v20 }
 0x280   : > { %v3091_v22 = vpop.f32.mrf.mxu2  ;;  %4300 = vmatpush.bf16.msrb.mxu1 %v7366_v6 }
 0x281   : > { %v3092_v61 = vadd.f32 %v3091_v22, %v11997_v4 }
 0x282   : > { %v2885_v45 = vpop.f32.mrf.mxu1  ;;  %v10368_v9 = vpop.f32.mrf.mxu3 }
 0x283   : > { %v10363_v31 = vadd.f32 %v10255_v35, %v3092_v61  ;;  %v10366_v8 = vadd.f32 %v10276_v24, %v2885_v45  ;;  %11998 = vst [vmem:[#allocation24_spill] sm:$0xff] %v10368_v9  ;;  %v7507_v9 = vld [vmem:[#allocation4 + $0x4e8] sm:$0xf0] }
 0x286   : > { %v10370_v28 = vpop.f32.mrf.mxu0 }
 0x288   : > { %v3093_v13 = vpop.f32.mrf.mxu2 }
 0x289   : > { %4292 = vmatmul.bf16.gmra.mxu0 %v11999_v18  ;;  %v3094_v48 = vadd.f32 %v3093_v13, %v10083_v58  ;;  %v7355_v58 = vld [vmem:[#allocation4 + $0x1c8] sm:$0xf0]  ;;  %v7515_v13 = vld [vmem:[#allocation4 + $0x4f8] sm:$0xf0] }
 0x28a   : > { %v3163_v22 = vpop.f32.mrf.mxu1  ;;  %v10378_v4 = vpop.f32.mrf.mxu3  ;;  %v7358_v3 = vor.u32 %v8208_v37, %v7355_v58  ;;  %v8206_v58 = vld [vmem:[#allocation4 + $0x1b4] sm:$0xf] }
 0x28b   : > { %v10375_v35 = vadd.f32 %v10274_v27, %v3094_v48  ;;  %v3164_v24 = vadd.f32 %v3163_v22, %v10272_v36  ;;  %12000 = vst [vmem:[#allocation32_spill] sm:$0xff] %v10378_v4  ;;  %v12002_v27 = vld [vmem:[#allocation41_spill] sm:$0xff]  ;;  %v12005_v4 = vld [vmem:[#allocation44_spill] sm:$0xff] }
 0x28c   : > { %4301 = vmatpush.bf16.msrb.mxu1 %v7358_v3 }
 0x28d   : > { %v10381_v61 = vadd.f32 %v3164_v24, %v10097_v62  ;;  %7251 = vmatmul.msk.bf16.vlgmr.msra.gmra.mxu1 %vm2372_vm10, %v10110_v19  ;;  %4219 = vmatmul.bf16.vlgmr.msra.gmra.mxu2 %v11981_v39  ;;  %v8246_v62 = vld [vmem:[#allocation4 + $0x4f4] sm:$0xf] }
 0x28e   : > { %v10383_v45 = vpop.f32.mrf.mxu0  ;;  %v7518_v22 = vor.u32 %v8246_v62, %v7515_v13  ;;  %v8242_v13 = vld [vmem:[#allocation4 + $0x4d4] sm:$0xf] }
 0x28f   : > { %12001 = vst [vmem:[#allocation30_spill] sm:$0xff] %v10381_v61  ;;  %7387 = vmatmul.msk.bf16.vlgmr.msra.gmra.mxu3 %vm2372_vm10, %v12002_v27  ;;  %v7347_v61 = vld [vmem:[#allocation4 + $0x1b8] sm:$0xf0] }
 0x290   : > { %v3260_v6 = vpop.f32.mrf.mxu2  ;;  %4729 = vmatpush.bf16.msrb.mxu3 %v7518_v22  ;;  %v7350_v3 = vor.u32 %v8206_v58, %v7347_v61  ;;  %v12006_v61 = vld [vmem:[#allocation83_spill] sm:$0xff] }
 0x291   : > { %v10391_v36 = vadd.f32 %v10290_v44, %v3260_v6  ;;  %v8244_v6 = vld [vmem:[#allocation4 + $0x4e4] sm:$0xf] }
 0x292   : > { %v3165_v48 = vpop.f32.mrf.mxu1  ;;  %v10394_v19 = vpop.f32.mrf.mxu3  ;;  %4302 = vmatpush.bf16.msrb.mxu1 %v7350_v3  ;;  %v8240_v3 = vld [vmem:[#allocation4 + $0x4c4] sm:$0xf] }
 0x293   : > { %v3166_v24 = vadd.f32 %v3165_v48, %v10286_v47  ;;  %v7510_v47 = vor.u32 %v8244_v6, %v7507_v9  ;;  %v7499_v48 = vld [vmem:[#allocation4 + $0x4d8] sm:$0xf0]  ;;  %v7339_v9 = vld [vmem:[#allocation4 + $0x1a8] sm:$0xf0] }
 0x294   : > { %v7491_v6 = vld [vmem:[#allocation4 + $0x4c8] sm:$0xf0] }
 0x295   : > { %v10397_v39 = vadd.f32 %v3166_v24, %v10117_v11  ;;  %4730 = vmatpush.bf16.msrb.mxu3 %v7510_v47  ;;  %v7494_v47 = vor.u32 %v8240_v3, %v7491_v6  ;;  %v12011_v3 = vld [vmem:[#allocation50_spill] sm:$0xff] }
 0x296   : > { %v10399_v37 = vpop.f32.mrf.mxu0  ;;  %v3867_v6 = vshll.u32 %v12011_v3, 16 }
 0x297   : > { %12003 = vst [vmem:[#allocation22_spill] sm:$0xff] %v10397_v39  ;;  %v7502_v39 = vor.u32 %v8242_v13, %v7499_v48 }
 0x298   : > { %12004 = vst [vmem:[#allocation35_spill] sm:$0xff] %v10399_v37  ;;  %v3262_v44 = vpop.f32.mrf.mxu2 }
 0x299   : > { %4650 = vmatmul.bf16.vlgmr.msra.gmra.mxu0 %v12005_v4  ;;  %v10403_v62 = vadd.f32 %v10302_v10, %v3262_v44  ;;  %v8204_v10 = vld [vmem:[#allocation4 + $0x1a4] sm:$0xf]  ;;  %4731 = vmatpush.bf16.msrb.mxu3 %v7502_v39 }
 0x29a   : > { %v3168_v22 = vpop.f32.mrf.mxu1  ;;  %v10406_v24 = vpop.f32.mrf.mxu3  ;;  %v7342_v44 = vor.u32 %v8204_v10, %v7339_v9  ;;  %v8202_v10 = vld [vmem:[#allocation4 + $0x194] sm:$0xf]  ;;  %v7331_v9 = vld [vmem:[#allocation4 + $0x198] sm:$0xf0] }
 0x29b   : > { %v3169_v11 = vadd.f32 %v3168_v22, %v10298_v34  ;;  %v10418_v34 = vpack.c.b16 %v10200_v15, %v10143_v23  ;;  %v8238_v22 = vld [vmem:[#allocation4 + $0x4b4] sm:$0xf] }
 0x29c   : > { %4303 = vmatpush.bf16.msrb.mxu1 %v7342_v44  ;;  %v3864_v44 = vshrl.u32 %v12011_v3, 16 }
 0x29d   : > { %v10409_v58 = vadd.f32 %v3169_v11, %v12006_v61  ;;  %7252 = vmatmul.msk.bf16.gmra.mxu1 %vm2372_vm10, %v10161_v43  ;;  %4224 = vmatmul.bf16.gmra.mxu2 %v11988_v57  ;;  %v7483_v11 = vld [vmem:[#allocation4 + $0x4b8] sm:$0xf0]  ;;  %v3869_v57 = vrot.slane %v3867_v6, 5 }
 0x29e   : > { %v10411_v37 = vpop.f32.mrf.mxu0  ;;  %4732 = vmatpush.bf16.msrb.mxu3 %v7494_v47  ;;  %v7486_v23 = vor.u32 %v8238_v22, %v7483_v11  ;;  %v7475_v47 = vld [vmem:[#allocation4 + $0x4a8] sm:$0xf0]  ;;  %v7467_v11 = vld [vmem:[#allocation4 + $0x498] sm:$0xf0] }
 0x29f   : > { %12007 = vst [vmem:[#allocation72_spill] sm:$0xff] %v10409_v58  ;;  %7388 = vmatmul.msk.bf16.gmra.mxu3 %vm2372_vm10, %v10418_v34 }
 0x2a0   : > { %12008 = vst [vmem:[#allocation28_spill] sm:$0xff] %v10411_v37  ;;  %v3265_v13 = vpop.f32.mrf.mxu2 }
 0x2a1   : > { %v10423_v48 = vadd.f32 %v10316_v21, %v3265_v13  ;;  %v7334_v21 = vor.u32 %v8202_v10, %v7331_v9  ;;  %v12012_v13 = vld [vmem:[#allocation16_spill] sm:$0xff]  ;;  %v3866_v9 = vrot.slane %v3864_v44, 4  ;;  %v10460_v44 = vpack.c.b16 %v10257_v33, %v10190_v5 }
 0x2a2   : > { %v3170_v61 = vpop.f32.mrf.mxu1  ;;  %v10426_v37 = vpop.f32.mrf.mxu3  ;;  %4733 = vmatpush.bf16.msrb.mxu3 %v7486_v23 }
 0x2a3   : > { %v3171_v58 = vadd.f32 %v3170_v61, %v10312_v51  ;;  %4304 = vmatpush.bf16.msrb.mxu1 %v7334_v21  ;;  %v8236_v61 = vld [vmem:[#allocation4 + $0x4a4] sm:$0xf] }
 0x2a5   : > { %v10429_v15 = vadd.f32 %v3171_v58, %v10168_v60  ;;  %v7478_v60 = vor.u32 %v8236_v61, %v7475_v47  ;;  %v8234_v58 = vld [vmem:[#allocation4 + $0x494] sm:$0xf]  ;;  %v8232_v47 = vld [vmem:[#allocation4 + $0x484] sm:$0xf] }
 0x2a6   : > { %v10431_v39 = vpop.f32.mrf.mxu0 }
 0x2a7   : > { %12009 = vst [vmem:[#allocation15_spill] sm:$0xff] %v10429_v15  ;;  %v12013_v15 = vld [vmem:[#allocation79_spill] sm:$0xff]  ;;  %4734 = vmatpush.bf16.msrb.mxu3 %v7478_v60  ;;  %v7459_v60 = vld [vmem:[#allocation4 + $0x488] sm:$0xf0] }
 0x2a8   : > { %12010 = vst [vmem:[#allocation73_spill] sm:$0xff] %v10431_v39  ;;  %v3267_v51 = vpop.f32.mrf.mxu2  ;;  %v10441_v39 = vadd.f32 %v10283_v56, %v12013_v15  ;;  %v8200_v56 = vld [vmem:[#allocation4 + $0x184] sm:$0xf]  ;;  %v8230_v15 = vld [vmem:[#allocation4 + $0x474] sm:$0xf] }
 0x2a9   : > { %4655 = vmatmul.bf16.gmra.mxu0 %v12012_v13  ;;  %v10437_v22 = vadd.f32 %v10328_v25, %v3267_v51  ;;  %v12014_v13 = vld [vmem:[#allocation71_spill] sm:$0xff]  ;;  %v7470_v25 = vor.u32 %v8234_v58, %v7467_v11 }
 0x2aa   : > { %v3173_v10 = vpop.f32.mrf.mxu1  ;;  %v10444_v3 = vpop.f32.mrf.mxu3  ;;  %v10448_v21 = vpack.c.bf16 %v12014_v13, %v12014_v13  ;;  %v7451_v13 = vld [vmem:[#allocation4 + $0x478] sm:$0xf0] }
 0x2ab   : > { %v3174_v23 = vadd.f32 %v3173_v10, %v10324_v54  ;;  %v7323_v54 = vld [vmem:[#allocation4 + $0x188] sm:$0xf0]  ;;  %4735 = vmatpush.bf16.msrb.mxu3 %v7470_v25  ;;  %v7454_v11 = vor.u32 %v8230_v15, %v7451_v13  ;;  %v7462_v10 = vor.u32 %v8232_v47, %v7459_v60  ;;  %v7513_v13 = vld [vmem:[#allocation4 + $0x4f0] sm:$0xf]  ;;  %v8247_v47 = vld [vmem:[#allocation4 + $0x4f4] sm:$0xf0] }
 0x2ac   : > { %12015 = vst [vmem:[#allocation51_spill] sm:$0xff] %v10448_v21  ;;  %v7326_v6 = vor.u32 %v8200_v56, %v7323_v54  ;;  %v3873_v58 = vshll.u32 %v10448_v21, 16  ;;  %v12017_v25 = vld [vmem:[#allocation80_spill] sm:$0xff]  ;;  %v7514_v60 = vor.u32 %v8247_v47, %v7513_v13 }
 0x2ad   : > { %v10451_v51 = vadd.f32 %v3174_v23, %v10193_v26  ;;  %7253 = vmatmul.msk.bf16.gmra.mxu1 %vm2372_vm10, %v10211_v30  ;;  %4229 = vmatmul.bf16.gmra.mxu2 %v11994_v53  ;;  %v3870_v26 = vor.u32 %v3869_v57, %v3866_v9  ;;  %v10473_v54 = vadd.f32 %v10295_v32, %v12017_v25  ;;  %v12019_v32 = vld [vmem:[#allocation34_spill] sm:$0xff] }
 0x2ae   : > { %v10453_v61 = vpop.f32.mrf.mxu0  ;;  %4305 = vmatpush.bf16.msrb.mxu1 %v7326_v6  ;;  %4700 = vmatpush.bf16.msra.mxu2 %v7454_v11  ;;  %v3875_v9 = vrot.slane %v3873_v58, 5  ;;  %v8228_v11 = vld [vmem:[#allocation4 + $0x464] sm:$0xf] }
 0x2af   : > { %12016 = vst [vmem:[#allocation75_spill] sm:$0xff] %v10451_v51  ;;  %7389 = vmatmul.msk.bf16.gmra.mxu3 %vm2372_vm10, %v10460_v44  ;;  %v3871_v57 = vrot.slane %v3870_v26, 4  ;;  %v7443_v26 = vld [vmem:[#allocation4 + $0x468] sm:$0xf0] }
 0x2b0   : > { %v3270_v23 = vpop.f32.mrf.mxu2  ;;  %4736 = vmatpush.bf16.msrb.mxu3 %v7462_v10  ;;  %v7446_v10 = vor.u32 %v8228_v11, %v7443_v26  ;;  %v8245_v11 = vld [vmem:[#allocation4 + $0x4e4] sm:$0xf0] }
 0x2b1   : > { %v10466_v51 = vadd.f32 %v10344_v41, %v3270_v23  ;;  %v10480_v41 = vld [vmem:[#allocation6 + $0x38] sm:$0xff]  ;;  %v3876_v58 = vsel %vm9429_vm13, %v3871_v57, %v3875_v9 }
 0x2b2   : > { %v3175_v5 = vpop.f32.mrf.mxu1  ;;  %v10469_v56 = vpop.f32.mrf.mxu3  ;;  %4671 = vmatpush.bf16.msra.mxu1 %v7514_v60  ;;  %4701 = vmatpush.bf16.msra.mxu2 %v7446_v10  ;;  %v10489_v25 = vunpack.c.l.b16 %v3876_v58  ;;  %v12020_v57 = vld [vmem:[#allocation82_spill] sm:$0xff] }
 0x2b3   : > { %v3176_v33 = vadd.f32 %v3175_v5, %v10340_v12  ;;  %v4812_v12 = vunpack.c.l.b16 %v10480_v41  ;;  %v10497_v9 = vadd.f32 %v10309_v17, %v12020_v57  ;;  %v7505_v60 = vld [vmem:[#allocation4 + $0x4e0] sm:$0xf]  ;;  %v7435_v17 = vld [vmem:[#allocation4 + $0x458] sm:$0xf0] }
 0x2b4   : > { %v10509_v26 = vpack.c.b16 %v10489_v25, %v10247_v38  ;;  %v7506_v58 = vor.u32 %v8245_v11, %v7505_v60  ;;  %v7497_v11 = vld [vmem:[#allocation4 + $0x4d0] sm:$0xf] }
 0x2b5   : > { %v10476_v15 = vadd.f32 %v3176_v33, %v10223_v1  ;;  %v4814_v1 = vpack.c.b16 %v4812_v12, %v4812_v12 }
 0x2b6   : > { %v10478_v6 = vpop.f32.mrf.mxu0  ;;  %4672 = vmatpush.bf16.msra.mxu1 %v7506_v58  ;;  %v8224_v58 = vld [vmem:[#allocation4 + $0x444] sm:$0xf] }
 0x2b7   : > { %12018 = vst [vmem:[#allocation78_spill] sm:$0xff] %v10476_v15  ;;  %v4820_v13 = vsel %vm2385_vm8, %v4814_v1, 0 }
 0x2b8   : > { %v3272_v23 = vpop.f32.mrf.mxu2  ;;  %4832 = vmatpush.bf16.msrb.mxu0 %v4820_v13 }
 0x2b9   : > { %4660 = vmatmul.bf16.gmra.mxu0 %v12019_v32  ;;  %v10487_v5 = vadd.f32 %v10356_v49, %v3272_v23 }
 0x2ba   : > { %v3178_v33 = vpop.f32.mrf.mxu1  ;;  %v10493_v21 = vpop.f32.mrf.mxu3 }
 0x2bb   : > { %v3179_v47 = vadd.f32 %v3178_v33, %v10352_v0  ;;  %v8226_v0 = vld [vmem:[#allocation4 + $0x454] sm:$0xf] }
 0x2bc   : > { %v7438_v10 = vor.u32 %v8226_v0, %v7435_v17  ;;  %v8243_v0 = vld [vmem:[#allocation4 + $0x4d4] sm:$0xf0] }
 0x2bd   : > { %v10500_v12 = vadd.f32 %v3179_v47, %v10250_v59  ;;  %7254 = vmatmul.msk.bf16.gmra.mxu1 %vm2372_vm10, %v10263_v52  ;;  %4234 = vmatmul.bf16.gmra.mxu2 %v11999_v18  ;;  %v12022_v47 = vld [vmem:[#allocation84_spill] sm:$0xff] }
 0x2be   : > { %v10502_v49 = vpop.f32.mrf.mxu0  ;;  %4702 = vmatpush.bf16.msra.mxu2 %v7438_v10  ;;  %v10521_v38 = vadd.f32 %v10321_v50, %v12022_v47  ;;  %v12027_v10 = vld [vmem:[#allocation12_spill] sm:$0xff] }
 0x2bf   : > { %12021 = vst [vmem:[#allocation18_spill] sm:$0xff] %v10500_v12  ;;  %7390 = vmatmul.msk.bf16.gmra.mxu3 %vm2372_vm10, %v10509_v26 }
 0x2c0   : > { %v3275_v23 = vpop.f32.mrf.mxu2 }
 0x2c1   : > { %v10514_v59 = vadd.f32 %v10370_v28, %v3275_v23  ;;  %v12025_v28 = vld [vmem:[#allocation13_spill] sm:$0xff]  ;;  %v12028_v23 = vunpack.c.l.b16 %v12027_v10 }
 0x2c2   : > { %v3180_v1 = vpop.f32.mrf.mxu1  ;;  %v10517_v13 = vpop.f32.mrf.mxu3  ;;  %v12026_v17 = vunpack.c.l.b16 %v12025_v28 }
 0x2c3   : > { %v3181_v33 = vadd.f32 %v3180_v1, %v10366_v8  ;;  %v7498_v8 = vor.u32 %v8243_v0, %v7497_v11  ;;  %v7427_v1 = vld [vmem:[#allocation4 + $0x448] sm:$0xf0] }
 0x2c4   : > { %v10532_v12 = vpack.c.b16 %v12028_v23, %v12026_v17  ;;  %v7430_v15 = vor.u32 %v8224_v58, %v7427_v1  ;;  %v10543_v17 = vadd.f32 %v10337_v16, %v10171_v7  ;;  %v8222_v58 = vld [vmem:[#allocation4 + $0x434] sm:$0xf]  ;;  %v7419_v23 = vld [vmem:[#allocation4 + $0x438] sm:$0xf0] }
 0x2c5   : > { %v10524_v57 = vadd.f32 %v3181_v33, %v10269_v40  ;;  %4673 = vmatpush.bf16.msra.mxu1 %v7498_v8  ;;  %v7422_v8 = vor.u32 %v8222_v58, %v7419_v23  ;;  %v7481_v23 = vld [vmem:[#allocation4 + $0x4b0] sm:$0xf] }
 0x2c6   : > { %v10526_v60 = vpop.f32.mrf.mxu0  ;;  %12029 = vst [vmem:[#allocation83_spill] sm:$0xff] %v10532_v12  ;;  %4703 = vmatpush.bf16.msra.mxu2 %v7430_v15  ;;  %v8241_v15 = vld [vmem:[#allocation4 + $0x4c4] sm:$0xf0] }
 0x2c7   : > { %12023 = vst [vmem:[#allocation41_spill] sm:$0xff] %v10524_v57 }
 0x2c8   : > { %12024 = vst [vmem:[#allocation44_spill] sm:$0xff] %v10526_v60  ;;  %v3277_v50 = vpop.f32.mrf.mxu2 }
 0x2c9   : > { %4665 = vmatmul.bf16.gmra.mxu0 %v10532_v12  ;;  %v10536_v40 = vadd.f32 %v10383_v45, %v3277_v50  ;;  %v7489_v45 = vld [vmem:[#allocation4 + $0x4c0] sm:$0xf] }
 0x2ca   : > { %v3514_v33 = vpop.f32.mrf.mxu1  ;;  %v10539_v57 = vpop.f32.mrf.mxu3  ;;  %v12032_v50 = vld [vmem:[#allocation43_spill] sm:$0xff]  ;;  %4704 = vmatpush.bf16.msra.mxu2 %v7422_v8  ;;  %v8239_v8 = vld [vmem:[#allocation4 + $0x4b4] sm:$0xf0] }
 0x2cb   : > { %v3515_v47 = vadd.f32 %v3514_v33, %v10391_v36  ;;  %v7490_v36 = vor.u32 %v8241_v15, %v7489_v45  ;;  %v7649_v33 = vld [vmem:[#allocation4 + $0x7f0] sm:$0xf] }
 0x2cc   : > { %v12033_v45 = vld [vmem:[#allocation85_spill] sm:$0xff] }
 0x2cd   : > { %v10546_v11 = vadd.f32 %v3515_v47, %v10441_v39  ;;  %4306 = vmatmul.bf16.vlgmr.msrb.gmra.mxu1 %v11979_v14  ;;  %7383 = vmatmul.msk.bf16.vlgmr.msrb.gmra.mxu2 %vm2372_vm10, %v12002_v27  ;;  %v8279_v47 = vld [vmem:[#allocation4 + $0x7f4] sm:$0xf0]  ;;  %v10563_v15 = vadd.f32 %v10349_v46, %v12033_v45  ;;  %v7641_v46 = vld [vmem:[#allocation4 + $0x7e0] sm:$0xf]  ;;  %v8277_v45 = vld [vmem:[#allocation4 + $0x7e4] sm:$0xf0] }
 0x2ce   : > { %v10548_v0 = vpop.f32.mrf.mxu0  ;;  %4674 = vmatpush.bf16.msra.mxu1 %v7490_v36  ;;  %v7650_v58 = vor.u32 %v8279_v47, %v7649_v33  ;;  %v8262_v33 = vld [vmem:[#allocation4 + $0x774] sm:$0xf]  ;;  %v12035_v47 = vld [vmem:[#allocation76_spill] sm:$0xff] }
 0x2cf   : > { %12030 = vst [vmem:[#allocation79_spill] sm:$0xff] %v10546_v11  ;;  %4737 = vmatmul.bf16.vlgmr.msrb.gmra.mxu3 %v12032_v50 }
 0x2d0   : > { %12031 = vst [vmem:[#allocation71_spill] sm:$0xff] %v10548_v0  ;;  %v3543_v1 = vpop.f32.mrf.mxu2  ;;  %5078 = vmatpush.bf16.msra.mxu3 %v7650_v58 }
 0x2d1   : > { %v3544_v7 = vadd.f32 %v3543_v1, %v10288_v55  ;;  %v7482_v1 = vor.u32 %v8239_v8, %v7481_v23 }
 0x2d2   : > { %v3516_v16 = vpop.f32.mrf.mxu1  ;;  %v10559_v27 = vpop.f32.mrf.mxu3 }
 0x2d3   : > { %v10556_v39 = vadd.f32 %v10394_v19, %v3544_v7  ;;  %v3517_v14 = vadd.f32 %v3516_v16, %v10403_v62  ;;  %v8220_v19 = vld [vmem:[#allocation4 + $0x424] sm:$0xf]  ;;  %v7411_v62 = vld [vmem:[#allocation4 + $0x428] sm:$0xf0]  ;;  %4675 = vmatpush.bf16.msra.mxu1 %v7482_v1  ;;  %v8275_v1 = vld [vmem:[#allocation4 + $0x7d4] sm:$0xf0] }
 0x2d4   : > { %v7414_v7 = vor.u32 %v8220_v19, %v7411_v62  ;;  %v7633_v19 = vld [vmem:[#allocation4 + $0x7d0] sm:$0xf] }
 0x2d5   : > { %v10566_v36 = vadd.f32 %v3517_v14, %v10473_v54  ;;  %v7642_v14 = vor.u32 %v8277_v45, %v7641_v46  ;;  %v12036_v62 = vld [vmem:[#allocation89_spill] sm:$0xff]  ;;  %v7473_v46 = vld [vmem:[#allocation4 + $0x4a0] sm:$0xf] }
 0x2d6   : > { %v10568_v55 = vpop.f32.mrf.mxu0  ;;  %4705 = vmatpush.bf16.msra.mxu2 %v7414_v7  ;;  %v7634_v7 = vor.u32 %v8275_v1, %v7633_v19  ;;  %v12039_v1 = vld [vmem:[#allocation52_spill] sm:$0xff] }
 0x2d7   : > { %12034 = vst [vmem:[#allocation80_spill] sm:$0xff] %v10566_v36  ;;  %v7587_v36 = vld [vmem:[#allocation4 + $0x778] sm:$0xf0]  ;;  %5079 = vmatpush.bf16.msra.mxu3 %v7642_v14  ;;  %v7625_v14 = vld [vmem:[#allocation4 + $0x7c0] sm:$0xf] }
 0x2d8   : > { %v3545_v16 = vpop.f32.mrf.mxu2  ;;  %v7590_v0 = vor.u32 %v8262_v33, %v7587_v36  ;;  %v8237_v33 = vld [vmem:[#allocation4 + $0x4a4] sm:$0xf0] }
 0x2d9   : > { %7519 = vmatmul.msk.bf16.vlgmr.msrb.gmra.mxu0 %vm2372_vm10, %v10161_v43  ;;  %v3546_v54 = vadd.f32 %v3545_v16, %v12035_v47  ;;  %v10581_v43 = vadd.f32 %v10363_v31, %v12036_v62  ;;  %v8218_v47 = vld [vmem:[#allocation4 + $0x414] sm:$0xf]  ;;  %v7403_v31 = vld [vmem:[#allocation4 + $0x418] sm:$0xf0] }
 0x2da   : > { %v3519_v11 = vpop.f32.mrf.mxu1  ;;  %v10577_v8 = vpop.f32.mrf.mxu3  ;;  %5107 = vmatpush.bf16.msra.mxu0 %v7590_v0  ;;  %v7474_v0 = vor.u32 %v8237_v33, %v7473_v46  ;;  %v7617_v33 = vld [vmem:[#allocation4 + $0x7b0] sm:$0xf] }
 0x2db   : > { %v10574_v58 = vadd.f32 %v10406_v24, %v3546_v54  ;;  %v3520_v23 = vadd.f32 %v3519_v11, %v10423_v48  ;;  %v12038_v24 = vld [vmem:[#allocation48_spill] sm:$0xff]  ;;  %v8260_v48 = vld [vmem:[#allocation4 + $0x764] sm:$0xf]  ;;  %5080 = vmatpush.bf16.msra.mxu3 %v7634_v7  ;;  %v7406_v54 = vor.u32 %v8218_v47, %v7403_v31  ;;  %v8271_v47 = vld [vmem:[#allocation4 + $0x7b4] sm:$0xf0] }
 0x2dc   : > { %v7579_v11 = vld [vmem:[#allocation4 + $0x768] sm:$0xf0]  ;;  %4676 = vmatpush.bf16.msra.mxu1 %v7474_v0  ;;  %v12041_v31 = vld [vmem:[#allocation77_spill] sm:$0xff] }
 0x2dd   : > { %v10584_v16 = vadd.f32 %v3520_v23, %v10497_v9  ;;  %4311 = vmatmul.bf16.gmra.mxu1 %v12038_v24  ;;  %7384 = vmatmul.msk.bf16.gmra.mxu2 %vm2372_vm10, %v10418_v34  ;;  %v7582_v45 = vor.u32 %v8260_v48, %v7579_v11  ;;  %v8273_v9 = vld [vmem:[#allocation4 + $0x7c4] sm:$0xf0]  ;;  %v8258_v23 = vld [vmem:[#allocation4 + $0x754] sm:$0xf] }
 0x2de   : > { %v10586_v36 = vpop.f32.mrf.mxu0  ;;  %v7626_v62 = vor.u32 %v8273_v9, %v7625_v14  ;;  %v12040_v34 = vld [vmem:[#allocation20_spill] sm:$0xff]  ;;  %4706 = vmatpush.bf16.msra.mxu2 %v7406_v54  ;;  %v7618_v14 = vor.u32 %v8271_v47, %v7617_v33  ;;  %v8235_v9 = vld [vmem:[#allocation4 + $0x494] sm:$0xf0] }
 0x2df   : > { %12037 = vst [vmem:[#allocation34_spill] sm:$0xff] %v10584_v16  ;;  %4742 = vmatmul.bf16.gmra.mxu3 %v12039_v1  ;;  %5108 = vmatpush.bf16.msra.mxu0 %v7582_v45  ;;  %v7571_v16 = vld [vmem:[#allocation4 + $0x758] sm:$0xf0]  ;;  %v10601_v45 = vadd.f32 %v10375_v35, %v12041_v31  ;;  %v7465_v54 = vld [vmem:[#allocation4 + $0x490] sm:$0xf] }
 0x2e0   : > { %v3548_v19 = vpop.f32.mrf.mxu2  ;;  %v7574_v48 = vor.u32 %v8258_v23, %v7571_v16  ;;  %5081 = vmatpush.bf16.msra.mxu3 %v7626_v62  ;;  %v8216_v23 = vld [vmem:[#allocation4 + $0x404] sm:$0xf]  ;;  %v7466_v62 = vor.u32 %v8235_v9, %v7465_v54  ;;  %v7555_v31 = vld [vmem:[#allocation4 + $0x738] sm:$0xf0] }
 0x2e1   : > { %v3549_v60 = vadd.f32 %v3548_v19, %v12040_v34  ;;  %v7395_v19 = vld [vmem:[#allocation4 + $0x408] sm:$0xf0] }
 0x2e2   : > { %v3521_v11 = vpop.f32.mrf.mxu1  ;;  %v10597_v46 = vpop.f32.mrf.mxu3  ;;  %v7398_v34 = vor.u32 %v8216_v23, %v7395_v19  ;;  %4677 = vmatpush.bf16.msra.mxu1 %v7466_v62  ;;  %v7601_v23 = vld [vmem:[#allocation4 + $0x790] sm:$0xf]  ;;  %v8267_v19 = vld [vmem:[#allocation4 + $0x794] sm:$0xf0] }
 0x2e3   : > { %v10594_v12 = vadd.f32 %v10426_v37, %v3549_v60  ;;  %v3522_v7 = vadd.f32 %v3521_v11, %v10437_v22  ;;  %5109 = vmatpush.bf16.msra.mxu0 %v7574_v48  ;;  %v8256_v37 = vld [vmem:[#allocation4 + $0x744] sm:$0xf]  ;;  %v7563_v60 = vld [vmem:[#allocation4 + $0x748] sm:$0xf0]  ;;  %v7609_v48 = vld [vmem:[#allocation4 + $0x7a0] sm:$0xf]  ;;  %v7602_v62 = vor.u32 %v8267_v19, %v7601_v23 }
 0x2e4   : > { %v7566_v22 = vor.u32 %v8256_v37, %v7563_v60  ;;  %5082 = vmatpush.bf16.msra.mxu3 %v7618_v14  ;;  %v8269_v11 = vld [vmem:[#allocation4 + $0x7a4] sm:$0xf0]  ;;  %4707 = vmatpush.bf16.msra.mxu2 %v7398_v34  ;;  %v8250_v23 = vld [vmem:[#allocation4 + $0x714] sm:$0xf] }
 0x2e5   : > { %v10604_v0 = vadd.f32 %v3522_v7, %v10521_v38  ;;  %v8254_v38 = vld [vmem:[#allocation4 + $0x734] sm:$0xf]  ;;  %v12043_v7 = vld [vmem:[#allocation31_spill] sm:$0xff]  ;;  %v7610_v47 = vor.u32 %v8269_v11, %v7609_v48 }
 0x2e6   : > { %v10606_v16 = vpop.f32.mrf.mxu0  ;;  %v7558_v60 = vor.u32 %v8254_v38, %v7555_v31  ;;  %v8233_v48 = vld [vmem:[#allocation4 + $0x484] sm:$0xf0]  ;;  %v8252_v11 = vld [vmem:[#allocation4 + $0x724] sm:$0xf] }
 0x2e7   : > { %12042 = vst [vmem:[#allocation82_spill] sm:$0xff] %v10604_v0  ;;  %5110 = vmatpush.bf16.msra.mxu0 %v7566_v22  ;;  %v12045_v0 = vld [vmem:[#allocation74_spill] sm:$0xff] }
 0x2e8   : > { %v3550_v35 = vpop.f32.mrf.mxu2  ;;  %5083 = vmatpush.bf16.msra.mxu3 %v7610_v47  ;;  %v3881_v22 = vshll.u32 %v12045_v0, 16  ;;  %v8263_v47 = vld [vmem:[#allocation4 + $0x774] sm:$0xf0] }
 0x2e9   : > { %7520 = vmatmul.msk.bf16.gmra.mxu0 %vm2372_vm10, %v10211_v30  ;;  %v3551_v33 = vadd.f32 %v3550_v35, %v12043_v7  ;;  %v3878_v30 = vshrl.u32 %v12045_v0, 16  ;;  %v7547_v7 = vld [vmem:[#allocation4 + $0x728] sm:$0xf0]  ;;  %v12047_v0 = vld [vmem:[#allocation17_spill] sm:$0xff] }
 0x2ea   : > { %v3524_v37 = vpop.f32.mrf.mxu1  ;;  %v10615_v9 = vpop.f32.mrf.mxu3  ;;  %v7550_v31 = vor.u32 %v8252_v11, %v7547_v7 }
 0x2eb   : > { %v10612_v14 = vadd.f32 %v10444_v3, %v3551_v33  ;;  %v3525_v54 = vadd.f32 %v3524_v37, %v10466_v51  ;;  %v2273_v3 = vld.sshfl [vmem:[#allocation1 + $0x20] sm:$0xff pattern:$0x73625140]  ;;  %v7457_v51 = vld [vmem:[#allocation4 + $0x480] sm:$0xf]  ;;  %5111 = vmatpush.bf16.msra.mxu0 %v7558_v60 }
 0x2ec   : > { %v7458_v38 = vor.u32 %v8233_v48, %v7457_v51  ;;  %v7585_v33 = vld [vmem:[#allocation4 + $0x770] sm:$0xf]  ;;  %5084 = vmatpush.bf16.msra.mxu3 %v7602_v62  ;;  %v7593_v37 = vld [vmem:[#allocation4 + $0x780] sm:$0xf]  ;;  %v10629_v51 = vpack.c.bf16 %v2273_v3, %v2273_v3  ;;  %v7531_v3 = vld [vmem:[#allocation4 + $0x708] sm:$0xf0] }
 0x2ed   : > { %12044 = vst [vmem:[#allocation84_spill] sm:$0xff] %v10612_v14  ;;  %v10620_v35 = vadd.f32 %v3525_v54, %v10543_v17  ;;  %4316 = vmatmul.bf16.gmra.mxu1 %v11992_v2  ;;  %7385 = vmatmul.msk.bf16.gmra.mxu2 %vm2372_vm10, %v10460_v44  ;;  %v7586_v17 = vor.u32 %v8263_v47, %v7585_v33  ;;  %v8265_v54 = vld [vmem:[#allocation4 + $0x784] sm:$0xf0]  ;;  %v3880_v33 = vrot.slane %v3878_v30, 4  ;;  %v3883_v47 = vrot.slane %v3881_v22, 5 }
 0x2ee   : > { %v10622_v34 = vpop.f32.mrf.mxu0  ;;  %4678 = vmatpush.bf16.msra.mxu1 %v7458_v38  ;;  %v7594_v44 = vor.u32 %v8265_v54, %v7593_v37  ;;  %12048 = vst [vmem:[#allocation12_spill] sm:$0xff] %v10629_v51 }
 0x2ef   : > { %12046 = vst [vmem:[#allocation13_spill] sm:$0xff] %v10620_v35  ;;  %4747 = vmatmul.bf16.gmra.mxu3 %v12047_v0  ;;  %v7539_v35 = vld [vmem:[#allocation4 + $0x718] sm:$0xf0]  ;;  %5049 = vmatpush.bf16.msrb.mxu2 %v7586_v17  ;;  %v8248_v17 = vld [vmem:[#allocation4 + $0x704] sm:$0xf]  ;;  %v3884_v37 = vor.u32 %v3883_v47, %v3880_v33 }
 0x2f0   : > { %v3553_v19 = vpop.f32.mrf.mxu2  ;;  %5112 = vmatpush.bf16.msra.mxu0 %v7550_v31  ;;  %v7542_v48 = vor.u32 %v8250_v23, %v7539_v35  ;;  %5085 = vmatpush.bf16.msra.mxu3 %v7594_v44  ;;  %v4813_v31 = vunpack.c.h.b16 %v10480_v41  ;;  %v7577_v35 = vld [vmem:[#allocation4 + $0x760] sm:$0xf] }
 0x2f1   : > { %v3554_v14 = vadd.f32 %v3553_v19, %v10342_v42 }
 0x2f2   : > { %v3526_v60 = vpop.f32.mrf.mxu1  ;;  %v10635_v7 = vpop.f32.mrf.mxu3  ;;  %v4815_v54 = vpack.c.b16 %v4813_v31, %v4813_v31 }
 0x2f3   : > { %v10632_v62 = vadd.f32 %v10469_v56, %v3554_v14  ;;  %v3527_v11 = vadd.f32 %v3526_v60, %v10487_v5  ;;  %v7534_v56 = vor.u32 %v8248_v17, %v7531_v3  ;;  %v8261_v14 = vld [vmem:[#allocation4 + $0x764] sm:$0xf0]  ;;  %v3887_v5 = vshll.u32 %v10629_v51, 16  ;;  %v8259_v17 = vld [vmem:[#allocation4 + $0x754] sm:$0xf0] }
 0x2f4   : > { %5113 = vmatpush.bf16.msra.mxu0 %v7542_v48  ;;  %v7578_v30 = vor.u32 %v8261_v14, %v7577_v35  ;;  %v4823_v23 = vsel %vm2385_vm8, %v4815_v54, 0  ;;  %v3885_v48 = vrot.slane %v3884_v37, 4 }
 0x2f5   : > { %v10638_v38 = vadd.f32 %v3527_v11, %v10563_v15  ;;  %4861 = vmatpush.bf16.msrb.mxu1 %v4823_v23  ;;  %v3889_v11 = vrot.slane %v3887_v5, 5 }
 0x2f6   : > { %v10640_v42 = vpop.f32.mrf.mxu0  ;;  %5050 = vmatpush.bf16.msrb.mxu2 %v7578_v30  ;;  %v7561_v30 = vld [vmem:[#allocation4 + $0x740] sm:$0xf] }
 0x2f8   : > { %v3555_v15 = vpop.f32.mrf.mxu2  ;;  %5114 = vmatpush.bf16.msra.mxu0 %v7534_v56  ;;  %v12051_v56 = vld [vmem:[#allocation24_spill] sm:$0xff] }
 0x2f9   : > { %7521 = vmatmul.msk.bf16.gmra.mxu0 %vm2372_vm10, %v10263_v52  ;;  %v3556_v22 = vadd.f32 %v3555_v15, %v10354_v63  ;;  %v7569_v63 = vld [vmem:[#allocation4 + $0x750] sm:$0xf]  ;;  %v8257_v15 = vld [vmem:[#allocation4 + $0x744] sm:$0xf0] }
 0x2fa   : > { %v3529_v19 = vpop.f32.mrf.mxu1  ;;  %v10652_v60 = vpop.f32.mrf.mxu3  ;;  %v7570_v31 = vor.u32 %v8259_v17, %v7569_v63  ;;  %v7562_v23 = vor.u32 %v8257_v15, %v7561_v30  ;;  %v8255_v17 = vld [vmem:[#allocation4 + $0x734] sm:$0xf0]  ;;  %v7741_v30 = vld [vmem:[#allocation4 + $0x270] sm:$0xf] }
 0x2fb   : > { %v10649_v41 = vadd.f32 %v10493_v21, %v3556_v22  ;;  %v3530_v44 = vadd.f32 %v3529_v19, %v10514_v59  ;;  %v12049_v21 = vunpack.c.h.b16 %v12025_v28  ;;  %v12050_v59 = vunpack.c.h.b16 %v12027_v10  ;;  %v12052_v19 = vld [vmem:[#allocation32_spill] sm:$0xff]  ;;  %v8295_v15 = vld [vmem:[#allocation4 + $0x274] sm:$0xf0] }
 0x2fc   : > { %5051 = vmatpush.bf16.msrb.mxu2 %v7570_v31 }
 0x2fd   : > { %v10655_v33 = vadd.f32 %v3530_v44, %v10581_v43  ;;  %4321 = vmatmul.bf16.gmra.mxu1 %v11996_v20  ;;  %7386 = vmatmul.msk.bf16.gmra.mxu2 %vm2372_vm10, %v10509_v26  ;;  %v10666_v3 = vpack.c.b16 %v12050_v59, %v12049_v21  ;;  %v3890_v43 = vsel %vm9429_vm13, %v3885_v48, %v3889_v11 }
 0x2fe   : > { %v10657_v47 = vpop.f32.mrf.mxu0  ;;  %v4809_v26 = vunpack.c.l.b16 %v3890_v43 }
 0x2ff   : > { %4752 = vmatmul.bf16.gmra.mxu3 %v10666_v3 }
 0x300   : > { %v3558_v35 = vpop.f32.mrf.mxu2  ;;  %v10684_v22 = vpack.c.b16 %v4809_v26, %v10489_v25  ;;  %5052 = vmatpush.bf16.msrb.mxu2 %v7562_v23  ;;  %v7553_v25 = vld [vmem:[#allocation4 + $0x730] sm:$0xf] }
 0x301   : > { %v3559_v14 = vadd.f32 %v3558_v35, %v12051_v56  ;;  %v7554_v21 = vor.u32 %v8255_v17, %v7553_v25  ;;  %v12054_v26 = vld [vmem:[#allocation49_spill] sm:$0xff]  ;;  %v12055_v23 = vld [vmem:[#allocation28_spill] sm:$0xff] }
 0x302   : > { %v3531_v37 = vpop.f32.mrf.mxu1  ;;  %v10676_v10 = vpop.f32.mrf.mxu3  ;;  %v12056_v17 = vld [vmem:[#allocation16_spill] sm:$0xff] }
 0x303   : > { %v10673_v5 = vadd.f32 %v10517_v13, %v3559_v14  ;;  %v3532_v28 = vadd.f32 %v3531_v37, %v10536_v40  ;;  %v8253_v14 = vld [vmem:[#allocation4 + $0x724] sm:$0xf0] }
 0x304   : > { %5053 = vmatpush.bf16.msrb.mxu2 %v7554_v21  ;;  %v7733_v21 = vld [vmem:[#allocation4 + $0x260] sm:$0xf] }
 0x305   : > { %v10679_v54 = vadd.f32 %v3532_v28, %v10601_v45 }
 0x306   : > { %v10681_v29 = vpop.f32.mrf.mxu0 }
 0x308   : > { %v3560_v13 = vpop.f32.mrf.mxu2 }
 0x309   : > { %7522 = vmatmul.msk.bf16.gmra.mxu0 %vm2372_vm10, %v10684_v22  ;;  %v3561_v40 = vadd.f32 %v3560_v13, %v12052_v19 }
 0x30a   : > { %v3999_v44 = vpop.f32.mrf.mxu1  ;;  %v10695_v11 = vpop.f32.mrf.mxu3 }
 0x30b   : > { %v10690_v48 = vadd.f32 %v10539_v57, %v3561_v40  ;;  %v10693_v45 = vadd.f32 %v10568_v55, %v3999_v44  ;;  %v12053_v57 = vld [vmem:[#allocation35_spill] sm:$0xff] }
 0x30d   : > { %4679 = vmatmul.bf16.vlgmr.msra.gmra.mxu1 %v12032_v50  ;;  %4708 = vmatmul.bf16.vlgmr.msra.gmra.mxu2 %v12005_v4  ;;  %v7545_v4 = vld [vmem:[#allocation4 + $0x720] sm:$0xf] }
 0x30e   : > { %v10697_v63 = vpop.f32.mrf.mxu0  ;;  %v7546_v37 = vor.u32 %v8253_v14, %v7545_v4  ;;  %v7725_v4 = vld [vmem:[#allocation4 + $0x250] sm:$0xf] }
 0x30f   : > { %5086 = vmatmul.bf16.vlgmr.msra.gmra.mxu3 %v12038_v24 }
 0x310   : > { %v4220_v59 = vpop.f32.mrf.mxu2  ;;  %5054 = vmatpush.bf16.msrb.mxu2 %v7546_v37 }
 0x311   : > { %v4221_v31 = vadd.f32 %v4220_v59, %v12053_v57  ;;  %v8293_v59 = vld [vmem:[#allocation4 + $0x264] sm:$0xf0]  ;;  %v7537_v57 = vld [vmem:[#allocation4 + $0x710] sm:$0xf] }
 0x312   : > { %v4001_v43 = vpop.f32.mrf.mxu1  ;;  %v10709_v56 = vpop.f32.mrf.mxu3 }
 0x313   : > { %v10704_v55 = vadd.f32 %v10559_v27, %v4221_v31  ;;  %v10707_v35 = vadd.f32 %v10586_v36, %v4001_v43  ;;  %v7742_v27 = vor.u32 %v8295_v15, %v7741_v30  ;;  %v7734_v31 = vor.u32 %v8293_v59, %v7733_v21  ;;  %v8251_v43 = vld [vmem:[#allocation4 + $0x714] sm:$0xf0] }
 0x314   : > { %v7538_v14 = vor.u32 %v8251_v43, %v7537_v57  ;;  %v8249_v57 = vld [vmem:[#allocation4 + $0x704] sm:$0xf0] }
 0x315   : > { %5604 = vmatpush.bf16.msrb.mxu0 %v7742_v27  ;;  %v7717_v27 = vld [vmem:[#allocation4 + $0x240] sm:$0xf] }
 0x316   : > { %v10711_v50 = vpop.f32.mrf.mxu0  ;;  %5055 = vmatpush.bf16.msrb.mxu2 %v7538_v14 }
 0x318   : > { %v4222_v28 = vpop.f32.mrf.mxu2 }
 0x319   : > { %5115 = vmatmul.bf16.vlgmr.msra.gmra.mxu0 %v12054_v26  ;;  %v4223_v13 = vadd.f32 %v4222_v28, %v12055_v23  ;;  %v12057_v28 = vld [vmem:[#allocation73_spill] sm:$0xff] }
 0x31a   : > { %v4004_v19 = vpop.f32.mrf.mxu1  ;;  %v10721_v44 = vpop.f32.mrf.mxu3  ;;  %5605 = vmatpush.bf16.msrb.mxu0 %v7734_v31 }
 0x31b   : > { %v10716_v36 = vadd.f32 %v10577_v8, %v4223_v13  ;;  %v10719_v40 = vadd.f32 %v10606_v16, %v4004_v19  ;;  %v8291_v8 = vld [vmem:[#allocation4 + $0x254] sm:$0xf0]  ;;  %v8289_v19 = vld [vmem:[#allocation4 + $0x244] sm:$0xf0] }
 0x31c   : > { %v7726_v16 = vor.u32 %v8291_v8, %v7725_v4  ;;  %v7718_v59 = vor.u32 %v8289_v19, %v7717_v27  ;;  %v7709_v4 = vld [vmem:[#allocation4 + $0x230] sm:$0xf]  ;;  %v8285_v27 = vld [vmem:[#allocation4 + $0x224] sm:$0xf0] }
 0x31d   : > { %4684 = vmatmul.bf16.gmra.mxu1 %v12039_v1  ;;  %4713 = vmatmul.bf16.gmra.mxu2 %v12056_v17  ;;  %v7529_v17 = vld [vmem:[#allocation4 + $0x700] sm:$0xf]  ;;  %v5318_v19 = vld [vmem:[#allocation6 + $0x10] sm:$0xff] }
 0x31e   : > { %v10723_v25 = vpop.f32.mrf.mxu0  ;;  %5606 = vmatpush.bf16.msrb.mxu0 %v7726_v16  ;;  %v7530_v31 = vor.u32 %v8249_v57, %v7529_v17  ;;  %v7693_v57 = vld [vmem:[#allocation4 + $0x210] sm:$0xf] }
 0x31f   : > { %5091 = vmatmul.bf16.gmra.mxu3 %v11992_v2 }
 0x320   : > { %v4225_v37 = vpop.f32.mrf.mxu2  ;;  %5056 = vmatpush.bf16.msrb.mxu2 %v7530_v31 }
 0x321   : > { %v4226_v30 = vadd.f32 %v4225_v37, %v12057_v28 }
 0x322   : > { %v4006_v15 = vpop.f32.mrf.mxu1  ;;  %v10735_v13 = vpop.f32.mrf.mxu3  ;;  %5607 = vmatpush.bf16.msrb.mxu0 %v7718_v59  ;;  %v5333_v59 = vunpack.c.h.b16 %v5318_v19 }
 0x323   : > { %v10730_v1 = vadd.f32 %v10597_v46, %v4226_v30  ;;  %v10733_v23 = vadd.f32 %v10622_v34, %v4006_v15  ;;  %v8287_v46 = vld [vmem:[#allocation4 + $0x234] sm:$0xf0] }
 0x324   : > { %v7710_v14 = vor.u32 %v8287_v46, %v7709_v4  ;;  %v12059_v30 = vld [vmem:[#allocation30_spill] sm:$0xff]  ;;  %v5335_v4 = vpack.c.b16 %v5333_v59, %v5333_v59 }
 0x325   : > { %v10751_v15 = vadd.f32 %v10556_v39, %v12059_v30  ;;  %v12060_v46 = vld [vmem:[#allocation22_spill] sm:$0xff] }
 0x326   : > { %v10737_v21 = vpop.f32.mrf.mxu0  ;;  %5608 = vmatpush.bf16.msrb.mxu0 %v7710_v14  ;;  %v5352_v14 = vsel %vm2385_vm8, %v5335_v4, 0  ;;  %v7651_v59 = vld [vmem:[#allocation4 + $0x7f8] sm:$0xf0] }
 0x327   : > { %5390 = vmatpush.bf16.msrb.mxu3 %v5352_v14  ;;  %v7643_v14 = vld [vmem:[#allocation4 + $0x7e8] sm:$0xf0] }
 0x328   : > { %v4227_v43 = vpop.f32.mrf.mxu2 }
 0x329   : > { %5120 = vmatmul.bf16.gmra.mxu0 %v11994_v53  ;;  %v4228_v8 = vadd.f32 %v4227_v43, %v10453_v61  ;;  %v7701_v61 = vld [vmem:[#allocation4 + $0x220] sm:$0xf] }
 0x32a   : > { %v4009_v34 = vpop.f32.mrf.mxu1  ;;  %v10747_v28 = vpop.f32.mrf.mxu3  ;;  %v7702_v17 = vor.u32 %v8285_v27, %v7701_v61 }
 0x32b   : > { %v10742_v37 = vadd.f32 %v10615_v9, %v4228_v8  ;;  %v10745_v16 = vadd.f32 %v10640_v42, %v4009_v34  ;;  %12058 = vst [vmem:[#allocation43_spill] sm:$0xff] %v10747_v28  ;;  %v5332_v9 = vunpack.c.l.b16 %v5318_v19  ;;  %v8283_v42 = vld [vmem:[#allocation4 + $0x214] sm:$0xf0] }
 0x32c   : > { %5609 = vmatpush.bf16.msrb.mxu0 %v7702_v17  ;;  %v7694_v30 = vor.u32 %v8283_v42, %v7693_v57  ;;  %v12062_v42 = vld [vmem:[#allocation72_spill] sm:$0xff] }
 0x32d   : > { %4689 = vmatmul.bf16.gmra.mxu1 %v12047_v0  ;;  %4718 = vmatmul.bf16.gmra.mxu2 %v12019_v32  ;;  %v5334_v39 = vpack.c.b16 %v5332_v9, %v5332_v9  ;;  %v10761_v32 = vadd.f32 %v10574_v58, %v12060_v46  ;;  %v8281_v58 = vld [vmem:[#allocation4 + $0x204] sm:$0xf0]  ;;  %v8278_v9 = vld [vmem:[#allocation4 + $0x7f4] sm:$0xf] }
 0x32e   : > { %v10755_v31 = vpop.f32.mrf.mxu0 }
 0x32f   : > { %5096 = vmatmul.bf16.gmra.mxu3 %v11996_v20  ;;  %v5349_v34 = vsel %vm2385_vm8, %v5334_v39, 0 }
 0x330   : > { %v4230_v43 = vpop.f32.mrf.mxu2  ;;  %5361 = vmatpush.bf16.msra.mxu2 %v5349_v34  ;;  %5610 = vmatpush.bf16.msrb.mxu0 %v7694_v30  ;;  %v8276_v34 = vld [vmem:[#allocation4 + $0x7e4] sm:$0xf] }
 0x331   : > { %v4231_v0 = vadd.f32 %v4230_v43, %v10478_v6  ;;  %v7685_v6 = vld [vmem:[#allocation4 + $0x200] sm:$0xf]  ;;  %v7654_v43 = vor.u32 %v8278_v9, %v7651_v59 }
 0x332   : > { %v4011_v8 = vpop.f32.mrf.mxu1  ;;  %v10771_v19 = vpop.f32.mrf.mxu3  ;;  %v7686_v17 = vor.u32 %v8281_v58, %v7685_v6  ;;  %v12065_v6 = vld [vmem:[#allocation56_spill] sm:$0xff] }
 0x333   : > { %v10766_v61 = vadd.f32 %v10635_v7, %v4231_v0  ;;  %v10769_v27 = vadd.f32 %v10657_v47, %v4011_v8  ;;  %12061 = vst [vmem:[#allocation85_spill] sm:$0xff] %v10771_v19  ;;  %5136 = vmatpush.bf16.msra.mxu1 %v7654_v43  ;;  %v10777_v47 = vadd.f32 %v10594_v12, %v12062_v42  ;;  %v12066_v58 = vld [vmem:[#allocation44_spill] sm:$0xff] }
 0x334   : > { %5611 = vmatpush.bf16.msrb.mxu0 %v7686_v17  ;;  %v7646_v12 = vor.u32 %v8276_v34, %v7643_v14  ;;  %v12068_v17 = vld [vmem:[#allocation84_spill] sm:$0xff]  ;;  %v12072_v14 = vld [vmem:[#allocation26_spill] sm:$0xff] }
 0x336   : > { %v10779_v39 = vpop.f32.mrf.mxu0 }
 0x337   : > { %5137 = vmatpush.bf16.msra.mxu1 %v7646_v12  ;;  %v7666_v12 = vrot.slane %v12072_v14, 9 }
 0x338   : > { %v4232_v57 = vpop.f32.mrf.mxu2 }
 0x339   : > { %5125 = vmatmul.bf16.gmra.mxu0 %v11999_v18  ;;  %v4233_v7 = vadd.f32 %v4232_v57, %v10502_v49  ;;  %v12064_v49 = vld [vmem:[#allocation83_spill] sm:$0xff] }
 0x33a   : > { %v4014_v4 = vpop.f32.mrf.mxu1  ;;  %v10787_v8 = vpop.f32.mrf.mxu3 }
 0x33b   : > { %v10782_v0 = vadd.f32 %v10652_v60, %v4233_v7  ;;  %v10785_v46 = vadd.f32 %v10681_v29, %v4014_v4  ;;  %12063 = vst [vmem:[#allocation76_spill] sm:$0xff] %v10787_v8  ;;  %v12067_v60 = vld [vmem:[#allocation15_spill] sm:$0xff]  ;;  %v12070_v7 = vld [vmem:[#allocation36_spill] sm:$0xff]  ;;  %v12086_v8 = vld [vmem:[#allocation37_spill] sm:$0xff] }
 0x33c   : > { %v10795_v59 = vadd.f32 %v12068_v17, %v12067_v60  ;;  %v5250_v42 = vrot.slane %v12070_v7, 5  ;;  %v12073_v17 = vld [vmem:[#allocation25_spill] sm:$0xff]  ;;  %v12076_v7 = vld [vmem:[#allocation71_spill] sm:$0xff]  ;;  %v5254_v19 = vrot.slane %v12086_v8, 5 }
 0x33d   : > { %4694 = vmatmul.bf16.gmra.mxu1 %v10666_v3  ;;  %4723 = vmatmul.bf16.gmra.mxu2 %v12064_v49  ;;  %v12071_v49 = vld [vmem:[#allocation27_spill] sm:$0xff]  ;;  %v7665_v51 = vrot.slane %v12073_v17, 9 }
 0x33e   : > { %v10806_v4 = vpop.f32.mrf.mxu0  ;;  %v5246_v34 = vrot.slane %v12071_v49, 5 }
 0x33f   : > { %5101 = vmatmul.bf16.gmra.mxu3 %v12065_v6  ;;  %v12077_v6 = vld [vmem:[#allocation75_spill] sm:$0xff] }
 0x340   : > { %v4235_v30 = vpop.f32.mrf.mxu2  ;;  %v5247_v49 = vsel %vm9783_vm0, %v7665_v51, %v5246_v34  ;;  %v10821_v14 = vadd.f32 %v10632_v62, %v12077_v6  ;;  %v8272_v51 = vld [vmem:[#allocation4 + $0x7c4] sm:$0xf]  ;;  %v7627_v62 = vld [vmem:[#allocation4 + $0x7c8] sm:$0xf0]  ;;  %v8310_v34 = vld [vmem:[#allocation4 + $0x2f4] sm:$0xf] }
 0x341   : > { %v4236_v9 = vadd.f32 %v4235_v30, %v12066_v58  ;;  %v8274_v30 = vld [vmem:[#allocation4 + $0x7d4] sm:$0xf]  ;;  %v7635_v58 = vld [vmem:[#allocation4 + $0x7d8] sm:$0xf0] }
 0x342   : > { %v4016_v29 = vpop.f32.mrf.mxu1  ;;  %v10803_v57 = vpop.f32.mrf.mxu3  ;;  %v7638_v60 = vor.u32 %v8274_v30, %v7635_v58 }
 0x343   : > { %v10798_v43 = vadd.f32 %v10676_v10, %v4236_v9  ;;  %v10801_v3 = vadd.f32 %v10697_v63, %v4016_v29  ;;  %12069 = vst [vmem:[#allocation89_spill] sm:$0xff] %v10803_v57  ;;  %v10813_v9 = vsel %vm9783_vm0, %v7666_v12, %v5250_v42  ;;  %v12075_v63 = vld [vmem:[#allocation57_spill] sm:$0xff] }
 0x344   : > { %5138 = vmatpush.bf16.msra.mxu1 %v7638_v60  ;;  %v11812_v58 = vunpack.c.l.b16 %v10813_v9  ;;  %v5319_v60 = vunpack.c.l.b16 %v5247_v49  ;;  %v7807_v49 = vld [vmem:[#allocation4 + $0x2f8] sm:$0xf0] }
 0x346   : > { %v10836_v6 = vpop.f32.mrf.mxu0 }
 0x348   : > { %v4237_v29 = vpop.f32.mrf.mxu2 }
 0x349   : > { %5130 = vmatmul.bf16.gmra.mxu0 %v12075_v63  ;;  %v4238_v57 = vadd.f32 %v4237_v29, %v12076_v7  ;;  %v12080_v7 = vld [vmem:[#allocation39_spill] sm:$0xff] }
 0x34a   : > { %v4307_v30 = vpop.f32.mrf.mxu1  ;;  %v10828_v12 = vpop.f32.mrf.mxu3 }
 0x34b   : > { %v10825_v17 = vadd.f32 %v10695_v11, %v4238_v57  ;;  %v4308_v42 = vadd.f32 %v4307_v30, %v10693_v45  ;;  %12078 = vst [vmem:[#allocation48_spill] sm:$0xff] %v10828_v12  ;;  %v10840_v11 = vpack.c.b16 %v11812_v58, %v5319_v60  ;;  %v7630_v45 = vor.u32 %v8272_v51, %v7627_v62  ;;  %v12082_v51 = vld [vmem:[#allocation33_spill] sm:$0xff] }
 0x34c   : > { %v7668_v62 = vrot.slane %v12082_v51, 9  ;;  %v8306_v51 = vld [vmem:[#allocation4 + $0x2d4] sm:$0xf] }
 0x34d   : > { %v10831_v29 = vadd.f32 %v4308_v42, %v10751_v15  ;;  %7523 = vmatmul.msk.bf16.vlgmr.msrb.gmra.mxu1 %vm2372_vm10, %v12080_v7  ;;  %5057 = vmatmul.bf16.vlgmr.msrb.gmra.mxu2 %v12054_v26  ;;  %v12081_v26 = vld [vmem:[#allocation78_spill] sm:$0xff]  ;;  %v7810_v7 = vor.u32 %v8310_v34, %v7807_v49  ;;  %v12088_v49 = vld [vmem:[#allocation21_spill] sm:$0xff] }
 0x34e   : > { %5139 = vmatpush.bf16.msra.mxu1 %v7630_v45  ;;  %v10849_v30 = vadd.f32 %v10649_v41, %v12081_v26  ;;  %v12085_v45 = vld [vmem:[#allocation29_spill] sm:$0xff]  ;;  %v7619_v26 = vld [vmem:[#allocation4 + $0x7b8] sm:$0xf0]  ;;  %v10865_v34 = vpop.f32.mrf.mxu0 }
 0x34f   : > { %12079 = vst [vmem:[#allocation52_spill] sm:$0xff] %v10831_v29  ;;  %7679 = vmatmul.msk.bf16.vlgmr.msrb.gmra.mxu3 %vm2372_vm10, %v10840_v11  ;;  %v12083_v29 = vld [vmem:[#allocation81_spill] sm:$0xff] }
 0x350   : > { %v4415_v57 = vpop.f32.mrf.mxu2  ;;  %v5258_v12 = vrot.slane %v12083_v29, 5  ;;  %5691 = vmatpush.bf16.msra.mxu3 %v7810_v7  ;;  %v8270_v41 = vld [vmem:[#allocation4 + $0x7b4] sm:$0xf] }
 0x351   : > { %v10845_v15 = vadd.f32 %v10711_v50, %v4415_v57  ;;  %v7667_v57 = vrot.slane %v12085_v45, 9  ;;  %v7622_v20 = vor.u32 %v8270_v41, %v7619_v26  ;;  %v7791_v45 = vld [vmem:[#allocation4 + $0x2d8] sm:$0xf0] }
 0x352   : > { %v4309_v42 = vpop.f32.mrf.mxu1  ;;  %v10852_v58 = vpop.f32.mrf.mxu3 }
 0x353   : > { %v4310_v60 = vadd.f32 %v4309_v42, %v10707_v35  ;;  %v10863_v35 = vsel %vm9783_vm0, %v7668_v62, %v5258_v12  ;;  %5140 = vmatpush.bf16.msra.mxu1 %v7622_v20  ;;  %v8308_v42 = vld [vmem:[#allocation4 + $0x2e4] sm:$0xf]  ;;  %v10873_v8 = vsel %vm9783_vm0, %v7667_v57, %v5254_v19  ;;  %v12089_v12 = vld [vmem:[#allocation18_spill] sm:$0xff] }
 0x354   : > { %12087 = vst [vmem:[#allocation77_spill] sm:$0xff] %v10863_v35  ;;  %v10877_v62 = vadd.f32 %v10673_v5, %v12089_v12  ;;  %v11814_v26 = vunpack.c.l.b16 %v10863_v35  ;;  %v12091_v57 = vld [vmem:[#allocation87_spill] sm:$0xff]  ;;  %v8302_v12 = vld [vmem:[#allocation4 + $0x2b4] sm:$0xf] }
 0x355   : > { %v10857_v50 = vadd.f32 %v4310_v60, %v10761_v32  ;;  %v7799_v32 = vld [vmem:[#allocation4 + $0x2e8] sm:$0xf0]  ;;  %v8268_v5 = vld [vmem:[#allocation4 + $0x7a4] sm:$0xf] }
 0x356   : > { %v7802_v60 = vor.u32 %v8308_v42, %v7799_v32  ;;  %v7611_v42 = vld [vmem:[#allocation4 + $0x7a8] sm:$0xf0]  ;;  %v8304_v32 = vld [vmem:[#allocation4 + $0x2c4] sm:$0xf] }
 0x357   : > { %12084 = vst [vmem:[#allocation20_spill] sm:$0xff] %v10857_v50 }
 0x358   : > { %v4417_v29 = vpop.f32.mrf.mxu2  ;;  %5692 = vmatpush.bf16.msra.mxu3 %v7802_v60  ;;  %v7614_v60 = vor.u32 %v8268_v5, %v7611_v42 }
 0x359   : > { %5612 = vmatmul.bf16.vlgmr.msrb.gmra.mxu0 %v12088_v49  ;;  %v10869_v7 = vadd.f32 %v10723_v25, %v4417_v29  ;;  %v7794_v25 = vor.u32 %v8306_v51, %v7791_v45  ;;  %v11815_v29 = vunpack.c.l.b16 %v10873_v8  ;;  %v7783_v51 = vld [vmem:[#allocation4 + $0x2c8] sm:$0xf0] }
 0x35a   : > { %v4312_v41 = vpop.f32.mrf.mxu1  ;;  %v10881_v50 = vpop.f32.mrf.mxu3  ;;  %v7786_v45 = vor.u32 %v8304_v32, %v7783_v51  ;;  %5141 = vmatpush.bf16.msra.mxu1 %v7614_v60  ;;  %v12094_v32 = vld [vmem:[#allocation46_spill] sm:$0xff] }
 0x35b   : > { %v4313_v20 = vadd.f32 %v4312_v41, %v10719_v40  ;;  %v10894_v40 = vpack.c.b16 %v11814_v26, %v11815_v29  ;;  %v7775_v41 = vld [vmem:[#allocation4 + $0x2b8] sm:$0xf0]  ;;  %v10905_v26 = vpop.f32.mrf.mxu0  ;;  %v5266_v51 = vrot.slane %v12094_v32, 5 }
 0x35c   : > { %5693 = vmatpush.bf16.msra.mxu3 %v7794_v25  ;;  %12093 = vst [vmem:[#allocation17_spill] sm:$0xff] %v10905_v26  ;;  %v7778_v60 = vor.u32 %v8302_v12, %v7775_v41  ;;  %v12098_v26 = vld [vmem:[#allocation38_spill] sm:$0xff]  ;;  %v7767_v12 = vld [vmem:[#allocation4 + $0x2a8] sm:$0xf0] }
 0x35d   : > { %v10885_v19 = vadd.f32 %v4313_v20, %v10777_v47  ;;  %7524 = vmatmul.msk.bf16.gmra.mxu1 %vm2372_vm10, %v12091_v57  ;;  %5062 = vmatmul.bf16.gmra.mxu2 %v11994_v53  ;;  %v12092_v20 = vld [vmem:[#allocation41_spill] sm:$0xff]  ;;  %v7669_v35 = vrot.slane %v12098_v26, 9  ;;  %v7759_v32 = vld [vmem:[#allocation4 + $0x298] sm:$0xf0] }
 0x35e   : > { %v10903_v57 = vadd.f32 %v10690_v48, %v12092_v20  ;;  %v8266_v48 = vld [vmem:[#allocation4 + $0x794] sm:$0xf]  ;;  %v7603_v20 = vld [vmem:[#allocation4 + $0x798] sm:$0xf0] }
 0x35f   : > { %12090 = vst [vmem:[#allocation31_spill] sm:$0xff] %v10885_v19  ;;  %7680 = vmatmul.msk.bf16.gmra.mxu3 %vm2372_vm10, %v10894_v40  ;;  %v12097_v19 = vld [vmem:[#allocation40_spill] sm:$0xff]  ;;  %v7606_v28 = vor.u32 %v8266_v48, %v7603_v20  ;;  %v8298_v26 = vld [vmem:[#allocation4 + $0x294] sm:$0xf] }
 0x360   : > { %v4420_v47 = vpop.f32.mrf.mxu2  ;;  %5694 = vmatpush.bf16.msra.mxu3 %v7786_v45  ;;  %v7670_v49 = vrot.slane %v12097_v19, 9 }
 0x361   : > { %v10899_v53 = vadd.f32 %v10737_v21, %v4420_v47  ;;  %v12096_v47 = vld [vmem:[#allocation42_spill] sm:$0xff]  ;;  %5142 = vmatpush.bf16.msra.mxu1 %v7606_v28 }
 0x362   : > { %v4314_v5 = vpop.f32.mrf.mxu1  ;;  %v10908_v42 = vpop.f32.mrf.mxu3  ;;  %v5262_v29 = vrot.slane %v12096_v47, 5  ;;  %v12100_v47 = vld [vmem:[#allocation79_spill] sm:$0xff] }
 0x363   : > { %v4315_v25 = vadd.f32 %v4314_v5, %v10733_v23  ;;  %v10919_v23 = vsel %vm9783_vm0, %v7670_v49, %v5266_v51  ;;  %v12099_v5 = vld [vmem:[#allocation54_spill] sm:$0xff]  ;;  %v10931_v49 = vadd.f32 %v10704_v55, %v12100_v47  ;;  %v10937_v20 = vpop.f32.mrf.mxu0  ;;  %v8264_v55 = vld [vmem:[#allocation4 + $0x784] sm:$0xf] }
 0x364   : > { %5695 = vmatpush.bf16.msra.mxu3 %v7778_v60  ;;  %v10927_v19 = vsel %vm9783_vm0, %v7669_v35, %v5262_v29  ;;  %v11817_v60 = vunpack.c.l.b16 %v10919_v23 }
 0x365   : > { %v10912_v21 = vadd.f32 %v4315_v25, %v10795_v59  ;;  %v8300_v59 = vld [vmem:[#allocation4 + $0x2a4] sm:$0xf]  ;;  %v11818_v35 = vunpack.c.l.b16 %v10927_v19 }
 0x366   : > { %v7770_v25 = vor.u32 %v8300_v59, %v7767_v12  ;;  %v8294_v59 = vld [vmem:[#allocation4 + $0x274] sm:$0xf] }
 0x367   : > { %12095 = vst [vmem:[#allocation24_spill] sm:$0xff] %v10912_v21  ;;  %v7735_v21 = vld [vmem:[#allocation4 + $0x268] sm:$0xf0] }
 0x368   : > { %v4422_v45 = vpop.f32.mrf.mxu2  ;;  %5696 = vmatpush.bf16.msra.mxu3 %v7770_v25  ;;  %v7743_v25 = vld [vmem:[#allocation4 + $0x278] sm:$0xf0] }
 0x369   : > { %5617 = vmatmul.bf16.gmra.mxu0 %v12099_v5  ;;  %v10923_v41 = vadd.f32 %v10755_v31, %v4422_v45  ;;  %v7762_v31 = vor.u32 %v8298_v26, %v7759_v32  ;;  %v7595_v45 = vld [vmem:[#allocation4 + $0x788] sm:$0xf0]  ;;  %v8296_v26 = vld [vmem:[#allocation4 + $0x284] sm:$0xf] }
 0x36a   : > { %v4317_v51 = vpop.f32.mrf.mxu1  ;;  %v10935_v48 = vpop.f32.mrf.mxu3  ;;  %v7598_v12 = vor.u32 %v8264_v55, %v7595_v45  ;;  %v7751_v32 = vld [vmem:[#allocation4 + $0x288] sm:$0xf0]  ;;  %v12102_v55 = vld [vmem:[#allocation47_spill] sm:$0xff] }
 0x36b   : > { %v4318_v28 = vadd.f32 %v4317_v51, %v10745_v16  ;;  %v10950_v16 = vpack.c.b16 %v11817_v60, %v11818_v35  ;;  %v7754_v47 = vor.u32 %v8296_v26, %v7751_v32  ;;  %v7672_v45 = vrot.slane %v12102_v55, 9  ;;  %v12103_v35 = vld [vmem:[#allocation86_spill] sm:$0xff]  ;;  %v12105_v26 = vld [vmem:[#allocation45_spill] sm:$0xff]  ;;  %v12107_v32 = vld [vmem:[#allocation88_spill] sm:$0xff] }
 0x36c   : > { %5697 = vmatpush.bf16.msra.mxu3 %v7762_v31  ;;  %5143 = vmatpush.bf16.msra.mxu1 %v7598_v12  ;;  %v5274_v31 = vrot.slane %v12103_v35, 5  ;;  %v7671_v12 = vrot.slane %v12105_v26, 9  ;;  %v8292_v55 = vld [vmem:[#allocation4 + $0x264] sm:$0xf] }
 0x36d   : > { %v10941_v29 = vadd.f32 %v4318_v28, %v10821_v14  ;;  %7525 = vmatmul.msk.bf16.gmra.mxu1 %vm2372_vm10, %v10263_v52  ;;  %5067 = vmatmul.bf16.gmra.mxu2 %v11999_v18  ;;  %v7746_v14 = vor.u32 %v8294_v59, %v7743_v25  ;;  %v12104_v59 = vld [vmem:[#allocation80_spill] sm:$0xff] }
 0x36e   : > { %v10964_v25 = vadd.f32 %v10716_v36, %v12104_v59  ;;  %v10978_v36 = vsel %vm9783_vm0, %v7672_v45, %v5274_v31  ;;  %v7738_v59 = vor.u32 %v8292_v55, %v7735_v21  ;;  %v8309_v55 = vld [vmem:[#allocation4 + $0x2e4] sm:$0xf0] }
 0x36f   : > { %12101 = vst [vmem:[#allocation32_spill] sm:$0xff] %v10941_v29  ;;  %7681 = vmatmul.msk.bf16.gmra.mxu3 %vm2372_vm10, %v10950_v16  ;;  %5662 = vmatpush.bf16.msrb.mxu2 %v7746_v14  ;;  %v5270_v14 = vrot.slane %v12107_v32, 5  ;;  %v10973_v29 = vpop.f32.mrf.mxu0 }
 0x370   : > { %v4425_v51 = vpop.f32.mrf.mxu2  ;;  %5698 = vmatpush.bf16.msra.mxu3 %v7754_v47 }
 0x371   : > { %v10955_v52 = vadd.f32 %v10779_v39, %v4425_v51  ;;  %v10971_v51 = vld [vmem:[#allocation6 + $0x28] sm:$0xff] }
 0x372   : > { %v4319_v18 = vpop.f32.mrf.mxu1  ;;  %v10958_v60 = vpop.f32.mrf.mxu3  ;;  %v5777_v35 = vunpack.c.l.b16 %v10971_v51 }
 0x373   : > { %v4320_v28 = vadd.f32 %v4319_v18, %v10769_v27  ;;  %v7805_v27 = vld [vmem:[#allocation4 + $0x2f0] sm:$0xf]  ;;  %v8311_v18 = vld [vmem:[#allocation4 + $0x2f4] sm:$0xf0]  ;;  %5663 = vmatpush.bf16.msrb.mxu2 %v7738_v59 }
 0x374   : > { %v7806_v47 = vor.u32 %v8311_v18, %v7805_v27  ;;  %v5779_v26 = vpack.c.b16 %v5777_v35, %v5777_v35  ;;  %v11819_v18 = vunpack.c.l.b16 %v10978_v36  ;;  %v12109_v35 = vld [vmem:[#allocation34_spill] sm:$0xff] }
 0x375   : > { %v10968_v39 = vadd.f32 %v4320_v28, %v10849_v30  ;;  %v12108_v30 = vld [vmem:[#allocation19_spill] sm:$0xff] }
 0x376   : > { %5633 = vmatpush.bf16.msrb.mxu1 %v7806_v47  ;;  %v5794_v45 = vsel %vm2385_vm8, %v5779_v26, 0  ;;  %v10995_v47 = vadd.f32 %v10730_v1, %v12109_v35  ;;  %v12110_v35 = vld [vmem:[#allocation82_spill] sm:$0xff] }
 0x377   : > { %12106 = vst [vmem:[#allocation35_spill] sm:$0xff] %v10968_v39  ;;  %v10986_v39 = vsel %vm9783_vm0, %v7671_v12, %v5270_v14  ;;  %5806 = vmatpush.bf16.msra.mxu0 %v5794_v45  ;;  %v7797_v14 = vld [vmem:[#allocation4 + $0x2e0] sm:$0xf] }
 0x378   : > { %v4427_v28 = vpop.f32.mrf.mxu2  ;;  %v7798_v1 = vor.u32 %v8309_v55, %v7797_v14  ;;  %v11022_v14 = vadd.f32 %v10742_v37, %v12110_v35  ;;  %v12112_v35 = vld [vmem:[#allocation13_spill] sm:$0xff] }
 0x379   : > { %5622 = vmatmul.bf16.gmra.mxu0 %v12108_v30  ;;  %v10982_v32 = vadd.f32 %v10806_v4, %v4427_v28  ;;  %v11820_v4 = vunpack.c.l.b16 %v10986_v39  ;;  %v7727_v28 = vld [vmem:[#allocation4 + $0x258] sm:$0xf0] }
 0x37a   : > { %v4322_v27 = vpop.f32.mrf.mxu1  ;;  %v10991_v31 = vpop.f32.mrf.mxu3  ;;  %5634 = vmatpush.bf16.msrb.mxu1 %v7798_v1 }
 0x37b   : > { %v4323_v21 = vadd.f32 %v4322_v27, %v10785_v46  ;;  %v8290_v46 = vld [vmem:[#allocation4 + $0x254] sm:$0xf]  ;;  %v11008_v59 = vpack.c.b16 %v11819_v18, %v11820_v4  ;;  %v11010_v27 = vpop.f32.mrf.mxu0  ;;  %v8288_v18 = vld [vmem:[#allocation4 + $0x244] sm:$0xf]  ;;  %v7719_v4 = vld [vmem:[#allocation4 + $0x248] sm:$0xf0] }
 0x37c   : > { %v7730_v26 = vor.u32 %v8290_v46, %v7727_v28  ;;  %v7789_v46 = vld [vmem:[#allocation4 + $0x2d0] sm:$0xf]  ;;  %v8307_v28 = vld [vmem:[#allocation4 + $0x2d4] sm:$0xf0] }
 0x37d   : > { %v10999_v12 = vadd.f32 %v4323_v21, %v10877_v62  ;;  %7526 = vmatmul.msk.bf16.gmra.mxu1 %vm2372_vm10, %v10684_v22  ;;  %5072 = vmatmul.bf16.gmra.mxu2 %v12075_v63  ;;  %v7790_v1 = vor.u32 %v8307_v28, %v7789_v46  ;;  %v11038_v46 = vadd.f32 %v10766_v61, %v12112_v35  ;;  %v8286_v28 = vld [vmem:[#allocation4 + $0x234] sm:$0xf]  ;;  %v7941_v35 = vld [vmem:[#allocation4 + $0x5f0] sm:$0xf] }
 0x37e   : > { %5664 = vmatpush.bf16.msrb.mxu2 %v7730_v26 }
 0x37f   : > { %7682 = vmatmul.msk.bf16.gmra.mxu3 %vm2372_vm10, %v11008_v59  ;;  %5635 = vmatpush.bf16.msrb.mxu1 %v7790_v1 }
 0x380   : > { %v4430_v62 = vpop.f32.mrf.mxu2 }
 0x381   : > { %v11015_v22 = vadd.f32 %v10836_v6, %v4430_v62  ;;  %v7722_v6 = vor.u32 %v8288_v18, %v7719_v4  ;;  %v12111_v62 = vld [vmem:[#allocation61_spill] sm:$0xff]  ;;  %v8305_v4 = vld [vmem:[#allocation4 + $0x2c4] sm:$0xf0] }
 0x382   : > { %v4324_v63 = vpop.f32.mrf.mxu1  ;;  %v11018_v21 = vpop.f32.mrf.mxu3 }
 0x383   : > { %v4325_v45 = vadd.f32 %v4324_v63, %v10801_v3  ;;  %5665 = vmatpush.bf16.msrb.mxu2 %v7722_v6  ;;  %v11031_v63 = vpop.f32.mrf.mxu0  ;;  %v7711_v6 = vld [vmem:[#allocation4 + $0x238] sm:$0xf0] }
 0x385   : > { %v11025_v55 = vadd.f32 %v4325_v45, %v10903_v57 }
 0x388   : > { %v4432_v26 = vpop.f32.mrf.mxu2 }
 0x389   : > { %5627 = vmatmul.bf16.gmra.mxu0 %v12111_v62  ;;  %v11029_v3 = vadd.f32 %v10865_v34, %v4432_v26  ;;  %v7781_v34 = vld [vmem:[#allocation4 + $0x2c0] sm:$0xf] }
 0x38a   : > { %v4680_v37 = vpop.f32.mrf.mxu1  ;;  %v11034_v45 = vpop.f32.mrf.mxu3  ;;  %v7782_v1 = vor.u32 %v8305_v4, %v7781_v34  ;;  %v11056_v34 = vadd.f32 %v10782_v0, %v10638_v38 }
 0x38b   : > { %v4681_v57 = vadd.f32 %v4680_v37, %v10845_v15  ;;  %v7714_v15 = vor.u32 %v8286_v28, %v7711_v6  ;;  %v12114_v37 = vld [vmem:[#allocation58_spill] sm:$0xff]  ;;  %v11058_v4 = vpop.f32.mrf.mxu0 }
 0x38c   : > { %5636 = vmatpush.bf16.msrb.mxu1 %v7782_v1  ;;  %v7773_v1 = vld [vmem:[#allocation4 + $0x2b0] sm:$0xf]  ;;  %v8303_v6 = vld [vmem:[#allocation4 + $0x2b4] sm:$0xf0] }
 0x38d   : > { %v11041_v18 = vadd.f32 %v4681_v57, %v10931_v49  ;;  %5144 = vmatmul.bf16.vlgmr.msra.gmra.mxu1 %v12038_v24  ;;  %7675 = vmatmul.msk.bf16.vlgmr.msra.gmra.mxu2 %vm2372_vm10, %v10840_v11 }
 0x38e   : > { %5666 = vmatpush.bf16.msrb.mxu2 %v7714_v15  ;;  %v12116_v15 = vunpack.c.l.b16 %v10813_v9 }
 0x38f   : > { %12113 = vst [vmem:[#allocation49_spill] sm:$0xff] %v11041_v18  ;;  %5699 = vmatmul.bf16.vlgmr.msra.gmra.mxu3 %v12114_v37  ;;  %v8343_v18 = vld [vmem:[#allocation4 + $0x5f4] sm:$0xf0] }
 0x390   : > { %v4709_v26 = vpop.f32.mrf.mxu2  ;;  %v7942_v28 = vor.u32 %v8343_v18, %v7941_v35  ;;  %v8341_v18 = vld [vmem:[#allocation4 + $0x5e4] sm:$0xf0] }
 0x391   : > { %v4710_v61 = vadd.f32 %v4709_v26, %v10709_v56 }
 0x392   : > { %v4682_v49 = vpop.f32.mrf.mxu1  ;;  %v11052_v11 = vpop.f32.mrf.mxu3  ;;  %6064 = vmatpush.bf16.msrb.mxu3 %v7942_v28 }
 0x393   : > { %v11049_v57 = vadd.f32 %v10852_v58, %v4710_v61  ;;  %v4683_v24 = vadd.f32 %v4682_v49, %v10869_v7  ;;  %v8284_v58 = vld [vmem:[#allocation4 + $0x224] sm:$0xf]  ;;  %v12117_v7 = vunpack.c.l.b16 %v10873_v8  ;;  %v7774_v61 = vor.u32 %v8303_v6, %v7773_v1  ;;  %v7703_v49 = vld [vmem:[#allocation4 + $0x228] sm:$0xf0] }
 0x394   : > { %v7706_v38 = vor.u32 %v8284_v58, %v7703_v49  ;;  %v7925_v58 = vld [vmem:[#allocation4 + $0x5d0] sm:$0xf] }
 0x395   : > { %v11061_v56 = vadd.f32 %v4683_v24, %v10964_v25  ;;  %v11067_v26 = vpack.c.b16 %v12117_v7, %v12116_v15  ;;  %5637 = vmatpush.bf16.msrb.mxu1 %v7774_v61  ;;  %v7933_v25 = vld [vmem:[#allocation4 + $0x5e0] sm:$0xf]  ;;  %v8326_v24 = vld [vmem:[#allocation4 + $0x574] sm:$0xf]  ;;  %v8339_v7 = vld [vmem:[#allocation4 + $0x5d4] sm:$0xf0]  ;;  %v11080_v61 = vadd.f32 %v10798_v43, %v10655_v33 }
 0x396   : > { %5667 = vmatpush.bf16.msrb.mxu2 %v7706_v38  ;;  %v7934_v9 = vor.u32 %v8341_v18, %v7933_v25  ;;  %v11088_v38 = vpop.f32.mrf.mxu0  ;;  %v8301_v25 = vld [vmem:[#allocation4 + $0x2a4] sm:$0xf0]  ;;  %v8282_v18 = vld [vmem:[#allocation4 + $0x214] sm:$0xf]  ;;  %v7695_v33 = vld [vmem:[#allocation4 + $0x218] sm:$0xf0] }
 0x397   : > { %12115 = vst [vmem:[#allocation28_spill] sm:$0xff] %v11061_v56  ;;  %v7879_v56 = vld [vmem:[#allocation4 + $0x578] sm:$0xf0] }
 0x398   : > { %v4711_v0 = vpop.f32.mrf.mxu2  ;;  %v7882_v15 = vor.u32 %v8326_v24, %v7879_v56  ;;  %6065 = vmatpush.bf16.msrb.mxu3 %v7934_v9  ;;  %v7765_v56 = vld [vmem:[#allocation4 + $0x2a0] sm:$0xf]  ;;  %v7698_v24 = vor.u32 %v8282_v18, %v7695_v33  ;;  %v8322_v9 = vld [vmem:[#allocation4 + $0x554] sm:$0xf]  ;;  %v8335_v18 = vld [vmem:[#allocation4 + $0x5b4] sm:$0xf0] }
 0x399   : > { %7811 = vmatmul.msk.bf16.vlgmr.msra.gmra.mxu0 %vm2372_vm10, %v11067_v26  ;;  %v4712_v35 = vadd.f32 %v4711_v0, %v10721_v44  ;;  %v7926_v44 = vor.u32 %v8339_v7, %v7925_v58  ;;  %v7766_v43 = vor.u32 %v8301_v25, %v7765_v56  ;;  %v7909_v25 = vld [vmem:[#allocation4 + $0x5b0] sm:$0xf] }
 0x39a   : > { %v4685_v8 = vpop.f32.mrf.mxu1  ;;  %v11076_v6 = vpop.f32.mrf.mxu3  ;;  %6093 = vmatpush.bf16.msrb.mxu0 %v7882_v15  ;;  %5668 = vmatpush.bf16.msrb.mxu2 %v7698_v24  ;;  %v7855_v24 = vld [vmem:[#allocation4 + $0x548] sm:$0xf0] }
 0x39b   : > { %v11073_v28 = vadd.f32 %v10881_v50, %v4712_v35  ;;  %v4686_v1 = vadd.f32 %v4685_v8, %v10899_v53  ;;  %v8324_v50 = vld [vmem:[#allocation4 + $0x564] sm:$0xf]  ;;  %v7871_v53 = vld [vmem:[#allocation4 + $0x568] sm:$0xf0]  ;;  %v7917_v35 = vld [vmem:[#allocation4 + $0x5c0] sm:$0xf]  ;;  %5638 = vmatpush.bf16.msrb.mxu1 %v7766_v43 }
 0x39c   : > { %v7874_v0 = vor.u32 %v8324_v50, %v7871_v53  ;;  %6066 = vmatpush.bf16.msrb.mxu3 %v7926_v44  ;;  %v8320_v43 = vld [vmem:[#allocation4 + $0x544] sm:$0xf] }
 0x39d   : > { %v11083_v49 = vadd.f32 %v4686_v1, %v10995_v47  ;;  %5149 = vmatmul.bf16.gmra.mxu1 %v11992_v2  ;;  %7676 = vmatmul.msk.bf16.gmra.mxu2 %vm2372_vm10, %v10894_v40  ;;  %v8337_v47 = vld [vmem:[#allocation4 + $0x5c4] sm:$0xf0]  ;;  %v7863_v1 = vld [vmem:[#allocation4 + $0x558] sm:$0xf0] }
 0x39e   : > { %v12118_v2 = vld [vmem:[#allocation60_spill] sm:$0xff]  ;;  %6094 = vmatpush.bf16.msrb.mxu0 %v7874_v0  ;;  %v7918_v15 = vor.u32 %v8337_v47, %v7917_v35  ;;  %v7866_v7 = vor.u32 %v8322_v9, %v7863_v1  ;;  %v11100_v0 = vadd.f32 %v10825_v17, %v10679_v54  ;;  %v12119_v35 = vld [vmem:[#allocation77_spill] sm:$0xff]  ;;  %v8280_v1 = vld [vmem:[#allocation4 + $0x204] sm:$0xf] }
 0x39f   : > { %5704 = vmatmul.bf16.gmra.mxu3 %v12118_v2  ;;  %v12120_v47 = vunpack.c.l.b16 %v12119_v35 }
 0x3a0   : > { %v4714_v8 = vpop.f32.mrf.mxu2  ;;  %6067 = vmatpush.bf16.msrb.mxu3 %v7918_v15  ;;  %v8299_v15 = vld [vmem:[#allocation4 + $0x294] sm:$0xf0] }
 0x3a1   : > { %v4715_v58 = vadd.f32 %v4714_v8, %v10735_v13  ;;  %v7910_v13 = vor.u32 %v8335_v18, %v7909_v25  ;;  %v7858_v8 = vor.u32 %v8320_v43, %v7855_v24  ;;  %v8318_v25 = vld [vmem:[#allocation4 + $0x534] sm:$0xf]  ;;  %v12122_v18 = vld [vmem:[#allocation43_spill] sm:$0xff]  ;;  %v7847_v24 = vld [vmem:[#allocation4 + $0x538] sm:$0xf0] }
 0x3a2   : > { %v4687_v50 = vpop.f32.mrf.mxu1  ;;  %v11096_v56 = vpop.f32.mrf.mxu3  ;;  %6095 = vmatpush.bf16.msrb.mxu0 %v7866_v7 }
 0x3a3   : > { %v11093_v53 = vadd.f32 %v10908_v42, %v4715_v58  ;;  %v4688_v44 = vadd.f32 %v4687_v50, %v10923_v41  ;;  %v7757_v42 = vld [vmem:[#allocation4 + $0x290] sm:$0xf]  ;;  %v12121_v41 = vunpack.c.l.b16 %v10927_v19  ;;  %v7687_v58 = vld [vmem:[#allocation4 + $0x208] sm:$0xf0]  ;;  %v11111_v7 = vpop.f32.mrf.mxu0  ;;  %v7901_v50 = vld [vmem:[#allocation4 + $0x5a0] sm:$0xf] }
 0x3a4   : > { %6068 = vmatpush.bf16.msrb.mxu3 %v7910_v13  ;;  %v7758_v54 = vor.u32 %v8299_v15, %v7757_v42  ;;  %v7690_v17 = vor.u32 %v8280_v1, %v7687_v58  ;;  %v7850_v13 = vor.u32 %v8318_v25, %v7847_v24  ;;  %v7893_v15 = vld [vmem:[#allocation4 + $0x590] sm:$0xf]  ;;  %v8331_v1 = vld [vmem:[#allocation4 + $0x594] sm:$0xf0]  ;;  %v8329_v24 = vld [vmem:[#allocation4 + $0x584] sm:$0xf0] }
 0x3a5   : > { %v11103_v33 = vadd.f32 %v4688_v44, %v11022_v14  ;;  %v11109_v9 = vpack.c.b16 %v12121_v41, %v12120_v47  ;;  %v8333_v44 = vld [vmem:[#allocation4 + $0x5a4] sm:$0xf0]  ;;  %v7894_v58 = vor.u32 %v8331_v1, %v7893_v15  ;;  %v8327_v25 = vld [vmem:[#allocation4 + $0x574] sm:$0xf0]  ;;  %v7831_v1 = vld [vmem:[#allocation4 + $0x518] sm:$0xf0] }
 0x3a6   : > { %6096 = vmatpush.bf16.msrb.mxu0 %v7858_v8  ;;  %5639 = vmatpush.bf16.msrb.mxu1 %v7758_v54  ;;  %v7902_v43 = vor.u32 %v8333_v44, %v7901_v50  ;;  %v12124_v8 = vld [vmem:[#allocation14_spill] sm:$0xff]  ;;  %v7877_v44 = vld [vmem:[#allocation4 + $0x570] sm:$0xf] }
 0x3a7   : > { %5669 = vmatpush.bf16.msrb.mxu2 %v7690_v17  ;;  %v7749_v54 = vld [vmem:[#allocation4 + $0x280] sm:$0xf]  ;;  %v8297_v17 = vld [vmem:[#allocation4 + $0x284] sm:$0xf0] }
 0x3a8   : > { %v4716_v14 = vpop.f32.mrf.mxu2  ;;  %6069 = vmatpush.bf16.msrb.mxu3 %v7902_v43  ;;  %v7750_v50 = vor.u32 %v8297_v17, %v7749_v54  ;;  %v7885_v43 = vld [vmem:[#allocation4 + $0x580] sm:$0xf] }
 0x3a9   : > { %7812 = vmatmul.msk.bf16.gmra.mxu0 %vm2372_vm10, %v11109_v9  ;;  %v4717_v19 = vadd.f32 %v4716_v14, %v12122_v18  ;;  %v7886_v15 = vor.u32 %v8329_v24, %v7885_v43  ;;  %v5778_v43 = vunpack.c.h.b16 %v10971_v51  ;;  %v12128_v24 = vunpack.c.l.b16 %v10919_v23 }
 0x3aa   : > { %v4690_v35 = vpop.f32.mrf.mxu1  ;;  %v11120_v41 = vpop.f32.mrf.mxu3  ;;  %6097 = vmatpush.bf16.msrb.mxu0 %v7850_v13  ;;  %5640 = vmatpush.bf16.msrb.mxu1 %v7750_v50  ;;  %v8312_v50 = vld [vmem:[#allocation4 + $0x504] sm:$0xf] }
 0x3ab   : > { %v11117_v42 = vadd.f32 %v10935_v48, %v4717_v19  ;;  %v4691_v47 = vadd.f32 %v4690_v35, %v10955_v52  ;;  %v8316_v48 = vld [vmem:[#allocation4 + $0x524] sm:$0xf]  ;;  %v7839_v52 = vld [vmem:[#allocation4 + $0x528] sm:$0xf0]  ;;  %v7878_v19 = vor.u32 %v8327_v25, %v7877_v44  ;;  %v5116_v13 = vpop.f32.mrf.mxu0 }
 0x3ac   : > { %6070 = vmatpush.bf16.msrb.mxu3 %v7894_v58  ;;  %v7842_v18 = vor.u32 %v8316_v48, %v7839_v52  ;;  %v7823_v25 = vld [vmem:[#allocation4 + $0x508] sm:$0xf0] }
 0x3ad   : > { %v11123_v14 = vadd.f32 %v4691_v47, %v11038_v46  ;;  %5154 = vmatmul.bf16.gmra.mxu1 %v12124_v8  ;;  %7677 = vmatmul.msk.bf16.gmra.mxu2 %vm2372_vm10, %v10950_v16  ;;  %v8314_v46 = vld [vmem:[#allocation4 + $0x514] sm:$0xf]  ;;  %v12125_v47 = vld [vmem:[#allocation62_spill] sm:$0xff] }
 0x3ae   : > { %v12126_v8 = vld [vmem:[#allocation85_spill] sm:$0xff]  ;;  %6035 = vmatpush.bf16.msra.mxu2 %v7878_v19  ;;  %6098 = vmatpush.bf16.msrb.mxu0 %v7842_v18  ;;  %v7834_v17 = vor.u32 %v8314_v46, %v7831_v1  ;;  %v7869_v19 = vld [vmem:[#allocation4 + $0x560] sm:$0xf]  ;;  %v12129_v18 = vunpack.c.l.b16 %v10986_v39 }
 0x3af   : > { %12123 = vst [vmem:[#allocation16_spill] sm:$0xff] %v11123_v14  ;;  %5709 = vmatmul.bf16.gmra.mxu3 %v12125_v47 }
 0x3b0   : > { %v4719_v35 = vpop.f32.mrf.mxu2  ;;  %6071 = vmatpush.bf16.msrb.mxu3 %v7886_v15  ;;  %v11144_v46 = vpack.c.b16 %v12129_v18, %v12128_v24  ;;  %v12130_v15 = vld [vmem:[#allocation76_spill] sm:$0xff] }
 0x3b1   : > { %v4720_v14 = vadd.f32 %v4719_v35, %v12126_v8  ;;  %v12134_v24 = vld [vmem:[#allocation56_spill] sm:$0xff] }
 0x3b2   : > { %v4692_v54 = vpop.f32.mrf.mxu1  ;;  %v11134_v52 = vpop.f32.mrf.mxu3  ;;  %6099 = vmatpush.bf16.msrb.mxu0 %v7834_v17  ;;  %v12131_v17 = vld [vmem:[#allocation50_spill] sm:$0xff]  ;;  %v7861_v18 = vld [vmem:[#allocation4 + $0x550] sm:$0xf] }
 0x3b3   : > { %v11131_v58 = vadd.f32 %v10958_v60, %v4720_v14  ;;  %v4693_v48 = vadd.f32 %v4692_v54, %v10982_v32  ;;  %v7826_v60 = vor.u32 %v8312_v50, %v7823_v25  ;;  %v8325_v32 = vld [vmem:[#allocation4 + $0x564] sm:$0xf0]  ;;  %v5780_v14 = vpack.c.b16 %v5778_v43, %v5778_v43  ;;  %v5118_v43 = vpop.f32.mrf.mxu0 }
 0x3b4   : > { %v7870_v35 = vor.u32 %v8325_v32, %v7869_v19  ;;  %v12132_v50 = vld [vmem:[#allocation51_spill] sm:$0xff] }
 0x3b5   : > { %v11137_v44 = vadd.f32 %v4693_v48, %v11056_v34  ;;  %v5797_v51 = vsel %vm2385_vm8, %v5780_v14, 0  ;;  %v7673_v48 = vrot.slane %v12131_v17, 9  ;;  %v5278_v25 = vrot.slane %v12132_v50, 5  ;;  %v12135_v14 = vld [vmem:[#allocation67_spill] sm:$0xff] }
 0x3b6   : > { %6036 = vmatpush.bf16.msra.mxu2 %v7870_v35  ;;  %6100 = vmatpush.bf16.msrb.mxu0 %v7826_v60  ;;  %v12136_v35 = vld [vmem:[#allocation89_spill] sm:$0xff]  ;;  %v7853_v17 = vld [vmem:[#allocation4 + $0x540] sm:$0xf] }
 0x3b7   : > { %12127 = vst [vmem:[#allocation73_spill] sm:$0xff] %v11137_v44  ;;  %5835 = vmatpush.bf16.msra.mxu1 %v5797_v51 }
 0x3b8   : > { %v4721_v34 = vpop.f32.mrf.mxu2 }
 0x3b9   : > { %7813 = vmatmul.msk.bf16.gmra.mxu0 %vm2372_vm10, %v11144_v46  ;;  %v4722_v1 = vadd.f32 %v4721_v34, %v12130_v15 }
 0x3ba   : > { %v4695_v8 = vpop.f32.mrf.mxu1  ;;  %v11154_v54 = vpop.f32.mrf.mxu3 }
 0x3bb   : > { %v11151_v23 = vadd.f32 %v10991_v31, %v4722_v1  ;;  %v4696_v39 = vadd.f32 %v4695_v8, %v11015_v22  ;;  %v8323_v31 = vld [vmem:[#allocation4 + $0x554] sm:$0xf0]  ;;  %v11166_v22 = vsel %vm9783_vm0, %v7673_v48, %v5278_v25  ;;  %v8321_v48 = vld [vmem:[#allocation4 + $0x544] sm:$0xf0]  ;;  %v5121_v50 = vpop.f32.mrf.mxu0  ;;  %v12138_v25 = vunpack.c.l.b16 %v10978_v36 }
 0x3bc   : > { %v7862_v60 = vor.u32 %v8323_v31, %v7861_v18  ;;  %v11821_v15 = vunpack.c.l.b16 %v11166_v22  ;;  %v7854_v18 = vor.u32 %v8321_v48, %v7853_v17  ;;  %v12140_v36 = vld [vmem:[#allocation21_spill] sm:$0xff] }
 0x3bd   : > { %v11159_v19 = vadd.f32 %v4696_v39, %v11080_v61  ;;  %5159 = vmatmul.bf16.gmra.mxu1 %v12134_v24  ;;  %7678 = vmatmul.msk.bf16.gmra.mxu2 %vm2372_vm10, %v11008_v59 }
 0x3be   : > { %6037 = vmatpush.bf16.msra.mxu2 %v7862_v60  ;;  %v11184_v24 = vpack.c.b16 %v11821_v15, %v12138_v25  ;;  %v12141_v25 = vld [vmem:[#allocation59_spill] sm:$0xff] }
 0x3bf   : > { %12133 = vst [vmem:[#allocation30_spill] sm:$0xff] %v11159_v19  ;;  %5714 = vmatmul.bf16.gmra.mxu3 %v12135_v14  ;;  %v12144_v15 = vld [vmem:[#allocation55_spill] sm:$0xff] }
 0x3c0   : > { %v4724_v32 = vpop.f32.mrf.mxu2 }
 0x3c1   : > { %v4725_v34 = vadd.f32 %v4724_v32, %v12136_v35 }
 0x3c2   : > { %v4697_v61 = vpop.f32.mrf.mxu1  ;;  %v11175_v8 = vpop.f32.mrf.mxu3  ;;  %6038 = vmatpush.bf16.msra.mxu2 %v7854_v18  ;;  %v12142_v18 = vld [vmem:[#allocation17_spill] sm:$0xff] }
 0x3c3   : > { %v11172_v1 = vadd.f32 %v11018_v21, %v4725_v34  ;;  %v4698_v51 = vadd.f32 %v4697_v61, %v11029_v3  ;;  %v12139_v3 = vld [vmem:[#allocation48_spill] sm:$0xff]  ;;  %v8319_v61 = vld [vmem:[#allocation4 + $0x534] sm:$0xf0]  ;;  %v5123_v17 = vpop.f32.mrf.mxu0 }
 0x3c4   : > { %v7845_v34 = vld [vmem:[#allocation4 + $0x530] sm:$0xf] }
 0x3c5   : > { %v11178_v39 = vadd.f32 %v4698_v51, %v11100_v0  ;;  %v7846_v51 = vor.u32 %v8319_v61, %v7845_v34  ;;  %v8013_v61 = vld [vmem:[#allocation4 + $0x870] sm:$0xf] }
 0x3c7   : > { %12137 = vst [vmem:[#allocation22_spill] sm:$0xff] %v11178_v39  ;;  %6039 = vmatpush.bf16.msra.mxu2 %v7846_v51  ;;  %v8359_v39 = vld [vmem:[#allocation4 + $0x874] sm:$0xf0] }
 0x3c8   : > { %v4726_v21 = vpop.f32.mrf.mxu2 }
 0x3c9   : > { %7814 = vmatmul.msk.bf16.gmra.mxu0 %vm2372_vm10, %v11184_v24  ;;  %v4727_v31 = vadd.f32 %v4726_v21, %v12139_v3 }
 0x3ca   : > { %v4863_v60 = vpop.f32.mrf.mxu1  ;;  %v11194_v35 = vpop.f32.mrf.mxu3 }
 0x3cb   : > { %v11190_v0 = vadd.f32 %v11034_v45, %v4727_v31  ;;  %v11192_v32 = vadd.f32 %v5116_v13, %v4863_v60  ;;  %v8317_v60 = vld [vmem:[#allocation4 + $0x524] sm:$0xf0] }
 0x3cd   : > { %5641 = vmatmul.bf16.vlgmr.msrb.gmra.mxu1 %v12114_v37  ;;  %5670 = vmatmul.bf16.vlgmr.msrb.gmra.mxu2 %v12140_v36  ;;  %v7837_v37 = vld [vmem:[#allocation4 + $0x520] sm:$0xf] }
 0x3ce   : > { %v7838_v36 = vor.u32 %v8317_v60, %v7837_v37  ;;  %v8357_v37 = vld [vmem:[#allocation4 + $0x864] sm:$0xf0]  ;;  %v7829_v60 = vld [vmem:[#allocation4 + $0x510] sm:$0xf] }
 0x3cf   : > { %6072 = vmatmul.bf16.vlgmr.msrb.gmra.mxu3 %v12141_v25 }
 0x3d0   : > { %v5058_v48 = vpop.f32.mrf.mxu2  ;;  %6040 = vmatpush.bf16.msra.mxu2 %v7838_v36 }
 0x3d1   : > { %v5059_v21 = vadd.f32 %v5058_v48, %v12142_v18  ;;  %v8014_v48 = vor.u32 %v8359_v39, %v8013_v61  ;;  %v5126_v18 = vpop.f32.mrf.mxu0  ;;  %v7997_v39 = vld [vmem:[#allocation4 + $0x850] sm:$0xf] }
 0x3d2   : > { %v4865_v45 = vpop.f32.mrf.mxu1  ;;  %v11205_v31 = vpop.f32.mrf.mxu3 }
 0x3d3   : > { %v11201_v13 = vadd.f32 %v11052_v11, %v5059_v21  ;;  %v11203_v3 = vadd.f32 %v5118_v43, %v4865_v45  ;;  %12143 = vst [vmem:[#allocation72_spill] sm:$0xff] %v11205_v31  ;;  %6442 = vmatpush.bf16.msra.mxu0 %v8014_v48  ;;  %v8005_v45 = vld [vmem:[#allocation4 + $0x860] sm:$0xf] }
 0x3d4   : > { %v8006_v36 = vor.u32 %v8357_v37, %v8005_v45  ;;  %v7989_v37 = vld [vmem:[#allocation4 + $0x840] sm:$0xf] }
 0x3d7   : > { %6443 = vmatpush.bf16.msra.mxu0 %v8006_v36 }
 0x3d8   : > { %v5060_v34 = vpop.f32.mrf.mxu2 }
 0x3d9   : > { %6101 = vmatmul.bf16.vlgmr.msrb.gmra.mxu0 %v12144_v15  ;;  %v5061_v51 = vadd.f32 %v5060_v34, %v10937_v20  ;;  %v8315_v20 = vld [vmem:[#allocation4 + $0x514] sm:$0xf0]  ;;  %v5128_v45 = vpop.f32.mrf.mxu0 }
 0x3da   : > { %v4868_v19 = vpop.f32.mrf.mxu1  ;;  %v11214_v21 = vpop.f32.mrf.mxu3  ;;  %v8355_v34 = vld [vmem:[#allocation4 + $0x854] sm:$0xf0]  ;;  %v7830_v61 = vor.u32 %v8315_v20, %v7829_v60  ;;  %v8353_v60 = vld [vmem:[#allocation4 + $0x844] sm:$0xf0]  ;;  %v7821_v20 = vld [vmem:[#allocation4 + $0x500] sm:$0xf] }
 0x3db   : > { %v11210_v11 = vadd.f32 %v11076_v6, %v5061_v51  ;;  %v11212_v43 = vadd.f32 %v5121_v50, %v4868_v19  ;;  %12145 = vst [vmem:[#allocation83_spill] sm:$0xff] %v11214_v21  ;;  %v12146_v6 = vld [vmem:[#allocation63_spill] sm:$0xff]  ;;  %v7998_v19 = vor.u32 %v8355_v34, %v7997_v39  ;;  %v12148_v39 = vld [vmem:[#allocation64_spill] sm:$0xff]  ;;  %v8351_v34 = vld [vmem:[#allocation4 + $0x834] sm:$0xf0] }
 0x3dc   : > { %6041 = vmatpush.bf16.msra.mxu2 %v7830_v61 }
 0x3dd   : > { %5646 = vmatmul.bf16.gmra.mxu1 %v12118_v2  ;;  %5675 = vmatmul.bf16.gmra.mxu2 %v12099_v5  ;;  %v7990_v2 = vor.u32 %v8353_v60, %v7989_v37  ;;  %v12150_v37 = vld [vmem:[#allocation52_spill] sm:$0xff]  ;;  %v6201_v60 = vld [vmem:[#allocation6 + $0x40] sm:$0xff] }
 0x3de   : > { %6444 = vmatpush.bf16.msra.mxu0 %v7998_v19 }
 0x3df   : > { %6077 = vmatmul.bf16.gmra.mxu3 %v12146_v6  ;;  %v8313_v6 = vld [vmem:[#allocation4 + $0x504] sm:$0xf0] }
 0x3e0   : > { %v5063_v44 = vpop.f32.mrf.mxu2  ;;  %v7822_v36 = vor.u32 %v8313_v6, %v7821_v20  ;;  %v11238_v6 = vadd.f32 %v11049_v57, %v12150_v37 }
 0x3e1   : > { %v5064_v50 = vadd.f32 %v5063_v44, %v10973_v29  ;;  %v7981_v44 = vld [vmem:[#allocation4 + $0x830] sm:$0xf]  ;;  %v5131_v20 = vpop.f32.mrf.mxu0 }
 0x3e2   : > { %v4870_v51 = vpop.f32.mrf.mxu1  ;;  %v11225_v31 = vpop.f32.mrf.mxu3  ;;  %6445 = vmatpush.bf16.msra.mxu0 %v7990_v2  ;;  %6042 = vmatpush.bf16.msra.mxu2 %v7822_v36  ;;  %v7982_v61 = vor.u32 %v8351_v34, %v7981_v44  ;;  %v8349_v2 = vld [vmem:[#allocation4 + $0x824] sm:$0xf0]  ;;  %v8347_v44 = vld [vmem:[#allocation4 + $0x814] sm:$0xf0] }
 0x3e3   : > { %v11221_v48 = vadd.f32 %v11096_v56, %v5064_v50  ;;  %v11223_v21 = vadd.f32 %v5123_v17, %v4870_v51  ;;  %12147 = vst [vmem:[#allocation44_spill] sm:$0xff] %v11225_v31 }
 0x3e6   : > { %6446 = vmatpush.bf16.msra.mxu0 %v7982_v61 }
 0x3e8   : > { %v5065_v29 = vpop.f32.mrf.mxu2 }
 0x3e9   : > { %6106 = vmatmul.bf16.gmra.mxu0 %v12148_v39  ;;  %v5066_v56 = vadd.f32 %v5065_v29, %v11010_v27  ;;  %v7973_v27 = vld [vmem:[#allocation4 + $0x820] sm:$0xf]  ;;  %v6206_v29 = vunpack.c.h.b16 %v6201_v60 }
 0x3ea   : > { %v4873_v17 = vpop.f32.mrf.mxu1  ;;  %v11234_v51 = vpop.f32.mrf.mxu3  ;;  %v7974_v36 = vor.u32 %v8349_v2, %v7973_v27 }
 0x3eb   : > { %v11230_v50 = vadd.f32 %v11120_v41, %v5066_v56  ;;  %v11232_v19 = vadd.f32 %v5126_v18, %v4873_v17  ;;  %12149 = vst [vmem:[#allocation15_spill] sm:$0xff] %v11234_v51  ;;  %v6205_v41 = vunpack.c.l.b16 %v6201_v60  ;;  %v7965_v18 = vld [vmem:[#allocation4 + $0x810] sm:$0xf]  ;;  %v6208_v57 = vpack.c.b16 %v6206_v29, %v6206_v29  ;;  %v8345_v29 = vld [vmem:[#allocation4 + $0x804] sm:$0xf0] }
 0x3ec   : > { %v12151_v56 = vld [vmem:[#allocation65_spill] sm:$0xff]  ;;  %v12152_v51 = vld [vmem:[#allocation20_spill] sm:$0xff]  ;;  %6447 = vmatpush.bf16.msra.mxu0 %v7974_v36  ;;  %v7966_v2 = vor.u32 %v8347_v44, %v7965_v18  ;;  %v7943_v36 = vld [vmem:[#allocation4 + $0x5f8] sm:$0xf0] }
 0x3ed   : > { %5651 = vmatmul.bf16.gmra.mxu1 %v12125_v47  ;;  %5680 = vmatmul.bf16.gmra.mxu2 %v12108_v30  ;;  %v6207_v17 = vpack.c.b16 %v6205_v41, %v6205_v41  ;;  %v11246_v31 = vadd.f32 %v11073_v28, %v12152_v51  ;;  %v6216_v27 = vsel %vm2385_vm8, %v6208_v57, 0  ;;  %v8342_v28 = vld [vmem:[#allocation4 + $0x5f4] sm:$0xf] }
 0x3ee   : > { %6254 = vmatpush.bf16.msra.mxu3 %v6216_v27  ;;  %v8340_v27 = vld [vmem:[#allocation4 + $0x5e4] sm:$0xf] }
 0x3ef   : > { %6082 = vmatmul.bf16.gmra.mxu3 %v12151_v56  ;;  %v6213_v61 = vsel %vm2385_vm8, %v6207_v17, 0  ;;  %v5133_v17 = vpop.f32.mrf.mxu0  ;;  %v12153_v56 = vld [vmem:[#allocation66_spill] sm:$0xff] }
 0x3f0   : > { %v5068_v34 = vpop.f32.mrf.mxu2  ;;  %6225 = vmatpush.bf16.msrb.mxu2 %v6213_v61  ;;  %6448 = vmatpush.bf16.msra.mxu0 %v7966_v2 }
 0x3f1   : > { %v5069_v37 = vadd.f32 %v5068_v34, %v11031_v63  ;;  %v7957_v63 = vld [vmem:[#allocation4 + $0x800] sm:$0xf]  ;;  %v7946_v34 = vor.u32 %v8342_v28, %v7943_v36  ;;  %v12156_v28 = vld [vmem:[#allocation24_spill] sm:$0xff] }
 0x3f2   : > { %v4875_v47 = vpop.f32.mrf.mxu1  ;;  %v11255_v41 = vpop.f32.mrf.mxu3  ;;  %v7958_v51 = vor.u32 %v8345_v29, %v7957_v63  ;;  %v12155_v29 = vld [vmem:[#allocation23_spill] sm:$0xff] }
 0x3f3   : > { %v11251_v60 = vadd.f32 %v11134_v52, %v5069_v37  ;;  %v11253_v25 = vadd.f32 %v5128_v45, %v4875_v47  ;;  %6122 = vmatpush.bf16.msrb.mxu1 %v7946_v34  ;;  %v12154_v47 = vld [vmem:[#allocation31_spill] sm:$0xff] }
 0x3f4   : > { %v11261_v45 = vadd.f32 %v11093_v53, %v12154_v47  ;;  %6449 = vmatpush.bf16.msra.mxu0 %v7958_v51  ;;  %v7927_v47 = vld [vmem:[#allocation4 + $0x5d8] sm:$0xf0] }
 0x3f8   : > { %v5070_v18 = vpop.f32.mrf.mxu2 }
 0x3f9   : > { %6111 = vmatmul.bf16.gmra.mxu0 %v12153_v56  ;;  %v5071_v52 = vadd.f32 %v5070_v18, %v11058_v4  ;;  %v7935_v4 = vld [vmem:[#allocation4 + $0x5e8] sm:$0xf0] }
 0x3fa   : > { %v4878_v44 = vpop.f32.mrf.mxu1  ;;  %v11268_v61 = vpop.f32.mrf.mxu3  ;;  %v7938_v2 = vor.u32 %v8340_v27, %v7935_v4  ;;  %v12157_v27 = vld [vmem:[#allocation68_spill] sm:$0xff] }
 0x3fb   : > { %v11264_v57 = vadd.f32 %v11154_v54, %v5071_v52  ;;  %v11266_v37 = vadd.f32 %v5131_v20, %v4878_v44  ;;  %v11276_v54 = vadd.f32 %v11117_v42, %v12156_v28  ;;  %v5613_v20 = vpop.f32.mrf.mxu0  ;;  %v8338_v52 = vld [vmem:[#allocation4 + $0x5d4] sm:$0xf]  ;;  %v12158_v42 = vld [vmem:[#allocation32_spill] sm:$0xff] }
 0x3fc   : > { %6123 = vmatpush.bf16.msrb.mxu1 %v7938_v2  ;;  %v7930_v44 = vor.u32 %v8338_v52, %v7927_v47  ;;  %v11289_v2 = vadd.f32 %v11131_v58, %v12158_v42  ;;  %v7919_v58 = vld [vmem:[#allocation4 + $0x5c8] sm:$0xf0] }
 0x3fd   : > { %5656 = vmatmul.bf16.gmra.mxu1 %v12135_v14  ;;  %5685 = vmatmul.bf16.gmra.mxu2 %v12111_v62 }
 0x3ff   : > { %6087 = vmatmul.bf16.gmra.mxu3 %v12155_v29 }
 0x400   : > { %v5073_v63 = vpop.f32.mrf.mxu2  ;;  %6124 = vmatpush.bf16.msrb.mxu1 %v7930_v44  ;;  %v8079_v44 = vld [vmem:[#allocation4 + $0x8f8] sm:$0xf0] }
 0x401   : > { %v5074_v53 = vadd.f32 %v5073_v63, %v11088_v38 }
 0x402   : > { %v4880_v51 = vpop.f32.mrf.mxu1  ;;  %v11283_v18 = vpop.f32.mrf.mxu3 }
 0x403   : > { %v11279_v36 = vadd.f32 %v11175_v8, %v5074_v53  ;;  %v11281_v34 = vadd.f32 %v5133_v17, %v4880_v51  ;;  %v5615_v28 = vpop.f32.mrf.mxu0 }
 0x408   : > { %v5075_v4 = vpop.f32.mrf.mxu2 }
 0x409   : > { %6116 = vmatmul.bf16.gmra.mxu0 %v12157_v27  ;;  %v5076_v38 = vadd.f32 %v5075_v4, %v11111_v7  ;;  %v8336_v7 = vld [vmem:[#allocation4 + $0x5c4] sm:$0xf] }
 0x40a   : > { %v5145_v63 = vpop.f32.mrf.mxu1  ;;  %v11295_v53 = vpop.f32.mrf.mxu3  ;;  %v7922_v52 = vor.u32 %v8336_v7, %v7919_v58  ;;  %v12159_v4 = vld [vmem:[#allocation35_spill] sm:$0xff]  ;;  %v7911_v7 = vld [vmem:[#allocation4 + $0x5b8] sm:$0xf0] }
 0x40b   : > { %v11292_v8 = vadd.f32 %v11194_v35, %v5076_v38  ;;  %v5146_v17 = vadd.f32 %v5145_v63, %v11192_v32  ;;  %v8374_v35 = vld [vmem:[#allocation4 + $0x8f4] sm:$0xf] }
 0x40c   : > { %6125 = vmatpush.bf16.msrb.mxu1 %v7922_v52 }
 0x40d   : > { %v11298_v51 = vadd.f32 %v5146_v17, %v11238_v6  ;;  %7815 = vmatmul.msk.bf16.vlgmr.msra.gmra.mxu1 %vm2372_vm10, %v11067_v26  ;;  %6043 = vmatmul.bf16.vlgmr.msra.gmra.mxu2 %v12144_v15  ;;  %v11309_v6 = vadd.f32 %v11151_v23, %v12159_v4  ;;  %v8082_v26 = vor.u32 %v8374_v35, %v8079_v44  ;;  %v8334_v17 = vld [vmem:[#allocation4 + $0x5b4] sm:$0xf]  ;;  %v8372_v23 = vld [vmem:[#allocation4 + $0x8e4] sm:$0xf]  ;;  %v8063_v44 = vld [vmem:[#allocation4 + $0x8d8] sm:$0xf0] }
 0x40e   : > { %v7914_v58 = vor.u32 %v8334_v17, %v7911_v7  ;;  %v7903_v7 = vld [vmem:[#allocation4 + $0x5a8] sm:$0xf0] }
 0x40f   : > { %7951 = vmatmul.msk.bf16.vlgmr.msra.gmra.mxu3 %vm2372_vm10, %v10894_v40 }
 0x410   : > { %v5363_v47 = vpop.f32.mrf.mxu2  ;;  %6529 = vmatpush.bf16.msrb.mxu3 %v8082_v26  ;;  %6126 = vmatpush.bf16.msrb.mxu1 %v7914_v58  ;;  %v8368_v58 = vld [vmem:[#allocation4 + $0x8c4] sm:$0xf] }
 0x411   : > { %v11305_v32 = vadd.f32 %v5613_v20, %v5363_v47  ;;  %v5618_v20 = vpop.f32.mrf.mxu0  ;;  %v8071_v47 = vld [vmem:[#allocation4 + $0x8e8] sm:$0xf0] }
 0x412   : > { %v5147_v38 = vpop.f32.mrf.mxu1  ;;  %v11312_v42 = vpop.f32.mrf.mxu3  ;;  %v8074_v35 = vor.u32 %v8372_v23, %v8071_v47 }
 0x413   : > { %v5148_v15 = vadd.f32 %v5147_v38, %v11203_v3  ;;  %v8370_v3 = vld [vmem:[#allocation4 + $0x8d4] sm:$0xf]  ;;  %v11322_v38 = vadd.f32 %v11172_v1, %v10999_v12  ;;  %v8055_v1 = vld [vmem:[#allocation4 + $0x8c8] sm:$0xf0] }
 0x414   : > { %6530 = vmatpush.bf16.msrb.mxu3 %v8074_v35  ;;  %v8058_v23 = vor.u32 %v8368_v58, %v8055_v1  ;;  %v8047_v35 = vld [vmem:[#allocation4 + $0x8b8] sm:$0xf0]  ;;  %v8362_v1 = vld [vmem:[#allocation4 + $0x894] sm:$0xf] }
 0x415   : > { %v11315_v63 = vadd.f32 %v5148_v15, %v11246_v31  ;;  %v8066_v15 = vor.u32 %v8370_v3, %v8063_v44 }
 0x418   : > { %v5365_v52 = vpop.f32.mrf.mxu2  ;;  %6531 = vmatpush.bf16.msrb.mxu3 %v8066_v15  ;;  %v8330_v15 = vld [vmem:[#allocation4 + $0x594] sm:$0xf] }
 0x419   : > { %6450 = vmatmul.bf16.vlgmr.msra.gmra.mxu0 %v12099_v5  ;;  %v11318_v4 = vadd.f32 %v5615_v28, %v5365_v52  ;;  %v8332_v28 = vld [vmem:[#allocation4 + $0x5a4] sm:$0xf] }
 0x41a   : > { %v5150_v31 = vpop.f32.mrf.mxu1  ;;  %v11331_v52 = vpop.f32.mrf.mxu3  ;;  %v7906_v12 = vor.u32 %v8332_v28, %v7903_v7  ;;  %v7895_v28 = vld [vmem:[#allocation4 + $0x598] sm:$0xf0] }
 0x41b   : > { %v5151_v26 = vadd.f32 %v5150_v31, %v11212_v43  ;;  %v5620_v43 = vpop.f32.mrf.mxu0  ;;  %v7898_v7 = vor.u32 %v8330_v15, %v7895_v28  ;;  %v7887_v15 = vld [vmem:[#allocation4 + $0x588] sm:$0xf0]  ;;  %v8358_v28 = vld [vmem:[#allocation4 + $0x874] sm:$0xf] }
 0x41c   : > { %6127 = vmatpush.bf16.msrb.mxu1 %v7906_v12  ;;  %6532 = vmatpush.bf16.msrb.mxu3 %v8058_v23  ;;  %v8031_v23 = vld [vmem:[#allocation4 + $0x898] sm:$0xf0] }
 0x41d   : > { %v11326_v17 = vadd.f32 %v5151_v26, %v11261_v45  ;;  %7816 = vmatmul.msk.bf16.gmra.mxu1 %vm2372_vm10, %v11109_v9  ;;  %6048 = vmatmul.bf16.gmra.mxu2 %v12148_v39  ;;  %v8366_v9 = vld [vmem:[#allocation4 + $0x8b4] sm:$0xf]  ;;  %v11339_v39 = vadd.f32 %v11190_v0, %v11025_v55  ;;  %v8364_v55 = vld [vmem:[#allocation4 + $0x8a4] sm:$0xf]  ;;  %v8039_v0 = vld [vmem:[#allocation4 + $0x8a8] sm:$0xf0] }
 0x41e   : > { %v8050_v31 = vor.u32 %v8366_v9, %v8047_v35 }
 0x41f   : > { %7952 = vmatmul.msk.bf16.gmra.mxu3 %vm2372_vm10, %v10950_v16 }
 0x420   : > { %v5368_v47 = vpop.f32.mrf.mxu2  ;;  %6533 = vmatpush.bf16.msrb.mxu3 %v8050_v31  ;;  %6128 = vmatpush.bf16.msrb.mxu1 %v7898_v7 }
 0x421   : > { %v11335_v45 = vadd.f32 %v5618_v20, %v5368_v47  ;;  %v12160_v47 = vld [vmem:[#allocation49_spill] sm:$0xff] }
 0x422   : > { %v5152_v3 = vpop.f32.mrf.mxu1  ;;  %v11345_v20 = vpop.f32.mrf.mxu3 }
 0x423   : > { %v5153_v44 = vadd.f32 %v5152_v3, %v11223_v21  ;;  %v8042_v21 = vor.u32 %v8364_v55, %v8039_v0  ;;  %v5623_v9 = vpop.f32.mrf.mxu0  ;;  %v8023_v55 = vld [vmem:[#allocation4 + $0x888] sm:$0xf0] }
 0x425   : > { %v11343_v26 = vadd.f32 %v5153_v44, %v11276_v54  ;;  %v11352_v54 = vadd.f32 %v11201_v13, %v12160_v47  ;;  %6534 = vmatpush.bf16.msrb.mxu3 %v8042_v21  ;;  %v8034_v44 = vor.u32 %v8362_v1, %v8031_v23  ;;  %v8015_v13 = vld [vmem:[#allocation4 + $0x878] sm:$0xf0] }
 0x426   : > { %v8018_v0 = vor.u32 %v8358_v28, %v8015_v13  ;;  %v12161_v23 = vld [vmem:[#allocation74_spill] sm:$0xff]  ;;  %v8356_v13 = vld [vmem:[#allocation4 + $0x864] sm:$0xf] }
 0x427   : > { %v7674_v47 = vrot.slane %v12161_v23, 9 }
 0x428   : > { %v5370_v58 = vpop.f32.mrf.mxu2  ;;  %6500 = vmatpush.bf16.msra.mxu2 %v8018_v0 }
 0x429   : > { %6455 = vmatmul.bf16.gmra.mxu0 %v12108_v30  ;;  %v11348_v12 = vadd.f32 %v5620_v43, %v5370_v58  ;;  %v8328_v43 = vld [vmem:[#allocation4 + $0x584] sm:$0xf]  ;;  %6535 = vmatpush.bf16.msrb.mxu3 %v8034_v44  ;;  %v12163_v44 = vld [vmem:[#allocation28_spill] sm:$0xff] }
 0x42a   : > { %v5155_v35 = vpop.f32.mrf.mxu1  ;;  %v7890_v7 = vor.u32 %v8328_v43, %v7887_v15  ;;  %v8360_v58 = vld [vmem:[#allocation4 + $0x884] sm:$0xf]  ;;  %v11372_v43 = vadd.f32 %v11210_v11, %v12163_v44 }
 0x42b   : > { %v5156_v3 = vadd.f32 %v5155_v35, %v11232_v19  ;;  %v8026_v19 = vor.u32 %v8360_v58, %v8023_v55  ;;  %v12162_v35 = vld [vmem:[#allocation12_spill] sm:$0xff]  ;;  %v5625_v15 = vpop.f32.mrf.mxu0 }
 0x42c   : > { %6129 = vmatpush.bf16.msrb.mxu1 %v7890_v7  ;;  %v8375_v7 = vld [vmem:[#allocation4 + $0x8f4] sm:$0xf0]  ;;  %v8007_v55 = vld [vmem:[#allocation4 + $0x868] sm:$0xf0] }
 0x42d   : > { %v11356_v31 = vadd.f32 %v5156_v3, %v11289_v2  ;;  %7817 = vmatmul.msk.bf16.gmra.mxu1 %vm2372_vm10, %v11144_v46  ;;  %6053 = vmatmul.bf16.gmra.mxu2 %v12153_v56  ;;  %v11365_v46 = vpop.f32.mrf.mxu3  ;;  %v5282_v3 = vrot.slane %v12162_v35, 5  ;;  %v8010_v0 = vor.u32 %v8356_v13, %v8007_v55  ;;  %v8373_v35 = vld [vmem:[#allocation4 + $0x8e4] sm:$0xf0]  ;;  %v11406_v13 = vadd.f32 %v11230_v50, %v11103_v33  ;;  %v8371_v55 = vld [vmem:[#allocation4 + $0x8d4] sm:$0xf0] }
 0x42e   : > { %6536 = vmatpush.bf16.msrb.mxu3 %v8026_v19 }
 0x42f   : > { %7953 = vmatmul.msk.bf16.gmra.mxu3 %vm2372_vm10, %v11008_v59  ;;  %6501 = vmatpush.bf16.msra.mxu2 %v8010_v0 }
 0x430   : > { %v5373_v21 = vpop.f32.mrf.mxu2 }
 0x431   : > { %v11363_v2 = vadd.f32 %v5623_v9, %v5373_v21  ;;  %v8077_v9 = vld [vmem:[#allocation4 + $0x8f0] sm:$0xf] }
 0x432   : > { %v5157_v56 = vpop.f32.mrf.mxu1  ;;  %v8078_v58 = vor.u32 %v8375_v7, %v8077_v9 }
 0x433   : > { %v5158_v1 = vadd.f32 %v5157_v56, %v11253_v25  ;;  %v5283_v25 = vsel %vm9783_vm0, %v7674_v47, %v5282_v3  ;;  %v8069_v47 = vld [vmem:[#allocation4 + $0x8e0] sm:$0xf]  ;;  %v8354_v3 = vld [vmem:[#allocation4 + $0x854] sm:$0xf]  ;;  %v5628_v44 = vpop.f32.mrf.mxu0 }
 0x434   : > { %6471 = vmatpush.bf16.msra.mxu1 %v8078_v58  ;;  %v6202_v56 = vunpack.c.l.b16 %v5283_v25  ;;  %v8061_v58 = vld [vmem:[#allocation4 + $0x8d0] sm:$0xf]  ;;  %v8352_v25 = vld [vmem:[#allocation4 + $0x844] sm:$0xf] }
 0x435   : > { %v11375_v28 = vadd.f32 %v5158_v1, %v11309_v6  ;;  %v11385_v1 = vadd.f32 %v11221_v48, %v11083_v49  ;;  %v11387_v23 = vpop.f32.mrf.mxu3  ;;  %v8070_v49 = vor.u32 %v8373_v35, %v8069_v47  ;;  %v7999_v48 = vld [vmem:[#allocation4 + $0x858] sm:$0xf0]  ;;  %v12165_v47 = vld [vmem:[#allocation69_spill] sm:$0xff] }
 0x436   : > { %v8002_v9 = vor.u32 %v8354_v3, %v7999_v48  ;;  %v8369_v48 = vld [vmem:[#allocation4 + $0x8c4] sm:$0xf0] }
 0x438   : > { %v5375_v19 = vpop.f32.mrf.mxu2  ;;  %6472 = vmatpush.bf16.msra.mxu1 %v8070_v49  ;;  %6502 = vmatpush.bf16.msra.mxu2 %v8002_v9  ;;  %v8053_v49 = vld [vmem:[#allocation4 + $0x8c0] sm:$0xf]  ;;  %v8350_v9 = vld [vmem:[#allocation4 + $0x834] sm:$0xf] }
 0x439   : > { %6460 = vmatmul.bf16.gmra.mxu0 %v12111_v62  ;;  %v11380_v21 = vadd.f32 %v5625_v15, %v5375_v19  ;;  %v8062_v19 = vor.u32 %v8371_v55, %v8061_v58  ;;  %v12168_v55 = vld [vmem:[#allocation60_spill] sm:$0xff] }
 0x43a   : > { %v5160_v11 = vpop.f32.mrf.mxu1 }
 0x43b   : > { %v5161_v6 = vadd.f32 %v5160_v11, %v11266_v37  ;;  %v12164_v37 = vunpack.c.l.b16 %v11166_v22  ;;  %v7991_v11 = vld [vmem:[#allocation4 + $0x848] sm:$0xf0] }
 0x43c   : > { %6473 = vmatpush.bf16.msra.mxu1 %v8062_v19 }
 0x43d   : > { %v11390_v10 = vadd.f32 %v5161_v6, %v11322_v38  ;;  %7818 = vmatmul.msk.bf16.gmra.mxu1 %vm2372_vm10, %v11184_v24  ;;  %6058 = vmatmul.bf16.gmra.mxu2 %v12157_v27  ;;  %v11397_v15 = vpack.c.b16 %v6202_v56, %v12164_v37  ;;  %v11411_v0 = vpop.f32.mrf.mxu3  ;;  %v7994_v56 = vor.u32 %v8352_v25, %v7991_v11  ;;  %v5630_v6 = vpop.f32.mrf.mxu0  ;;  %v12167_v37 = vld [vmem:[#allocation59_spill] sm:$0xff]  ;;  %v12170_v11 = vld [vmem:[#allocation73_spill] sm:$0xff] }
 0x43f   : > { %7954 = vmatmul.msk.bf16.gmra.mxu3 %vm2372_vm10, %v11397_v15  ;;  %6503 = vmatpush.bf16.msra.mxu2 %v7994_v56  ;;  %v11437_v56 = vadd.f32 %v11264_v57, %v12170_v11  ;;  %v8346_v11 = vld [vmem:[#allocation4 + $0x814] sm:$0xf] }
 0x440   : > { %v5378_v7 = vpop.f32.mrf.mxu2 }
 0x441   : > { %v11401_v38 = vadd.f32 %v5628_v44, %v5378_v7  ;;  %v8054_v7 = vor.u32 %v8369_v48, %v8053_v49 }
 0x442   : > { %v5162_v24 = vpop.f32.mrf.mxu1 }
 0x443   : > { %v5163_v27 = vadd.f32 %v5162_v24, %v11281_v34  ;;  %v7983_v24 = vld [vmem:[#allocation4 + $0x838] sm:$0xf0]  ;;  %6474 = vmatpush.bf16.msra.mxu1 %v8054_v7 }
 0x445   : > { %v11409_v22 = vadd.f32 %v5163_v27, %v11339_v39  ;;  %v12166_v39 = vld [vmem:[#allocation16_spill] sm:$0xff]  ;;  %v7986_v27 = vor.u32 %v8350_v9, %v7983_v24  ;;  %v11427_v58 = vpop.f32.mrf.mxu3  ;;  %v11442_v9 = vpop.f32.mrf.mxu0 }
 0x446   : > { %v11419_v3 = vadd.f32 %v11251_v60, %v12166_v39  ;;  %v12169_v60 = vld [vmem:[#allocation72_spill] sm:$0xff] }
 0x447   : > { %6504 = vmatpush.bf16.msra.mxu2 %v7986_v27  ;;  %v12172_v27 = vld [vmem:[#allocation30_spill] sm:$0xff] }
 0x448   : > { %v5380_v35 = vpop.f32.mrf.mxu2 }
 0x449   : > { %6465 = vmatmul.bf16.gmra.mxu0 %v12165_v47  ;;  %v11414_v34 = vadd.f32 %v5630_v6, %v5380_v35  ;;  %v8045_v35 = vld [vmem:[#allocation4 + $0x8b0] sm:$0xf] }
 0x44a   : > { %v5642_v33 = vpop.f32.mrf.mxu1 }
 0x44b   : > { %v5643_v50 = vadd.f32 %v5642_v33, %v11305_v32  ;;  %v8367_v33 = vld [vmem:[#allocation4 + $0x8b4] sm:$0xf0] }
 0x44c   : > { %v8046_v39 = vor.u32 %v8367_v33, %v8045_v35  ;;  %v7967_v33 = vld [vmem:[#allocation4 + $0x818] sm:$0xf0] }
 0x44d   : > { %v11422_v44 = vadd.f32 %v5643_v50, %v11352_v54  ;;  %6130 = vmatmul.bf16.vlgmr.msrb.gmra.mxu1 %v12167_v37  ;;  %7947 = vmatmul.msk.bf16.vlgmr.msrb.gmra.mxu2 %vm2372_vm10, %v10894_v40  ;;  %v8348_v50 = vld [vmem:[#allocation4 + $0x824] sm:$0xf]  ;;  %v7975_v37 = vld [vmem:[#allocation4 + $0x828] sm:$0xf0] }
 0x44e   : > { %v7978_v49 = vor.u32 %v8348_v50, %v7975_v37  ;;  %6475 = vmatpush.bf16.msra.mxu1 %v8046_v39  ;;  %v12174_v39 = vld [vmem:[#allocation62_spill] sm:$0xff]  ;;  %v11461_v37 = vpop.f32.mrf.mxu0 }
 0x44f   : > { %6537 = vmatmul.bf16.vlgmr.msrb.gmra.mxu3 %v12168_v55 }
 0x450   : > { %v5671_v32 = vpop.f32.mrf.mxu2  ;;  %6505 = vmatpush.bf16.msra.mxu2 %v7978_v49 }
 0x451   : > { %v5672_v54 = vadd.f32 %v5671_v32, %v12169_v60  ;;  %v5177_v32 = vadd.f32 %v11279_v36, %v12172_v27  ;;  %v8363_v27 = vld [vmem:[#allocation4 + $0x894] sm:$0xf0] }
 0x452   : > { %v5644_v25 = vpop.f32.mrf.mxu1 }
 0x453   : > { %v11432_v19 = vadd.f32 %v11312_v42, %v5672_v54  ;;  %v5645_v40 = vadd.f32 %v5644_v25, %v11318_v4  ;;  %v12171_v42 = vld [vmem:[#allocation83_spill] sm:$0xff]  ;;  %v11445_v4 = vpop.f32.mrf.mxu3 }
 0x454   : > { %v12173_v54 = vld [vmem:[#allocation63_spill] sm:$0xff] }
 0x455   : > { %v11440_v6 = vadd.f32 %v5645_v40, %v11372_v43  ;;  %v8037_v25 = vld [vmem:[#allocation4 + $0x8a0] sm:$0xf]  ;;  %v8365_v40 = vld [vmem:[#allocation4 + $0x8a4] sm:$0xf0] }
 0x456   : > { %v8038_v35 = vor.u32 %v8365_v40, %v8037_v25  ;;  %v7959_v40 = vld [vmem:[#allocation4 + $0x808] sm:$0xf0] }
 0x458   : > { %v5673_v48 = vpop.f32.mrf.mxu2  ;;  %6476 = vmatpush.bf16.msra.mxu1 %v8038_v35 }
 0x459   : > { %v5674_v7 = vadd.f32 %v5673_v48, %v12171_v42  ;;  %v12176_v48 = vld [vmem:[#allocation22_spill] sm:$0xff] }
 0x45a   : > { %v5647_v57 = vpop.f32.mrf.mxu1  ;;  %v5179_v42 = vadd.f32 %v11292_v8, %v12176_v48 }
 0x45b   : > { %v11448_v24 = vadd.f32 %v11331_v52, %v5674_v7  ;;  %v5648_v43 = vadd.f32 %v5647_v57, %v11335_v45  ;;  %v7970_v52 = vor.u32 %v8346_v11, %v7967_v33  ;;  %v12175_v45 = vld [vmem:[#allocation44_spill] sm:$0xff]  ;;  %v6073_v7 = vpop.f32.mrf.mxu3  ;;  %v12177_v33 = vld [vmem:[#allocation15_spill] sm:$0xff] }
 0x45d   : > { %v11454_v60 = vadd.f32 %v5648_v43, %v11385_v1  ;;  %6135 = vmatmul.bf16.gmra.mxu1 %v12173_v54  ;;  %7948 = vmatmul.msk.bf16.gmra.mxu2 %vm2372_vm10, %v10950_v16  ;;  %v8029_v43 = vld [vmem:[#allocation4 + $0x890] sm:$0xf]  ;;  %v8344_v54 = vld [vmem:[#allocation4 + $0x804] sm:$0xf] }
 0x45e   : > { %6506 = vmatpush.bf16.msra.mxu2 %v7970_v52  ;;  %v8030_v25 = vor.u32 %v8363_v27, %v8029_v43  ;;  %v7962_v11 = vor.u32 %v8344_v54, %v7959_v40 }
 0x45f   : > { %6542 = vmatmul.bf16.gmra.mxu3 %v12174_v39 }
 0x460   : > { %v5676_v50 = vpop.f32.mrf.mxu2  ;;  %6477 = vmatpush.bf16.msra.mxu1 %v8030_v25 }
 0x461   : > { %v5677_v36 = vadd.f32 %v5676_v50, %v12175_v45  ;;  %v5813_v50 = vpop.f32.mrf.mxu0  ;;  %v12178_v45 = vld [vmem:[#allocation65_spill] sm:$0xff] }
 0x462   : > { %v5649_v1 = vpop.f32.mrf.mxu1  ;;  %6507 = vmatpush.bf16.msra.mxu2 %v7962_v11 }
 0x463   : > { %v11464_v49 = vadd.f32 %v11345_v20, %v5677_v36  ;;  %v5650_v16 = vadd.f32 %v5649_v1, %v11348_v12  ;;  %v8021_v36 = vld [vmem:[#allocation4 + $0x880] sm:$0xf]  ;;  %v8361_v1 = vld [vmem:[#allocation4 + $0x884] sm:$0xf0] }
 0x464   : > { %v8022_v48 = vor.u32 %v8361_v1, %v8021_v36 }
 0x465   : > { %v11470_v57 = vadd.f32 %v5650_v16, %v11406_v13  ;;  %v6075_v16 = vpop.f32.mrf.mxu3 }
 0x466   : > { %6478 = vmatpush.bf16.msra.mxu1 %v8022_v48 }
 0x468   : > { %v5678_v35 = vpop.f32.mrf.mxu2 }
 0x469   : > { %v5679_v20 = vadd.f32 %v5678_v35, %v12177_v33 }
 0x46a   : > { %v5652_v52 = vpop.f32.mrf.mxu1 }
 0x46b   : > { %v11474_v12 = vadd.f32 %v11365_v46, %v5679_v20  ;;  %v5653_v8 = vadd.f32 %v5652_v52, %v11363_v2 }
 0x46d   : > { %v11478_v13 = vadd.f32 %v5653_v8, %v11419_v3  ;;  %6140 = vmatmul.bf16.gmra.mxu1 %v12178_v45  ;;  %7949 = vmatmul.msk.bf16.gmra.mxu2 %vm2372_vm10, %v11008_v59  ;;  %v5815_v59 = vpop.f32.mrf.mxu0  ;;  %v6078_v25 = vpop.f32.mrf.mxu3 }
 0x46f   : > { %6547 = vmatmul.bf16.gmra.mxu3 %v12135_v14 }
 0x470   : > { %v5681_v43 = vpop.f32.mrf.mxu2 }
 0x471   : > { %v5682_v46 = vadd.f32 %v5681_v43, %v11255_v41 }
 0x472   : > { %v5654_v2 = vpop.f32.mrf.mxu1 }
 0x473   : > { %v11486_v27 = vadd.f32 %v11387_v23, %v5682_v46  ;;  %v5655_v3 = vadd.f32 %v5654_v2, %v11380_v21  ;;  %v12179_v23 = vld [vmem:[#allocation70_spill] sm:$0xff] }
 0x475   : > { %v11490_v54 = vadd.f32 %v5655_v3, %v11437_v56  ;;  %v5818_v56 = vpop.f32.mrf.mxu0 }
 0x478   : > { %v5683_v40 = vpop.f32.mrf.mxu2 }
 0x479   : > { %v5684_v11 = vadd.f32 %v5683_v40, %v11268_v61  ;;  %v6080_v61 = vpop.f32.mrf.mxu3 }
 0x47a   : > { %v5657_v35 = vpop.f32.mrf.mxu1 }
 0x47b   : > { %v11494_v33 = vadd.f32 %v11411_v0, %v5684_v11  ;;  %v5658_v41 = vadd.f32 %v5657_v35, %v11401_v38 }
 0x47d   : > { %v11497_v20 = vadd.f32 %v5658_v41, %v5177_v32  ;;  %6145 = vmatmul.bf16.gmra.mxu1 %v12155_v29  ;;  %7950 = vmatmul.msk.bf16.gmra.mxu2 %vm2372_vm10, %v11397_v15  ;;  %v5820_v15 = vpop.f32.mrf.mxu0 }
 0x47f   : > { %6552 = vmatmul.bf16.gmra.mxu3 %v12179_v23 }
 0x480   : > { %v5686_v21 = vpop.f32.mrf.mxu2 }
 0x481   : > { %v5687_v52 = vadd.f32 %v5686_v21, %v11283_v18  ;;  %v6083_v48 = vpop.f32.mrf.mxu3 }
 0x482   : > { %v5659_v8 = vpop.f32.mrf.mxu1 }
 0x483   : > { %v11505_v0 = vadd.f32 %v11427_v58, %v5687_v52  ;;  %v5660_v38 = vadd.f32 %v5659_v8, %v11414_v34 }
 0x485   : > { %v11508_v32 = vadd.f32 %v5660_v38, %v5179_v42  ;;  %v5823_v42 = vpop.f32.mrf.mxu0 }
 0x488   : > { %v5688_v45 = vpop.f32.mrf.mxu2 }
 0x489   : > { %v5689_v29 = vadd.f32 %v5688_v45, %v11295_v53  ;;  %v6085_v46 = vpop.f32.mrf.mxu3 }
 0x48a   : > { %v5837_v36 = vpop.f32.mrf.mxu1 }
 0x48b   : > { %v11512_v1 = vadd.f32 %v11445_v4, %v5689_v29 }
 0x48d   : > { %6479 = vmatmul.bf16.vlgmr.msra.gmra.mxu1 %v12168_v55  ;;  %6508 = vmatmul.bf16.vlgmr.msra.gmra.mxu2 %v12099_v5  ;;  %v5825_v55 = vpop.f32.mrf.mxu0 }
 0x490   : > { %v6044_v18 = vpop.f32.mrf.mxu2 }
 0x491   : > { %v6045_v58 = vadd.f32 %v6044_v18, %v11442_v9  ;;  %v6088_v5 = vpop.f32.mrf.mxu3 }
 0x492   : > { %v5839_v43 = vpop.f32.mrf.mxu1 }
 0x493   : > { %v11517_v34 = vadd.f32 %v6073_v7, %v6045_v58 }
 0x495   : > { %v6102_v41 = vpop.f32.mrf.mxu0 }
 0x498   : > { %v6046_v2 = vpop.f32.mrf.mxu2 }
 0x499   : > { %v6047_v53 = vadd.f32 %v6046_v2, %v11461_v37  ;;  %v6090_v52 = vpop.f32.mrf.mxu3 }
 0x49a   : > { %v5842_v3 = vpop.f32.mrf.mxu1 }
 0x49b   : > { %v11520_v40 = vadd.f32 %v6075_v16, %v6047_v53  ;;  %v5721_v16 = vadd.f32 %v11432_v19, %v11298_v51  ;;  %v5725_v51 = vadd.f32 %v11464_v49, %v11326_v17 }
 0x49d   : > { %6484 = vmatmul.bf16.gmra.mxu1 %v12174_v39  ;;  %6513 = vmatmul.bf16.gmra.mxu2 %v12108_v30  ;;  %v6104_v38 = vpop.f32.mrf.mxu0 }
 0x4a0   : > { %v6049_v4 = vpop.f32.mrf.mxu2 }
 0x4a1   : > { %v6050_v11 = vadd.f32 %v6049_v4, %v5813_v50  ;;  %v5723_v50 = vadd.f32 %v11448_v24, %v11315_v63 }
 0x4a2   : > { %v5844_v9 = vpop.f32.mrf.mxu1 }
 0x4a3   : > { %v11524_v35 = vadd.f32 %v6078_v25, %v6050_v11 }
 0x4a8   : > { %v6051_v7 = vpop.f32.mrf.mxu2 }
 0x4a9   : > { %v6052_v21 = vadd.f32 %v6051_v7, %v5815_v59  ;;  %v11536_v59 = vpop.f32.mrf.mxu3 }
 0x4aa   : > { %v5847_v8 = vpop.f32.mrf.mxu1 }
 0x4ab   : > { %v11526_v37 = vadd.f32 %v6080_v61, %v6052_v21 }
 0x4ad   : > { %6489 = vmatmul.bf16.gmra.mxu1 %v12135_v14  ;;  %6518 = vmatmul.bf16.gmra.mxu2 %v12111_v62  ;;  %v6107_v62 = vpop.f32.mrf.mxu0 }
 0x4b0   : > { %v6054_v30 = vpop.f32.mrf.mxu2 }
 0x4b1   : > { %v6055_v39 = vadd.f32 %v6054_v30, %v5818_v56  ;;  %v11544_v63 = vpop.f32.mrf.mxu3 }
 0x4b2   : > { %v5849_v25 = vpop.f32.mrf.mxu1 }
 0x4b3   : > { %v11534_v45 = vadd.f32 %v6083_v48, %v6055_v39  ;;  %v5727_v48 = vadd.f32 %v11474_v12, %v11343_v26  ;;  %v6105_v12 = vadd.f32 %v6104_v38, %v5839_v43 }
 0x4b5   : > { %v6109_v58 = vpop.f32.mrf.mxu0 }
 0x4b8   : > { %v6056_v61 = vpop.f32.mrf.mxu2 }
 0x4b9   : > { %v6057_v29 = vadd.f32 %v6056_v61, %v5820_v15  ;;  %v11550_v17 = vpop.f32.mrf.mxu3 }
 0x4ba   : > { %v5852_v19 = vpop.f32.mrf.mxu1 }
 0x4bb   : > { %v11540_v14 = vadd.f32 %v6085_v46, %v6057_v29  ;;  %v6103_v46 = vadd.f32 %v6102_v41, %v5837_v36 }
 0x4bd   : > { %6494 = vmatmul.bf16.gmra.mxu1 %v12179_v23  ;;  %6523 = vmatmul.bf16.gmra.mxu2 %v12165_v47  ;;  %v5729_v23 = vadd.f32 %v11486_v27, %v11356_v31  ;;  %v6112_v26 = vpop.f32.mrf.mxu0  ;;  %v6108_v31 = vadd.f32 %v6107_v62, %v5842_v3  ;;  %v5733_v27 = vadd.f32 %v11505_v0, %v11390_v10 }
 0x4be   : > { %v6113_v0 = vadd.f32 %v6112_v26, %v5847_v8 }
 0x4c0   : > { %v6059_v24 = vpop.f32.mrf.mxu2 }
 0x4c1   : > { %v6060_v56 = vadd.f32 %v6059_v24, %v5823_v42  ;;  %v11560_v7 = vpop.f32.mrf.mxu3 }
 0x4c2   : > { %v5854_v18 = vpop.f32.mrf.mxu1 }
 0x4c3   : > { %v11548_v15 = vadd.f32 %v6088_v5, %v6060_v56  ;;  %v5731_v5 = vadd.f32 %v11494_v33, %v11375_v28  ;;  %v6110_v28 = vadd.f32 %v6109_v58, %v5844_v9  ;;  %v5735_v33 = vadd.f32 %v11512_v1, %v11409_v22 }
 0x4c8   : > { %v6061_v49 = vpop.f32.mrf.mxu2 }
 0x4c9   : > { %v6062_v2 = vadd.f32 %v6061_v49, %v5825_v55  ;;  %v11566_v39 = vpop.f32.mrf.mxu3 }
 0x4ca   : > { %v6131_v47 = vpop.f32.mrf.mxu1 }
 0x4cb   : > { %v11554_v53 = vadd.f32 %v6090_v52, %v6062_v2  ;;  %v6132_v4 = vadd.f32 %v6131_v47, %v6103_v46 }
 0x4cd   : > { %v11556_v42 = vadd.f32 %v6132_v4, %v5721_v16  ;;  %v6114_v16 = vpop.f32.mrf.mxu0 }
 0x4ce   : > { %v6115_v1 = vadd.f32 %v6114_v16, %v5849_v25 }
 0x4d0   : > { %v6227_v11 = vpop.f32.mrf.mxu2 }
 0x4d1   : > { %v11576_v62 = vpop.f32.mrf.mxu3 }
 0x4d2   : > { %v6133_v21 = vpop.f32.mrf.mxu1 }
 0x4d3   : > { %v6134_v36 = vadd.f32 %v6133_v21, %v6105_v12  ;;  %v6153_v12 = vadd.f32 %v11520_v40, %v11440_v6  ;;  %v6157_v6 = vadd.f32 %v11526_v37, %v11470_v57  ;;  %v6159_v57 = vadd.f32 %v11534_v45, %v11478_v13 }
 0x4d5   : > { %v11562_v55 = vadd.f32 %v6134_v36, %v5723_v50  ;;  %v6117_v29 = vpop.f32.mrf.mxu0 }
 0x4d6   : > { %v6118_v4 = vadd.f32 %v6117_v29, %v5852_v19  ;;  %v6155_v19 = vadd.f32 %v11524_v35, %v11454_v60 }
 0x4d8   : > { %v6229_v41 = vpop.f32.mrf.mxu2 }
 0x4d9   : > { %v11584_v58 = vpop.f32.mrf.mxu3 }
 0x4da   : > { %v6136_v52 = vpop.f32.mrf.mxu1 }
 0x4db   : > { %v6137_v30 = vadd.f32 %v6136_v52, %v6108_v31 }
 0x4dd   : > { %v11568_v43 = vadd.f32 %v6137_v30, %v5725_v51  ;;  %v6151_v51 = vadd.f32 %v11517_v34, %v11422_v44  ;;  %v6119_v9 = vpop.f32.mrf.mxu0 }
 0x4de   : > { %v6120_v25 = vadd.f32 %v6119_v9, %v5854_v18  ;;  %v6574_v18 = vld [vmem:[#allocation7] sm:$0x3] }
 0x4df   : > { %v11611_v9 = vperm.slane %v6574_v18, 1 }
 0x4e0   : > { %v11570_v38 = vpop.f32.mrf.mxu2 }
 0x4e1   : > { %v11592_v26 = vpop.f32.mrf.mxu3 }
 0x4e2   : > { %v6138_v50 = vpop.f32.mrf.mxu1 }
 0x4e3   : > { %v6139_v61 = vadd.f32 %v6138_v50, %v6110_v28 }
 0x4e5   : > { %v11574_v3 = vadd.f32 %v6139_v61, %v5727_v48  ;;  %v6451_v8 = vpop.f32.mrf.mxu0 }
 0x4e6   : > { %v6452_v28 = vadd.f32 %v6451_v8, %v6227_v11 }
 0x4e8   : > { %v11578_v10 = vpop.f32.mrf.mxu2 }
 0x4e9   : > { %v6538_v52 = vpop.f32.mrf.mxu3 }
 0x4ea   : > { %v6141_v24 = vpop.f32.mrf.mxu1 }
 0x4eb   : > { %v6142_v56 = vadd.f32 %v6141_v24, %v6113_v0 }
 0x4ed   : > { %v11582_v49 = vadd.f32 %v6142_v56, %v5729_v23  ;;  %v6453_v31 = vpop.f32.mrf.mxu0 }
 0x4ee   : > { %v6454_v24 = vadd.f32 %v6453_v31, %v6229_v41 }
 0x4f0   : > { %v11586_v22 = vpop.f32.mrf.mxu2 }
 0x4f1   : > { %v6540_v40 = vpop.f32.mrf.mxu3 }
 0x4f2   : > { %v6143_v48 = vpop.f32.mrf.mxu1 }
 0x4f3   : > { %v6144_v46 = vadd.f32 %v6143_v48, %v6115_v1 }
 0x4f5   : > { %v11588_v2 = vadd.f32 %v6144_v46, %v5731_v5  ;;  %v6456_v61 = vpop.f32.mrf.mxu0 }
 0x4f8   : > { %v11590_v47 = vpop.f32.mrf.mxu2 }
 0x4f9   : > { %v6543_v46 = vpop.f32.mrf.mxu3 }
 0x4fa   : > { %v6146_v44 = vpop.f32.mrf.mxu1 }
 0x4fb   : > { %v6147_v34 = vadd.f32 %v6146_v44, %v6118_v4 }
 0x4fd   : > { %v11594_v23 = vadd.f32 %v6147_v34, %v5733_v27  ;;  %v6458_v37 = vpop.f32.mrf.mxu0 }
 0x500   : > { %v11598_v21 = vpop.f32.mrf.mxu2 }
 0x502   : > { %v6148_v36 = vpop.f32.mrf.mxu1 }
 0x503   : > { %v6149_v5 = vadd.f32 %v6148_v36, %v6120_v25 }
 0x505   : > { %v11600_v16 = vadd.f32 %v6149_v5, %v5735_v33  ;;  %v11608_v33 = vperm.slane %v6574_v18, 0 }
 0x508   : > { %v11604_v30 = vpop.f32.mrf.mxu2 }
 0x50a   : > { %v6480_v27 = vpop.f32.mrf.mxu1 }
 0x50b   : > { %v6481_v50 = vadd.f32 %v6480_v27, %v6452_v28  ;;  %v6459_v28 = vadd.f32 %v6458_v37, %v11578_v10 }
 0x50d   : > { %v6558_v29 = vadd.f32 %v6481_v50, %v6151_v51 }
 0x50f   : > { %v6580_v1 = vadd.f32 %v11608_v33, %v6558_v29  ;;  %v6545_v29 = vpop.f32.mrf.mxu3 }
 0x510   : > { %v6509_v0 = vpop.f32.mrf.mxu2 }
 0x511   : > { %v6510_v56 = vadd.f32 %v6509_v0, %v11536_v59  ;;  %v6457_v59 = vadd.f32 %v6456_v61, %v11570_v38  ;;  %v6596_v4 = vmax.f32 %v6580_v1, 0.0 }
 0x512   : > { %v6482_v60 = vpop.f32.mrf.mxu1 }
 0x513   : > { %v6539_v35 = vadd.f32 %v6538_v52, %v6510_v56  ;;  %v6483_v11 = vadd.f32 %v6482_v60, %v6454_v24  ;;  %v6461_v52 = vpop.f32.mrf.mxu0 }
 0x515   : > { %v6559_v51 = vadd.f32 %v6539_v35, %v11556_v42  ;;  %v6560_v48 = vadd.f32 %v6483_v11, %v6153_v12 }
 0x517   : > { %v6581_v41 = vadd.f32 %v11611_v9, %v6559_v51  ;;  %v6582_v25 = vadd.f32 %v11608_v33, %v6560_v48 }
 0x518   : > { %v6511_v8 = vpop.f32.mrf.mxu2 }
 0x519   : > { %v6597_v44 = vmax.f32 %v6581_v41, 0.0  ;;  %v6512_v34 = vadd.f32 %v6511_v8, %v11544_v63  ;;  %v6161_v63 = vadd.f32 %v11540_v14, %v11490_v54  ;;  %v6598_v27 = vmax.f32 %v6582_v25, 0.0 }
 0x51a   : > { %v6485_v42 = vpop.f32.mrf.mxu1 }
 0x51b   : > { %v6612_v13 = vpack.c.bf16 %v6597_v44, %v6596_v4  ;;  %v6541_v45 = vadd.f32 %v6540_v40, %v6512_v34  ;;  %v6486_v12 = vadd.f32 %v6485_v42, %v6457_v59  ;;  %v6463_v51 = vpop.f32.mrf.mxu0 }
 0x51d   : > { %6620 = vst [vmem:[%s11624_s21] sm:$0xff] %v6612_v13  ;;  %v6561_v38 = vadd.f32 %v6541_v45, %v11562_v55  ;;  %v6562_v36 = vadd.f32 %v6486_v12, %v6155_v19  ;;  %v6163_v19 = vadd.f32 %v11548_v15, %v11497_v20 }
 0x51f   : > { %v6583_v31 = vadd.f32 %v11611_v9, %v6561_v38  ;;  %v6584_v55 = vadd.f32 %v11608_v33, %v6562_v36 }
 0x520   : > { %v6514_v5 = vpop.f32.mrf.mxu2 }
 0x521   : > { %v6599_v50 = vmax.f32 %v6583_v31, 0.0  ;;  %v6515_v61 = vadd.f32 %v6514_v5, %v11550_v17  ;;  %v6462_v17 = vadd.f32 %v6461_v52, %v11586_v22  ;;  %v6600_v60 = vmax.f32 %v6584_v55, 0.0 }
 0x522   : > { %v6487_v40 = vpop.f32.mrf.mxu1  ;;  %v6165_v22 = vadd.f32 %v11554_v53, %v11508_v32 }
 0x523   : > { %v6613_v18 = vpack.c.bf16 %v6599_v50, %v6598_v27  ;;  %v6544_v0 = vadd.f32 %v6543_v46, %v6515_v61  ;;  %v6488_v24 = vadd.f32 %v6487_v40, %v6459_v28  ;;  %v6548_v46 = vpop.f32.mrf.mxu3  ;;  %v6466_v12 = vpop.f32.mrf.mxu0 }
 0x524   : > { %v6467_v38 = vadd.f32 %v6466_v12, %v11598_v21 }
 0x525   : > { %6621 = vst [vmem:[%s11624_s21 + $0x8] sm:$0xff] %v6613_v18  ;;  %v6563_v54 = vadd.f32 %v6544_v0, %v11568_v43  ;;  %v6564_v14 = vadd.f32 %v6488_v24, %v6157_v6 }
 0x527   : > { %v6585_v10 = vadd.f32 %v11611_v9, %v6563_v54  ;;  %v6586_v43 = vadd.f32 %v11608_v33, %v6564_v14 }
 0x528   : > { %v6516_v56 = vpop.f32.mrf.mxu2 }
 0x529   : > { %v6601_v35 = vmax.f32 %v6585_v10, 0.0  ;;  %v6517_v11 = vadd.f32 %v6516_v56, %v11560_v7  ;;  %v6464_v7 = vadd.f32 %v6463_v51, %v11590_v47  ;;  %v6602_v59 = vmax.f32 %v6586_v43, 0.0 }
 0x52a   : > { %v6490_v1 = vpop.f32.mrf.mxu1 }
 0x52b   : > { %v6614_v48 = vpack.c.bf16 %v6601_v35, %v6600_v60  ;;  %v6546_v37 = vadd.f32 %v6545_v29, %v6517_v11  ;;  %v6491_v41 = vadd.f32 %v6490_v1, %v6462_v17  ;;  %v6468_v61 = vpop.f32.mrf.mxu0 }
 0x52c   : > { %v6469_v18 = vadd.f32 %v6468_v61, %v11604_v30 }
 0x52d   : > { %6622 = vst [vmem:[%s11624_s21 + $0x10] sm:$0xff] %v6614_v48  ;;  %v6565_v20 = vadd.f32 %v6546_v37, %v11574_v3  ;;  %v6566_v15 = vadd.f32 %v6491_v41, %v6159_v57  ;;  %v6550_v57 = vpop.f32.mrf.mxu3 }
 0x52f   : > { %v6587_v6 = vadd.f32 %v11611_v9, %v6565_v20  ;;  %v6588_v3 = vadd.f32 %v11608_v33, %v6566_v15 }
 0x530   : > { %v6519_v8 = vpop.f32.mrf.mxu2 }
 0x531   : > { %v6603_v4 = vmax.f32 %v6587_v6, 0.0  ;;  %v6520_v44 = vadd.f32 %v6519_v8, %v11566_v39  ;;  %v6604_v36 = vmax.f32 %v6588_v3, 0.0 }
 0x532   : > { %v6492_v34 = vpop.f32.mrf.mxu1 }
 0x533   : > { %v6615_v42 = vpack.c.bf16 %v6603_v4, %v6602_v59  ;;  %v6549_v13 = vadd.f32 %v6548_v46, %v6520_v44  ;;  %v6493_v45 = vadd.f32 %v6492_v34, %v6464_v7 }
 0x535   : > { %6623 = vst [vmem:[%s11624_s21 + $0x18] sm:$0xff] %v6615_v42  ;;  %v6567_v32 = vadd.f32 %v6549_v13, %v11582_v49  ;;  %v6568_v53 = vadd.f32 %v6493_v45, %v6161_v63  ;;  %v6553_v40 = vpop.f32.mrf.mxu3 }
 0x537   : > { %v6589_v25 = vadd.f32 %v11611_v9, %v6567_v32  ;;  %v6590_v50 = vadd.f32 %v11608_v33, %v6568_v53 }
 0x538   : > { %v6521_v47 = vpop.f32.mrf.mxu2 }
 0x539   : > { %v6605_v39 = vmax.f32 %v6589_v25, 0.0  ;;  %v6522_v31 = vadd.f32 %v6521_v47, %v11576_v62  ;;  %v6606_v0 = vmax.f32 %v6590_v50, 0.0 }
 0x53a   : > { %v6495_v5 = vpop.f32.mrf.mxu1 }
 0x53b   : > { %v6616_v52 = vpack.c.bf16 %v6605_v39, %v6604_v36  ;;  %v6551_v28 = vadd.f32 %v6550_v57, %v6522_v31  ;;  %v6496_v27 = vadd.f32 %v6495_v5, %v6467_v38 }
 0x53d   : > { %6624 = vst [vmem:[%s11624_s21 + $0x20] sm:$0xff] %v6616_v52  ;;  %v6569_v49 = vadd.f32 %v6551_v28, %v11588_v2  ;;  %v6570_v63 = vadd.f32 %v6496_v27, %v6163_v19 }
 0x53f   : > { %v6591_v29 = vadd.f32 %v11611_v9, %v6569_v49  ;;  %v6592_v2 = vadd.f32 %v11608_v33, %v6570_v63 }
 0x540   : > { %v6524_v21 = vpop.f32.mrf.mxu2 }
 0x541   : > { %v6607_v62 = vmax.f32 %v6591_v29, 0.0  ;;  %v6525_v24 = vadd.f32 %v6524_v21, %v11584_v58  ;;  %v6608_v30 = vmax.f32 %v6592_v2, 0.0  ;;  %v6555_v58 = vpop.f32.mrf.mxu3 }
 0x542   : > { %v6497_v55 = vpop.f32.mrf.mxu1 }
 0x543   : > { %v6617_v54 = vpack.c.bf16 %v6607_v62, %v6606_v0  ;;  %v6554_v14 = vadd.f32 %v6553_v40, %v6525_v24  ;;  %v6498_v10 = vadd.f32 %v6497_v55, %v6469_v18 }
 0x545   : > { %6625 = vst [vmem:[%s11624_s21 + $0x28] sm:$0xff] %v6617_v54  ;;  %v6571_v19 = vadd.f32 %v6554_v14, %v11594_v23  ;;  %v6572_v56 = vadd.f32 %v6498_v10, %v6165_v22 }
 0x547   : > { %v6593_v17 = vadd.f32 %v11611_v9, %v6571_v19  ;;  %v6594_v48 = vadd.f32 %v11608_v33, %v6572_v56 }
 0x548   : > { %v6526_v60 = vpop.f32.mrf.mxu2 }
 0x549   : > { %v6609_v35 = vmax.f32 %v6593_v17, 0.0  ;;  %v6527_v11 = vadd.f32 %v6526_v60, %v11592_v26  ;;  %v6610_v23 = vmax.f32 %v6594_v48, 0.0 }
 0x54b   : > { %v6618_v1 = vpack.c.bf16 %v6609_v35, %v6608_v30  ;;  %v6556_v51 = vadd.f32 %v6555_v58, %v6527_v11 }
 0x54d   : > { %6626 = vst [vmem:[%s11624_s21 + $0x30] sm:$0xff] %v6618_v1  ;;  %v6573_v37 = vadd.f32 %v6556_v51, %v11600_v16 }
 0x54f   : > { %v6595_v41 = vadd.f32 %v11611_v9, %v6573_v37 }
 0x551   : > { %v6611_v46 = vmax.f32 %v6595_v41, 0.0 }
 0x553   : > { %v6619_v43 = vpack.c.bf16 %v6611_v46, %v6610_v23 }
 0x555   : > { %6627 = vst [vmem:[%s11624_s21 + $0x38] sm:$0xff] %v6619_v43 }
 0x556 PF: > { %s21_s29 = sadd.s32 1, %s8608_s29   ;;  %s12180_s27 = smov %s8604_s28 }
 0x557   : > { %p18_p8 = scmp.ge.s32.totalorder %s21_s29, 4   ;;  %s12181_s28 = smov %s12183_s17 }
 0x559   :  { %20 = sbr.rel (!%p18_p8) target bundleno = 4 (0x4), region = 131 }
 0x55e   :  { %6660 = vsyncpa [#allocation3], 1 }
 0x55f   :  { %6662 = vsyncpa [#allocation3 + $0x1], 1 }
 0x560   :  { %6663 = vsyncpa [#allocation5], 1 }
 0x561   :  { %6664 = vsyncpa [#allocation8], 1 }

</bundles_post_ra>
